<compile_context>
chip_gen: v6e
topology: v6e:2x2x1
jax: 0.10.0
libtpu: 0.0.40
codegen_flags: <defaults>
</compile_context>

<pallas_src>
import jax
import jax.numpy as jnp
import numpy as np
from jax.experimental import pallas as pl
from jax.experimental.pallas import tpu as pltpu

NZ = 128
C1, H1, W1 = 64, 4, 4                 # after View
C2, KH, KW = 32, 4, 4                 # first ConvTranspose2d
H2, W2 = H1 + KH - 1, W1 + KW - 1     # 7, 7
C3 = 16                               # second ConvTranspose2d (1x1)
P = H2 * W2                           # 49 output pixels per channel
FEAT = C1 * H1 * W1                   # 1024
D2 = C2 * P                           # 1568 (channel-major flat deconv1 out)
BN_EPS = 1e-5
INV_P = 1.0 / P


# ---------------- single fused Pallas kernel ----------------

def generator_kernel(x_ref, w1_ref, b1_ref, weff_ref, b2_ref,
                     gamma_ref, beta_ref, w3t_ref, b3_ref, o_ref):
    # Linear(128 -> 1024) + ReLU.  bf16 operands, f32 accumulation on the MXU.
    h1 = jnp.maximum(
        jnp.dot(x_ref[...].astype(jnp.bfloat16), w1_ref[...],
                preferred_element_type=jnp.float32) + b1_ref[...], 0.0)

    # ConvTranspose2d(64->32, 4x4, s=1) folded into dense Weff (bf16 weights).
    # Flat channel-major output: column index = c*49 + (oh*7 + ow).  Kept f32.
    y = jnp.dot(h1.astype(jnp.bfloat16), weff_ref[...],
                preferred_element_type=jnp.float32) + b2_ref[...]   # (1, 1568)

    gamma = gamma_ref[...]      # (1, 32)
    beta = beta_ref[...]        # (1, 32)
    w3t = w3t_ref[...]          # (16, 32)

    # BatchNorm2d(32) training-mode (biased stats over the 49 pixels), ReLU,
    # and the 1x1 ConvTranspose2d, all on per-channel (1,49) strips.  The
    # reductions / broadcasts run on the VPU/XLU, replacing the avg/sel and
    # block-diagonal w3big matmuls of the previous version.
    acc = jnp.zeros((C3, P), jnp.float32)
    for c in range(C2):
        y_c = y[:, c * P:(c + 1) * P]                               # (1, 49)
        mean = jnp.sum(y_c, axis=-1, keepdims=True) * INV_P         # (1, 1)
        d = y_c - mean
        var = jnp.sum(d * d, axis=-1, keepdims=True) * INV_P        # (1, 1)
        scale = gamma[:, c:c + 1] * jax.lax.rsqrt(var + BN_EPS)     # (1, 1)
        h2_c = jnp.maximum(d * scale + beta[:, c:c + 1], 0.0)       # (1, 49)
        acc = acc + w3t[:, c:c + 1] * h2_c                          # (16, 49)

    # Tanh.  Rows are already the channels-first flatten order (e*49 + p),
    # so .view(1,1,28,28) outside the kernel is a free reshape.
    o_ref[...] = jnp.tanh(acc + b3_ref[...])                        # (16, 49)


# ---------------- one-time host-side parameter packing ----------------

def prepare_params(params):
    """Pack PyTorch-layout params into kernel operands. Run once, outside jit."""
    w1t, b1, w2, b2, gamma, beta, w3, b3 = (np.asarray(p, np.float32)
                                            for p in params)

    # Effective deconv weight:
    #   Weff[ci*16 + ih*4 + iw, co*49 + (ih+kh)*7 + (iw+kw)] = w2[ci, co, kh, kw]
    weff = np.zeros((FEAT, D2), np.float32)
    for ih in range(H1):
        for iw in range(W1):
            g = ih * W1 + iw
            for kh in range(KH):
                for kw in range(KW):
                    p = (ih + kh) * W2 + (iw + kw)
                    weff[g::H1 * W1, p::P] = w2[:, :, kh, kw]
    b2b = np.repeat(b2, P)[None, :]                       # (1, 1568)

    packed = (
        jnp.asarray(w1t, jnp.bfloat16),                   # (128, 1024)  bf16
        jnp.asarray(b1.reshape(1, FEAT), jnp.float32),    # (1, 1024)
        jnp.asarray(weff, jnp.bfloat16),                  # (1024, 1568) bf16
        jnp.asarray(b2b, jnp.float32),                    # (1, 1568)
        jnp.asarray(gamma.reshape(1, C2), jnp.float32),   # (1, 32)
        jnp.asarray(beta.reshape(1, C2), jnp.float32),    # (1, 32)
        jnp.asarray(np.ascontiguousarray(w3.T), jnp.float32),  # (16, 32)
        jnp.asarray(b3.reshape(C3, 1), jnp.float32),      # (16, 1)
    )
    return packed


# ---------------- forward wrapper ----------------

def _spec(shape):
    return pl.BlockSpec(shape, lambda i: (0,) * len(shape))


@jax.jit
def generator_forward(x, packed):
    out = pl.pallas_call(
        generator_kernel,
        out_shape=jax.ShapeDtypeStruct((C3, P), jnp.float32),
        grid=(1,),
        in_specs=[_spec(tuple(x.shape))] + [_spec(tuple(p.shape)) for p in packed],
        out_specs=_spec((C3, P)),
        compiler_params=pltpu.CompilerParams(
            dimension_semantics=("arbitrary",),
            vmem_limit_bytes=24 * 1024 * 1024),
    )(x, *packed)
    # Free view: (16,49) row-major == channels-first flatten of (1,16,7,7).
    return out.reshape(1, 1, 28, 28)


# ---------------- pure-JAX f32 reference (direct conv-transpose scatter) ----

def reference_forward(x, params):
    (w1t, b1, w2, b2, gamma, beta, w3, b3) = params
    h = jnp.maximum(x @ w1t + b1, 0.0).reshape(C1, H1, W1)
    out = jnp.zeros((C2, H2, W2), jnp.float32)
    for r in range(KH):
        for s in range(KW):
            contrib = jnp.einsum('cij,cd->dij', h, w2[:, :, r, s])
            out = out.at[:, r:r + H1, s:s + W1].add(contrib)
    out = out + b2[:, None, None]
    mean = jnp.mean(out, axis=(1, 2), keepdims=True)
    var = jnp.mean((out - mean) ** 2, axis=(1, 2), keepdims=True)
    bn = (out - mean) * jax.lax.rsqrt(var + BN_EPS) * gamma[:, None, None] \
        + beta[:, None, None]
    h2 = jnp.maximum(bn, 0.0)
    y = jnp.tanh(jnp.einsum('cij,ce->eij', h2, w3) + b3[:, None, None])
    return y.reshape(1, 1, 28, 28)


if __name__ == "__main__":
    key = jax.random.PRNGKey(0)
    keys = jax.random.split(key, 9)
    x = jax.random.normal(keys[0], (1, NZ), jnp.float32)

    # Deterministic synthetic parameters (shapes follow the nn.Module __init__).
    w1t = jax.random.normal(keys[1], (NZ, FEAT), jnp.float32) * 0.05
    b1 = jax.random.normal(keys[2], (1, FEAT), jnp.float32) * 0.05
    w2 = jax.random.normal(keys[3], (C1, C2, KH, KW), jnp.float32) * 0.05  # (in,out,kh,kw)
    b2 = jax.random.normal(keys[4], (C2,), jnp.float32) * 0.05
    gamma = 1.0 + jax.random.normal(keys[5], (C2,), jnp.float32) * 0.05
    beta = jax.random.normal(keys[6], (C2,), jnp.float32) * 0.05
    w3 = jax.random.normal(keys[7], (C2, C3), jnp.float32) * 0.05          # 1x1 deconv
    b3 = jax.random.normal(keys[8], (C3,), jnp.float32) * 0.05
    params = (w1t, b1, w2, b2, gamma, beta, w3, b3)

    packed = prepare_params(params)   # one-time host-side packing

    y = jax.block_until_ready(generator_forward(x, packed))
    assert y.shape == (1, 1, 28, 28)

    # f32 reference vs bf16-weight kernel: tolerance loosened per review.
    y_ref = reference_forward(x, params)
    np.testing.assert_allclose(np.asarray(y), np.asarray(y_ref),
                               rtol=2e-2, atol=2e-2)
    print("KERNEL_OK")
</pallas_src>

<mosaic_0001>
module attributes {stable_mosaic.version = 11 : i64} {
  func.func @generator_kernel(%arg0: i32, %arg1: memref<1x128xf32, #tpu.memory_space<vmem>>, %arg2: memref<128x1024xbf16, #tpu.memory_space<vmem>>, %arg3: memref<1x1024xf32, #tpu.memory_space<vmem>>, %arg4: memref<1024x1568xbf16, #tpu.memory_space<vmem>>, %arg5: memref<1x1568xf32, #tpu.memory_space<vmem>>, %arg6: memref<1x32xf32, #tpu.memory_space<vmem>>, %arg7: memref<1x32xf32, #tpu.memory_space<vmem>>, %arg8: memref<16x32xf32, #tpu.memory_space<vmem>>, %arg9: memref<16x1xf32, #tpu.memory_space<vmem>>, %arg10: memref<16x49xf32, #tpu.memory_space<vmem>>) attributes {dimension_semantics = [#tpu.dimension_semantics<arbitrary>], iteration_bounds = array<i64: 1>, scalar_prefetch = 0 : i64, scratch_operands = 0 : i64, tpu.core_type = #tpu.core_type<tc>, window_params = [{pipeline_mode = #tpu.pipeline_mode<synchronous>, transform_indices = @transform_0, window_bounds = array<i64: 1, 128>}, {pipeline_mode = #tpu.pipeline_mode<synchronous>, transform_indices = @transform_1, window_bounds = array<i64: 128, 1024>}, {pipeline_mode = #tpu.pipeline_mode<synchronous>, transform_indices = @transform_2, window_bounds = array<i64: 1, 1024>}, {pipeline_mode = #tpu.pipeline_mode<synchronous>, transform_indices = @transform_3, window_bounds = array<i64: 1024, 1568>}, {pipeline_mode = #tpu.pipeline_mode<synchronous>, transform_indices = @transform_4, window_bounds = array<i64: 1, 1568>}, {pipeline_mode = #tpu.pipeline_mode<synchronous>, transform_indices = @transform_5, window_bounds = array<i64: 1, 32>}, {pipeline_mode = #tpu.pipeline_mode<synchronous>, transform_indices = @transform_6, window_bounds = array<i64: 1, 32>}, {pipeline_mode = #tpu.pipeline_mode<synchronous>, transform_indices = @transform_7, window_bounds = array<i64: 16, 32>}, {pipeline_mode = #tpu.pipeline_mode<synchronous>, transform_indices = @transform_8, window_bounds = array<i64: 16, 1>}, {pipeline_mode = #tpu.pipeline_mode<synchronous>, transform_indices = @transform_9, window_bounds = array<i64: 16, 49>}]} {
    %c0 = arith.constant 0 : index
    %c0_0 = arith.constant 0 : index
    %0 = vector.load %arg1[%c0, %c0_0] : memref<1x128xf32, #tpu.memory_space<vmem>>, vector<1x128xf32>
    %1 = arith.truncf %0 : vector<1x128xf32> to vector<1x128xbf16>
    %c0_1 = arith.constant 0 : index
    %c0_2 = arith.constant 0 : index
    %2 = vector.load %arg2[%c0_1, %c0_2] : memref<128x1024xbf16, #tpu.memory_space<vmem>>, vector<128x1024xbf16>
    %cst = arith.constant dense<0.000000e+00> : vector<1x1024xf32>
    %3 = tpu.matmul %1, %2, %cst {dimension_numbers = #tpu.dot_dimension_numbers<[1], [0], [0], [1], [0, 0, 1, 1], [], []>} : vector<1x128xbf16>, vector<128x1024xbf16>, vector<1x1024xf32> -> vector<1x1024xf32>
    %c0_3 = arith.constant 0 : index
    %c0_4 = arith.constant 0 : index
    %4 = vector.load %arg3[%c0_3, %c0_4] : memref<1x1024xf32, #tpu.memory_space<vmem>>, vector<1x1024xf32>
    %5 = arith.addf %3, %4 : vector<1x1024xf32>
    %cst_5 = arith.constant 0.000000e+00 : f32
    %6 = vector.broadcast %cst_5 : f32 to vector<1x1024xf32>
    %7 = arith.maximumf %5, %6 : vector<1x1024xf32>
    %8 = arith.truncf %7 : vector<1x1024xf32> to vector<1x1024xbf16>
    %c0_6 = arith.constant 0 : index
    %c0_7 = arith.constant 0 : index
    %9 = vector.load %arg4[%c0_6, %c0_7] : memref<1024x1568xbf16, #tpu.memory_space<vmem>>, vector<1024x1568xbf16>
    %cst_8 = arith.constant dense<0.000000e+00> : vector<1x1568xf32>
    %10 = tpu.matmul %8, %9, %cst_8 {dimension_numbers = #tpu.dot_dimension_numbers<[1], [0], [0], [1], [0, 0, 1, 1], [], []>} : vector<1x1024xbf16>, vector<1024x1568xbf16>, vector<1x1568xf32> -> vector<1x1568xf32>
    %c0_9 = arith.constant 0 : index
    %c0_10 = arith.constant 0 : index
    %11 = vector.load %arg5[%c0_9, %c0_10] : memref<1x1568xf32, #tpu.memory_space<vmem>>, vector<1x1568xf32>
    %12 = arith.addf %10, %11 : vector<1x1568xf32>
    %c0_11 = arith.constant 0 : index
    %c0_12 = arith.constant 0 : index
    %13 = vector.load %arg6[%c0_11, %c0_12] : memref<1x32xf32, #tpu.memory_space<vmem>>, vector<1x32xf32>
    %c0_13 = arith.constant 0 : index
    %c0_14 = arith.constant 0 : index
    %14 = vector.load %arg7[%c0_13, %c0_14] : memref<1x32xf32, #tpu.memory_space<vmem>>, vector<1x32xf32>
    %c0_15 = arith.constant 0 : index
    %c0_16 = arith.constant 0 : index
    %15 = vector.load %arg8[%c0_15, %c0_16] : memref<16x32xf32, #tpu.memory_space<vmem>>, vector<16x32xf32>
    %cst_17 = arith.constant 0.000000e+00 : f32
    %16 = vector.broadcast %cst_17 : f32 to vector<16x49xf32>
    %17 = vector.extract_strided_slice %12 {offsets = [0, 0], sizes = [1, 49], strides = [1, 1]} : vector<1x1568xf32> to vector<1x49xf32>
    %cst_18 = arith.constant dense<0.000000e+00> : vector<1xf32>
    %18 = vector.multi_reduction <add>, %17, %cst_18 [1] : vector<1x49xf32> to vector<1xf32>
    %19 = vector.shape_cast %18 : vector<1xf32> to vector<1x1xf32>
    %cst_19 = arith.constant 0.0204081628 : f32
    %20 = vector.broadcast %cst_19 : f32 to vector<1x1xf32>
    %21 = arith.mulf %19, %20 : vector<1x1xf32>
    %22 = vector.broadcast %21 : vector<1x1xf32> to vector<1x49xf32>
    %23 = arith.subf %17, %22 : vector<1x49xf32>
    %24 = arith.mulf %23, %23 : vector<1x49xf32>
    %cst_20 = arith.constant dense<0.000000e+00> : vector<1xf32>
    %25 = vector.multi_reduction <add>, %24, %cst_20 [1] : vector<1x49xf32> to vector<1xf32>
    %26 = vector.shape_cast %25 : vector<1xf32> to vector<1x1xf32>
    %cst_21 = arith.constant 0.0204081628 : f32
    %27 = vector.broadcast %cst_21 : f32 to vector<1x1xf32>
    %28 = arith.mulf %26, %27 : vector<1x1xf32>
    %29 = vector.extract_strided_slice %13 {offsets = [0, 0], sizes = [1, 1], strides = [1, 1]} : vector<1x32xf32> to vector<1x1xf32>
    %cst_22 = arith.constant 9.99999974E-6 : f32
    %30 = vector.broadcast %cst_22 : f32 to vector<1x1xf32>
    %31 = arith.addf %28, %30 : vector<1x1xf32>
    %32 = math.rsqrt %31 : vector<1x1xf32>
    %33 = arith.mulf %29, %32 : vector<1x1xf32>
    %34 = vector.broadcast %33 : vector<1x1xf32> to vector<1x49xf32>
    %35 = arith.mulf %23, %34 : vector<1x49xf32>
    %36 = vector.extract_strided_slice %14 {offsets = [0, 0], sizes = [1, 1], strides = [1, 1]} : vector<1x32xf32> to vector<1x1xf32>
    %37 = vector.broadcast %36 : vector<1x1xf32> to vector<1x49xf32>
    %38 = arith.addf %35, %37 : vector<1x49xf32>
    %cst_23 = arith.constant 0.000000e+00 : f32
    %39 = vector.broadcast %cst_23 : f32 to vector<1x49xf32>
    %40 = arith.maximumf %38, %39 : vector<1x49xf32>
    %41 = vector.extract_strided_slice %15 {offsets = [0, 0], sizes = [16, 1], strides = [1, 1]} : vector<16x32xf32> to vector<16x1xf32>
    %42 = vector.broadcast %41 : vector<16x1xf32> to vector<16x49xf32>
    %43 = vector.broadcast %40 : vector<1x49xf32> to vector<16x49xf32>
    %44 = arith.mulf %42, %43 : vector<16x49xf32>
    %45 = arith.addf %16, %44 : vector<16x49xf32>
    %46 = vector.extract_strided_slice %12 {offsets = [0, 49], sizes = [1, 49], strides = [1, 1]} : vector<1x1568xf32> to vector<1x49xf32>
    %cst_24 = arith.constant dense<0.000000e+00> : vector<1xf32>
    %47 = vector.multi_reduction <add>, %46, %cst_24 [1] : vector<1x49xf32> to vector<1xf32>
    %48 = vector.shape_cast %47 : vector<1xf32> to vector<1x1xf32>
    %cst_25 = arith.constant 0.0204081628 : f32
    %49 = vector.broadcast %cst_25 : f32 to vector<1x1xf32>
    %50 = arith.mulf %48, %49 : vector<1x1xf32>
    %51 = vector.broadcast %50 : vector<1x1xf32> to vector<1x49xf32>
    %52 = arith.subf %46, %51 : vector<1x49xf32>
    %53 = arith.mulf %52, %52 : vector<1x49xf32>
    %cst_26 = arith.constant dense<0.000000e+00> : vector<1xf32>
    %54 = vector.multi_reduction <add>, %53, %cst_26 [1] : vector<1x49xf32> to vector<1xf32>
    %55 = vector.shape_cast %54 : vector<1xf32> to vector<1x1xf32>
    %cst_27 = arith.constant 0.0204081628 : f32
    %56 = vector.broadcast %cst_27 : f32 to vector<1x1xf32>
    %57 = arith.mulf %55, %56 : vector<1x1xf32>
    %58 = vector.extract_strided_slice %13 {offsets = [0, 1], sizes = [1, 1], strides = [1, 1]} : vector<1x32xf32> to vector<1x1xf32>
    %cst_28 = arith.constant 9.99999974E-6 : f32
    %59 = vector.broadcast %cst_28 : f32 to vector<1x1xf32>
    %60 = arith.addf %57, %59 : vector<1x1xf32>
    %61 = math.rsqrt %60 : vector<1x1xf32>
    %62 = arith.mulf %58, %61 : vector<1x1xf32>
    %63 = vector.broadcast %62 : vector<1x1xf32> to vector<1x49xf32>
    %64 = arith.mulf %52, %63 : vector<1x49xf32>
    %65 = vector.extract_strided_slice %14 {offsets = [0, 1], sizes = [1, 1], strides = [1, 1]} : vector<1x32xf32> to vector<1x1xf32>
    %66 = vector.broadcast %65 : vector<1x1xf32> to vector<1x49xf32>
    %67 = arith.addf %64, %66 : vector<1x49xf32>
    %cst_29 = arith.constant 0.000000e+00 : f32
    %68 = vector.broadcast %cst_29 : f32 to vector<1x49xf32>
    %69 = arith.maximumf %67, %68 : vector<1x49xf32>
    %70 = vector.extract_strided_slice %15 {offsets = [0, 1], sizes = [16, 1], strides = [1, 1]} : vector<16x32xf32> to vector<16x1xf32>
    %71 = vector.broadcast %70 : vector<16x1xf32> to vector<16x49xf32>
    %72 = vector.broadcast %69 : vector<1x49xf32> to vector<16x49xf32>
    %73 = arith.mulf %71, %72 : vector<16x49xf32>
    %74 = arith.addf %45, %73 : vector<16x49xf32>
    %75 = vector.extract_strided_slice %12 {offsets = [0, 98], sizes = [1, 49], strides = [1, 1]} : vector<1x1568xf32> to vector<1x49xf32>
    %cst_30 = arith.constant dense<0.000000e+00> : vector<1xf32>
    %76 = vector.multi_reduction <add>, %75, %cst_30 [1] : vector<1x49xf32> to vector<1xf32>
    %77 = vector.shape_cast %76 : vector<1xf32> to vector<1x1xf32>
    %cst_31 = arith.constant 0.0204081628 : f32
    %78 = vector.broadcast %cst_31 : f32 to vector<1x1xf32>
    %79 = arith.mulf %77, %78 : vector<1x1xf32>
    %80 = vector.broadcast %79 : vector<1x1xf32> to vector<1x49xf32>
    %81 = arith.subf %75, %80 : vector<1x49xf32>
    %82 = arith.mulf %81, %81 : vector<1x49xf32>
    %cst_32 = arith.constant dense<0.000000e+00> : vector<1xf32>
    %83 = vector.multi_reduction <add>, %82, %cst_32 [1] : vector<1x49xf32> to vector<1xf32>
    %84 = vector.shape_cast %83 : vector<1xf32> to vector<1x1xf32>
    %cst_33 = arith.constant 0.0204081628 : f32
    %85 = vector.broadcast %cst_33 : f32 to vector<1x1xf32>
    %86 = arith.mulf %84, %85 : vector<1x1xf32>
    %87 = vector.extract_strided_slice %13 {offsets = [0, 2], sizes = [1, 1], strides = [1, 1]} : vector<1x32xf32> to vector<1x1xf32>
    %cst_34 = arith.constant 9.99999974E-6 : f32
    %88 = vector.broadcast %cst_34 : f32 to vector<1x1xf32>
    %89 = arith.addf %86, %88 : vector<1x1xf32>
    %90 = math.rsqrt %89 : vector<1x1xf32>
    %91 = arith.mulf %87, %90 : vector<1x1xf32>
    %92 = vector.broadcast %91 : vector<1x1xf32> to vector<1x49xf32>
    %93 = arith.mulf %81, %92 : vector<1x49xf32>
    %94 = vector.extract_strided_slice %14 {offsets = [0, 2], sizes = [1, 1], strides = [1, 1]} : vector<1x32xf32> to vector<1x1xf32>
    %95 = vector.broadcast %94 : vector<1x1xf32> to vector<1x49xf32>
    %96 = arith.addf %93, %95 : vector<1x49xf32>
    %cst_35 = arith.constant 0.000000e+00 : f32
    %97 = vector.broadcast %cst_35 : f32 to vector<1x49xf32>
    %98 = arith.maximumf %96, %97 : vector<1x49xf32>
    %99 = vector.extract_strided_slice %15 {offsets = [0, 2], sizes = [16, 1], strides = [1, 1]} : vector<16x32xf32> to vector<16x1xf32>
    %100 = vector.broadcast %99 : vector<16x1xf32> to vector<16x49xf32>
    %101 = vector.broadcast %98 : vector<1x49xf32> to vector<16x49xf32>
    %102 = arith.mulf %100, %101 : vector<16x49xf32>
    %103 = arith.addf %74, %102 : vector<16x49xf32>
    %104 = vector.extract_strided_slice %12 {offsets = [0, 147], sizes = [1, 49], strides = [1, 1]} : vector<1x1568xf32> to vector<1x49xf32>
    %cst_36 = arith.constant dense<0.000000e+00> : vector<1xf32>
    %105 = vector.multi_reduction <add>, %104, %cst_36 [1] : vector<1x49xf32> to vector<1xf32>
    %106 = vector.shape_cast %105 : vector<1xf32> to vector<1x1xf32>
    %cst_37 = arith.constant 0.0204081628 : f32
    %107 = vector.broadcast %cst_37 : f32 to vector<1x1xf32>
    %108 = arith.mulf %106, %107 : vector<1x1xf32>
    %109 = vector.broadcast %108 : vector<1x1xf32> to vector<1x49xf32>
    %110 = arith.subf %104, %109 : vector<1x49xf32>
    %111 = arith.mulf %110, %110 : vector<1x49xf32>
    %cst_38 = arith.constant dense<0.000000e+00> : vector<1xf32>
    %112 = vector.multi_reduction <add>, %111, %cst_38 [1] : vector<1x49xf32> to vector<1xf32>
    %113 = vector.shape_cast %112 : vector<1xf32> to vector<1x1xf32>
    %cst_39 = arith.constant 0.0204081628 : f32
    %114 = vector.broadcast %cst_39 : f32 to vector<1x1xf32>
    %115 = arith.mulf %113, %114 : vector<1x1xf32>
    %116 = vector.extract_strided_slice %13 {offsets = [0, 3], sizes = [1, 1], strides = [1, 1]} : vector<1x32xf32> to vector<1x1xf32>
    %cst_40 = arith.constant 9.99999974E-6 : f32
    %117 = vector.broadcast %cst_40 : f32 to vector<1x1xf32>
    %118 = arith.addf %115, %117 : vector<1x1xf32>
    %119 = math.rsqrt %118 : vector<1x1xf32>
    %120 = arith.mulf %116, %119 : vector<1x1xf32>
    %121 = vector.broadcast %120 : vector<1x1xf32> to vector<1x49xf32>
    %122 = arith.mulf %110, %121 : vector<1x49xf32>
    %123 = vector.extract_strided_slice %14 {offsets = [0, 3], sizes = [1, 1], strides = [1, 1]} : vector<1x32xf32> to vector<1x1xf32>
    %124 = vector.broadcast %123 : vector<1x1xf32> to vector<1x49xf32>
    %125 = arith.addf %122, %124 : vector<1x49xf32>
    %cst_41 = arith.constant 0.000000e+00 : f32
    %126 = vector.broadcast %cst_41 : f32 to vector<1x49xf32>
    %127 = arith.maximumf %125, %126 : vector<1x49xf32>
    %128 = vector.extract_strided_slice %15 {offsets = [0, 3], sizes = [16, 1], strides = [1, 1]} : vector<16x32xf32> to vector<16x1xf32>
    %129 = vector.broadcast %128 : vector<16x1xf32> to vector<16x49xf32>
    %130 = vector.broadcast %127 : vector<1x49xf32> to vector<16x49xf32>
    %131 = arith.mulf %129, %130 : vector<16x49xf32>
    %132 = arith.addf %103, %131 : vector<16x49xf32>
    %133 = vector.extract_strided_slice %12 {offsets = [0, 196], sizes = [1, 49], strides = [1, 1]} : vector<1x1568xf32> to vector<1x49xf32>
    %cst_42 = arith.constant dense<0.000000e+00> : vector<1xf32>
    %134 = vector.multi_reduction <add>, %133, %cst_42 [1] : vector<1x49xf32> to vector<1xf32>
    %135 = vector.shape_cast %134 : vector<1xf32> to vector<1x1xf32>
    %cst_43 = arith.constant 0.0204081628 : f32
    %136 = vector.broadcast %cst_43 : f32 to vector<1x1xf32>
    %137 = arith.mulf %135, %136 : vector<1x1xf32>
    %138 = vector.broadcast %137 : vector<1x1xf32> to vector<1x49xf32>
    %139 = arith.subf %133, %138 : vector<1x49xf32>
    %140 = arith.mulf %139, %139 : vector<1x49xf32>
    %cst_44 = arith.constant dense<0.000000e+00> : vector<1xf32>
    %141 = vector.multi_reduction <add>, %140, %cst_44 [1] : vector<1x49xf32> to vector<1xf32>
    %142 = vector.shape_cast %141 : vector<1xf32> to vector<1x1xf32>
    %cst_45 = arith.constant 0.0204081628 : f32
    %143 = vector.broadcast %cst_45 : f32 to vector<1x1xf32>
    %144 = arith.mulf %142, %143 : vector<1x1xf32>
    %145 = vector.extract_strided_slice %13 {offsets = [0, 4], sizes = [1, 1], strides = [1, 1]} : vector<1x32xf32> to vector<1x1xf32>
    %cst_46 = arith.constant 9.99999974E-6 : f32
    %146 = vector.broadcast %cst_46 : f32 to vector<1x1xf32>
    %147 = arith.addf %144, %146 : vector<1x1xf32>
    %148 = math.rsqrt %147 : vector<1x1xf32>
    %149 = arith.mulf %145, %148 : vector<1x1xf32>
    %150 = vector.broadcast %149 : vector<1x1xf32> to vector<1x49xf32>
    %151 = arith.mulf %139, %150 : vector<1x49xf32>
    %152 = vector.extract_strided_slice %14 {offsets = [0, 4], sizes = [1, 1], strides = [1, 1]} : vector<1x32xf32> to vector<1x1xf32>
    %153 = vector.broadcast %152 : vector<1x1xf32> to vector<1x49xf32>
    %154 = arith.addf %151, %153 : vector<1x49xf32>
    %cst_47 = arith.constant 0.000000e+00 : f32
    %155 = vector.broadcast %cst_47 : f32 to vector<1x49xf32>
    %156 = arith.maximumf %154, %155 : vector<1x49xf32>
    %157 = vector.extract_strided_slice %15 {offsets = [0, 4], sizes = [16, 1], strides = [1, 1]} : vector<16x32xf32> to vector<16x1xf32>
    %158 = vector.broadcast %157 : vector<16x1xf32> to vector<16x49xf32>
    %159 = vector.broadcast %156 : vector<1x49xf32> to vector<16x49xf32>
    %160 = arith.mulf %158, %159 : vector<16x49xf32>
    %161 = arith.addf %132, %160 : vector<16x49xf32>
    %162 = vector.extract_strided_slice %12 {offsets = [0, 245], sizes = [1, 49], strides = [1, 1]} : vector<1x1568xf32> to vector<1x49xf32>
    %cst_48 = arith.constant dense<0.000000e+00> : vector<1xf32>
    %163 = vector.multi_reduction <add>, %162, %cst_48 [1] : vector<1x49xf32> to vector<1xf32>
    %164 = vector.shape_cast %163 : vector<1xf32> to vector<1x1xf32>
    %cst_49 = arith.constant 0.0204081628 : f32
    %165 = vector.broadcast %cst_49 : f32 to vector<1x1xf32>
    %166 = arith.mulf %164, %165 : vector<1x1xf32>
    %167 = vector.broadcast %166 : vector<1x1xf32> to vector<1x49xf32>
    %168 = arith.subf %162, %167 : vector<1x49xf32>
    %169 = arith.mulf %168, %168 : vector<1x49xf32>
    %cst_50 = arith.constant dense<0.000000e+00> : vector<1xf32>
    %170 = vector.multi_reduction <add>, %169, %cst_50 [1] : vector<1x49xf32> to vector<1xf32>
    %171 = vector.shape_cast %170 : vector<1xf32> to vector<1x1xf32>
    %cst_51 = arith.constant 0.0204081628 : f32
    %172 = vector.broadcast %cst_51 : f32 to vector<1x1xf32>
    %173 = arith.mulf %171, %172 : vector<1x1xf32>
    %174 = vector.extract_strided_slice %13 {offsets = [0, 5], sizes = [1, 1], strides = [1, 1]} : vector<1x32xf32> to vector<1x1xf32>
    %cst_52 = arith.constant 9.99999974E-6 : f32
    %175 = vector.broadcast %cst_52 : f32 to vector<1x1xf32>
    %176 = arith.addf %173, %175 : vector<1x1xf32>
    %177 = math.rsqrt %176 : vector<1x1xf32>
    %178 = arith.mulf %174, %177 : vector<1x1xf32>
    %179 = vector.broadcast %178 : vector<1x1xf32> to vector<1x49xf32>
    %180 = arith.mulf %168, %179 : vector<1x49xf32>
    %181 = vector.extract_strided_slice %14 {offsets = [0, 5], sizes = [1, 1], strides = [1, 1]} : vector<1x32xf32> to vector<1x1xf32>
    %182 = vector.broadcast %181 : vector<1x1xf32> to vector<1x49xf32>
    %183 = arith.addf %180, %182 : vector<1x49xf32>
    %cst_53 = arith.constant 0.000000e+00 : f32
    %184 = vector.broadcast %cst_53 : f32 to vector<1x49xf32>
    %185 = arith.maximumf %183, %184 : vector<1x49xf32>
    %186 = vector.extract_strided_slice %15 {offsets = [0, 5], sizes = [16, 1], strides = [1, 1]} : vector<16x32xf32> to vector<16x1xf32>
    %187 = vector.broadcast %186 : vector<16x1xf32> to vector<16x49xf32>
    %188 = vector.broadcast %185 : vector<1x49xf32> to vector<16x49xf32>
    %189 = arith.mulf %187, %188 : vector<16x49xf32>
    %190 = arith.addf %161, %189 : vector<16x49xf32>
    %191 = vector.extract_strided_slice %12 {offsets = [0, 294], sizes = [1, 49], strides = [1, 1]} : vector<1x1568xf32> to vector<1x49xf32>
    %cst_54 = arith.constant dense<0.000000e+00> : vector<1xf32>
    %192 = vector.multi_reduction <add>, %191, %cst_54 [1] : vector<1x49xf32> to vector<1xf32>
    %193 = vector.shape_cast %192 : vector<1xf32> to vector<1x1xf32>
    %cst_55 = arith.constant 0.0204081628 : f32
    %194 = vector.broadcast %cst_55 : f32 to vector<1x1xf32>
    %195 = arith.mulf %193, %194 : vector<1x1xf32>
    %196 = vector.broadcast %195 : vector<1x1xf32> to vector<1x49xf32>
    %197 = arith.subf %191, %196 : vector<1x49xf32>
    %198 = arith.mulf %197, %197 : vector<1x49xf32>
    %cst_56 = arith.constant dense<0.000000e+00> : vector<1xf32>
    %199 = vector.multi_reduction <add>, %198, %cst_56 [1] : vector<1x49xf32> to vector<1xf32>
    %200 = vector.shape_cast %199 : vector<1xf32> to vector<1x1xf32>
    %cst_57 = arith.constant 0.0204081628 : f32
    %201 = vector.broadcast %cst_57 : f32 to vector<1x1xf32>
    %202 = arith.mulf %200, %201 : vector<1x1xf32>
    %203 = vector.extract_strided_slice %13 {offsets = [0, 6], sizes = [1, 1], strides = [1, 1]} : vector<1x32xf32> to vector<1x1xf32>
    %cst_58 = arith.constant 9.99999974E-6 : f32
    %204 = vector.broadcast %cst_58 : f32 to vector<1x1xf32>
    %205 = arith.addf %202, %204 : vector<1x1xf32>
    %206 = math.rsqrt %205 : vector<1x1xf32>
    %207 = arith.mulf %203, %206 : vector<1x1xf32>
    %208 = vector.broadcast %207 : vector<1x1xf32> to vector<1x49xf32>
    %209 = arith.mulf %197, %208 : vector<1x49xf32>
    %210 = vector.extract_strided_slice %14 {offsets = [0, 6], sizes = [1, 1], strides = [1, 1]} : vector<1x32xf32> to vector<1x1xf32>
    %211 = vector.broadcast %210 : vector<1x1xf32> to vector<1x49xf32>
    %212 = arith.addf %209, %211 : vector<1x49xf32>
    %cst_59 = arith.constant 0.000000e+00 : f32
    %213 = vector.broadcast %cst_59 : f32 to vector<1x49xf32>
    %214 = arith.maximumf %212, %213 : vector<1x49xf32>
    %215 = vector.extract_strided_slice %15 {offsets = [0, 6], sizes = [16, 1], strides = [1, 1]} : vector<16x32xf32> to vector<16x1xf32>
    %216 = vector.broadcast %215 : vector<16x1xf32> to vector<16x49xf32>
    %217 = vector.broadcast %214 : vector<1x49xf32> to vector<16x49xf32>
    %218 = arith.mulf %216, %217 : vector<16x49xf32>
    %219 = arith.addf %190, %218 : vector<16x49xf32>
    %220 = vector.extract_strided_slice %12 {offsets = [0, 343], sizes = [1, 49], strides = [1, 1]} : vector<1x1568xf32> to vector<1x49xf32>
    %cst_60 = arith.constant dense<0.000000e+00> : vector<1xf32>
    %221 = vector.multi_reduction <add>, %220, %cst_60 [1] : vector<1x49xf32> to vector<1xf32>
    %222 = vector.shape_cast %221 : vector<1xf32> to vector<1x1xf32>
    %cst_61 = arith.constant 0.0204081628 : f32
    %223 = vector.broadcast %cst_61 : f32 to vector<1x1xf32>
    %224 = arith.mulf %222, %223 : vector<1x1xf32>
    %225 = vector.broadcast %224 : vector<1x1xf32> to vector<1x49xf32>
    %226 = arith.subf %220, %225 : vector<1x49xf32>
    %227 = arith.mulf %226, %226 : vector<1x49xf32>
    %cst_62 = arith.constant dense<0.000000e+00> : vector<1xf32>
    %228 = vector.multi_reduction <add>, %227, %cst_62 [1] : vector<1x49xf32> to vector<1xf32>
    %229 = vector.shape_cast %228 : vector<1xf32> to vector<1x1xf32>
    %cst_63 = arith.constant 0.0204081628 : f32
    %230 = vector.broadcast %cst_63 : f32 to vector<1x1xf32>
    %231 = arith.mulf %229, %230 : vector<1x1xf32>
    %232 = vector.extract_strided_slice %13 {offsets = [0, 7], sizes = [1, 1], strides = [1, 1]} : vector<1x32xf32> to vector<1x1xf32>
    %cst_64 = arith.constant 9.99999974E-6 : f32
    %233 = vector.broadcast %cst_64 : f32 to vector<1x1xf32>
    %234 = arith.addf %231, %233 : vector<1x1xf32>
    %235 = math.rsqrt %234 : vector<1x1xf32>
    %236 = arith.mulf %232, %235 : vector<1x1xf32>
    %237 = vector.broadcast %236 : vector<1x1xf32> to vector<1x49xf32>
    %238 = arith.mulf %226, %237 : vector<1x49xf32>
    %239 = vector.extract_strided_slice %14 {offsets = [0, 7], sizes = [1, 1], strides = [1, 1]} : vector<1x32xf32> to vector<1x1xf32>
    %240 = vector.broadcast %239 : vector<1x1xf32> to vector<1x49xf32>
    %241 = arith.addf %238, %240 : vector<1x49xf32>
    %cst_65 = arith.constant 0.000000e+00 : f32
    %242 = vector.broadcast %cst_65 : f32 to vector<1x49xf32>
    %243 = arith.maximumf %241, %242 : vector<1x49xf32>
    %244 = vector.extract_strided_slice %15 {offsets = [0, 7], sizes = [16, 1], strides = [1, 1]} : vector<16x32xf32> to vector<16x1xf32>
    %245 = vector.broadcast %244 : vector<16x1xf32> to vector<16x49xf32>
    %246 = vector.broadcast %243 : vector<1x49xf32> to vector<16x49xf32>
    %247 = arith.mulf %245, %246 : vector<16x49xf32>
    %248 = arith.addf %219, %247 : vector<16x49xf32>
    %249 = vector.extract_strided_slice %12 {offsets = [0, 392], sizes = [1, 49], strides = [1, 1]} : vector<1x1568xf32> to vector<1x49xf32>
    %cst_66 = arith.constant dense<0.000000e+00> : vector<1xf32>
    %250 = vector.multi_reduction <add>, %249, %cst_66 [1] : vector<1x49xf32> to vector<1xf32>
    %251 = vector.shape_cast %250 : vector<1xf32> to vector<1x1xf32>
    %cst_67 = arith.constant 0.0204081628 : f32
    %252 = vector.broadcast %cst_67 : f32 to vector<1x1xf32>
    %253 = arith.mulf %251, %252 : vector<1x1xf32>
    %254 = vector.broadcast %253 : vector<1x1xf32> to vector<1x49xf32>
    %255 = arith.subf %249, %254 : vector<1x49xf32>
    %256 = arith.mulf %255, %255 : vector<1x49xf32>
    %cst_68 = arith.constant dense<0.000000e+00> : vector<1xf32>
    %257 = vector.multi_reduction <add>, %256, %cst_68 [1] : vector<1x49xf32> to vector<1xf32>
    %258 = vector.shape_cast %257 : vector<1xf32> to vector<1x1xf32>
    %cst_69 = arith.constant 0.0204081628 : f32
    %259 = vector.broadcast %cst_69 : f32 to vector<1x1xf32>
    %260 = arith.mulf %258, %259 : vector<1x1xf32>
    %261 = vector.extract_strided_slice %13 {offsets = [0, 8], sizes = [1, 1], strides = [1, 1]} : vector<1x32xf32> to vector<1x1xf32>
    %cst_70 = arith.constant 9.99999974E-6 : f32
    %262 = vector.broadcast %cst_70 : f32 to vector<1x1xf32>
    %263 = arith.addf %260, %262 : vector<1x1xf32>
    %264 = math.rsqrt %263 : vector<1x1xf32>
    %265 = arith.mulf %261, %264 : vector<1x1xf32>
    %266 = vector.broadcast %265 : vector<1x1xf32> to vector<1x49xf32>
    %267 = arith.mulf %255, %266 : vector<1x49xf32>
    %268 = vector.extract_strided_slice %14 {offsets = [0, 8], sizes = [1, 1], strides = [1, 1]} : vector<1x32xf32> to vector<1x1xf32>
    %269 = vector.broadcast %268 : vector<1x1xf32> to vector<1x49xf32>
    %270 = arith.addf %267, %269 : vector<1x49xf32>
    %cst_71 = arith.constant 0.000000e+00 : f32
    %271 = vector.broadcast %cst_71 : f32 to vector<1x49xf32>
    %272 = arith.maximumf %270, %271 : vector<1x49xf32>
    %273 = vector.extract_strided_slice %15 {offsets = [0, 8], sizes = [16, 1], strides = [1, 1]} : vector<16x32xf32> to vector<16x1xf32>
    %274 = vector.broadcast %273 : vector<16x1xf32> to vector<16x49xf32>
    %275 = vector.broadcast %272 : vector<1x49xf32> to vector<16x49xf32>
    %276 = arith.mulf %274, %275 : vector<16x49xf32>
    %277 = arith.addf %248, %276 : vector<16x49xf32>
    %278 = vector.extract_strided_slice %12 {offsets = [0, 441], sizes = [1, 49], strides = [1, 1]} : vector<1x1568xf32> to vector<1x49xf32>
    %cst_72 = arith.constant dense<0.000000e+00> : vector<1xf32>
    %279 = vector.multi_reduction <add>, %278, %cst_72 [1] : vector<1x49xf32> to vector<1xf32>
    %280 = vector.shape_cast %279 : vector<1xf32> to vector<1x1xf32>
    %cst_73 = arith.constant 0.0204081628 : f32
    %281 = vector.broadcast %cst_73 : f32 to vector<1x1xf32>
    %282 = arith.mulf %280, %281 : vector<1x1xf32>
    %283 = vector.broadcast %282 : vector<1x1xf32> to vector<1x49xf32>
    %284 = arith.subf %278, %283 : vector<1x49xf32>
    %285 = arith.mulf %284, %284 : vector<1x49xf32>
    %cst_74 = arith.constant dense<0.000000e+00> : vector<1xf32>
    %286 = vector.multi_reduction <add>, %285, %cst_74 [1] : vector<1x49xf32> to vector<1xf32>
    %287 = vector.shape_cast %286 : vector<1xf32> to vector<1x1xf32>
    %cst_75 = arith.constant 0.0204081628 : f32
    %288 = vector.broadcast %cst_75 : f32 to vector<1x1xf32>
    %289 = arith.mulf %287, %288 : vector<1x1xf32>
    %290 = vector.extract_strided_slice %13 {offsets = [0, 9], sizes = [1, 1], strides = [1, 1]} : vector<1x32xf32> to vector<1x1xf32>
    %cst_76 = arith.constant 9.99999974E-6 : f32
    %291 = vector.broadcast %cst_76 : f32 to vector<1x1xf32>
    %292 = arith.addf %289, %291 : vector<1x1xf32>
    %293 = math.rsqrt %292 : vector<1x1xf32>
    %294 = arith.mulf %290, %293 : vector<1x1xf32>
    %295 = vector.broadcast %294 : vector<1x1xf32> to vector<1x49xf32>
    %296 = arith.mulf %284, %295 : vector<1x49xf32>
    %297 = vector.extract_strided_slice %14 {offsets = [0, 9], sizes = [1, 1], strides = [1, 1]} : vector<1x32xf32> to vector<1x1xf32>
    %298 = vector.broadcast %297 : vector<1x1xf32> to vector<1x49xf32>
    %299 = arith.addf %296, %298 : vector<1x49xf32>
    %cst_77 = arith.constant 0.000000e+00 : f32
    %300 = vector.broadcast %cst_77 : f32 to vector<1x49xf32>
    %301 = arith.maximumf %299, %300 : vector<1x49xf32>
    %302 = vector.extract_strided_slice %15 {offsets = [0, 9], sizes = [16, 1], strides = [1, 1]} : vector<16x32xf32> to vector<16x1xf32>
    %303 = vector.broadcast %302 : vector<16x1xf32> to vector<16x49xf32>
    %304 = vector.broadcast %301 : vector<1x49xf32> to vector<16x49xf32>
    %305 = arith.mulf %303, %304 : vector<16x49xf32>
    %306 = arith.addf %277, %305 : vector<16x49xf32>
    %307 = vector.extract_strided_slice %12 {offsets = [0, 490], sizes = [1, 49], strides = [1, 1]} : vector<1x1568xf32> to vector<1x49xf32>
    %cst_78 = arith.constant dense<0.000000e+00> : vector<1xf32>
    %308 = vector.multi_reduction <add>, %307, %cst_78 [1] : vector<1x49xf32> to vector<1xf32>
    %309 = vector.shape_cast %308 : vector<1xf32> to vector<1x1xf32>
    %cst_79 = arith.constant 0.0204081628 : f32
    %310 = vector.broadcast %cst_79 : f32 to vector<1x1xf32>
    %311 = arith.mulf %309, %310 : vector<1x1xf32>
    %312 = vector.broadcast %311 : vector<1x1xf32> to vector<1x49xf32>
    %313 = arith.subf %307, %312 : vector<1x49xf32>
    %314 = arith.mulf %313, %313 : vector<1x49xf32>
    %cst_80 = arith.constant dense<0.000000e+00> : vector<1xf32>
    %315 = vector.multi_reduction <add>, %314, %cst_80 [1] : vector<1x49xf32> to vector<1xf32>
    %316 = vector.shape_cast %315 : vector<1xf32> to vector<1x1xf32>
    %cst_81 = arith.constant 0.0204081628 : f32
    %317 = vector.broadcast %cst_81 : f32 to vector<1x1xf32>
    %318 = arith.mulf %316, %317 : vector<1x1xf32>
    %319 = vector.extract_strided_slice %13 {offsets = [0, 10], sizes = [1, 1], strides = [1, 1]} : vector<1x32xf32> to vector<1x1xf32>
    %cst_82 = arith.constant 9.99999974E-6 : f32
    %320 = vector.broadcast %cst_82 : f32 to vector<1x1xf32>
    %321 = arith.addf %318, %320 : vector<1x1xf32>
    %322 = math.rsqrt %321 : vector<1x1xf32>
    %323 = arith.mulf %319, %322 : vector<1x1xf32>
    %324 = vector.broadcast %323 : vector<1x1xf32> to vector<1x49xf32>
    %325 = arith.mulf %313, %324 : vector<1x49xf32>
    %326 = vector.extract_strided_slice %14 {offsets = [0, 10], sizes = [1, 1], strides = [1, 1]} : vector<1x32xf32> to vector<1x1xf32>
    %327 = vector.broadcast %326 : vector<1x1xf32> to vector<1x49xf32>
    %328 = arith.addf %325, %327 : vector<1x49xf32>
    %cst_83 = arith.constant 0.000000e+00 : f32
    %329 = vector.broadcast %cst_83 : f32 to vector<1x49xf32>
    %330 = arith.maximumf %328, %329 : vector<1x49xf32>
    %331 = vector.extract_strided_slice %15 {offsets = [0, 10], sizes = [16, 1], strides = [1, 1]} : vector<16x32xf32> to vector<16x1xf32>
    %332 = vector.broadcast %331 : vector<16x1xf32> to vector<16x49xf32>
    %333 = vector.broadcast %330 : vector<1x49xf32> to vector<16x49xf32>
    %334 = arith.mulf %332, %333 : vector<16x49xf32>
    %335 = arith.addf %306, %334 : vector<16x49xf32>
    %336 = vector.extract_strided_slice %12 {offsets = [0, 539], sizes = [1, 49], strides = [1, 1]} : vector<1x1568xf32> to vector<1x49xf32>
    %cst_84 = arith.constant dense<0.000000e+00> : vector<1xf32>
    %337 = vector.multi_reduction <add>, %336, %cst_84 [1] : vector<1x49xf32> to vector<1xf32>
    %338 = vector.shape_cast %337 : vector<1xf32> to vector<1x1xf32>
    %cst_85 = arith.constant 0.0204081628 : f32
    %339 = vector.broadcast %cst_85 : f32 to vector<1x1xf32>
    %340 = arith.mulf %338, %339 : vector<1x1xf32>
    %341 = vector.broadcast %340 : vector<1x1xf32> to vector<1x49xf32>
    %342 = arith.subf %336, %341 : vector<1x49xf32>
    %343 = arith.mulf %342, %342 : vector<1x49xf32>
    %cst_86 = arith.constant dense<0.000000e+00> : vector<1xf32>
    %344 = vector.multi_reduction <add>, %343, %cst_86 [1] : vector<1x49xf32> to vector<1xf32>
    %345 = vector.shape_cast %344 : vector<1xf32> to vector<1x1xf32>
    %cst_87 = arith.constant 0.0204081628 : f32
    %346 = vector.broadcast %cst_87 : f32 to vector<1x1xf32>
    %347 = arith.mulf %345, %346 : vector<1x1xf32>
    %348 = vector.extract_strided_slice %13 {offsets = [0, 11], sizes = [1, 1], strides = [1, 1]} : vector<1x32xf32> to vector<1x1xf32>
    %cst_88 = arith.constant 9.99999974E-6 : f32
    %349 = vector.broadcast %cst_88 : f32 to vector<1x1xf32>
    %350 = arith.addf %347, %349 : vector<1x1xf32>
    %351 = math.rsqrt %350 : vector<1x1xf32>
    %352 = arith.mulf %348, %351 : vector<1x1xf32>
    %353 = vector.broadcast %352 : vector<1x1xf32> to vector<1x49xf32>
    %354 = arith.mulf %342, %353 : vector<1x49xf32>
    %355 = vector.extract_strided_slice %14 {offsets = [0, 11], sizes = [1, 1], strides = [1, 1]} : vector<1x32xf32> to vector<1x1xf32>
    %356 = vector.broadcast %355 : vector<1x1xf32> to vector<1x49xf32>
    %357 = arith.addf %354, %356 : vector<1x49xf32>
    %cst_89 = arith.constant 0.000000e+00 : f32
    %358 = vector.broadcast %cst_89 : f32 to vector<1x49xf32>
    %359 = arith.maximumf %357, %358 : vector<1x49xf32>
    %360 = vector.extract_strided_slice %15 {offsets = [0, 11], sizes = [16, 1], strides = [1, 1]} : vector<16x32xf32> to vector<16x1xf32>
    %361 = vector.broadcast %360 : vector<16x1xf32> to vector<16x49xf32>
    %362 = vector.broadcast %359 : vector<1x49xf32> to vector<16x49xf32>
    %363 = arith.mulf %361, %362 : vector<16x49xf32>
    %364 = arith.addf %335, %363 : vector<16x49xf32>
    %365 = vector.extract_strided_slice %12 {offsets = [0, 588], sizes = [1, 49], strides = [1, 1]} : vector<1x1568xf32> to vector<1x49xf32>
    %cst_90 = arith.constant dense<0.000000e+00> : vector<1xf32>
    %366 = vector.multi_reduction <add>, %365, %cst_90 [1] : vector<1x49xf32> to vector<1xf32>
    %367 = vector.shape_cast %366 : vector<1xf32> to vector<1x1xf32>
    %cst_91 = arith.constant 0.0204081628 : f32
    %368 = vector.broadcast %cst_91 : f32 to vector<1x1xf32>
    %369 = arith.mulf %367, %368 : vector<1x1xf32>
    %370 = vector.broadcast %369 : vector<1x1xf32> to vector<1x49xf32>
    %371 = arith.subf %365, %370 : vector<1x49xf32>
    %372 = arith.mulf %371, %371 : vector<1x49xf32>
    %cst_92 = arith.constant dense<0.000000e+00> : vector<1xf32>
    %373 = vector.multi_reduction <add>, %372, %cst_92 [1] : vector<1x49xf32> to vector<1xf32>
    %374 = vector.shape_cast %373 : vector<1xf32> to vector<1x1xf32>
    %cst_93 = arith.constant 0.0204081628 : f32
    %375 = vector.broadcast %cst_93 : f32 to vector<1x1xf32>
    %376 = arith.mulf %374, %375 : vector<1x1xf32>
    %377 = vector.extract_strided_slice %13 {offsets = [0, 12], sizes = [1, 1], strides = [1, 1]} : vector<1x32xf32> to vector<1x1xf32>
    %cst_94 = arith.constant 9.99999974E-6 : f32
    %378 = vector.broadcast %cst_94 : f32 to vector<1x1xf32>
    %379 = arith.addf %376, %378 : vector<1x1xf32>
    %380 = math.rsqrt %379 : vector<1x1xf32>
    %381 = arith.mulf %377, %380 : vector<1x1xf32>
    %382 = vector.broadcast %381 : vector<1x1xf32> to vector<1x49xf32>
    %383 = arith.mulf %371, %382 : vector<1x49xf32>
    %384 = vector.extract_strided_slice %14 {offsets = [0, 12], sizes = [1, 1], strides = [1, 1]} : vector<1x32xf32> to vector<1x1xf32>
    %385 = vector.broadcast %384 : vector<1x1xf32> to vector<1x49xf32>
    %386 = arith.addf %383, %385 : vector<1x49xf32>
    %cst_95 = arith.constant 0.000000e+00 : f32
    %387 = vector.broadcast %cst_95 : f32 to vector<1x49xf32>
    %388 = arith.maximumf %386, %387 : vector<1x49xf32>
    %389 = vector.extract_strided_slice %15 {offsets = [0, 12], sizes = [16, 1], strides = [1, 1]} : vector<16x32xf32> to vector<16x1xf32>
    %390 = vector.broadcast %389 : vector<16x1xf32> to vector<16x49xf32>
    %391 = vector.broadcast %388 : vector<1x49xf32> to vector<16x49xf32>
    %392 = arith.mulf %390, %391 : vector<16x49xf32>
    %393 = arith.addf %364, %392 : vector<16x49xf32>
    %394 = vector.extract_strided_slice %12 {offsets = [0, 637], sizes = [1, 49], strides = [1, 1]} : vector<1x1568xf32> to vector<1x49xf32>
    %cst_96 = arith.constant dense<0.000000e+00> : vector<1xf32>
    %395 = vector.multi_reduction <add>, %394, %cst_96 [1] : vector<1x49xf32> to vector<1xf32>
    %396 = vector.shape_cast %395 : vector<1xf32> to vector<1x1xf32>
    %cst_97 = arith.constant 0.0204081628 : f32
    %397 = vector.broadcast %cst_97 : f32 to vector<1x1xf32>
    %398 = arith.mulf %396, %397 : vector<1x1xf32>
    %399 = vector.broadcast %398 : vector<1x1xf32> to vector<1x49xf32>
    %400 = arith.subf %394, %399 : vector<1x49xf32>
    %401 = arith.mulf %400, %400 : vector<1x49xf32>
    %cst_98 = arith.constant dense<0.000000e+00> : vector<1xf32>
    %402 = vector.multi_reduction <add>, %401, %cst_98 [1] : vector<1x49xf32> to vector<1xf32>
    %403 = vector.shape_cast %402 : vector<1xf32> to vector<1x1xf32>
    %cst_99 = arith.constant 0.0204081628 : f32
    %404 = vector.broadcast %cst_99 : f32 to vector<1x1xf32>
    %405 = arith.mulf %403, %404 : vector<1x1xf32>
    %406 = vector.extract_strided_slice %13 {offsets = [0, 13], sizes = [1, 1], strides = [1, 1]} : vector<1x32xf32> to vector<1x1xf32>
    %cst_100 = arith.constant 9.99999974E-6 : f32
    %407 = vector.broadcast %cst_100 : f32 to vector<1x1xf32>
    %408 = arith.addf %405, %407 : vector<1x1xf32>
    %409 = math.rsqrt %408 : vector<1x1xf32>
    %410 = arith.mulf %406, %409 : vector<1x1xf32>
    %411 = vector.broadcast %410 : vector<1x1xf32> to vector<1x49xf32>
    %412 = arith.mulf %400, %411 : vector<1x49xf32>
    %413 = vector.extract_strided_slice %14 {offsets = [0, 13], sizes = [1, 1], strides = [1, 1]} : vector<1x32xf32> to vector<1x1xf32>
    %414 = vector.broadcast %413 : vector<1x1xf32> to vector<1x49xf32>
    %415 = arith.addf %412, %414 : vector<1x49xf32>
    %cst_101 = arith.constant 0.000000e+00 : f32
    %416 = vector.broadcast %cst_101 : f32 to vector<1x49xf32>
    %417 = arith.maximumf %415, %416 : vector<1x49xf32>
    %418 = vector.extract_strided_slice %15 {offsets = [0, 13], sizes = [16, 1], strides = [1, 1]} : vector<16x32xf32> to vector<16x1xf32>
    %419 = vector.broadcast %418 : vector<16x1xf32> to vector<16x49xf32>
    %420 = vector.broadcast %417 : vector<1x49xf32> to vector<16x49xf32>
    %421 = arith.mulf %419, %420 : vector<16x49xf32>
    %422 = arith.addf %393, %421 : vector<16x49xf32>
    %423 = vector.extract_strided_slice %12 {offsets = [0, 686], sizes = [1, 49], strides = [1, 1]} : vector<1x1568xf32> to vector<1x49xf32>
    %cst_102 = arith.constant dense<0.000000e+00> : vector<1xf32>
    %424 = vector.multi_reduction <add>, %423, %cst_102 [1] : vector<1x49xf32> to vector<1xf32>
    %425 = vector.shape_cast %424 : vector<1xf32> to vector<1x1xf32>
    %cst_103 = arith.constant 0.0204081628 : f32
    %426 = vector.broadcast %cst_103 : f32 to vector<1x1xf32>
    %427 = arith.mulf %425, %426 : vector<1x1xf32>
    %428 = vector.broadcast %427 : vector<1x1xf32> to vector<1x49xf32>
    %429 = arith.subf %423, %428 : vector<1x49xf32>
    %430 = arith.mulf %429, %429 : vector<1x49xf32>
    %cst_104 = arith.constant dense<0.000000e+00> : vector<1xf32>
    %431 = vector.multi_reduction <add>, %430, %cst_104 [1] : vector<1x49xf32> to vector<1xf32>
    %432 = vector.shape_cast %431 : vector<1xf32> to vector<1x1xf32>
    %cst_105 = arith.constant 0.0204081628 : f32
    %433 = vector.broadcast %cst_105 : f32 to vector<1x1xf32>
    %434 = arith.mulf %432, %433 : vector<1x1xf32>
    %435 = vector.extract_strided_slice %13 {offsets = [0, 14], sizes = [1, 1], strides = [1, 1]} : vector<1x32xf32> to vector<1x1xf32>
    %cst_106 = arith.constant 9.99999974E-6 : f32
    %436 = vector.broadcast %cst_106 : f32 to vector<1x1xf32>
    %437 = arith.addf %434, %436 : vector<1x1xf32>
    %438 = math.rsqrt %437 : vector<1x1xf32>
    %439 = arith.mulf %435, %438 : vector<1x1xf32>
    %440 = vector.broadcast %439 : vector<1x1xf32> to vector<1x49xf32>
    %441 = arith.mulf %429, %440 : vector<1x49xf32>
    %442 = vector.extract_strided_slice %14 {offsets = [0, 14], sizes = [1, 1], strides = [1, 1]} : vector<1x32xf32> to vector<1x1xf32>
    %443 = vector.broadcast %442 : vector<1x1xf32> to vector<1x49xf32>
    %444 = arith.addf %441, %443 : vector<1x49xf32>
    %cst_107 = arith.constant 0.000000e+00 : f32
    %445 = vector.broadcast %cst_107 : f32 to vector<1x49xf32>
    %446 = arith.maximumf %444, %445 : vector<1x49xf32>
    %447 = vector.extract_strided_slice %15 {offsets = [0, 14], sizes = [16, 1], strides = [1, 1]} : vector<16x32xf32> to vector<16x1xf32>
    %448 = vector.broadcast %447 : vector<16x1xf32> to vector<16x49xf32>
    %449 = vector.broadcast %446 : vector<1x49xf32> to vector<16x49xf32>
    %450 = arith.mulf %448, %449 : vector<16x49xf32>
    %451 = arith.addf %422, %450 : vector<16x49xf32>
    %452 = vector.extract_strided_slice %12 {offsets = [0, 735], sizes = [1, 49], strides = [1, 1]} : vector<1x1568xf32> to vector<1x49xf32>
    %cst_108 = arith.constant dense<0.000000e+00> : vector<1xf32>
    %453 = vector.multi_reduction <add>, %452, %cst_108 [1] : vector<1x49xf32> to vector<1xf32>
    %454 = vector.shape_cast %453 : vector<1xf32> to vector<1x1xf32>
    %cst_109 = arith.constant 0.0204081628 : f32
    %455 = vector.broadcast %cst_109 : f32 to vector<1x1xf32>
    %456 = arith.mulf %454, %455 : vector<1x1xf32>
    %457 = vector.broadcast %456 : vector<1x1xf32> to vector<1x49xf32>
    %458 = arith.subf %452, %457 : vector<1x49xf32>
    %459 = arith.mulf %458, %458 : vector<1x49xf32>
    %cst_110 = arith.constant dense<0.000000e+00> : vector<1xf32>
    %460 = vector.multi_reduction <add>, %459, %cst_110 [1] : vector<1x49xf32> to vector<1xf32>
    %461 = vector.shape_cast %460 : vector<1xf32> to vector<1x1xf32>
    %cst_111 = arith.constant 0.0204081628 : f32
    %462 = vector.broadcast %cst_111 : f32 to vector<1x1xf32>
    %463 = arith.mulf %461, %462 : vector<1x1xf32>
    %464 = vector.extract_strided_slice %13 {offsets = [0, 15], sizes = [1, 1], strides = [1, 1]} : vector<1x32xf32> to vector<1x1xf32>
    %cst_112 = arith.constant 9.99999974E-6 : f32
    %465 = vector.broadcast %cst_112 : f32 to vector<1x1xf32>
    %466 = arith.addf %463, %465 : vector<1x1xf32>
    %467 = math.rsqrt %466 : vector<1x1xf32>
    %468 = arith.mulf %464, %467 : vector<1x1xf32>
    %469 = vector.broadcast %468 : vector<1x1xf32> to vector<1x49xf32>
    %470 = arith.mulf %458, %469 : vector<1x49xf32>
    %471 = vector.extract_strided_slice %14 {offsets = [0, 15], sizes = [1, 1], strides = [1, 1]} : vector<1x32xf32> to vector<1x1xf32>
    %472 = vector.broadcast %471 : vector<1x1xf32> to vector<1x49xf32>
    %473 = arith.addf %470, %472 : vector<1x49xf32>
    %cst_113 = arith.constant 0.000000e+00 : f32
    %474 = vector.broadcast %cst_113 : f32 to vector<1x49xf32>
    %475 = arith.maximumf %473, %474 : vector<1x49xf32>
    %476 = vector.extract_strided_slice %15 {offsets = [0, 15], sizes = [16, 1], strides = [1, 1]} : vector<16x32xf32> to vector<16x1xf32>
    %477 = vector.broadcast %476 : vector<16x1xf32> to vector<16x49xf32>
    %478 = vector.broadcast %475 : vector<1x49xf32> to vector<16x49xf32>
    %479 = arith.mulf %477, %478 : vector<16x49xf32>
    %480 = arith.addf %451, %479 : vector<16x49xf32>
    %481 = vector.extract_strided_slice %12 {offsets = [0, 784], sizes = [1, 49], strides = [1, 1]} : vector<1x1568xf32> to vector<1x49xf32>
    %cst_114 = arith.constant dense<0.000000e+00> : vector<1xf32>
    %482 = vector.multi_reduction <add>, %481, %cst_114 [1] : vector<1x49xf32> to vector<1xf32>
    %483 = vector.shape_cast %482 : vector<1xf32> to vector<1x1xf32>
    %cst_115 = arith.constant 0.0204081628 : f32
    %484 = vector.broadcast %cst_115 : f32 to vector<1x1xf32>
    %485 = arith.mulf %483, %484 : vector<1x1xf32>
    %486 = vector.broadcast %485 : vector<1x1xf32> to vector<1x49xf32>
    %487 = arith.subf %481, %486 : vector<1x49xf32>
    %488 = arith.mulf %487, %487 : vector<1x49xf32>
    %cst_116 = arith.constant dense<0.000000e+00> : vector<1xf32>
    %489 = vector.multi_reduction <add>, %488, %cst_116 [1] : vector<1x49xf32> to vector<1xf32>
    %490 = vector.shape_cast %489 : vector<1xf32> to vector<1x1xf32>
    %cst_117 = arith.constant 0.0204081628 : f32
    %491 = vector.broadcast %cst_117 : f32 to vector<1x1xf32>
    %492 = arith.mulf %490, %491 : vector<1x1xf32>
    %493 = vector.extract_strided_slice %13 {offsets = [0, 16], sizes = [1, 1], strides = [1, 1]} : vector<1x32xf32> to vector<1x1xf32>
    %cst_118 = arith.constant 9.99999974E-6 : f32
    %494 = vector.broadcast %cst_118 : f32 to vector<1x1xf32>
    %495 = arith.addf %492, %494 : vector<1x1xf32>
    %496 = math.rsqrt %495 : vector<1x1xf32>
    %497 = arith.mulf %493, %496 : vector<1x1xf32>
    %498 = vector.broadcast %497 : vector<1x1xf32> to vector<1x49xf32>
    %499 = arith.mulf %487, %498 : vector<1x49xf32>
    %500 = vector.extract_strided_slice %14 {offsets = [0, 16], sizes = [1, 1], strides = [1, 1]} : vector<1x32xf32> to vector<1x1xf32>
    %501 = vector.broadcast %500 : vector<1x1xf32> to vector<1x49xf32>
    %502 = arith.addf %499, %501 : vector<1x49xf32>
    %cst_119 = arith.constant 0.000000e+00 : f32
    %503 = vector.broadcast %cst_119 : f32 to vector<1x49xf32>
    %504 = arith.maximumf %502, %503 : vector<1x49xf32>
    %505 = vector.extract_strided_slice %15 {offsets = [0, 16], sizes = [16, 1], strides = [1, 1]} : vector<16x32xf32> to vector<16x1xf32>
    %506 = vector.broadcast %505 : vector<16x1xf32> to vector<16x49xf32>
    %507 = vector.broadcast %504 : vector<1x49xf32> to vector<16x49xf32>
    %508 = arith.mulf %506, %507 : vector<16x49xf32>
    %509 = arith.addf %480, %508 : vector<16x49xf32>
    %510 = vector.extract_strided_slice %12 {offsets = [0, 833], sizes = [1, 49], strides = [1, 1]} : vector<1x1568xf32> to vector<1x49xf32>
    %cst_120 = arith.constant dense<0.000000e+00> : vector<1xf32>
    %511 = vector.multi_reduction <add>, %510, %cst_120 [1] : vector<1x49xf32> to vector<1xf32>
    %512 = vector.shape_cast %511 : vector<1xf32> to vector<1x1xf32>
    %cst_121 = arith.constant 0.0204081628 : f32
    %513 = vector.broadcast %cst_121 : f32 to vector<1x1xf32>
    %514 = arith.mulf %512, %513 : vector<1x1xf32>
    %515 = vector.broadcast %514 : vector<1x1xf32> to vector<1x49xf32>
    %516 = arith.subf %510, %515 : vector<1x49xf32>
    %517 = arith.mulf %516, %516 : vector<1x49xf32>
    %cst_122 = arith.constant dense<0.000000e+00> : vector<1xf32>
    %518 = vector.multi_reduction <add>, %517, %cst_122 [1] : vector<1x49xf32> to vector<1xf32>
    %519 = vector.shape_cast %518 : vector<1xf32> to vector<1x1xf32>
    %cst_123 = arith.constant 0.0204081628 : f32
    %520 = vector.broadcast %cst_123 : f32 to vector<1x1xf32>
    %521 = arith.mulf %519, %520 : vector<1x1xf32>
    %522 = vector.extract_strided_slice %13 {offsets = [0, 17], sizes = [1, 1], strides = [1, 1]} : vector<1x32xf32> to vector<1x1xf32>
    %cst_124 = arith.constant 9.99999974E-6 : f32
    %523 = vector.broadcast %cst_124 : f32 to vector<1x1xf32>
    %524 = arith.addf %521, %523 : vector<1x1xf32>
    %525 = math.rsqrt %524 : vector<1x1xf32>
    %526 = arith.mulf %522, %525 : vector<1x1xf32>
    %527 = vector.broadcast %526 : vector<1x1xf32> to vector<1x49xf32>
    %528 = arith.mulf %516, %527 : vector<1x49xf32>
    %529 = vector.extract_strided_slice %14 {offsets = [0, 17], sizes = [1, 1], strides = [1, 1]} : vector<1x32xf32> to vector<1x1xf32>
    %530 = vector.broadcast %529 : vector<1x1xf32> to vector<1x49xf32>
    %531 = arith.addf %528, %530 : vector<1x49xf32>
    %cst_125 = arith.constant 0.000000e+00 : f32
    %532 = vector.broadcast %cst_125 : f32 to vector<1x49xf32>
    %533 = arith.maximumf %531, %532 : vector<1x49xf32>
    %534 = vector.extract_strided_slice %15 {offsets = [0, 17], sizes = [16, 1], strides = [1, 1]} : vector<16x32xf32> to vector<16x1xf32>
    %535 = vector.broadcast %534 : vector<16x1xf32> to vector<16x49xf32>
    %536 = vector.broadcast %533 : vector<1x49xf32> to vector<16x49xf32>
    %537 = arith.mulf %535, %536 : vector<16x49xf32>
    %538 = arith.addf %509, %537 : vector<16x49xf32>
    %539 = vector.extract_strided_slice %12 {offsets = [0, 882], sizes = [1, 49], strides = [1, 1]} : vector<1x1568xf32> to vector<1x49xf32>
    %cst_126 = arith.constant dense<0.000000e+00> : vector<1xf32>
    %540 = vector.multi_reduction <add>, %539, %cst_126 [1] : vector<1x49xf32> to vector<1xf32>
    %541 = vector.shape_cast %540 : vector<1xf32> to vector<1x1xf32>
    %cst_127 = arith.constant 0.0204081628 : f32
    %542 = vector.broadcast %cst_127 : f32 to vector<1x1xf32>
    %543 = arith.mulf %541, %542 : vector<1x1xf32>
    %544 = vector.broadcast %543 : vector<1x1xf32> to vector<1x49xf32>
    %545 = arith.subf %539, %544 : vector<1x49xf32>
    %546 = arith.mulf %545, %545 : vector<1x49xf32>
    %cst_128 = arith.constant dense<0.000000e+00> : vector<1xf32>
    %547 = vector.multi_reduction <add>, %546, %cst_128 [1] : vector<1x49xf32> to vector<1xf32>
    %548 = vector.shape_cast %547 : vector<1xf32> to vector<1x1xf32>
    %cst_129 = arith.constant 0.0204081628 : f32
    %549 = vector.broadcast %cst_129 : f32 to vector<1x1xf32>
    %550 = arith.mulf %548, %549 : vector<1x1xf32>
    %551 = vector.extract_strided_slice %13 {offsets = [0, 18], sizes = [1, 1], strides = [1, 1]} : vector<1x32xf32> to vector<1x1xf32>
    %cst_130 = arith.constant 9.99999974E-6 : f32
    %552 = vector.broadcast %cst_130 : f32 to vector<1x1xf32>
    %553 = arith.addf %550, %552 : vector<1x1xf32>
    %554 = math.rsqrt %553 : vector<1x1xf32>
    %555 = arith.mulf %551, %554 : vector<1x1xf32>
    %556 = vector.broadcast %555 : vector<1x1xf32> to vector<1x49xf32>
    %557 = arith.mulf %545, %556 : vector<1x49xf32>
    %558 = vector.extract_strided_slice %14 {offsets = [0, 18], sizes = [1, 1], strides = [1, 1]} : vector<1x32xf32> to vector<1x1xf32>
    %559 = vector.broadcast %558 : vector<1x1xf32> to vector<1x49xf32>
    %560 = arith.addf %557, %559 : vector<1x49xf32>
    %cst_131 = arith.constant 0.000000e+00 : f32
    %561 = vector.broadcast %cst_131 : f32 to vector<1x49xf32>
    %562 = arith.maximumf %560, %561 : vector<1x49xf32>
    %563 = vector.extract_strided_slice %15 {offsets = [0, 18], sizes = [16, 1], strides = [1, 1]} : vector<16x32xf32> to vector<16x1xf32>
    %564 = vector.broadcast %563 : vector<16x1xf32> to vector<16x49xf32>
    %565 = vector.broadcast %562 : vector<1x49xf32> to vector<16x49xf32>
    %566 = arith.mulf %564, %565 : vector<16x49xf32>
    %567 = arith.addf %538, %566 : vector<16x49xf32>
    %568 = vector.extract_strided_slice %12 {offsets = [0, 931], sizes = [1, 49], strides = [1, 1]} : vector<1x1568xf32> to vector<1x49xf32>
    %cst_132 = arith.constant dense<0.000000e+00> : vector<1xf32>
    %569 = vector.multi_reduction <add>, %568, %cst_132 [1] : vector<1x49xf32> to vector<1xf32>
    %570 = vector.shape_cast %569 : vector<1xf32> to vector<1x1xf32>
    %cst_133 = arith.constant 0.0204081628 : f32
    %571 = vector.broadcast %cst_133 : f32 to vector<1x1xf32>
    %572 = arith.mulf %570, %571 : vector<1x1xf32>
    %573 = vector.broadcast %572 : vector<1x1xf32> to vector<1x49xf32>
    %574 = arith.subf %568, %573 : vector<1x49xf32>
    %575 = arith.mulf %574, %574 : vector<1x49xf32>
    %cst_134 = arith.constant dense<0.000000e+00> : vector<1xf32>
    %576 = vector.multi_reduction <add>, %575, %cst_134 [1] : vector<1x49xf32> to vector<1xf32>
    %577 = vector.shape_cast %576 : vector<1xf32> to vector<1x1xf32>
    %cst_135 = arith.constant 0.0204081628 : f32
    %578 = vector.broadcast %cst_135 : f32 to vector<1x1xf32>
    %579 = arith.mulf %577, %578 : vector<1x1xf32>
    %580 = vector.extract_strided_slice %13 {offsets = [0, 19], sizes = [1, 1], strides = [1, 1]} : vector<1x32xf32> to vector<1x1xf32>
    %cst_136 = arith.constant 9.99999974E-6 : f32
    %581 = vector.broadcast %cst_136 : f32 to vector<1x1xf32>
    %582 = arith.addf %579, %581 : vector<1x1xf32>
    %583 = math.rsqrt %582 : vector<1x1xf32>
    %584 = arith.mulf %580, %583 : vector<1x1xf32>
    %585 = vector.broadcast %584 : vector<1x1xf32> to vector<1x49xf32>
    %586 = arith.mulf %574, %585 : vector<1x49xf32>
    %587 = vector.extract_strided_slice %14 {offsets = [0, 19], sizes = [1, 1], strides = [1, 1]} : vector<1x32xf32> to vector<1x1xf32>
    %588 = vector.broadcast %587 : vector<1x1xf32> to vector<1x49xf32>
    %589 = arith.addf %586, %588 : vector<1x49xf32>
    %cst_137 = arith.constant 0.000000e+00 : f32
    %590 = vector.broadcast %cst_137 : f32 to vector<1x49xf32>
    %591 = arith.maximumf %589, %590 : vector<1x49xf32>
    %592 = vector.extract_strided_slice %15 {offsets = [0, 19], sizes = [16, 1], strides = [1, 1]} : vector<16x32xf32> to vector<16x1xf32>
    %593 = vector.broadcast %592 : vector<16x1xf32> to vector<16x49xf32>
    %594 = vector.broadcast %591 : vector<1x49xf32> to vector<16x49xf32>
    %595 = arith.mulf %593, %594 : vector<16x49xf32>
    %596 = arith.addf %567, %595 : vector<16x49xf32>
    %597 = vector.extract_strided_slice %12 {offsets = [0, 980], sizes = [1, 49], strides = [1, 1]} : vector<1x1568xf32> to vector<1x49xf32>
    %cst_138 = arith.constant dense<0.000000e+00> : vector<1xf32>
    %598 = vector.multi_reduction <add>, %597, %cst_138 [1] : vector<1x49xf32> to vector<1xf32>
    %599 = vector.shape_cast %598 : vector<1xf32> to vector<1x1xf32>
    %cst_139 = arith.constant 0.0204081628 : f32
    %600 = vector.broadcast %cst_139 : f32 to vector<1x1xf32>
    %601 = arith.mulf %599, %600 : vector<1x1xf32>
    %602 = vector.broadcast %601 : vector<1x1xf32> to vector<1x49xf32>
    %603 = arith.subf %597, %602 : vector<1x49xf32>
    %604 = arith.mulf %603, %603 : vector<1x49xf32>
    %cst_140 = arith.constant dense<0.000000e+00> : vector<1xf32>
    %605 = vector.multi_reduction <add>, %604, %cst_140 [1] : vector<1x49xf32> to vector<1xf32>
    %606 = vector.shape_cast %605 : vector<1xf32> to vector<1x1xf32>
    %cst_141 = arith.constant 0.0204081628 : f32
    %607 = vector.broadcast %cst_141 : f32 to vector<1x1xf32>
    %608 = arith.mulf %606, %607 : vector<1x1xf32>
    %609 = vector.extract_strided_slice %13 {offsets = [0, 20], sizes = [1, 1], strides = [1, 1]} : vector<1x32xf32> to vector<1x1xf32>
    %cst_142 = arith.constant 9.99999974E-6 : f32
    %610 = vector.broadcast %cst_142 : f32 to vector<1x1xf32>
    %611 = arith.addf %608, %610 : vector<1x1xf32>
    %612 = math.rsqrt %611 : vector<1x1xf32>
    %613 = arith.mulf %609, %612 : vector<1x1xf32>
    %614 = vector.broadcast %613 : vector<1x1xf32> to vector<1x49xf32>
    %615 = arith.mulf %603, %614 : vector<1x49xf32>
    %616 = vector.extract_strided_slice %14 {offsets = [0, 20], sizes = [1, 1], strides = [1, 1]} : vector<1x32xf32> to vector<1x1xf32>
    %617 = vector.broadcast %616 : vector<1x1xf32> to vector<1x49xf32>
    %618 = arith.addf %615, %617 : vector<1x49xf32>
    %cst_143 = arith.constant 0.000000e+00 : f32
    %619 = vector.broadcast %cst_143 : f32 to vector<1x49xf32>
    %620 = arith.maximumf %618, %619 : vector<1x49xf32>
    %621 = vector.extract_strided_slice %15 {offsets = [0, 20], sizes = [16, 1], strides = [1, 1]} : vector<16x32xf32> to vector<16x1xf32>
    %622 = vector.broadcast %621 : vector<16x1xf32> to vector<16x49xf32>
    %623 = vector.broadcast %620 : vector<1x49xf32> to vector<16x49xf32>
    %624 = arith.mulf %622, %623 : vector<16x49xf32>
    %625 = arith.addf %596, %624 : vector<16x49xf32>
    %626 = vector.extract_strided_slice %12 {offsets = [0, 1029], sizes = [1, 49], strides = [1, 1]} : vector<1x1568xf32> to vector<1x49xf32>
    %cst_144 = arith.constant dense<0.000000e+00> : vector<1xf32>
    %627 = vector.multi_reduction <add>, %626, %cst_144 [1] : vector<1x49xf32> to vector<1xf32>
    %628 = vector.shape_cast %627 : vector<1xf32> to vector<1x1xf32>
    %cst_145 = arith.constant 0.0204081628 : f32
    %629 = vector.broadcast %cst_145 : f32 to vector<1x1xf32>
    %630 = arith.mulf %628, %629 : vector<1x1xf32>
    %631 = vector.broadcast %630 : vector<1x1xf32> to vector<1x49xf32>
    %632 = arith.subf %626, %631 : vector<1x49xf32>
    %633 = arith.mulf %632, %632 : vector<1x49xf32>
    %cst_146 = arith.constant dense<0.000000e+00> : vector<1xf32>
    %634 = vector.multi_reduction <add>, %633, %cst_146 [1] : vector<1x49xf32> to vector<1xf32>
    %635 = vector.shape_cast %634 : vector<1xf32> to vector<1x1xf32>
    %cst_147 = arith.constant 0.0204081628 : f32
    %636 = vector.broadcast %cst_147 : f32 to vector<1x1xf32>
    %637 = arith.mulf %635, %636 : vector<1x1xf32>
    %638 = vector.extract_strided_slice %13 {offsets = [0, 21], sizes = [1, 1], strides = [1, 1]} : vector<1x32xf32> to vector<1x1xf32>
    %cst_148 = arith.constant 9.99999974E-6 : f32
    %639 = vector.broadcast %cst_148 : f32 to vector<1x1xf32>
    %640 = arith.addf %637, %639 : vector<1x1xf32>
    %641 = math.rsqrt %640 : vector<1x1xf32>
    %642 = arith.mulf %638, %641 : vector<1x1xf32>
    %643 = vector.broadcast %642 : vector<1x1xf32> to vector<1x49xf32>
    %644 = arith.mulf %632, %643 : vector<1x49xf32>
    %645 = vector.extract_strided_slice %14 {offsets = [0, 21], sizes = [1, 1], strides = [1, 1]} : vector<1x32xf32> to vector<1x1xf32>
    %646 = vector.broadcast %645 : vector<1x1xf32> to vector<1x49xf32>
    %647 = arith.addf %644, %646 : vector<1x49xf32>
    %cst_149 = arith.constant 0.000000e+00 : f32
    %648 = vector.broadcast %cst_149 : f32 to vector<1x49xf32>
    %649 = arith.maximumf %647, %648 : vector<1x49xf32>
    %650 = vector.extract_strided_slice %15 {offsets = [0, 21], sizes = [16, 1], strides = [1, 1]} : vector<16x32xf32> to vector<16x1xf32>
    %651 = vector.broadcast %650 : vector<16x1xf32> to vector<16x49xf32>
    %652 = vector.broadcast %649 : vector<1x49xf32> to vector<16x49xf32>
    %653 = arith.mulf %651, %652 : vector<16x49xf32>
    %654 = arith.addf %625, %653 : vector<16x49xf32>
    %655 = vector.extract_strided_slice %12 {offsets = [0, 1078], sizes = [1, 49], strides = [1, 1]} : vector<1x1568xf32> to vector<1x49xf32>
    %cst_150 = arith.constant dense<0.000000e+00> : vector<1xf32>
    %656 = vector.multi_reduction <add>, %655, %cst_150 [1] : vector<1x49xf32> to vector<1xf32>
    %657 = vector.shape_cast %656 : vector<1xf32> to vector<1x1xf32>
    %cst_151 = arith.constant 0.0204081628 : f32
    %658 = vector.broadcast %cst_151 : f32 to vector<1x1xf32>
    %659 = arith.mulf %657, %658 : vector<1x1xf32>
    %660 = vector.broadcast %659 : vector<1x1xf32> to vector<1x49xf32>
    %661 = arith.subf %655, %660 : vector<1x49xf32>
    %662 = arith.mulf %661, %661 : vector<1x49xf32>
    %cst_152 = arith.constant dense<0.000000e+00> : vector<1xf32>
    %663 = vector.multi_reduction <add>, %662, %cst_152 [1] : vector<1x49xf32> to vector<1xf32>
    %664 = vector.shape_cast %663 : vector<1xf32> to vector<1x1xf32>
    %cst_153 = arith.constant 0.0204081628 : f32
    %665 = vector.broadcast %cst_153 : f32 to vector<1x1xf32>
    %666 = arith.mulf %664, %665 : vector<1x1xf32>
    %667 = vector.extract_strided_slice %13 {offsets = [0, 22], sizes = [1, 1], strides = [1, 1]} : vector<1x32xf32> to vector<1x1xf32>
    %cst_154 = arith.constant 9.99999974E-6 : f32
    %668 = vector.broadcast %cst_154 : f32 to vector<1x1xf32>
    %669 = arith.addf %666, %668 : vector<1x1xf32>
    %670 = math.rsqrt %669 : vector<1x1xf32>
    %671 = arith.mulf %667, %670 : vector<1x1xf32>
    %672 = vector.broadcast %671 : vector<1x1xf32> to vector<1x49xf32>
    %673 = arith.mulf %661, %672 : vector<1x49xf32>
    %674 = vector.extract_strided_slice %14 {offsets = [0, 22], sizes = [1, 1], strides = [1, 1]} : vector<1x32xf32> to vector<1x1xf32>
    %675 = vector.broadcast %674 : vector<1x1xf32> to vector<1x49xf32>
    %676 = arith.addf %673, %675 : vector<1x49xf32>
    %cst_155 = arith.constant 0.000000e+00 : f32
    %677 = vector.broadcast %cst_155 : f32 to vector<1x49xf32>
    %678 = arith.maximumf %676, %677 : vector<1x49xf32>
    %679 = vector.extract_strided_slice %15 {offsets = [0, 22], sizes = [16, 1], strides = [1, 1]} : vector<16x32xf32> to vector<16x1xf32>
    %680 = vector.broadcast %679 : vector<16x1xf32> to vector<16x49xf32>
    %681 = vector.broadcast %678 : vector<1x49xf32> to vector<16x49xf32>
    %682 = arith.mulf %680, %681 : vector<16x49xf32>
    %683 = arith.addf %654, %682 : vector<16x49xf32>
    %684 = vector.extract_strided_slice %12 {offsets = [0, 1127], sizes = [1, 49], strides = [1, 1]} : vector<1x1568xf32> to vector<1x49xf32>
    %cst_156 = arith.constant dense<0.000000e+00> : vector<1xf32>
    %685 = vector.multi_reduction <add>, %684, %cst_156 [1] : vector<1x49xf32> to vector<1xf32>
    %686 = vector.shape_cast %685 : vector<1xf32> to vector<1x1xf32>
    %cst_157 = arith.constant 0.0204081628 : f32
    %687 = vector.broadcast %cst_157 : f32 to vector<1x1xf32>
    %688 = arith.mulf %686, %687 : vector<1x1xf32>
    %689 = vector.broadcast %688 : vector<1x1xf32> to vector<1x49xf32>
    %690 = arith.subf %684, %689 : vector<1x49xf32>
    %691 = arith.mulf %690, %690 : vector<1x49xf32>
    %cst_158 = arith.constant dense<0.000000e+00> : vector<1xf32>
    %692 = vector.multi_reduction <add>, %691, %cst_158 [1] : vector<1x49xf32> to vector<1xf32>
    %693 = vector.shape_cast %692 : vector<1xf32> to vector<1x1xf32>
    %cst_159 = arith.constant 0.0204081628 : f32
    %694 = vector.broadcast %cst_159 : f32 to vector<1x1xf32>
    %695 = arith.mulf %693, %694 : vector<1x1xf32>
    %696 = vector.extract_strided_slice %13 {offsets = [0, 23], sizes = [1, 1], strides = [1, 1]} : vector<1x32xf32> to vector<1x1xf32>
    %cst_160 = arith.constant 9.99999974E-6 : f32
    %697 = vector.broadcast %cst_160 : f32 to vector<1x1xf32>
    %698 = arith.addf %695, %697 : vector<1x1xf32>
    %699 = math.rsqrt %698 : vector<1x1xf32>
    %700 = arith.mulf %696, %699 : vector<1x1xf32>
    %701 = vector.broadcast %700 : vector<1x1xf32> to vector<1x49xf32>
    %702 = arith.mulf %690, %701 : vector<1x49xf32>
    %703 = vector.extract_strided_slice %14 {offsets = [0, 23], sizes = [1, 1], strides = [1, 1]} : vector<1x32xf32> to vector<1x1xf32>
    %704 = vector.broadcast %703 : vector<1x1xf32> to vector<1x49xf32>
    %705 = arith.addf %702, %704 : vector<1x49xf32>
    %cst_161 = arith.constant 0.000000e+00 : f32
    %706 = vector.broadcast %cst_161 : f32 to vector<1x49xf32>
    %707 = arith.maximumf %705, %706 : vector<1x49xf32>
    %708 = vector.extract_strided_slice %15 {offsets = [0, 23], sizes = [16, 1], strides = [1, 1]} : vector<16x32xf32> to vector<16x1xf32>
    %709 = vector.broadcast %708 : vector<16x1xf32> to vector<16x49xf32>
    %710 = vector.broadcast %707 : vector<1x49xf32> to vector<16x49xf32>
    %711 = arith.mulf %709, %710 : vector<16x49xf32>
    %712 = arith.addf %683, %711 : vector<16x49xf32>
    %713 = vector.extract_strided_slice %12 {offsets = [0, 1176], sizes = [1, 49], strides = [1, 1]} : vector<1x1568xf32> to vector<1x49xf32>
    %cst_162 = arith.constant dense<0.000000e+00> : vector<1xf32>
    %714 = vector.multi_reduction <add>, %713, %cst_162 [1] : vector<1x49xf32> to vector<1xf32>
    %715 = vector.shape_cast %714 : vector<1xf32> to vector<1x1xf32>
    %cst_163 = arith.constant 0.0204081628 : f32
    %716 = vector.broadcast %cst_163 : f32 to vector<1x1xf32>
    %717 = arith.mulf %715, %716 : vector<1x1xf32>
    %718 = vector.broadcast %717 : vector<1x1xf32> to vector<1x49xf32>
    %719 = arith.subf %713, %718 : vector<1x49xf32>
    %720 = arith.mulf %719, %719 : vector<1x49xf32>
    %cst_164 = arith.constant dense<0.000000e+00> : vector<1xf32>
    %721 = vector.multi_reduction <add>, %720, %cst_164 [1] : vector<1x49xf32> to vector<1xf32>
    %722 = vector.shape_cast %721 : vector<1xf32> to vector<1x1xf32>
    %cst_165 = arith.constant 0.0204081628 : f32
    %723 = vector.broadcast %cst_165 : f32 to vector<1x1xf32>
    %724 = arith.mulf %722, %723 : vector<1x1xf32>
    %725 = vector.extract_strided_slice %13 {offsets = [0, 24], sizes = [1, 1], strides = [1, 1]} : vector<1x32xf32> to vector<1x1xf32>
    %cst_166 = arith.constant 9.99999974E-6 : f32
    %726 = vector.broadcast %cst_166 : f32 to vector<1x1xf32>
    %727 = arith.addf %724, %726 : vector<1x1xf32>
    %728 = math.rsqrt %727 : vector<1x1xf32>
    %729 = arith.mulf %725, %728 : vector<1x1xf32>
    %730 = vector.broadcast %729 : vector<1x1xf32> to vector<1x49xf32>
    %731 = arith.mulf %719, %730 : vector<1x49xf32>
    %732 = vector.extract_strided_slice %14 {offsets = [0, 24], sizes = [1, 1], strides = [1, 1]} : vector<1x32xf32> to vector<1x1xf32>
    %733 = vector.broadcast %732 : vector<1x1xf32> to vector<1x49xf32>
    %734 = arith.addf %731, %733 : vector<1x49xf32>
    %cst_167 = arith.constant 0.000000e+00 : f32
    %735 = vector.broadcast %cst_167 : f32 to vector<1x49xf32>
    %736 = arith.maximumf %734, %735 : vector<1x49xf32>
    %737 = vector.extract_strided_slice %15 {offsets = [0, 24], sizes = [16, 1], strides = [1, 1]} : vector<16x32xf32> to vector<16x1xf32>
    %738 = vector.broadcast %737 : vector<16x1xf32> to vector<16x49xf32>
    %739 = vector.broadcast %736 : vector<1x49xf32> to vector<16x49xf32>
    %740 = arith.mulf %738, %739 : vector<16x49xf32>
    %741 = arith.addf %712, %740 : vector<16x49xf32>
    %742 = vector.extract_strided_slice %12 {offsets = [0, 1225], sizes = [1, 49], strides = [1, 1]} : vector<1x1568xf32> to vector<1x49xf32>
    %cst_168 = arith.constant dense<0.000000e+00> : vector<1xf32>
    %743 = vector.multi_reduction <add>, %742, %cst_168 [1] : vector<1x49xf32> to vector<1xf32>
    %744 = vector.shape_cast %743 : vector<1xf32> to vector<1x1xf32>
    %cst_169 = arith.constant 0.0204081628 : f32
    %745 = vector.broadcast %cst_169 : f32 to vector<1x1xf32>
    %746 = arith.mulf %744, %745 : vector<1x1xf32>
    %747 = vector.broadcast %746 : vector<1x1xf32> to vector<1x49xf32>
    %748 = arith.subf %742, %747 : vector<1x49xf32>
    %749 = arith.mulf %748, %748 : vector<1x49xf32>
    %cst_170 = arith.constant dense<0.000000e+00> : vector<1xf32>
    %750 = vector.multi_reduction <add>, %749, %cst_170 [1] : vector<1x49xf32> to vector<1xf32>
    %751 = vector.shape_cast %750 : vector<1xf32> to vector<1x1xf32>
    %cst_171 = arith.constant 0.0204081628 : f32
    %752 = vector.broadcast %cst_171 : f32 to vector<1x1xf32>
    %753 = arith.mulf %751, %752 : vector<1x1xf32>
    %754 = vector.extract_strided_slice %13 {offsets = [0, 25], sizes = [1, 1], strides = [1, 1]} : vector<1x32xf32> to vector<1x1xf32>
    %cst_172 = arith.constant 9.99999974E-6 : f32
    %755 = vector.broadcast %cst_172 : f32 to vector<1x1xf32>
    %756 = arith.addf %753, %755 : vector<1x1xf32>
    %757 = math.rsqrt %756 : vector<1x1xf32>
    %758 = arith.mulf %754, %757 : vector<1x1xf32>
    %759 = vector.broadcast %758 : vector<1x1xf32> to vector<1x49xf32>
    %760 = arith.mulf %748, %759 : vector<1x49xf32>
    %761 = vector.extract_strided_slice %14 {offsets = [0, 25], sizes = [1, 1], strides = [1, 1]} : vector<1x32xf32> to vector<1x1xf32>
    %762 = vector.broadcast %761 : vector<1x1xf32> to vector<1x49xf32>
    %763 = arith.addf %760, %762 : vector<1x49xf32>
    %cst_173 = arith.constant 0.000000e+00 : f32
    %764 = vector.broadcast %cst_173 : f32 to vector<1x49xf32>
    %765 = arith.maximumf %763, %764 : vector<1x49xf32>
    %766 = vector.extract_strided_slice %15 {offsets = [0, 25], sizes = [16, 1], strides = [1, 1]} : vector<16x32xf32> to vector<16x1xf32>
    %767 = vector.broadcast %766 : vector<16x1xf32> to vector<16x49xf32>
    %768 = vector.broadcast %765 : vector<1x49xf32> to vector<16x49xf32>
    %769 = arith.mulf %767, %768 : vector<16x49xf32>
    %770 = arith.addf %741, %769 : vector<16x49xf32>
    %771 = vector.extract_strided_slice %12 {offsets = [0, 1274], sizes = [1, 49], strides = [1, 1]} : vector<1x1568xf32> to vector<1x49xf32>
    %cst_174 = arith.constant dense<0.000000e+00> : vector<1xf32>
    %772 = vector.multi_reduction <add>, %771, %cst_174 [1] : vector<1x49xf32> to vector<1xf32>
    %773 = vector.shape_cast %772 : vector<1xf32> to vector<1x1xf32>
    %cst_175 = arith.constant 0.0204081628 : f32
    %774 = vector.broadcast %cst_175 : f32 to vector<1x1xf32>
    %775 = arith.mulf %773, %774 : vector<1x1xf32>
    %776 = vector.broadcast %775 : vector<1x1xf32> to vector<1x49xf32>
    %777 = arith.subf %771, %776 : vector<1x49xf32>
    %778 = arith.mulf %777, %777 : vector<1x49xf32>
    %cst_176 = arith.constant dense<0.000000e+00> : vector<1xf32>
    %779 = vector.multi_reduction <add>, %778, %cst_176 [1] : vector<1x49xf32> to vector<1xf32>
    %780 = vector.shape_cast %779 : vector<1xf32> to vector<1x1xf32>
    %cst_177 = arith.constant 0.0204081628 : f32
    %781 = vector.broadcast %cst_177 : f32 to vector<1x1xf32>
    %782 = arith.mulf %780, %781 : vector<1x1xf32>
    %783 = vector.extract_strided_slice %13 {offsets = [0, 26], sizes = [1, 1], strides = [1, 1]} : vector<1x32xf32> to vector<1x1xf32>
    %cst_178 = arith.constant 9.99999974E-6 : f32
    %784 = vector.broadcast %cst_178 : f32 to vector<1x1xf32>
    %785 = arith.addf %782, %784 : vector<1x1xf32>
    %786 = math.rsqrt %785 : vector<1x1xf32>
    %787 = arith.mulf %783, %786 : vector<1x1xf32>
    %788 = vector.broadcast %787 : vector<1x1xf32> to vector<1x49xf32>
    %789 = arith.mulf %777, %788 : vector<1x49xf32>
    %790 = vector.extract_strided_slice %14 {offsets = [0, 26], sizes = [1, 1], strides = [1, 1]} : vector<1x32xf32> to vector<1x1xf32>
    %791 = vector.broadcast %790 : vector<1x1xf32> to vector<1x49xf32>
    %792 = arith.addf %789, %791 : vector<1x49xf32>
    %cst_179 = arith.constant 0.000000e+00 : f32
    %793 = vector.broadcast %cst_179 : f32 to vector<1x49xf32>
    %794 = arith.maximumf %792, %793 : vector<1x49xf32>
    %795 = vector.extract_strided_slice %15 {offsets = [0, 26], sizes = [16, 1], strides = [1, 1]} : vector<16x32xf32> to vector<16x1xf32>
    %796 = vector.broadcast %795 : vector<16x1xf32> to vector<16x49xf32>
    %797 = vector.broadcast %794 : vector<1x49xf32> to vector<16x49xf32>
    %798 = arith.mulf %796, %797 : vector<16x49xf32>
    %799 = arith.addf %770, %798 : vector<16x49xf32>
    %800 = vector.extract_strided_slice %12 {offsets = [0, 1323], sizes = [1, 49], strides = [1, 1]} : vector<1x1568xf32> to vector<1x49xf32>
    %cst_180 = arith.constant dense<0.000000e+00> : vector<1xf32>
    %801 = vector.multi_reduction <add>, %800, %cst_180 [1] : vector<1x49xf32> to vector<1xf32>
    %802 = vector.shape_cast %801 : vector<1xf32> to vector<1x1xf32>
    %cst_181 = arith.constant 0.0204081628 : f32
    %803 = vector.broadcast %cst_181 : f32 to vector<1x1xf32>
    %804 = arith.mulf %802, %803 : vector<1x1xf32>
    %805 = vector.broadcast %804 : vector<1x1xf32> to vector<1x49xf32>
    %806 = arith.subf %800, %805 : vector<1x49xf32>
    %807 = arith.mulf %806, %806 : vector<1x49xf32>
    %cst_182 = arith.constant dense<0.000000e+00> : vector<1xf32>
    %808 = vector.multi_reduction <add>, %807, %cst_182 [1] : vector<1x49xf32> to vector<1xf32>
    %809 = vector.shape_cast %808 : vector<1xf32> to vector<1x1xf32>
    %cst_183 = arith.constant 0.0204081628 : f32
    %810 = vector.broadcast %cst_183 : f32 to vector<1x1xf32>
    %811 = arith.mulf %809, %810 : vector<1x1xf32>
    %812 = vector.extract_strided_slice %13 {offsets = [0, 27], sizes = [1, 1], strides = [1, 1]} : vector<1x32xf32> to vector<1x1xf32>
    %cst_184 = arith.constant 9.99999974E-6 : f32
    %813 = vector.broadcast %cst_184 : f32 to vector<1x1xf32>
    %814 = arith.addf %811, %813 : vector<1x1xf32>
    %815 = math.rsqrt %814 : vector<1x1xf32>
    %816 = arith.mulf %812, %815 : vector<1x1xf32>
    %817 = vector.broadcast %816 : vector<1x1xf32> to vector<1x49xf32>
    %818 = arith.mulf %806, %817 : vector<1x49xf32>
    %819 = vector.extract_strided_slice %14 {offsets = [0, 27], sizes = [1, 1], strides = [1, 1]} : vector<1x32xf32> to vector<1x1xf32>
    %820 = vector.broadcast %819 : vector<1x1xf32> to vector<1x49xf32>
    %821 = arith.addf %818, %820 : vector<1x49xf32>
    %cst_185 = arith.constant 0.000000e+00 : f32
    %822 = vector.broadcast %cst_185 : f32 to vector<1x49xf32>
    %823 = arith.maximumf %821, %822 : vector<1x49xf32>
    %824 = vector.extract_strided_slice %15 {offsets = [0, 27], sizes = [16, 1], strides = [1, 1]} : vector<16x32xf32> to vector<16x1xf32>
    %825 = vector.broadcast %824 : vector<16x1xf32> to vector<16x49xf32>
    %826 = vector.broadcast %823 : vector<1x49xf32> to vector<16x49xf32>
    %827 = arith.mulf %825, %826 : vector<16x49xf32>
    %828 = arith.addf %799, %827 : vector<16x49xf32>
    %829 = vector.extract_strided_slice %12 {offsets = [0, 1372], sizes = [1, 49], strides = [1, 1]} : vector<1x1568xf32> to vector<1x49xf32>
    %cst_186 = arith.constant dense<0.000000e+00> : vector<1xf32>
    %830 = vector.multi_reduction <add>, %829, %cst_186 [1] : vector<1x49xf32> to vector<1xf32>
    %831 = vector.shape_cast %830 : vector<1xf32> to vector<1x1xf32>
    %cst_187 = arith.constant 0.0204081628 : f32
    %832 = vector.broadcast %cst_187 : f32 to vector<1x1xf32>
    %833 = arith.mulf %831, %832 : vector<1x1xf32>
    %834 = vector.broadcast %833 : vector<1x1xf32> to vector<1x49xf32>
    %835 = arith.subf %829, %834 : vector<1x49xf32>
    %836 = arith.mulf %835, %835 : vector<1x49xf32>
    %cst_188 = arith.constant dense<0.000000e+00> : vector<1xf32>
    %837 = vector.multi_reduction <add>, %836, %cst_188 [1] : vector<1x49xf32> to vector<1xf32>
    %838 = vector.shape_cast %837 : vector<1xf32> to vector<1x1xf32>
    %cst_189 = arith.constant 0.0204081628 : f32
    %839 = vector.broadcast %cst_189 : f32 to vector<1x1xf32>
    %840 = arith.mulf %838, %839 : vector<1x1xf32>
    %841 = vector.extract_strided_slice %13 {offsets = [0, 28], sizes = [1, 1], strides = [1, 1]} : vector<1x32xf32> to vector<1x1xf32>
    %cst_190 = arith.constant 9.99999974E-6 : f32
    %842 = vector.broadcast %cst_190 : f32 to vector<1x1xf32>
    %843 = arith.addf %840, %842 : vector<1x1xf32>
    %844 = math.rsqrt %843 : vector<1x1xf32>
    %845 = arith.mulf %841, %844 : vector<1x1xf32>
    %846 = vector.broadcast %845 : vector<1x1xf32> to vector<1x49xf32>
    %847 = arith.mulf %835, %846 : vector<1x49xf32>
    %848 = vector.extract_strided_slice %14 {offsets = [0, 28], sizes = [1, 1], strides = [1, 1]} : vector<1x32xf32> to vector<1x1xf32>
    %849 = vector.broadcast %848 : vector<1x1xf32> to vector<1x49xf32>
    %850 = arith.addf %847, %849 : vector<1x49xf32>
    %cst_191 = arith.constant 0.000000e+00 : f32
    %851 = vector.broadcast %cst_191 : f32 to vector<1x49xf32>
    %852 = arith.maximumf %850, %851 : vector<1x49xf32>
    %853 = vector.extract_strided_slice %15 {offsets = [0, 28], sizes = [16, 1], strides = [1, 1]} : vector<16x32xf32> to vector<16x1xf32>
    %854 = vector.broadcast %853 : vector<16x1xf32> to vector<16x49xf32>
    %855 = vector.broadcast %852 : vector<1x49xf32> to vector<16x49xf32>
    %856 = arith.mulf %854, %855 : vector<16x49xf32>
    %857 = arith.addf %828, %856 : vector<16x49xf32>
    %858 = vector.extract_strided_slice %12 {offsets = [0, 1421], sizes = [1, 49], strides = [1, 1]} : vector<1x1568xf32> to vector<1x49xf32>
    %cst_192 = arith.constant dense<0.000000e+00> : vector<1xf32>
    %859 = vector.multi_reduction <add>, %858, %cst_192 [1] : vector<1x49xf32> to vector<1xf32>
    %860 = vector.shape_cast %859 : vector<1xf32> to vector<1x1xf32>
    %cst_193 = arith.constant 0.0204081628 : f32
    %861 = vector.broadcast %cst_193 : f32 to vector<1x1xf32>
    %862 = arith.mulf %860, %861 : vector<1x1xf32>
    %863 = vector.broadcast %862 : vector<1x1xf32> to vector<1x49xf32>
    %864 = arith.subf %858, %863 : vector<1x49xf32>
    %865 = arith.mulf %864, %864 : vector<1x49xf32>
    %cst_194 = arith.constant dense<0.000000e+00> : vector<1xf32>
    %866 = vector.multi_reduction <add>, %865, %cst_194 [1] : vector<1x49xf32> to vector<1xf32>
    %867 = vector.shape_cast %866 : vector<1xf32> to vector<1x1xf32>
    %cst_195 = arith.constant 0.0204081628 : f32
    %868 = vector.broadcast %cst_195 : f32 to vector<1x1xf32>
    %869 = arith.mulf %867, %868 : vector<1x1xf32>
    %870 = vector.extract_strided_slice %13 {offsets = [0, 29], sizes = [1, 1], strides = [1, 1]} : vector<1x32xf32> to vector<1x1xf32>
    %cst_196 = arith.constant 9.99999974E-6 : f32
    %871 = vector.broadcast %cst_196 : f32 to vector<1x1xf32>
    %872 = arith.addf %869, %871 : vector<1x1xf32>
    %873 = math.rsqrt %872 : vector<1x1xf32>
    %874 = arith.mulf %870, %873 : vector<1x1xf32>
    %875 = vector.broadcast %874 : vector<1x1xf32> to vector<1x49xf32>
    %876 = arith.mulf %864, %875 : vector<1x49xf32>
    %877 = vector.extract_strided_slice %14 {offsets = [0, 29], sizes = [1, 1], strides = [1, 1]} : vector<1x32xf32> to vector<1x1xf32>
    %878 = vector.broadcast %877 : vector<1x1xf32> to vector<1x49xf32>
    %879 = arith.addf %876, %878 : vector<1x49xf32>
    %cst_197 = arith.constant 0.000000e+00 : f32
    %880 = vector.broadcast %cst_197 : f32 to vector<1x49xf32>
    %881 = arith.maximumf %879, %880 : vector<1x49xf32>
    %882 = vector.extract_strided_slice %15 {offsets = [0, 29], sizes = [16, 1], strides = [1, 1]} : vector<16x32xf32> to vector<16x1xf32>
    %883 = vector.broadcast %882 : vector<16x1xf32> to vector<16x49xf32>
    %884 = vector.broadcast %881 : vector<1x49xf32> to vector<16x49xf32>
    %885 = arith.mulf %883, %884 : vector<16x49xf32>
    %886 = arith.addf %857, %885 : vector<16x49xf32>
    %887 = vector.extract_strided_slice %12 {offsets = [0, 1470], sizes = [1, 49], strides = [1, 1]} : vector<1x1568xf32> to vector<1x49xf32>
    %cst_198 = arith.constant dense<0.000000e+00> : vector<1xf32>
    %888 = vector.multi_reduction <add>, %887, %cst_198 [1] : vector<1x49xf32> to vector<1xf32>
    %889 = vector.shape_cast %888 : vector<1xf32> to vector<1x1xf32>
    %cst_199 = arith.constant 0.0204081628 : f32
    %890 = vector.broadcast %cst_199 : f32 to vector<1x1xf32>
    %891 = arith.mulf %889, %890 : vector<1x1xf32>
    %892 = vector.broadcast %891 : vector<1x1xf32> to vector<1x49xf32>
    %893 = arith.subf %887, %892 : vector<1x49xf32>
    %894 = arith.mulf %893, %893 : vector<1x49xf32>
    %cst_200 = arith.constant dense<0.000000e+00> : vector<1xf32>
    %895 = vector.multi_reduction <add>, %894, %cst_200 [1] : vector<1x49xf32> to vector<1xf32>
    %896 = vector.shape_cast %895 : vector<1xf32> to vector<1x1xf32>
    %cst_201 = arith.constant 0.0204081628 : f32
    %897 = vector.broadcast %cst_201 : f32 to vector<1x1xf32>
    %898 = arith.mulf %896, %897 : vector<1x1xf32>
    %899 = vector.extract_strided_slice %13 {offsets = [0, 30], sizes = [1, 1], strides = [1, 1]} : vector<1x32xf32> to vector<1x1xf32>
    %cst_202 = arith.constant 9.99999974E-6 : f32
    %900 = vector.broadcast %cst_202 : f32 to vector<1x1xf32>
    %901 = arith.addf %898, %900 : vector<1x1xf32>
    %902 = math.rsqrt %901 : vector<1x1xf32>
    %903 = arith.mulf %899, %902 : vector<1x1xf32>
    %904 = vector.broadcast %903 : vector<1x1xf32> to vector<1x49xf32>
    %905 = arith.mulf %893, %904 : vector<1x49xf32>
    %906 = vector.extract_strided_slice %14 {offsets = [0, 30], sizes = [1, 1], strides = [1, 1]} : vector<1x32xf32> to vector<1x1xf32>
    %907 = vector.broadcast %906 : vector<1x1xf32> to vector<1x49xf32>
    %908 = arith.addf %905, %907 : vector<1x49xf32>
    %cst_203 = arith.constant 0.000000e+00 : f32
    %909 = vector.broadcast %cst_203 : f32 to vector<1x49xf32>
    %910 = arith.maximumf %908, %909 : vector<1x49xf32>
    %911 = vector.extract_strided_slice %15 {offsets = [0, 30], sizes = [16, 1], strides = [1, 1]} : vector<16x32xf32> to vector<16x1xf32>
    %912 = vector.broadcast %911 : vector<16x1xf32> to vector<16x49xf32>
    %913 = vector.broadcast %910 : vector<1x49xf32> to vector<16x49xf32>
    %914 = arith.mulf %912, %913 : vector<16x49xf32>
    %915 = arith.addf %886, %914 : vector<16x49xf32>
    %916 = vector.extract_strided_slice %12 {offsets = [0, 1519], sizes = [1, 49], strides = [1, 1]} : vector<1x1568xf32> to vector<1x49xf32>
    %cst_204 = arith.constant dense<0.000000e+00> : vector<1xf32>
    %917 = vector.multi_reduction <add>, %916, %cst_204 [1] : vector<1x49xf32> to vector<1xf32>
    %918 = vector.shape_cast %917 : vector<1xf32> to vector<1x1xf32>
    %cst_205 = arith.constant 0.0204081628 : f32
    %919 = vector.broadcast %cst_205 : f32 to vector<1x1xf32>
    %920 = arith.mulf %918, %919 : vector<1x1xf32>
    %921 = vector.broadcast %920 : vector<1x1xf32> to vector<1x49xf32>
    %922 = arith.subf %916, %921 : vector<1x49xf32>
    %923 = arith.mulf %922, %922 : vector<1x49xf32>
    %cst_206 = arith.constant dense<0.000000e+00> : vector<1xf32>
    %924 = vector.multi_reduction <add>, %923, %cst_206 [1] : vector<1x49xf32> to vector<1xf32>
    %925 = vector.shape_cast %924 : vector<1xf32> to vector<1x1xf32>
    %cst_207 = arith.constant 0.0204081628 : f32
    %926 = vector.broadcast %cst_207 : f32 to vector<1x1xf32>
    %927 = arith.mulf %925, %926 : vector<1x1xf32>
    %928 = vector.extract_strided_slice %13 {offsets = [0, 31], sizes = [1, 1], strides = [1, 1]} : vector<1x32xf32> to vector<1x1xf32>
    %cst_208 = arith.constant 9.99999974E-6 : f32
    %929 = vector.broadcast %cst_208 : f32 to vector<1x1xf32>
    %930 = arith.addf %927, %929 : vector<1x1xf32>
    %931 = math.rsqrt %930 : vector<1x1xf32>
    %932 = arith.mulf %928, %931 : vector<1x1xf32>
    %933 = vector.broadcast %932 : vector<1x1xf32> to vector<1x49xf32>
    %934 = arith.mulf %922, %933 : vector<1x49xf32>
    %935 = vector.extract_strided_slice %14 {offsets = [0, 31], sizes = [1, 1], strides = [1, 1]} : vector<1x32xf32> to vector<1x1xf32>
    %936 = vector.broadcast %935 : vector<1x1xf32> to vector<1x49xf32>
    %937 = arith.addf %934, %936 : vector<1x49xf32>
    %cst_209 = arith.constant 0.000000e+00 : f32
    %938 = vector.broadcast %cst_209 : f32 to vector<1x49xf32>
    %939 = arith.maximumf %937, %938 : vector<1x49xf32>
    %940 = vector.extract_strided_slice %15 {offsets = [0, 31], sizes = [16, 1], strides = [1, 1]} : vector<16x32xf32> to vector<16x1xf32>
    %941 = vector.broadcast %940 : vector<16x1xf32> to vector<16x49xf32>
    %942 = vector.broadcast %939 : vector<1x49xf32> to vector<16x49xf32>
    %943 = arith.mulf %941, %942 : vector<16x49xf32>
    %944 = arith.addf %915, %943 : vector<16x49xf32>
    %c0_210 = arith.constant 0 : index
    %c0_211 = arith.constant 0 : index
    %945 = vector.load %arg9[%c0_210, %c0_211] : memref<16x1xf32, #tpu.memory_space<vmem>>, vector<16x1xf32>
    %946 = vector.broadcast %945 : vector<16x1xf32> to vector<16x49xf32>
    %947 = arith.addf %944, %946 : vector<16x49xf32>
    %948 = math.tanh %947 : vector<16x49xf32>
    %c0_212 = arith.constant 0 : index
    %c0_213 = arith.constant 0 : index
    %949 = vector.load %arg10[%c0_212, %c0_213] : memref<16x49xf32, #tpu.memory_space<vmem>>, vector<16x49xf32>
    tpu.vector_store %arg10[%c0_212, %c0_213], %948 {strides = array<i32>} : memref<16x49xf32, #tpu.memory_space<vmem>>, vector<16x49xf32>,
    return
  }
  func.func @transform_0(%arg0: i32) -> (i32, i32) {
    %c0_i32 = arith.constant 0 : i32
    %c0_i32_0 = arith.constant 0 : i32
    %c0_i32_1 = arith.constant 0 : i32
    return %c0_i32, %c0_i32_0 : i32, i32
  }
  func.func @transform_1(%arg0: i32) -> (i32, i32) {
    %c0_i32 = arith.constant 0 : i32
    %c0_i32_0 = arith.constant 0 : i32
    %c0_i32_1 = arith.constant 0 : i32
    return %c0_i32, %c0_i32_0 : i32, i32
  }
  func.func @transform_2(%arg0: i32) -> (i32, i32) {
    %c0_i32 = arith.constant 0 : i32
    %c0_i32_0 = arith.constant 0 : i32
    %c0_i32_1 = arith.constant 0 : i32
    return %c0_i32, %c0_i32_0 : i32, i32
  }
  func.func @transform_3(%arg0: i32) -> (i32, i32) {
    %c0_i32 = arith.constant 0 : i32
    %c0_i32_0 = arith.constant 0 : i32
    %c0_i32_1 = arith.constant 0 : i32
    return %c0_i32, %c0_i32_0 : i32, i32
  }
  func.func @transform_4(%arg0: i32) -> (i32, i32) {
    %c0_i32 = arith.constant 0 : i32
    %c0_i32_0 = arith.constant 0 : i32
    %c0_i32_1 = arith.constant 0 : i32
    return %c0_i32, %c0_i32_0 : i32, i32
  }
  func.func @transform_5(%arg0: i32) -> (i32, i32) {
    %c0_i32 = arith.constant 0 : i32
    %c0_i32_0 = arith.constant 0 : i32
    %c0_i32_1 = arith.constant 0 : i32
    return %c0_i32, %c0_i32_0 : i32, i32
  }
  func.func @transform_6(%arg0: i32) -> (i32, i32) {
    %c0_i32 = arith.constant 0 : i32
    %c0_i32_0 = arith.constant 0 : i32
    %c0_i32_1 = arith.constant 0 : i32
    return %c0_i32, %c0_i32_0 : i32, i32
  }
  func.func @transform_7(%arg0: i32) -> (i32, i32) {
    %c0_i32 = arith.constant 0 : i32
    %c0_i32_0 = arith.constant 0 : i32
    %c0_i32_1 = arith.constant 0 : i32
    return %c0_i32, %c0_i32_0 : i32, i32
  }
  func.func @transform_8(%arg0: i32) -> (i32, i32) {
    %c0_i32 = arith.constant 0 : i32
    %c0_i32_0 = arith.constant 0 : i32
    %c0_i32_1 = arith.constant 0 : i32
    return %c0_i32, %c0_i32_0 : i32, i32
  }
  func.func @transform_9(%arg0: i32) -> (i32, i32) {
    %c0_i32 = arith.constant 0 : i32
    %c0_i32_0 = arith.constant 0 : i32
    %c0_i32_1 = arith.constant 0 : i32
    return %c0_i32, %c0_i32_0 : i32, i32
  }
}

</mosaic_0001>

<bundles_post_ra>
// kernel: generator_forward.1
= control target key start
LH: loop header
LB: loop body
LE: loop exit
PB: predicated region body
PF: predicated region fallthrough
CT: control target
= control target key end

     0   :  { %v16264_v3 = vmov 0   ;;  %s16291_s18 = smov 30   ;;  %s11819_s21 = smov 79   ;;  %vm6978_vm0 = vcmask 393216   ;;  %vm7101_vm1 = vcmask 244736   ;;  %vm7321_vm2 = vcmask 89088   ;;  %s16254_s1 = inlined_call_operand.vmem [shape: bf16[128,1024], index: 1, kind: input, shape index: {}]   ;;  %s16255_s3 = inlined_call_operand.vmem [shape: bf16[1024,1568], index: 3, kind: input, shape index: {}]   ;;  %s16256_s0 = inlined_call_operand.vmem [shape: f32[1,128], index: 0, kind: input, shape index: {}]   ;;  %s16257_s2 = inlined_call_operand.vmem [shape: f32[1,1024], index: 2, kind: input, shape index: {}]   ;;  %s16258_s6 = inlined_call_operand.vmem [shape: f32[1,32], index: 6, kind: input, shape index: {}]   ;;  %s16259_s7 = inlined_call_operand.vmem [shape: f32[16,32], index: 7, kind: input, shape index: {}]   ;;  %s16260_s4 = inlined_call_operand.vmem [shape: f32[1,1568], index: 4, kind: input, shape index: {}]   ;;  %s16261_s5 = inlined_call_operand.vmem [shape: f32[1,32], index: 5, kind: input, shape index: {}]   ;;  %s16262_s8 = inlined_call_operand.vmem [shape: f32[16,1], index: 8, kind: input, shape index: {}]   ;;  %s16263_s9 = inlined_call_operand.vmem [shape: f32[16,49], index: 9, kind: output, shape index: {}]  }
   0x1   :  { %v91_v0 = vld [vmem:[%s16254_s1 + $0x1c0] sm:$0xff]  ;;  %v92_v2 = vld [vmem:[%s16254_s1 + $0x1c8] sm:$0xff]  ;;  %493 = vmatprep.mubr.bf16.mxu0 %v16264_v3  ;;  %534 = vmatprep.mubr.bf16.mxu1 %v16264_v3  ;;  %v93_v62 = vld [vmem:[%s16254_s1 + $0x1d0] sm:$0xff]  ;;  %s11821_s12 = smov 11   ;;  %s11822_s26 = smov 109   ;;  %vm7477_vm3 = vcmask 334848  }
   0x2   :  { %v95_v1 = vld [vmem:[%s16254_s1 + $0x1e0] sm:$0xff]  ;;  %v96_v5 = vld [vmem:[%s16254_s1 + $0x1e8] sm:$0xff]  ;;  %10422 = vset.pattern.permute.xlu1 %v16264_v3  ;;  %10423 = vset.pattern.permute.xlu0 %v16264_v3  ;;  %s11823_s19 = smov 90   ;;  %s11824_s29 = smov 41   ;;  %vm7697_vm4 = vcmask 179200   ;;  %vm7917_vm5 = vcmask 23552  }
   0x3   :  { %v9432_v4 = vcombine.high %v91_v0, %v95_v1  ;;  %v9431_v6 = vcombine.low %v91_v0, %v95_v1  ;;  %v83_v7 = vld [vmem:[%s16254_s1 + $0x180] sm:$0xff]  ;;  %v9434_v9 = vcombine.high %v92_v2, %v96_v5  ;;  %v9433_v10 = vcombine.low %v92_v2, %v96_v5  ;;  %v84_v12 = vld [vmem:[%s16254_s1 + $0x188] sm:$0xff]  ;;  %v97_v0 = vld [vmem:[%s16254_s1 + $0x1f0] sm:$0xff]  ;;  %s11826_s17 = smov 71   ;;  %s11827_s10 = smov 22  }
   0x4   :  { %v87_v8 = vld [vmem:[%s16254_s1 + $0x1a0] sm:$0xff]  ;;  %v88_v13 = vld [vmem:[%s16254_s1 + $0x1a8] sm:$0xff]  ;;  %v94_v1 = vld [vmem:[%s16254_s1 + $0x1d8] sm:$0xff]  ;;  %s11828_s11 = smov 101   ;;  %s11829_s24 = smov 52   ;;  %vm8073_vm6 = vcmask 269312  }
   0x5   :  { %v9424_v11 = vcombine.high %v83_v7, %v87_v8  ;;  %v75_v14 = vld [vmem:[%s16254_s1 + $0x140] sm:$0xff]  ;;  %461 = vmatprep.subr.bf16.mxu0 %v9432_v4  ;;  %v9426_v15 = vcombine.high %v84_v12, %v88_v13  ;;  %v76_v17 = vld [vmem:[%s16254_s1 + $0x148] sm:$0xff]  ;;  %502 = vmatprep.subr.bf16.mxu1 %v9434_v9  ;;  %v9423_v19 = vcombine.low %v83_v7, %v87_v8  ;;  %v98_v2 = vld [vmem:[%s16254_s1 + $0x1f8] sm:$0xff]  ;;  %s11830_s16 = smov 3   ;;  %s11831_s28 = smov 82   ;;  %vm8293_vm7 = vcmask 113664  }
   0x6   :  { %v79_v16 = vld [vmem:[%s16254_s1 + $0x160] sm:$0xff]  ;;  %v80_v18 = vld [vmem:[%s16254_s1 + $0x168] sm:$0xff]  ;;  %462 = vmatpush1.bf16.msra.mxu0 %v9431_v6  ;;  %503 = vmatpush1.bf16.msra.mxu1 %v9433_v10  ;;  %v9425_v20 = vcombine.low %v84_v12, %v88_v13  ;;  %v9436_v7 = vcombine.high %v93_v62, %v97_v0  ;;  %v85_v8 = vld [vmem:[%s16254_s1 + $0x190] sm:$0xff]  ;;  %v9438_v9 = vcombine.high %v94_v1, %v98_v2  ;;  %s11832_s25 = smov 33   ;;  %s11835_s30 = smov 63   ;;  %vm8449_vm8 = vcmask 359424  }
   0x7   :  { %463 = vmatprep.subr.bf16.mxu0 %v9424_v11  ;;  %v9416_v21 = vcombine.high %v75_v14, %v79_v16  ;;  %504 = vmatprep.subr.bf16.mxu1 %v9426_v15  ;;  %v9418_v22 = vcombine.high %v76_v17, %v80_v18  ;;  %v67_v23 = vld [vmem:[%s16254_s1 + $0x100] sm:$0xff]  ;;  %v68_v25 = vld [vmem:[%s16254_s1 + $0x108] sm:$0xff]  ;;  %v9415_v27 = vcombine.low %v75_v14, %v79_v16  ;;  %v89_v10 = vld [vmem:[%s16254_s1 + $0x1b0] sm:$0xff]  ;;  %s11837_s13 = smov 14   ;;  %s11847_s14 = smov 25   ;;  %vm8669_vm9 = vcmask 203776  }
   0x8   :  { %v71_v24 = vld [vmem:[%s16254_s1 + $0x120] sm:$0xff]  ;;  %v72_v26 = vld [vmem:[%s16254_s1 + $0x128] sm:$0xff]  ;;  %v9417_v28 = vcombine.low %v76_v17, %v80_v18  ;;  %v86_v11 = vld [vmem:[%s16254_s1 + $0x198] sm:$0xff]  ;;  %v9435_v14 = vcombine.low %v93_v62, %v97_v0  ;;  %v9437_v15 = vcombine.low %v94_v1, %v98_v2  ;;  %v9428_v16 = vcombine.high %v85_v8, %v89_v10  ;;  %s11855_s15 = smov 17   ;;  %s11857_s20 = smov 85  }
   0x9   :  { %v9408_v29 = vcombine.high %v67_v23, %v71_v24  ;;  %v9410_v30 = vcombine.high %v68_v25, %v72_v26  ;;  %v59_v31 = vld [vmem:[%s16254_s1 + $0xc0] sm:$0xff]  ;;  %v60_v33 = vld [vmem:[%s16254_s1 + $0xc8] sm:$0xff]  ;;  %v9407_v35 = vcombine.low %v67_v23, %v71_v24  ;;  %v9409_v36 = vcombine.low %v68_v25, %v72_v26  ;;  %v90_v13 = vld [vmem:[%s16254_s1 + $0x1b8] sm:$0xff]  ;;  %s11858_s22 = smov 115  }
   0xa   :  { %464 = vmatpush1.bf16.msra.mxu0 %v9423_v19  ;;  %505 = vmatpush1.bf16.msra.mxu1 %v9425_v20  ;;  %v63_v32 = vld [vmem:[%s16254_s1 + $0xe0] sm:$0xff]  ;;  %v64_v34 = vld [vmem:[%s16254_s1 + $0xe8] sm:$0xff]  ;;  %v77_v17 = vld [vmem:[%s16254_s1 + $0x150] sm:$0xff]  ;;  %v9430_v18 = vcombine.high %v86_v11, %v90_v13  ;;  %v9429_v23 = vcombine.low %v86_v11, %v90_v13  ;;  %vm8889_vm10 = vcmask 48128   ;;  %vm9045_vm11 = vcmask 293888  }
   0xb   :  { %465 = vmatprep.subr.bf16.mxu0 %v9416_v21  ;;  %506 = vmatprep.subr.bf16.mxu1 %v9418_v22  ;;  %v9400_v37 = vcombine.high %v59_v31, %v63_v32  ;;  %v9402_v38 = vcombine.high %v60_v33, %v64_v34  ;;  %v51_v39 = vld [vmem:[%s16254_s1 + $0x80] sm:$0xff]  ;;  %v52_v41 = vld [vmem:[%s16254_s1 + $0x88] sm:$0xff]  ;;  %v9399_v43 = vcombine.low %v59_v31, %v63_v32  ;;  %v81_v19 = vld [vmem:[%s16254_s1 + $0x170] sm:$0xff]  ;;  %vm9265_vm12 = vcmask 138240  }
   0xc   :  { %v55_v40 = vld [vmem:[%s16254_s1 + $0xa0] sm:$0xff]  ;;  %v56_v42 = vld [vmem:[%s16254_s1 + $0xa8] sm:$0xff]  ;;  %v9401_v44 = vcombine.low %v60_v33, %v64_v34  ;;  %v78_v20 = vld [vmem:[%s16254_s1 + $0x158] sm:$0xff]  ;;  %v9427_v22 = vcombine.low %v85_v8, %v89_v10  ;;  %v9420_v24 = vcombine.high %v77_v17, %v81_v19  ;;  %vm9368_vm13 = vcmask 400384  }
   0xd   :  { %v9392_v45 = vcombine.high %v51_v39, %v55_v40  ;;  %v9394_v46 = vcombine.high %v52_v41, %v56_v42  ;;  %v43_v47 = vld [vmem:[%s16254_s1 + $0x40] sm:$0xff]  ;;  %v44_v49 = vld [vmem:[%s16254_s1 + $0x48] sm:$0xff]  ;;  %v9391_v51 = vcombine.low %v51_v39, %v55_v40  ;;  %v9393_v52 = vcombine.low %v52_v41, %v56_v42  ;;  %v82_v21 = vld [vmem:[%s16254_s1 + $0x178] sm:$0xff] }
   0xe   :  { %466 = vmatpush1.bf16.msra.mxu0 %v9415_v27  ;;  %507 = vmatpush1.bf16.msra.mxu1 %v9417_v28  ;;  %v47_v48 = vld [vmem:[%s16254_s1 + $0x60] sm:$0xff]  ;;  %v48_v50 = vld [vmem:[%s16254_s1 + $0x68] sm:$0xff]  ;;  %v69_v25 = vld [vmem:[%s16254_s1 + $0x110] sm:$0xff]  ;;  %v9422_v26 = vcombine.high %v78_v20, %v82_v21  ;;  %v9421_v31 = vcombine.low %v78_v20, %v82_v21 }
   0xf   :  { %467 = vmatprep.subr.bf16.mxu0 %v9408_v29  ;;  %508 = vmatprep.subr.bf16.mxu1 %v9410_v30  ;;  %v9384_v53 = vcombine.high %v43_v47, %v47_v48  ;;  %v35_v54 = vld [vmem:[%s16254_s1] sm:$0xff]  ;;  %v9386_v55 = vcombine.high %v44_v49, %v48_v50  ;;  %v36_v57 = vld [vmem:[%s16254_s1 + $0x8] sm:$0xff]  ;;  %v9383_v59 = vcombine.low %v43_v47, %v47_v48  ;;  %v73_v27 = vld [vmem:[%s16254_s1 + $0x130] sm:$0xff] }
  0x10   :  { %v39_v56 = vld [vmem:[%s16254_s1 + $0x20] sm:$0xff]  ;;  %v40_v58 = vld [vmem:[%s16254_s1 + $0x28] sm:$0xff]  ;;  %v9385_v60 = vcombine.low %v44_v49, %v48_v50  ;;  %v70_v28 = vld [vmem:[%s16254_s1 + $0x118] sm:$0xff]  ;;  %v9419_v30 = vcombine.low %v77_v17, %v81_v19  ;;  %v9412_v32 = vcombine.high %v69_v25, %v73_v27 }
  0x11   :  { %v9376_v61 = vcombine.high %v35_v54, %v39_v56  ;;  %v9378_v63 = vcombine.high %v36_v57, %v40_v58  ;;  %v9375_v4 = vcombine.low %v35_v54, %v39_v56  ;;  %v33_v5 = vld [vmem:[%s16256_s0] sm:$0x1]  ;;  %v9377_v6 = vcombine.low %v36_v57, %v40_v58  ;;  %v74_v29 = vld [vmem:[%s16254_s1 + $0x138] sm:$0xff]  ;;  %v61_v33 = vld [vmem:[%s16254_s1 + $0xd0] sm:$0xff]  ;;  %s11820_s0 = smov 60  }
  0x12   :  { %468 = vmatpush1.bf16.msra.mxu0 %v9407_v35  ;;  %509 = vmatpush1.bf16.msra.mxu1 %v9409_v36  ;;  %v12039_v12 = vpack.c.bf16 %v33_v5, %v33_v5  ;;  %v9414_v34 = vcombine.high %v70_v28, %v74_v29  ;;  %v65_v35 = vld [vmem:[%s16254_s1 + $0xf0] sm:$0xff]  ;;  %v62_v36 = vld [vmem:[%s16254_s1 + $0xd8] sm:$0xff]  ;;  %v9413_v39 = vcombine.low %v70_v28, %v74_v29  ;;  %v10538_v29 = vld [vmem:[%s16255_s3 + $0x6c] ss:$52 sps:$4 sm:$0xff]  }
  0x13   :  { %469 = vmatprep.subr.bf16.mxu0 %v9400_v37  ;;  %510 = vmatprep.subr.bf16.mxu1 %v9402_v38  ;;  %v66_v37 = vld [vmem:[%s16254_s1 + $0xf8] sm:$0xff]  ;;  %v9411_v38 = vcombine.low %v69_v25, %v73_v27  ;;  %v9404_v40 = vcombine.high %v61_v33, %v65_v35  ;;  %v53_v41 = vld [vmem:[%s16254_s1 + $0x90] sm:$0xff] }
  0x14   :  { %v9406_v42 = vcombine.high %v62_v36, %v66_v37  ;;  %v9405_v47 = vcombine.low %v62_v36, %v66_v37  ;;  %v45_v49 = vld [vmem:[%s16254_s1 + $0x50] sm:$0xff]  ;;  %v10503_v8 = vld [vmem:[%s16255_s3 + $0x958] ss:$52 sps:$4 sm:$0xff]   ;;  %v10515_v17 = vld [vmem:[%s16255_s3 + $0x888] ss:$52 sps:$4 sm:$0xff]  }
  0x15   :  { %v37_v57 = vld [vmem:[%s16254_s1 + $0x10] sm:$0xff] }
  0x16   :  { %470 = vmatpush1.bf16.msra.mxu0 %v9399_v43  ;;  %511 = vmatpush1.bf16.msra.mxu1 %v9401_v44  ;;  %v57_v43 = vld [vmem:[%s16254_s1 + $0xb0] sm:$0xff]  ;;  %v54_v44 = vld [vmem:[%s16254_s1 + $0x98] sm:$0xff] }
  0x17   :  { %471 = vmatprep.subr.bf16.mxu0 %v9392_v45  ;;  %512 = vmatprep.subr.bf16.mxu1 %v9394_v46  ;;  %v58_v45 = vld [vmem:[%s16254_s1 + $0xb8] sm:$0xff]  ;;  %v9403_v46 = vcombine.low %v61_v33, %v65_v35  ;;  %v9396_v48 = vcombine.high %v53_v41, %v57_v43  ;;  %v9395_v54 = vcombine.low %v53_v41, %v57_v43  ;;  %v10511_v10 = vld [vmem:[%s16255_s3 + $0x8f4] ss:$52 sps:$4 sm:$0xff]   ;;  %v10506_v11 = vld [vmem:[%s16255_s3 + $0x270] ss:$52 sps:$4 sm:$0xff]  }
  0x18   :  { %v9398_v50 = vcombine.high %v54_v44, %v58_v45  ;;  %v10502_v2 = vld [vmem:[%s16255_s3 + $0x2dc] ss:$52 sps:$4 sm:$0xff]   ;;  %v10518_v19 = vld [vmem:[%s16255_s3 + $0x1a0] ss:$52 sps:$4 sm:$0xff]   ;;  %v10544_v33 = vld [vmem:[%s16255_s3 + $0x4] ss:$52 sps:$4 sm:$0xff]  }
  0x19   :  { %v10505_v5 = vld [vmem:[%s16255_s3 + $0x95c] ss:$52 sps:$4 sm:$0xff]   ;;  %v10521_v20 = vld [vmem:[%s16255_s3 + $0x820] ss:$52 sps:$4 sm:$0xff]  }
  0x1a   :  { %472 = vmatpush1.bf16.msra.mxu0 %v9391_v51  ;;  %513 = vmatpush1.bf16.msra.mxu1 %v9393_v52  ;;  %v49_v51 = vld [vmem:[%s16254_s1 + $0x70] sm:$0xff]  ;;  %v46_v52 = vld [vmem:[%s16254_s1 + $0x58] sm:$0xff] }
  0x1b   :  { %473 = vmatprep.subr.bf16.mxu0 %v9384_v53  ;;  %514 = vmatprep.subr.bf16.mxu1 %v9386_v55  ;;  %v50_v53 = vld [vmem:[%s16254_s1 + $0x78] sm:$0xff]  ;;  %v9397_v55 = vcombine.low %v54_v44, %v58_v45  ;;  %v9388_v56 = vcombine.high %v45_v49, %v49_v51  ;;  %v9387_v62 = vcombine.low %v45_v49, %v49_v51  ;;  %v10509_v13 = vld [vmem:[%s16255_s3 + $0x8f0] ss:$52 sps:$4 sm:$0xff]   ;;  %v10532_v25 = vld [vmem:[%s16255_s3 + $0xd4] ss:$52 sps:$4 sm:$0xff]  }
  0x1c   :  { %v9390_v58 = vcombine.high %v46_v52, %v50_v53  ;;  %v10526_v21 = vld [vmem:[%s16255_s3 + $0x13c] ss:$52 sps:$4 sm:$0xff]   ;;  %v10542_v35 = vld [vmem:[%s16255_s3] ss:$52 sps:$4 sm:$0xff]   ;;  %v10568_v49 = vld [vmem:[%s16255_s3 + $0x4e4] ss:$52 sps:$4 sm:$0xff]  }
  0x1d   :  { %v10530_v27 = vld [vmem:[%s16255_s3 + $0xd0] ss:$52 sps:$4 sm:$0xff]   ;;  %v10545_v36 = vld [vmem:[%s16255_s3 + $0x680] ss:$52 sps:$4 sm:$0xff]  }
  0x1e   :  { %474 = vmatpush1.bf16.msra.mxu0 %v9383_v59  ;;  %515 = vmatpush1.bf16.msra.mxu1 %v9385_v60  ;;  %v41_v59 = vld [vmem:[%s16254_s1 + $0x30] sm:$0xff]  ;;  %v38_v60 = vld [vmem:[%s16254_s1 + $0x18] sm:$0xff]  ;;  %v10562_v45 = vld [vmem:[%s16255_s3 + $0x54c] ss:$52 sps:$4 sm:$0xff]  }
  0x1f   :  { %475 = vmatprep.subr.bf16.mxu0 %v9376_v61  ;;  %516 = vmatprep.subr.bf16.mxu1 %v9378_v63  ;;  %v42_v61 = vld [vmem:[%s16254_s1 + $0x38] sm:$0xff]  ;;  %v9389_v63 = vcombine.low %v46_v52, %v50_v53  ;;  %v9380_v0 = vcombine.high %v37_v57, %v41_v59  ;;  %v10533_v28 = vld [vmem:[%s16255_s3 + $0x750] ss:$52 sps:$4 sm:$0xff]   ;;  %v10556_v41 = vld [vmem:[%s16255_s3 + $0x5b4] ss:$52 sps:$4 sm:$0xff]   ;;  %s11839_s1 = smov 93  }
  0x20   :  { %v9382_v1 = vcombine.high %v38_v60, %v42_v61  ;;  %v10550_v37 = vld [vmem:[%s16255_s3 + $0x61c] ss:$52 sps:$4 sm:$0xff]   ;;  %v10566_v51 = vld [vmem:[%s16255_s3 + $0x4e0] ss:$52 sps:$4 sm:$0xff]  }
  0x21   :  { %v10554_v43 = vld [vmem:[%s16255_s3 + $0x5b0] ss:$52 sps:$4 sm:$0xff]   ;;  %v10569_v52 = vld [vmem:[%s16255_s3 + $0xb60] ss:$52 sps:$4 sm:$0xff]  }
  0x22   :  { %476 = vmatpush1.bf16.msra.mxu0 %v9375_v4  ;;  %517 = vmatpush1.bf16.msra.mxu1 %v9377_v6  ;;  %v9379_v4 = vcombine.low %v37_v57, %v41_v59  ;;  %v9381_v6 = vcombine.low %v38_v60, %v42_v61  ;;  %v10557_v44 = vld [vmem:[%s16255_s3 + $0xc30] ss:$52 sps:$4 sm:$0xff]   ;;  %v10580_v57 = vld [vmem:[%s16255_s3 + $0x414] ss:$52 sps:$4 sm:$0xff]   ;;  %v10586_v61 = vld [vmem:[%s16255_s3 + $0x3ac] ss:$52 sps:$4 sm:$0xff]  }
  0x23   :  { %543 = vmatprep.subr.bf16.mxu0 %v9436_v7  ;;  %584 = vmatprep.subr.bf16.mxu1 %v9438_v9  ;;  %v10500_v7 = vld [vmem:[%s16255_s3 + $0x2d8] ss:$52 sps:$4 sm:$0xff]   ;;  %v10508_v9 = vld [vmem:[%s16255_s3 + $0x274] ss:$52 sps:$4 sm:$0xff]   ;;  %v10574_v53 = vld [vmem:[%s16255_s3 + $0x47c] ss:$52 sps:$4 sm:$0xff]  }
  0x24   :  { %v10578_v59 = vld [vmem:[%s16255_s3 + $0x410] ss:$52 sps:$4 sm:$0xff]  }
  0x25   :  { %494 = vmatmul.mubr.bf16.vlgmr.msra.gmra.mxu0 %v12039_v12  ;;  %535 = vmatmul.mubr.bf16.vlgmr.msra.gmra.mxu1 %v12039_v12  ;;  %v10581_v60 = vld [vmem:[%s16255_s3 + $0xa90] ss:$52 sps:$4 sm:$0xff]  }
  0x26   :  { %544 = vmatpush1.bf16.msra.mxu0 %v9435_v14  ;;  %585 = vmatpush1.bf16.msra.mxu1 %v9437_v15  ;;  %v10514_v14 = vld [vmem:[%s16255_s3 + $0x20c] ss:$52 sps:$4 sm:$0xff]  }
  0x27   :  { %545 = vmatprep.subr.bf16.mxu0 %v9428_v16  ;;  %586 = vmatprep.subr.bf16.mxu1 %v9430_v18  ;;  %v10517_v15 = vld [vmem:[%s16255_s3 + $0x88c] ss:$52 sps:$4 sm:$0xff]   ;;  %v10512_v16 = vld [vmem:[%s16255_s3 + $0x208] ss:$52 sps:$4 sm:$0xff]   ;;  %v10523_v18 = vld [vmem:[%s16255_s3 + $0x824] ss:$52 sps:$4 sm:$0xff]  }
  0x28   :  { %575 = vmatprep.mubr.bf16.mxu0 %v16264_v3  ;;  %616 = vmatprep.mubr.bf16.mxu1 %v16264_v3 }
  0x2a   :  { %546 = vmatpush1.bf16.msra.mxu0 %v9427_v22  ;;  %587 = vmatpush1.bf16.msra.mxu1 %v9429_v23  ;;  %v10529_v22 = vld [vmem:[%s16255_s3 + $0x7bc] ss:$52 sps:$4 sm:$0xff]   ;;  %v10524_v23 = vld [vmem:[%s16255_s3 + $0x138] ss:$52 sps:$4 sm:$0xff]  }
  0x2b   :  { %547 = vmatprep.subr.bf16.mxu0 %v9420_v24  ;;  %588 = vmatprep.subr.bf16.mxu1 %v9422_v26  ;;  %v10527_v24 = vld [vmem:[%s16255_s3 + $0x7b8] ss:$52 sps:$4 sm:$0xff]   ;;  %v10535_v26 = vld [vmem:[%s16255_s3 + $0x754] ss:$52 sps:$4 sm:$0xff]  }
  0x2e   :  { %548 = vmatpush1.bf16.msra.mxu0 %v9419_v30  ;;  %589 = vmatpush1.bf16.msra.mxu1 %v9421_v31  ;;  %v10541_v30 = vld [vmem:[%s16255_s3 + $0x6ec] ss:$52 sps:$4 sm:$0xff]   ;;  %v10536_v31 = vld [vmem:[%s16255_s3 + $0x68] ss:$52 sps:$4 sm:$0xff]  }
  0x2f   :  { %549 = vmatprep.subr.bf16.mxu0 %v9412_v32  ;;  %590 = vmatprep.subr.bf16.mxu1 %v9414_v34  ;;  %v10539_v32 = vld [vmem:[%s16255_s3 + $0x6e8] ss:$52 sps:$4 sm:$0xff]   ;;  %v10547_v34 = vld [vmem:[%s16255_s3 + $0x684] ss:$52 sps:$4 sm:$0xff]  }
  0x32   :  { %550 = vmatpush1.bf16.msra.mxu0 %v9411_v38  ;;  %591 = vmatpush1.bf16.msra.mxu1 %v9413_v39  ;;  %v10553_v38 = vld [vmem:[%s16255_s3 + $0xc9c] ss:$52 sps:$4 sm:$0xff]   ;;  %v10548_v39 = vld [vmem:[%s16255_s3 + $0x618] ss:$52 sps:$4 sm:$0xff]  }
  0x33   :  { %551 = vmatprep.subr.bf16.mxu0 %v9404_v40  ;;  %592 = vmatprep.subr.bf16.mxu1 %v9406_v42  ;;  %v10551_v40 = vld [vmem:[%s16255_s3 + $0xc98] ss:$52 sps:$4 sm:$0xff]   ;;  %v10559_v42 = vld [vmem:[%s16255_s3 + $0xc34] ss:$52 sps:$4 sm:$0xff]  }
  0x36   :  { %552 = vmatpush1.bf16.msra.mxu0 %v9403_v46  ;;  %593 = vmatpush1.bf16.msra.mxu1 %v9405_v47  ;;  %v10565_v46 = vld [vmem:[%s16255_s3 + $0xbcc] ss:$52 sps:$4 sm:$0xff]   ;;  %v10560_v47 = vld [vmem:[%s16255_s3 + $0x548] ss:$52 sps:$4 sm:$0xff]  }
  0x37   :  { %553 = vmatprep.subr.bf16.mxu0 %v9396_v48  ;;  %594 = vmatprep.subr.bf16.mxu1 %v9398_v50  ;;  %v10563_v48 = vld [vmem:[%s16255_s3 + $0xbc8] ss:$52 sps:$4 sm:$0xff]   ;;  %v10571_v50 = vld [vmem:[%s16255_s3 + $0xb64] ss:$52 sps:$4 sm:$0xff]  }
  0x3a   :  { %554 = vmatpush1.bf16.msra.mxu0 %v9395_v54  ;;  %595 = vmatpush1.bf16.msra.mxu1 %v9397_v55  ;;  %v10577_v54 = vld [vmem:[%s16255_s3 + $0xafc] ss:$52 sps:$4 sm:$0xff]   ;;  %v10572_v55 = vld [vmem:[%s16255_s3 + $0x478] ss:$52 sps:$4 sm:$0xff]  }
  0x3b   :  { %555 = vmatprep.subr.bf16.mxu0 %v9388_v56  ;;  %596 = vmatprep.subr.bf16.mxu1 %v9390_v58  ;;  %v10575_v56 = vld [vmem:[%s16255_s3 + $0xaf8] ss:$52 sps:$4 sm:$0xff]   ;;  %v10583_v58 = vld [vmem:[%s16255_s3 + $0xa94] ss:$52 sps:$4 sm:$0xff]  }
  0x3e   :  { %556 = vmatpush1.bf16.msra.mxu0 %v9387_v62  ;;  %597 = vmatpush1.bf16.msra.mxu1 %v9389_v63  ;;  %v10589_v62 = vld [vmem:[%s16255_s3 + $0xa2c] ss:$52 sps:$4 sm:$0xff]   ;;  %v10584_v63 = vld [vmem:[%s16255_s3 + $0x3a8] ss:$52 sps:$4 sm:$0xff]  }
  0x3f   :  { %557 = vmatprep.subr.bf16.mxu0 %v9380_v0  ;;  %598 = vmatprep.subr.bf16.mxu1 %v9382_v1  ;;  %v10587_v0 = vld [vmem:[%s16255_s3 + $0xa28] ss:$52 sps:$4 sm:$0xff]   ;;  %v10592_v1 = vld [vmem:[%s16255_s3 + $0x344] ss:$52 sps:$4 sm:$0xff]  }
  0x42   :  { %558 = vmatpush1.bf16.msra.mxu0 %v9379_v4  ;;  %599 = vmatpush1.bf16.msra.mxu1 %v9381_v6  ;;  %v10590_v4 = vld [vmem:[%s16255_s3 + $0x340] ss:$52 sps:$4 sm:$0xff]   ;;  %v10598_v6 = vld [vmem:[%s16255_s3 + $0xfdc] ss:$52 sps:$4 sm:$0xff]  }
  0x43   :  { %5830 = vmatprep.subr.bf16.mxu0 %v10502_v2  ;;  %5871 = vmatprep.subr.bf16.mxu1 %v10505_v5  ;;  %v10595_v2 = vld [vmem:[%s16255_s3 + $0x9c4] ss:$52 sps:$4 sm:$0xff]   ;;  %v10593_v5 = vld [vmem:[%s16255_s3 + $0x9c0] ss:$52 sps:$4 sm:$0xff]  }
  0x45   :  { %576 = vmatmul.mubr.bf16.vlgmr.msra.gmra.mxu0 %v12039_v12  ;;  %617 = vmatmul.mubr.bf16.vlgmr.msra.gmra.mxu1 %v12039_v12  ;;  %v10520_v12 = vld [vmem:[%s16255_s3 + $0x1a4] ss:$52 sps:$4 sm:$0xff]  }
  0x46   :  { %5831 = vmatpush1.bf16.msra.mxu0 %v10500_v7  ;;  %5872 = vmatpush1.bf16.msra.mxu1 %v10503_v8  ;;  %v10601_v7 = vld [vmem:[%s16255_s3 + $0x165c] ss:$52 sps:$4 sm:$0xff]   ;;  %v421_v8 = vlaneseq }
  0x47   :  { %5832 = vmatprep.subr.bf16.mxu0 %v10508_v9  ;;  %5873 = vmatprep.subr.bf16.mxu1 %v10511_v10  ;;  %v12325_v10 = vld [vmem:[%s16257_s2] sm:$0xff]  ;;  %s11825_s2 = smov 120  }
  0x48   :  { %v12320_v9 = vshrl.u32 %v421_v8, 7  ;;  %v10637_v8 = vld [vmem:[%s16255_s3 + $0x13ec] ss:$52 sps:$4 sm:$0xff]  }
  0x4a   :  { %5833 = vmatpush1.bf16.msra.mxu0 %v10506_v11  ;;  %5874 = vmatpush1.bf16.msra.mxu1 %v10509_v13  ;;  %v12328_v11 = vsub.s32 0, %v12320_v9  ;;  %v12331_v13 = vsub.s32 2, %v12320_v9 }
  0x4b   :  { %5834 = vmatprep.subr.bf16.mxu0 %v10514_v14  ;;  %5875 = vmatprep.subr.bf16.mxu1 %v10517_v15  ;;  %v12334_v14 = vsub.s32 1, %v12320_v9  ;;  %v12337_v15 = vsub.s32 3, %v12320_v9 }
  0x4e   :  { %5835 = vmatpush1.bf16.msra.mxu0 %v10512_v16  ;;  %5876 = vmatpush1.bf16.msra.mxu1 %v10515_v17  ;;  %v424_v16 = vrot.slane %v12325_v10, %v12328_v11  ;;  %v12344_v17 = vld [vmem:[%s16258_s6] sm:$0x1] }
  0x4f   :  { %5836 = vmatprep.subr.bf16.mxu0 %v10520_v12  ;;  %5877 = vmatprep.subr.bf16.mxu1 %v10523_v18  ;;  %v432_v12 = vrot.slane %v12325_v10, %v12331_v13  ;;  %v428_v18 = vrot.slane %v12325_v10, %v12334_v14 }
  0x50   :  { %7004 = vperm.xlu1 %10422, %v12344_v17  }
  0x52   :  { %5837 = vmatpush1.bf16.msra.mxu0 %v10518_v19  ;;  %5878 = vmatpush1.bf16.msra.mxu1 %v10521_v20  ;;  %v436_v20 = vrot.slane %v12325_v10, %v12337_v15 }
  0x53   :  { %5838 = vmatprep.subr.bf16.mxu0 %v10526_v21  ;;  %5879 = vmatprep.subr.bf16.mxu1 %v10529_v22 }
  0x56   :  { %5839 = vmatpush1.bf16.msra.mxu0 %v10524_v23  ;;  %5880 = vmatpush1.bf16.msra.mxu1 %v10527_v24  ;;  %v12356_v23 = vld [vmem:[%s16259_s7 + $0x8] sm:$0xff] }
  0x57   :  { %5840 = vmatprep.subr.bf16.mxu0 %v10532_v25  ;;  %5881 = vmatprep.subr.bf16.mxu1 %v10535_v26 }
  0x58   :  { %7020 = vperm.xlu1 %10422, %v12356_v23  }
  0x5a   :  { %5841 = vmatpush1.bf16.msra.mxu0 %v10530_v27  ;;  %5882 = vmatpush1.bf16.msra.mxu1 %v10533_v28 }
  0x5b   :  { %5842 = vmatprep.subr.bf16.mxu0 %v10538_v29  ;;  %5883 = vmatprep.subr.bf16.mxu1 %v10541_v30 }
  0x5e   :  { %5843 = vmatpush1.bf16.msra.mxu0 %v10536_v31  ;;  %5884 = vmatpush1.bf16.msra.mxu1 %v10539_v32 }
  0x5f   :  { %5844 = vmatprep.subr.bf16.mxu0 %v10544_v33  ;;  %5885 = vmatprep.subr.bf16.mxu1 %v10547_v34  ;;  %v10596_v34 = vld [vmem:[%s16255_s3 + $0xfd8] ss:$52 sps:$4 sm:$0xff]  }
  0x62   :  { %5845 = vmatpush1.bf16.msra.mxu0 %v10542_v35  ;;  %5886 = vmatpush1.bf16.msra.mxu1 %v10545_v36 }
  0x63   :  { %5846 = vmatprep.subr.bf16.mxu0 %v10550_v37  ;;  %5887 = vmatprep.subr.bf16.mxu1 %v10553_v38  ;;  %v10599_v37 = vld [vmem:[%s16255_s3 + $0x1658] ss:$52 sps:$4 sm:$0xff]   ;;  %v10604_v38 = vld [vmem:[%s16255_s3 + $0xf74] ss:$52 sps:$4 sm:$0xff]  }
  0x66   :  { %5847 = vmatpush2.bf16.msra.mxu0 %v10548_v39  ;;  %5888 = vmatpush2.bf16.msra.mxu1 %v10551_v40  ;;  %v11803_v39 = vmov 1  }
  0x67   :  { %5848 = vmatprep.subr.bf16.mxu0 %v10556_v41  ;;  %5889 = vmatprep.subr.bf16.mxu1 %v10559_v42 }
  0x68   :  { %10424 = vset.pattern.permute.xlu1 %v11803_v39 }
  0x69   :  { %7063 = vperm.xlu1 %10424, %v12344_v17  }
  0x6a   :  { %5849 = vmatpush2.bf16.msra.mxu0 %v10554_v43  ;;  %5890 = vmatpush2.bf16.msra.mxu1 %v10557_v44  ;;  %v10607_v43 = vld [vmem:[%s16255_s3 + $0x15f4] ss:$52 sps:$4 sm:$0xff]  }
  0x6b   :  { %5850 = vmatprep.subr.bf16.mxu0 %v10562_v45  ;;  %5891 = vmatprep.subr.bf16.mxu1 %v10565_v46  ;;  %v10602_v46 = vld [vmem:[%s16255_s3 + $0xf70] ss:$52 sps:$4 sm:$0xff]  }
  0x6e   :  { %5851 = vmatpush2.bf16.msra.mxu0 %v10560_v47  ;;  %5892 = vmatpush2.bf16.msra.mxu1 %v10563_v48  ;;  %v10605_v47 = vld [vmem:[%s16255_s3 + $0x15f0] ss:$52 sps:$4 sm:$0xff]   ;;  %v10610_v48 = vld [vmem:[%s16255_s3 + $0xf0c] ss:$52 sps:$4 sm:$0xff]  }
  0x6f   :  { %5852 = vmatprep.subr.bf16.mxu0 %v10568_v49  ;;  %5893 = vmatprep.subr.bf16.mxu1 %v10571_v50  ;;  %v10613_v49 = vld [vmem:[%s16255_s3 + $0x158c] ss:$52 sps:$4 sm:$0xff]   ;;  %v16277_v50 = vmov 2  }
  0x70   :  { %10425 = vset.pattern.permute.xlu1 %v16277_v50 }
  0x71   :  { %7139 = vperm.xlu1 %10425, %v12344_v17  }
  0x72   :  { %5853 = vmatpush2.bf16.msra.mxu0 %v10566_v51  ;;  %5894 = vmatpush2.bf16.msra.mxu1 %v10569_v52  ;;  %v12401_v51 = vld [vmem:[%s16259_s7] sm:$0xff]  ;;  %v10608_v52 = vld [vmem:[%s16255_s3 + $0xf08] ss:$52 sps:$4 sm:$0xff]  }
  0x73   :  { %5854 = vmatprep.subr.bf16.mxu0 %v10574_v53  ;;  %5895 = vmatprep.subr.bf16.mxu1 %v10577_v54  ;;  %v10611_v53 = vld [vmem:[%s16255_s3 + $0x1588] ss:$52 sps:$4 sm:$0xff]   ;;  %v10616_v54 = vld [vmem:[%s16255_s3 + $0xea4] ss:$52 sps:$4 sm:$0xff]  }
  0x74   :  { %7015 = vperm.xlu0 %10423, %v12401_v51  }
  0x75   :  { %7151 = vperm.xlu1 %10425, %v12401_v51  }
  0x76   :  { %5855 = vmatpush2.bf16.msra.mxu0 %v10572_v55  ;;  %5896 = vmatpush2.bf16.msra.mxu1 %v10575_v56  ;;  %v10614_v55 = vld [vmem:[%s16255_s3 + $0xea0] ss:$52 sps:$4 sm:$0xff]   ;;  %v10619_v56 = vld [vmem:[%s16255_s3 + $0x1524] ss:$52 sps:$4 sm:$0xff]  }
  0x77   :  { %5856 = vmatprep.subr.bf16.mxu0 %v10580_v57  ;;  %5897 = vmatprep.subr.bf16.mxu1 %v10583_v58  ;;  %v10617_v57 = vld [vmem:[%s16255_s3 + $0x1520] ss:$52 sps:$4 sm:$0xff]   ;;  %v10622_v58 = vld [vmem:[%s16255_s3 + $0xe3c] ss:$52 sps:$4 sm:$0xff]  }
  0x79   :  { %7155 = vperm.xlu1 %10425, %v12356_v23  }
  0x7a   :  { %5857 = vmatpush2.bf16.msra.mxu0 %v10578_v59  ;;  %5898 = vmatpush2.bf16.msra.mxu1 %v10581_v60  ;;  %v10620_v59 = vld [vmem:[%s16255_s3 + $0xe38] ss:$52 sps:$4 sm:$0xff]   ;;  %v10625_v60 = vld [vmem:[%s16255_s3 + $0x14bc] ss:$52 sps:$4 sm:$0xff]  }
  0x7b   :  { %5858 = vmatprep.subr.bf16.mxu0 %v10586_v61  ;;  %5899 = vmatprep.subr.bf16.mxu1 %v10589_v62  ;;  %v10623_v61 = vld [vmem:[%s16255_s3 + $0x14b8] ss:$52 sps:$4 sm:$0xff]   ;;  %v10628_v62 = vld [vmem:[%s16255_s3 + $0xdd4] ss:$52 sps:$4 sm:$0xff]  }
  0x7e   :  { %5859 = vmatpush2.bf16.msra.mxu0 %v10584_v63  ;;  %5900 = vmatpush2.bf16.msra.mxu1 %v10587_v0  ;;  %v10626_v63 = vld [vmem:[%s16255_s3 + $0xdd0] ss:$52 sps:$4 sm:$0xff]   ;;  %v10631_v0 = vld [vmem:[%s16255_s3 + $0x1454] ss:$52 sps:$4 sm:$0xff]  }
  0x7f   :  { %5860 = vmatprep.subr.bf16.mxu0 %v10592_v1  ;;  %5901 = vmatprep.subr.bf16.mxu1 %v10595_v2  ;;  %v16278_v1 = vmov 3   ;;  %v16282_v2 = vsub.s32 5, %v12320_v9 }
  0x80   :  { %10426 = vset.pattern.permute.xlu1 %v16278_v1 }
  0x81   :  { %7219 = vperm.xlu1 %10426, %v12344_v17  }
  0x82   :  { %5861 = vmatpush2.bf16.msra.mxu0 %v10590_v4  ;;  %5902 = vmatpush2.bf16.msra.mxu1 %v10593_v5  ;;  %v10629_v4 = vld [vmem:[%s16255_s3 + $0x1450] ss:$52 sps:$4 sm:$0xff]   ;;  %v10634_v5 = vld [vmem:[%s16255_s3 + $0xd6c] ss:$52 sps:$4 sm:$0xff]  }
  0x83   :  { %5912 = vmatprep.subr.bf16.mxu0 %v10598_v6  ;;  %5953 = vmatprep.subr.bf16.mxu1 %v10601_v7  ;;  %v16280_v6 = vsub.s32 7, %v12320_v9  ;;  %v10632_v7 = vld [vmem:[%s16255_s3 + $0xd68] ss:$52 sps:$4 sm:$0xff]  }
  0x85   :  { %7229 = vperm.xlu1 %10426, %v12401_v51  }
  0x89   :  { %7233 = vperm.xlu1 %10426, %v12356_v23  }
  0xe5   :  { %v495_v19 = vpop.f32.mrf.mxu0  ;;  %v536_v22 = vpop.f32.mrf.mxu1 }
  0xe6   :  { %v496_v21 = vadd.f32 %v495_v19, %v424_v16  ;;  %v537_v24 = vadd.f32 %v536_v22, %v432_v12  ;;  %v444_v16 = vrot.slane %v12325_v10, %v16282_v2  ;;  %v10635_v12 = vld [vmem:[%s16255_s3 + $0x13e8] ss:$52 sps:$4 sm:$0xff]   ;;  %v10643_v22 = vld [vmem:[%s16255_s3 + $0x1384] ss:$52 sps:$4 sm:$0xff]  }
  0xe7   :  { %v497_v25 = vpop.f32.mrf.mxu0  ;;  %v538_v27 = vpop.f32.mrf.mxu1 }
  0xe8   :  { %v498_v26 = vadd.f32 %v497_v25, %v428_v18  ;;  %v625_v28 = vmax.f32 %v496_v21, 0.0  ;;  %v627_v29 = vmax.f32 %v537_v24, 0.0  ;;  %v539_v30 = vadd.f32 %v538_v27, %v436_v20  ;;  %v10640_v18 = vld [vmem:[%s16255_s3 + $0xd04] ss:$52 sps:$4 sm:$0xff]   ;;  %v10638_v21 = vld [vmem:[%s16255_s3 + $0xd00] ss:$52 sps:$4 sm:$0xff]  }
  0xe9   :  { %v499_v31 = vpop.f32.mrf.mxu0  ;;  %v540_v33 = vpop.f32.mrf.mxu1  ;;  %v452_v20 = vrot.slane %v12325_v10, %v16280_v6 }
  0xea   :  { %v626_v32 = vmax.f32 %v498_v26, 0.0  ;;  %v628_v35 = vmax.f32 %v539_v30, 0.0  ;;  %v12369_v40 = vpack.c.bf16 %v627_v29, %v627_v29  ;;  %v12377_v44 = vpack.c.bf16 %v625_v28, %v625_v28  ;;  %v10641_v29 = vld [vmem:[%s16255_s3 + $0x1380] ss:$52 sps:$4 sm:$0xff]   ;;  %v10646_v30 = vld [vmem:[%s16255_s3 + $0x131c] ss:$52 sps:$4 sm:$0xff]  }
  0xeb   :  { %v500_v36 = vpop.f32.mrf.mxu0  ;;  %v541_v42 = vpop.f32.mrf.mxu1  ;;  %v16279_v26 = vmov 4   ;;  %v10644_v33 = vld [vmem:[%s16255_s3 + $0x1318] ss:$52 sps:$4 sm:$0xff]  }
  0xec   :  { %v12371_v41 = vpack.c.bf16 %v626_v32, %v626_v32  ;;  %v12379_v45 = vpack.c.bf16 %v628_v35, %v628_v35  ;;  %10427 = vset.pattern.permute.xlu0 %v16279_v26  ;;  %10428 = vset.pattern.permute.xlu1 %v16279_v26  ;;  %v11141_v26 = vld [vmem:[%s16255_s3 + $0xbe4] ss:$52 sps:$4 sm:$0xff]  }
  0xed   :  { %7283 = vperm.xlu0 %10427, %v12344_v17   ;;  %7293 = vperm.xlu1 %10428, %v12401_v51  }
  0xee   :  { %5862 = vmatprep.mubr.bf16.mxu0 %v12371_v41  ;;  %5903 = vmatprep.mubr.bf16.mxu1 %v12379_v45 }
  0xef   :  { %5863 = vmatmul.mubr.bf16.vlgmr.msra.gmra.mxu0 %v12377_v44  ;;  %5904 = vmatmul.mubr.bf16.vlgmr.msra.gmra.mxu1 %v12369_v40 }
  0xf0   :  { %5913 = vmatpush1.bf16.msra.mxu0 %v10596_v34  ;;  %5954 = vmatpush1.bf16.msra.mxu1 %v10599_v37  ;;  %v10649_v34 = vld [vmem:[%s16255_s3 + $0x199c] ss:$52 sps:$4 sm:$0xff]  }
  0xf1   :  { %5914 = vmatprep.subr.bf16.mxu0 %v10604_v38  ;;  %5955 = vmatprep.subr.bf16.mxu1 %v10607_v43 }
  0xf2   :  { %7297 = vperm.xlu1 %10428, %v12356_v23  }
  0xf4   :  { %5915 = vmatpush1.bf16.msra.mxu0 %v10602_v46  ;;  %5956 = vmatpush1.bf16.msra.mxu1 %v10605_v47  ;;  %v10647_v46 = vld [vmem:[%s16255_s3 + $0x1998] ss:$52 sps:$4 sm:$0xff]   ;;  %v10652_v47 = vld [vmem:[%s16255_s3 + $0x12b4] ss:$52 sps:$4 sm:$0xff]  }
  0xf5   :  { %5916 = vmatprep.subr.bf16.mxu0 %v10610_v48  ;;  %5957 = vmatprep.subr.bf16.mxu1 %v10613_v49  ;;  %v10650_v49 = vld [vmem:[%s16255_s3 + $0x12b0] ss:$52 sps:$4 sm:$0xff]  }
  0xf8   :  { %5917 = vmatpush1.bf16.msra.mxu0 %v10608_v52  ;;  %5958 = vmatpush1.bf16.msra.mxu1 %v10611_v53  ;;  %v10655_v52 = vld [vmem:[%s16255_s3 + $0x1934] ss:$52 sps:$4 sm:$0xff]   ;;  %v10653_v53 = vld [vmem:[%s16255_s3 + $0x1930] ss:$52 sps:$4 sm:$0xff]  }
  0xf9   :  { %5918 = vmatprep.subr.bf16.mxu0 %v10616_v54  ;;  %5959 = vmatprep.subr.bf16.mxu1 %v10619_v56  ;;  %v10658_v54 = vld [vmem:[%s16255_s3 + $0x124c] ss:$52 sps:$4 sm:$0xff]  }
  0xfa   :  { %v10661_v56 = vld [vmem:[%s16255_s3 + $0x18cc] ss:$52 sps:$4 sm:$0xff]  }
  0xfc   :  { %5919 = vmatpush1.bf16.msra.mxu0 %v10614_v55  ;;  %5960 = vmatpush1.bf16.msra.mxu1 %v10617_v57  ;;  %v10656_v55 = vld [vmem:[%s16255_s3 + $0x1248] ss:$52 sps:$4 sm:$0xff]   ;;  %v16275_v57 = vmov 5  }
  0xfd   :  { %5920 = vmatprep.subr.bf16.mxu0 %v10622_v58  ;;  %5961 = vmatprep.subr.bf16.mxu1 %v10625_v60  ;;  %v10659_v58 = vld [vmem:[%s16255_s3 + $0x18c8] ss:$52 sps:$4 sm:$0xff]   ;;  %v10662_v60 = vld [vmem:[%s16255_s3 + $0x11e0] ss:$52 sps:$4 sm:$0xff]  }
  0xfe   :  { %10429 = vset.pattern.permute.xlu0 %v16275_v57  ;;  %10430 = vset.pattern.permute.xlu1 %v16275_v57 }
  0xff   :  { %7359 = vperm.xlu0 %10429, %v12344_v17   ;;  %7371 = vperm.xlu1 %10430, %v12401_v51  }
 0x100   :  { %5921 = vmatpush1.bf16.msra.mxu0 %v10620_v59  ;;  %5962 = vmatpush1.bf16.msra.mxu1 %v10623_v61  ;;  %v10664_v59 = vld [vmem:[%s16255_s3 + $0x11e4] ss:$52 sps:$4 sm:$0xff]  }
 0x101   :  { %5922 = vmatprep.subr.bf16.mxu0 %v10628_v62  ;;  %5963 = vmatprep.subr.bf16.mxu1 %v10631_v0  ;;  %v10667_v61 = vld [vmem:[%s16255_s3 + $0x1864] ss:$52 sps:$4 sm:$0xff]   ;;  %v10665_v62 = vld [vmem:[%s16255_s3 + $0x1860] ss:$52 sps:$4 sm:$0xff]  }
 0x102   :  { %v10668_v0 = vld [vmem:[%s16255_s3 + $0x1178] ss:$52 sps:$4 sm:$0xff]  }
 0x103   :  { %7375 = vperm.xlu1 %10430, %v12356_v23  }
 0x104   :  { %5923 = vmatpush1.bf16.msra.mxu0 %v10626_v63  ;;  %5964 = vmatpush1.bf16.msra.mxu1 %v10629_v4  ;;  %v10670_v63 = vld [vmem:[%s16255_s3 + $0x117c] ss:$52 sps:$4 sm:$0xff]  }
 0x105   :  { %5924 = vmatprep.subr.bf16.mxu0 %v10634_v5  ;;  %v12472_v19 = vpop.f32.mrf.mxu0  ;;  %5965 = vmatprep.subr.bf16.mxu1 %v10637_v8  ;;  %v12483_v24 = vpop.f32.mrf.mxu1  ;;  %v10673_v4 = vld [vmem:[%s16255_s3 + $0x17fc] ss:$52 sps:$4 sm:$0xff]   ;;  %v16276_v5 = vmov 6   ;;  %v12566_v8 = vsub.s32 4, %v12320_v9 }
 0x106   :  { %10431 = vset.pattern.permute.xlu0 %v16276_v5 }
 0x107   :  { %v579_v25 = vpop.f32.mrf.mxu0  ;;  %v620_v28 = vpop.f32.mrf.mxu1  ;;  %7439 = vperm.xlu0 %10431, %v12344_v17   ;;  %10432 = vset.pattern.permute.xlu1 %v16276_v5 }
 0x108   :  { %5925 = vmatpush1.bf16.msra.mxu0 %v10632_v7  ;;  %v580_v27 = vadd.f32 %v579_v25, %v444_v16  ;;  %5966 = vmatpush1.bf16.msra.mxu1 %v10635_v12  ;;  %v621_v32 = vadd.f32 %v620_v28, %v452_v20  ;;  %v16281_v7 = vsub.s32 6, %v12320_v9  ;;  %v10671_v16 = vld [vmem:[%s16255_s3 + $0x17f8] ss:$52 sps:$4 sm:$0xff]   ;;  %v10676_v12 = vld [vmem:[%s16255_s3 + $0x1114] ss:$52 sps:$4 sm:$0xff]  }
 0x109   :  { %5926 = vmatprep.subr.bf16.mxu0 %v10640_v18  ;;  %v581_v31 = vpop.f32.mrf.mxu0  ;;  %5967 = vmatprep.subr.bf16.mxu1 %v10643_v22  ;;  %v622_v36 = vpop.f32.mrf.mxu1  ;;  %v10674_v18 = vld [vmem:[%s16255_s3 + $0x1110] ss:$52 sps:$4 sm:$0xff]   ;;  %v10679_v20 = vld [vmem:[%s16255_s3 + $0x1794] ss:$52 sps:$4 sm:$0xff]   ;;  %v440_v22 = vrot.slane %v12325_v10, %v12566_v8 }
 0x10a   :  { %v630_v35 = vmax.f32 %v580_v27, 0.0  ;;  %v632_v37 = vmax.f32 %v621_v32, 0.0  ;;  %v10677_v25 = vld [vmem:[%s16255_s3 + $0x1790] ss:$52 sps:$4 sm:$0xff]   ;;  %v10682_v27 = vld [vmem:[%s16255_s3 + $0x10ac] ss:$52 sps:$4 sm:$0xff]   ;;  %7449 = vperm.xlu1 %10432, %v12401_v51  }
 0x10b   :  { %v582_v38 = vpop.f32.mrf.mxu0  ;;  %v623_v43 = vpop.f32.mrf.mxu1  ;;  %v10680_v28 = vld [vmem:[%s16255_s3 + $0x10a8] ss:$52 sps:$4 sm:$0xff]   ;;  %v578_v31 = vadd.f32 %v12472_v19, %v440_v22  ;;  %v10689_v19 = vld [vmem:[%s16255_s3 + $0x16c0] ss:$52 sps:$4 sm:$0xff]  }
 0x10c   :  { %5927 = vmatpush1.bf16.msra.mxu0 %v10638_v21  ;;  %v12500_v42 = vpack.c.bf16 %v630_v35, %v630_v35  ;;  %5968 = vmatpush1.bf16.msra.mxu1 %v10641_v29  ;;  %v12509_v48 = vpack.c.bf16 %v632_v37, %v632_v37  ;;  %v448_v21 = vrot.slane %v12325_v10, %v16281_v7  ;;  %v10685_v29 = vld [vmem:[%s16255_s3 + $0x172c] ss:$52 sps:$4 sm:$0xff]   ;;  %v16272_v10 = vmov 7   ;;  %v10683_v32 = vld [vmem:[%s16255_s3 + $0x1728] ss:$52 sps:$4 sm:$0xff]  }
 0x10d   :  { %5928 = vmatprep.subr.bf16.mxu0 %v10646_v30  ;;  %5969 = vmatprep.subr.bf16.mxu1 %v10649_v34  ;;  %v10691_v34 = vld [vmem:[%s16255_s3 + $0x16c4] ss:$52 sps:$4 sm:$0xff]   ;;  %v629_v36 = vmax.f32 %v578_v31, 0.0  ;;  %v10692_v43 = vld [vmem:[%s16255_s3 + $0x2e0] ss:$52 sps:$4 sm:$0xff]  }
 0x10e   :  { %5944 = vmatprep.mubr.bf16.mxu0 %v12500_v42  ;;  %5985 = vmatprep.mubr.bf16.mxu1 %v12509_v48  ;;  %v619_v30 = vadd.f32 %v12483_v24, %v448_v21  ;;  %v10686_v24 = vld [vmem:[%s16255_s3 + $0x1040] ss:$52 sps:$4 sm:$0xff]   ;;  %v10694_v37 = vld [vmem:[%s16255_s3 + $0x2e4] ss:$52 sps:$4 sm:$0xff]   ;;  %v10724_v22 = vld [vmem:[%s16255_s3 + $0xdc] ss:$52 sps:$4 sm:$0xff]  }
 0x10f   :  { %10433 = vset.pattern.permute.xlu0 %v16272_v10  ;;  %7453 = vperm.xlu1 %10432, %v12356_v23   ;;  %v10697_v38 = vld [vmem:[%s16255_s3 + $0x964] ss:$52 sps:$4 sm:$0xff]   ;;  %v10719_v21 = vld [vmem:[%s16255_s3 + $0x7c0] ss:$52 sps:$4 sm:$0xff]  }
 0x110   :  { %5929 = vmatpush2.bf16.msra.mxu0 %v10644_v33  ;;  %5970 = vmatpush2.bf16.msra.mxu1 %v10647_v46  ;;  %v10688_v33 = vld [vmem:[%s16255_s3 + $0x1044] ss:$52 sps:$4 sm:$0xff]   ;;  %v631_v35 = vmax.f32 %v619_v30, 0.0  ;;  %v10695_v46 = vld [vmem:[%s16255_s3 + $0x960] ss:$52 sps:$4 sm:$0xff]  }
 0x111   :  { %5930 = vmatprep.subr.bf16.mxu0 %v10652_v47  ;;  %5971 = vmatprep.subr.bf16.mxu1 %v10655_v52  ;;  %v16274_v47 = vmov 8   ;;  %v10700_v52 = vld [vmem:[%s16255_s3 + $0x27c] ss:$52 sps:$4 sm:$0xff]   ;;  %v10733_v31 = vld [vmem:[%s16255_s3 + $0x6f4] ss:$52 sps:$4 sm:$0xff]  }
 0x112   :  { %7515 = vperm.xlu0 %10433, %v12344_v17   ;;  %v10728_v30 = vld [vmem:[%s16255_s3 + $0x70] ss:$52 sps:$4 sm:$0xff]   ;;  %v11145_v7 = vld [vmem:[%s16255_s3 + $0xb78] ss:$52 sps:$4 sm:$0xff]  }
 0x113   :  { %10434 = vset.pattern.permute.xlu1 %v16272_v10 }
 0x114   :  { %5931 = vmatpush2.bf16.msra.mxu0 %v10650_v49  ;;  %5972 = vmatpush2.bf16.msra.mxu1 %v10653_v53  ;;  %v12634_v49 = vpack.c.bf16 %v631_v35, %v631_v35  ;;  %v12640_v53 = vpack.c.bf16 %v629_v36, %v629_v36  ;;  %v10742_v35 = vld [vmem:[%s16255_s3 + $0x624] ss:$52 sps:$4 sm:$0xff]   ;;  %v10740_v36 = vld [vmem:[%s16255_s3 + $0x620] ss:$52 sps:$4 sm:$0xff]  }
 0x115   :  { %5932 = vmatprep.subr.bf16.mxu0 %v10658_v54  ;;  %5973 = vmatprep.subr.bf16.mxu1 %v10661_v56  ;;  %v10698_v54 = vld [vmem:[%s16255_s3 + $0x278] ss:$52 sps:$4 sm:$0xff]  }
 0x116   :  { %7527 = vperm.xlu1 %10434, %v12401_v51   ;;  %10435 = vset.pattern.permute.xlu0 %v16274_v47  ;;  %v10701_v56 = vld [vmem:[%s16255_s3 + $0x8f8] ss:$52 sps:$4 sm:$0xff]  }
 0x117   :  { %7595 = vperm.xlu0 %10435, %v12344_v17  }
 0x118   :  { %5933 = vmatpush2.bf16.msra.mxu0 %v10656_v55  ;;  %5974 = vmatpush2.bf16.msra.mxu1 %v10659_v58  ;;  %v10703_v55 = vld [vmem:[%s16255_s3 + $0x8fc] ss:$52 sps:$4 sm:$0xff]   ;;  %v10706_v58 = vld [vmem:[%s16255_s3 + $0x214] ss:$52 sps:$4 sm:$0xff]  }
 0x119   :  { %5934 = vmatprep.subr.bf16.mxu0 %v10664_v59  ;;  %5975 = vmatprep.subr.bf16.mxu1 %v10667_v61  ;;  %v10709_v59 = vld [vmem:[%s16255_s3 + $0x894] ss:$52 sps:$4 sm:$0xff]   ;;  %v10707_v61 = vld [vmem:[%s16255_s3 + $0x890] ss:$52 sps:$4 sm:$0xff]  }
 0x11a   :  { %7531 = vperm.xlu1 %10434, %v12356_v23  }
 0x11c   :  { %5935 = vmatpush2.bf16.msra.mxu0 %v10662_v60  ;;  %5976 = vmatpush2.bf16.msra.mxu1 %v10665_v62  ;;  %v10704_v60 = vld [vmem:[%s16255_s3 + $0x210] ss:$52 sps:$4 sm:$0xff]   ;;  %v10712_v62 = vld [vmem:[%s16255_s3 + $0x1ac] ss:$52 sps:$4 sm:$0xff]  }
 0x11d   :  { %5936 = vmatprep.subr.bf16.mxu0 %v10670_v63  ;;  %5977 = vmatprep.subr.bf16.mxu1 %v10673_v4  ;;  %v10715_v63 = vld [vmem:[%s16255_s3 + $0x82c] ss:$52 sps:$4 sm:$0xff]   ;;  %v10710_v4 = vld [vmem:[%s16255_s3 + $0x1a8] ss:$52 sps:$4 sm:$0xff]  }
 0x11e   :  { %10436 = vset.pattern.permute.xlu1 %v16274_v47 }
 0x11f   :  { %7605 = vperm.xlu1 %10436, %v12401_v51  }
 0x120   :  { %5937 = vmatpush2.bf16.msra.mxu0 %v10668_v0  ;;  %5978 = vmatpush2.bf16.msra.mxu1 %v10671_v16  ;;  %v16273_v0 = vmov 9   ;;  %v10713_v16 = vld [vmem:[%s16255_s3 + $0x828] ss:$52 sps:$4 sm:$0xff]  }
 0x121   :  { %5938 = vmatprep.subr.bf16.mxu0 %v10676_v12  ;;  %5979 = vmatprep.subr.bf16.mxu1 %v10679_v20  ;;  %v10718_v12 = vld [vmem:[%s16255_s3 + $0x144] ss:$52 sps:$4 sm:$0xff]  }
 0x122   :  { %10438 = vset.pattern.permute.xlu0 %v16273_v0  ;;  %v10721_v20 = vld [vmem:[%s16255_s3 + $0x7c4] ss:$52 sps:$4 sm:$0xff]  }
 0x123   :  { %7669 = vperm.xlu0 %10438, %v12401_v51   ;;  %7609 = vperm.xlu1 %10436, %v12356_v23  }
 0x124   :  { %5939 = vmatpush2.bf16.msra.mxu0 %v10674_v18  ;;  %5980 = vmatpush2.bf16.msra.mxu1 %v10677_v25  ;;  %v10716_v18 = vld [vmem:[%s16255_s3 + $0x140] ss:$52 sps:$4 sm:$0xff]   ;;  %v10722_v25 = vld [vmem:[%s16255_s3 + $0xd8] ss:$52 sps:$4 sm:$0xff]  }
 0x125   :  { %5940 = vmatprep.subr.bf16.mxu0 %v10682_v27  ;;  %5981 = vmatprep.subr.bf16.mxu1 %v10685_v29  ;;  %v10727_v27 = vld [vmem:[%s16255_s3 + $0x75c] ss:$52 sps:$4 sm:$0xff]   ;;  %v10730_v29 = vld [vmem:[%s16255_s3 + $0x74] ss:$52 sps:$4 sm:$0xff]  }
 0x127   :  { %10437 = vset.pattern.permute.xlu1 %v16273_v0  ;;  %v11085_v0 = vld [vmem:[%s16255_s3 + $0x908] ss:$52 sps:$4 sm:$0xff]  }
 0x128   :  { %5941 = vmatpush2.bf16.msra.mxu0 %v10680_v28  ;;  %5982 = vmatpush2.bf16.msra.mxu1 %v10683_v32  ;;  %v10725_v28 = vld [vmem:[%s16255_s3 + $0x758] ss:$52 sps:$4 sm:$0xff]   ;;  %v10731_v32 = vld [vmem:[%s16255_s3 + $0x6f0] ss:$52 sps:$4 sm:$0xff]  }
 0x129   :  { %5942 = vmatprep.subr.bf16.mxu0 %v10688_v33  ;;  %5983 = vmatprep.subr.bf16.mxu1 %v10691_v34  ;;  %v10736_v33 = vld [vmem:[%s16255_s3 + $0xc] ss:$52 sps:$4 sm:$0xff]   ;;  %v16269_v34 = vmov 10  }
 0x12a   :  { %7659 = vperm.xlu1 %10437, %v12344_v17  }
 0x12c   :  { %5943 = vmatpush2.bf16.msra.mxu0 %v10686_v24  ;;  %5984 = vmatpush2.bf16.msra.mxu1 %v10689_v19  ;;  %v10734_v24 = vld [vmem:[%s16255_s3 + $0x8] ss:$52 sps:$4 sm:$0xff]  }
 0x12d   :  { %5994 = vmatprep.subr.bf16.mxu0 %v10694_v37  ;;  %6035 = vmatprep.subr.bf16.mxu1 %v10697_v38  ;;  %v10737_v19 = vld [vmem:[%s16255_s3 + $0x688] ss:$52 sps:$4 sm:$0xff]   ;;  %v10743_v37 = vld [vmem:[%s16255_s3 + $0xca0] ss:$52 sps:$4 sm:$0xff]  }
 0x12e   :  { %7673 = vperm.xlu1 %10437, %v12356_v23   ;;  %v10739_v23 = vld [vmem:[%s16255_s3 + $0x68c] ss:$52 sps:$4 sm:$0xff]   ;;  %v10748_v38 = vld [vmem:[%s16255_s3 + $0x5bc] ss:$52 sps:$4 sm:$0xff]  }
 0x12f   :  { %5945 = vmatmul.mubr.bf16.vlgmr.msra.gmra.mxu0 %v12640_v53  ;;  %5986 = vmatmul.mubr.bf16.vlgmr.msra.gmra.mxu1 %v12634_v49 }
 0x130   :  { %5995 = vmatpush1.bf16.msra.mxu0 %v10692_v43  ;;  %6026 = vmatprep.mubr.bf16.mxu0 %v12371_v41  ;;  %v10746_v43 = vld [vmem:[%s16255_s3 + $0x5b8] ss:$52 sps:$4 sm:$0xff]  }
 0x131   :  { %6036 = vmatpush1.bf16.msra.mxu1 %v10695_v46  ;;  %6067 = vmatprep.mubr.bf16.mxu1 %v12379_v45  ;;  %v10751_v46 = vld [vmem:[%s16255_s3 + $0xc3c] ss:$52 sps:$4 sm:$0xff]  }
 0x132   :  { %5996 = vmatprep.subr.bf16.mxu0 %v10700_v52  ;;  %6037 = vmatprep.subr.bf16.mxu1 %v10703_v55  ;;  %v12763_v52 = vld [vmem:[%s16259_s7 + $0x8] sm:$0xff] }
 0x133   :  { %10439 = vset.pattern.permute.xlu1 %v16269_v34  ;;  %v10754_v55 = vld [vmem:[%s16255_s3 + $0x554] ss:$52 sps:$4 sm:$0xff]   ;;  %v11788_v34 = vld [vmem:[%s16259_s7] sm:$0xff] }
 0x134   :  { %5997 = vmatpush1.bf16.msra.mxu0 %v10698_v54  ;;  %7735 = vperm.xlu1 %10439, %v12344_v17   ;;  %v10745_v17 = vld [vmem:[%s16255_s3 + $0xca4] ss:$52 sps:$4 sm:$0xff]  }
 0x135   :  { %6038 = vmatpush1.bf16.msra.mxu1 %v10701_v56  ;;  %5998 = vmatprep.subr.bf16.mxu0 %v10706_v58  ;;  %v10749_v54 = vld [vmem:[%s16255_s3 + $0xc38] ss:$52 sps:$4 sm:$0xff]   ;;  %v10752_v56 = vld [vmem:[%s16255_s3 + $0x550] ss:$52 sps:$4 sm:$0xff]   ;;  %v10757_v58 = vld [vmem:[%s16255_s3 + $0xbd4] ss:$52 sps:$4 sm:$0xff]  }
 0x136   :  { %6039 = vmatprep.subr.bf16.mxu1 %v10709_v59  ;;  %v16270_v59 = vmov 12  }
 0x138   :  { %5999 = vmatpush1.bf16.msra.mxu0 %v10704_v60  ;;  %7747 = vperm.xlu1 %10439, %v12401_v51   ;;  %v10755_v60 = vld [vmem:[%s16255_s3 + $0xbd0] ss:$52 sps:$4 sm:$0xff]  }
 0x139   :  { %6040 = vmatpush1.bf16.msra.mxu1 %v10707_v61  ;;  %6000 = vmatprep.subr.bf16.mxu0 %v10712_v62  ;;  %v10760_v61 = vld [vmem:[%s16255_s3 + $0x4ec] ss:$52 sps:$4 sm:$0xff]   ;;  %v10758_v62 = vld [vmem:[%s16255_s3 + $0x4e8] ss:$52 sps:$4 sm:$0xff]  }
 0x13a   :  { %6041 = vmatprep.subr.bf16.mxu1 %v10715_v63  ;;  %v10763_v63 = vld [vmem:[%s16255_s3 + $0xb6c] ss:$52 sps:$4 sm:$0xff]  }
 0x13c   :  { %6001 = vmatpush1.bf16.msra.mxu0 %v10710_v4  ;;  %7751 = vperm.xlu1 %10439, %v12763_v52   ;;  %v12796_v4 = vld [vmem:[%s16258_s6] sm:$0x1] }
 0x13d   :  { %6042 = vmatpush1.bf16.msra.mxu1 %v10713_v16  ;;  %6002 = vmatprep.subr.bf16.mxu0 %v10718_v12  ;;  %v10761_v16 = vld [vmem:[%s16255_s3 + $0xb68] ss:$52 sps:$4 sm:$0xff]   ;;  %v10766_v12 = vld [vmem:[%s16255_s3 + $0x484] ss:$52 sps:$4 sm:$0xff]  }
 0x13e   :  { %6043 = vmatprep.subr.bf16.mxu1 %v10721_v20  ;;  %v10769_v20 = vld [vmem:[%s16255_s3 + $0xb04] ss:$52 sps:$4 sm:$0xff]  }
 0x140   :  { %6003 = vmatpush1.bf16.msra.mxu0 %v10716_v18  ;;  %10442 = vset.pattern.permute.xlu1 %v16270_v59  ;;  %v10764_v18 = vld [vmem:[%s16255_s3 + $0x480] ss:$52 sps:$4 sm:$0xff]  }
 0x141   :  { %6044 = vmatpush1.bf16.msra.mxu1 %v10719_v21  ;;  %6004 = vmatprep.subr.bf16.mxu0 %v10724_v22  ;;  %v16267_v21 = vmov 13   ;;  %v10767_v22 = vld [vmem:[%s16255_s3 + $0xb00] ss:$52 sps:$4 sm:$0xff]  }
 0x142   :  { %6045 = vmatprep.subr.bf16.mxu1 %v10727_v27  ;;  %7889 = vperm.xlu1 %10442, %v12401_v51   ;;  %v16271_v51 = vmov 11   ;;  %v10770_v27 = vld [vmem:[%s16255_s3 + $0x418] ss:$52 sps:$4 sm:$0xff]  }
 0x143   :  { %10440 = vset.pattern.permute.xlu0 %v16271_v51  ;;  %v11082_v51 = vld [vmem:[%s16255_s3 + $0x288] ss:$52 sps:$4 sm:$0xff]  }
 0x144   :  { %6005 = vmatpush1.bf16.msra.mxu0 %v10722_v25  ;;  %7815 = vperm.xlu0 %10440, %v12796_v4   ;;  %v10772_v25 = vld [vmem:[%s16255_s3 + $0x41c] ss:$52 sps:$4 sm:$0xff]  }
 0x145   :  { %6046 = vmatpush1.bf16.msra.mxu1 %v10725_v28  ;;  %6006 = vmatprep.subr.bf16.mxu0 %v10730_v29  ;;  %v10775_v28 = vld [vmem:[%s16255_s3 + $0xa9c] ss:$52 sps:$4 sm:$0xff]   ;;  %v11786_v29 = vld [vmem:[%s16259_s7] sm:$0xff] }
 0x146   :  { %6047 = vmatprep.subr.bf16.mxu1 %v10733_v31  ;;  %7893 = vperm.xlu1 %10442, %v12763_v52   ;;  %v10778_v31 = vld [vmem:[%s16255_s3 + $0x3b4] ss:$52 sps:$4 sm:$0xff]  }
 0x148   :  { %6007 = vmatpush1.bf16.msra.mxu0 %v10728_v30  ;;  %10441 = vset.pattern.permute.xlu0 %v16270_v59  ;;  %v10773_v30 = vld [vmem:[%s16255_s3 + $0xa98] ss:$52 sps:$4 sm:$0xff]  }
 0x149   :  { %6048 = vmatpush1.bf16.msra.mxu1 %v10731_v32  ;;  %6008 = vmatprep.subr.bf16.mxu0 %v10736_v33  ;;  %v10776_v32 = vld [vmem:[%s16255_s3 + $0x3b0] ss:$52 sps:$4 sm:$0xff]   ;;  %v10781_v33 = vld [vmem:[%s16255_s3 + $0xa34] ss:$52 sps:$4 sm:$0xff]  }
 0x14a   :  { %6049 = vmatprep.subr.bf16.mxu1 %v10739_v23  ;;  %10444 = vset.pattern.permute.xlu1 %v16267_v21  ;;  %v10784_v23 = vld [vmem:[%s16255_s3 + $0x34c] ss:$52 sps:$4 sm:$0xff]  }
 0x14b   :  { %7967 = vperm.xlu1 %10444, %v11786_v29   ;;  %7879 = vperm.xlu0 %10441, %v12796_v4  }
 0x14c   :  { %6009 = vmatpush1.bf16.msra.mxu0 %v10734_v24  ;;  %v10779_v24 = vld [vmem:[%s16255_s3 + $0xa30] ss:$52 sps:$4 sm:$0xff]  }
 0x14d   :  { %6050 = vmatpush1.bf16.msra.mxu1 %v10737_v19  ;;  %6010 = vmatprep.subr.bf16.mxu0 %v10742_v35  ;;  %v10782_v19 = vld [vmem:[%s16255_s3 + $0x348] ss:$52 sps:$4 sm:$0xff]   ;;  %v10787_v35 = vld [vmem:[%s16255_s3 + $0x9cc] ss:$52 sps:$4 sm:$0xff]  }
 0x14e   :  { %6051 = vmatprep.subr.bf16.mxu1 %v10745_v17  ;;  %v10785_v17 = vld [vmem:[%s16255_s3 + $0x9c8] ss:$52 sps:$4 sm:$0xff]  }
 0x14f   :  { %7971 = vperm.xlu1 %10444, %v12763_v52   ;;  %10443 = vset.pattern.permute.xlu0 %v16267_v21 }
 0x150   :  { %6011 = vmatpush2.bf16.msra.mxu0 %v10740_v36  ;;  %7955 = vperm.xlu0 %10443, %v12796_v4   ;;  %v16268_v36 = vmov 14  }
 0x151   :  { %6052 = vmatpush2.bf16.msra.mxu1 %v10743_v37  ;;  %6012 = vmatprep.subr.bf16.mxu0 %v10748_v38  ;;  %v10790_v37 = vld [vmem:[%s16255_s3 + $0xfe4] ss:$52 sps:$4 sm:$0xff]  }
 0x152   :  { %6053 = vmatprep.subr.bf16.mxu1 %v10751_v46  ;;  %v10793_v38 = vld [vmem:[%s16255_s3 + $0x1664] ss:$52 sps:$4 sm:$0xff]   ;;  %v10791_v46 = vld [vmem:[%s16255_s3 + $0x1660] ss:$52 sps:$4 sm:$0xff]  }
 0x153   :  { %10446 = vset.pattern.permute.xlu1 %v16268_v36 }
 0x154   :  { %6013 = vmatpush2.bf16.msra.mxu0 %v10746_v43  ;;  %8045 = vperm.xlu1 %10446, %v11786_v29   ;;  %v10788_v43 = vld [vmem:[%s16255_s3 + $0xfe0] ss:$52 sps:$4 sm:$0xff]   ;;  %v10818_v29 = vld [vmem:[%s16255_s3 + $0xdd8] ss:$52 sps:$4 sm:$0xff]  }
 0x155   :  { %6054 = vmatpush2.bf16.msra.mxu1 %v10749_v54  ;;  %6014 = vmatprep.subr.bf16.mxu0 %v10754_v55  ;;  %v10796_v54 = vld [vmem:[%s16255_s3 + $0xf7c] ss:$52 sps:$4 sm:$0xff]   ;;  %v10794_v55 = vld [vmem:[%s16255_s3 + $0xf78] ss:$52 sps:$4 sm:$0xff]  }
 0x156   :  { %6055 = vmatprep.subr.bf16.mxu1 %v10757_v58  ;;  %10445 = vset.pattern.permute.xlu0 %v16268_v36  ;;  %v10799_v58 = vld [vmem:[%s16255_s3 + $0x15fc] ss:$52 sps:$4 sm:$0xff]  }
 0x157   :  { %8035 = vperm.xlu0 %10445, %v12796_v4   ;;  %v11076_v36 = vld [vmem:[%s16255_s3 + $0x2f0] ss:$52 sps:$4 sm:$0xff]  }
 0x158   :  { %6015 = vmatpush2.bf16.msra.mxu0 %v10752_v56  ;;  %8049 = vperm.xlu1 %10446, %v12763_v52   ;;  %v16266_v56 = vmov 15   ;;  %v10797_v52 = vld [vmem:[%s16255_s3 + $0x15f8] ss:$52 sps:$4 sm:$0xff]  }
 0x159   :  { %6056 = vmatpush2.bf16.msra.mxu1 %v10755_v60  ;;  %6016 = vmatprep.subr.bf16.mxu0 %v10760_v61  ;;  %v10802_v60 = vld [vmem:[%s16255_s3 + $0xf14] ss:$52 sps:$4 sm:$0xff]  }
 0x15a   :  { %6057 = vmatprep.subr.bf16.mxu1 %v10763_v63  ;;  %v10805_v61 = vld [vmem:[%s16255_s3 + $0x1594] ss:$52 sps:$4 sm:$0xff]   ;;  %v10803_v63 = vld [vmem:[%s16255_s3 + $0x1590] ss:$52 sps:$4 sm:$0xff]  }
 0x15b   :  { %10448 = vset.pattern.permute.xlu0 %v16266_v56 }
 0x15c   :  { %6017 = vmatpush2.bf16.msra.mxu0 %v10758_v62  ;;  %10447 = vset.pattern.permute.xlu1 %v16266_v56  ;;  %v10800_v62 = vld [vmem:[%s16255_s3 + $0xf10] ss:$52 sps:$4 sm:$0xff]   ;;  %v13546_v56 = vpop.permute.xlu0 %7015 }
 0x15d   :  { %6058 = vmatpush2.bf16.msra.mxu1 %v10761_v16  ;;  %6018 = vmatprep.subr.bf16.mxu0 %v10766_v12  ;;  %v10808_v16 = vld [vmem:[%s16255_s3 + $0xeac] ss:$52 sps:$4 sm:$0xff]   ;;  %16311 = vst [vmem:[#allocation8_spill] sm:$0xff] %v13546_v56  ;;  %v11157_v56 = vld [vmem:[%s16255_s3 + $0xaa8] ss:$52 sps:$4 sm:$0xff]  }
 0x15e   :  { %6059 = vmatprep.subr.bf16.mxu1 %v10769_v20  ;;  %8111 = vperm.xlu1 %10447, %v12796_v4   ;;  %v10811_v12 = vld [vmem:[%s16255_s3 + $0x152c] ss:$52 sps:$4 sm:$0xff]   ;;  %v10806_v4 = vld [vmem:[%s16255_s3 + $0xea8] ss:$52 sps:$4 sm:$0xff]   ;;  %v10814_v20 = vld [vmem:[%s16255_s3 + $0xe44] ss:$52 sps:$4 sm:$0xff]  }
 0x160   :  { %6019 = vmatpush2.bf16.msra.mxu0 %v10764_v18  ;;  %v10809_v18 = vld [vmem:[%s16255_s3 + $0x1528] ss:$52 sps:$4 sm:$0xff]  }
 0x161   :  { %6060 = vmatpush2.bf16.msra.mxu1 %v10767_v22  ;;  %6020 = vmatprep.subr.bf16.mxu0 %v10772_v25  ;;  %v10812_v22 = vld [vmem:[%s16255_s3 + $0xe40] ss:$52 sps:$4 sm:$0xff]   ;;  %v10817_v25 = vld [vmem:[%s16255_s3 + $0x14c4] ss:$52 sps:$4 sm:$0xff]  }
 0x162   :  { %6061 = vmatprep.subr.bf16.mxu1 %v10775_v28  ;;  %v10820_v28 = vld [vmem:[%s16255_s3 + $0xddc] ss:$52 sps:$4 sm:$0xff]  }
 0x164   :  { %6021 = vmatpush2.bf16.msra.mxu0 %v10770_v27  ;;  %v10815_v27 = vld [vmem:[%s16255_s3 + $0x14c0] ss:$52 sps:$4 sm:$0xff]  }
 0x165   :  { %6062 = vmatpush2.bf16.msra.mxu1 %v10773_v30  ;;  %6022 = vmatprep.subr.bf16.mxu0 %v10778_v31  ;;  %v10823_v30 = vld [vmem:[%s16255_s3 + $0x145c] ss:$52 sps:$4 sm:$0xff]   ;;  %v10821_v31 = vld [vmem:[%s16255_s3 + $0x1458] ss:$52 sps:$4 sm:$0xff]  }
 0x166   :  { %6063 = vmatprep.subr.bf16.mxu1 %v10781_v33  ;;  %v10824_v33 = vld [vmem:[%s16255_s3 + $0xd70] ss:$52 sps:$4 sm:$0xff]  }
 0x168   :  { %6023 = vmatpush2.bf16.msra.mxu0 %v10776_v32  ;;  %v10826_v32 = vld [vmem:[%s16255_s3 + $0xd74] ss:$52 sps:$4 sm:$0xff]  }
 0x169   :  { %6064 = vmatpush2.bf16.msra.mxu1 %v10779_v24  ;;  %6024 = vmatprep.subr.bf16.mxu0 %v10784_v23  ;;  %v10829_v24 = vld [vmem:[%s16255_s3 + $0x13f4] ss:$52 sps:$4 sm:$0xff]   ;;  %v10827_v23 = vld [vmem:[%s16255_s3 + $0x13f0] ss:$52 sps:$4 sm:$0xff]  }
 0x16a   :  { %6065 = vmatprep.subr.bf16.mxu1 %v10787_v35  ;;  %v10830_v35 = vld [vmem:[%s16255_s3 + $0xd08] ss:$52 sps:$4 sm:$0xff]  }
 0x16c   :  { %6025 = vmatpush2.bf16.msra.mxu0 %v10782_v19  ;;  %v10832_v19 = vld [vmem:[%s16255_s3 + $0xd0c] ss:$52 sps:$4 sm:$0xff]  }
 0x16d   :  { %6066 = vmatpush2.bf16.msra.mxu1 %v10785_v17  ;;  %6076 = vmatprep.subr.bf16.mxu0 %v10790_v37  ;;  %v10835_v17 = vld [vmem:[%s16255_s3 + $0x138c] ss:$52 sps:$4 sm:$0xff]   ;;  %v10833_v37 = vld [vmem:[%s16255_s3 + $0x1388] ss:$52 sps:$4 sm:$0xff]  }
 0x16e   :  { %6117 = vmatprep.subr.bf16.mxu1 %v10793_v38  ;;  %v10838_v38 = vld [vmem:[%s16255_s3 + $0x1324] ss:$52 sps:$4 sm:$0xff]  }
 0x16f   :  { %6027 = vmatmul.mubr.bf16.vlgmr.msra.gmra.mxu0 %v12377_v44 }
 0x170   :  { %6068 = vmatmul.mubr.bf16.vlgmr.msra.gmra.mxu1 %v12369_v40  ;;  %6077 = vmatpush1.bf16.msra.mxu0 %v10788_v43  ;;  %v10836_v43 = vld [vmem:[%s16255_s3 + $0x1320] ss:$52 sps:$4 sm:$0xff]  }
 0x171   :  { %6108 = vmatprep.mubr.bf16.mxu0 %v12500_v42  ;;  %6118 = vmatpush1.bf16.msra.mxu1 %v10791_v46  ;;  %v10841_v46 = vld [vmem:[%s16255_s3 + $0x19a4] ss:$52 sps:$4 sm:$0xff]  }
 0x172   :  { %6149 = vmatprep.mubr.bf16.mxu1 %v12509_v48  ;;  %6078 = vmatprep.subr.bf16.mxu0 %v10796_v54  ;;  %v10839_v54 = vld [vmem:[%s16255_s3 + $0x19a0] ss:$52 sps:$4 sm:$0xff]  }
 0x173   :  { %6119 = vmatprep.subr.bf16.mxu1 %v10799_v58  ;;  %v10847_v58 = vld [vmem:[%s16255_s3 + $0x193c] ss:$52 sps:$4 sm:$0xff]  }
 0x174   :  { %6079 = vmatpush1.bf16.msra.mxu0 %v10794_v55  ;;  %v10844_v55 = vld [vmem:[%s16255_s3 + $0x12bc] ss:$52 sps:$4 sm:$0xff]  }
 0x175   :  { %6120 = vmatpush1.bf16.msra.mxu1 %v10797_v52  ;;  %6080 = vmatprep.subr.bf16.mxu0 %v10802_v60  ;;  %v10842_v52 = vld [vmem:[%s16255_s3 + $0x12b8] ss:$52 sps:$4 sm:$0xff]  }
 0x176   :  { %6121 = vmatprep.subr.bf16.mxu1 %v10805_v61  ;;  %v10845_v60 = vld [vmem:[%s16255_s3 + $0x1938] ss:$52 sps:$4 sm:$0xff]   ;;  %v10850_v61 = vld [vmem:[%s16255_s3 + $0x1254] ss:$52 sps:$4 sm:$0xff]  }
 0x178   :  { %6081 = vmatpush1.bf16.msra.mxu0 %v10800_v62  ;;  %v10848_v62 = vld [vmem:[%s16255_s3 + $0x1250] ss:$52 sps:$4 sm:$0xff]  }
 0x179   :  { %6122 = vmatpush1.bf16.msra.mxu1 %v10803_v63  ;;  %6082 = vmatprep.subr.bf16.mxu0 %v10808_v16  ;;  %v10853_v63 = vld [vmem:[%s16255_s3 + $0x18d4] ss:$52 sps:$4 sm:$0xff]   ;;  %v10851_v16 = vld [vmem:[%s16255_s3 + $0x18d0] ss:$52 sps:$4 sm:$0xff]  }
 0x17a   :  { %6123 = vmatprep.subr.bf16.mxu1 %v10811_v12  ;;  %v10856_v12 = vld [vmem:[%s16255_s3 + $0x11ec] ss:$52 sps:$4 sm:$0xff]  }
 0x17c   :  { %6083 = vmatpush1.bf16.msra.mxu0 %v10806_v4  ;;  %v10854_v4 = vld [vmem:[%s16255_s3 + $0x11e8] ss:$52 sps:$4 sm:$0xff]  }
 0x17d   :  { %6124 = vmatpush1.bf16.msra.mxu1 %v10809_v18  ;;  %6084 = vmatprep.subr.bf16.mxu0 %v10814_v20  ;;  %v10859_v18 = vld [vmem:[%s16255_s3 + $0x186c] ss:$52 sps:$4 sm:$0xff]   ;;  %v10857_v20 = vld [vmem:[%s16255_s3 + $0x1868] ss:$52 sps:$4 sm:$0xff]  }
 0x17e   :  { %6125 = vmatprep.subr.bf16.mxu1 %v10817_v25  ;;  %v10860_v25 = vld [vmem:[%s16255_s3 + $0x1180] ss:$52 sps:$4 sm:$0xff]  }
 0x180   :  { %6085 = vmatpush1.bf16.msra.mxu0 %v10812_v22  ;;  %v10862_v22 = vld [vmem:[%s16255_s3 + $0x1184] ss:$52 sps:$4 sm:$0xff]  }
 0x181   :  { %6126 = vmatpush1.bf16.msra.mxu1 %v10815_v27  ;;  %6086 = vmatprep.subr.bf16.mxu0 %v10820_v28  ;;  %v10865_v27 = vld [vmem:[%s16255_s3 + $0x1804] ss:$52 sps:$4 sm:$0xff]   ;;  %v10863_v28 = vld [vmem:[%s16255_s3 + $0x1800] ss:$52 sps:$4 sm:$0xff]  }
 0x182   :  { %6127 = vmatprep.subr.bf16.mxu1 %v10823_v30  ;;  %v10866_v30 = vld [vmem:[%s16255_s3 + $0x1118] ss:$52 sps:$4 sm:$0xff]  }
 0x184   :  { %6087 = vmatpush1.bf16.msra.mxu0 %v10818_v29  ;;  %v10868_v29 = vld [vmem:[%s16255_s3 + $0x111c] ss:$52 sps:$4 sm:$0xff]  }
 0x185   :  { %6128 = vmatpush1.bf16.msra.mxu1 %v10821_v31  ;;  %6088 = vmatprep.subr.bf16.mxu0 %v10826_v32  ;;  %v10871_v31 = vld [vmem:[%s16255_s3 + $0x179c] ss:$52 sps:$4 sm:$0xff]   ;;  %v10869_v32 = vld [vmem:[%s16255_s3 + $0x1798] ss:$52 sps:$4 sm:$0xff]  }
 0x186   :  { %6129 = vmatprep.subr.bf16.mxu1 %v10829_v24  ;;  %v10872_v24 = vld [vmem:[%s16255_s3 + $0x10b0] ss:$52 sps:$4 sm:$0xff]  }
 0x188   :  { %6089 = vmatpush1.bf16.msra.mxu0 %v10824_v33  ;;  %v10874_v33 = vld [vmem:[%s16255_s3 + $0x10b4] ss:$52 sps:$4 sm:$0xff]  }
 0x189   :  { %6130 = vmatpush1.bf16.msra.mxu1 %v10827_v23  ;;  %6090 = vmatprep.subr.bf16.mxu0 %v10832_v19  ;;  %v10877_v23 = vld [vmem:[%s16255_s3 + $0x1734] ss:$52 sps:$4 sm:$0xff]   ;;  %v10875_v19 = vld [vmem:[%s16255_s3 + $0x1730] ss:$52 sps:$4 sm:$0xff]  }
 0x18a   :  { %6131 = vmatprep.subr.bf16.mxu1 %v10835_v17  ;;  %v10878_v17 = vld [vmem:[%s16255_s3 + $0x1048] ss:$52 sps:$4 sm:$0xff]  }
 0x18c   :  { %6091 = vmatpush1.bf16.msra.mxu0 %v10830_v35  ;;  %v10880_v35 = vld [vmem:[%s16255_s3 + $0x104c] ss:$52 sps:$4 sm:$0xff]  }
 0x18d   :  { %6132 = vmatpush1.bf16.msra.mxu1 %v10833_v37  ;;  %6092 = vmatprep.subr.bf16.mxu0 %v10838_v38  ;;  %v10883_v37 = vld [vmem:[%s16255_s3 + $0x16cc] ss:$52 sps:$4 sm:$0xff]   ;;  %v10881_v38 = vld [vmem:[%s16255_s3 + $0x16c8] ss:$52 sps:$4 sm:$0xff]  }
 0x18e   :  { %6133 = vmatprep.subr.bf16.mxu1 %v10841_v46  ;;  %v10884_v46 = vld [vmem:[%s16255_s3 + $0x2e8] ss:$52 sps:$4 sm:$0xff]  }
 0x190   :  { %6093 = vmatpush2.bf16.msra.mxu0 %v10836_v43  ;;  %v10886_v43 = vld [vmem:[%s16255_s3 + $0x2ec] ss:$52 sps:$4 sm:$0xff]  }
 0x191   :  { %6134 = vmatpush2.bf16.msra.mxu1 %v10839_v54  ;;  %6094 = vmatprep.subr.bf16.mxu0 %v10844_v55  ;;  %v10889_v54 = vld [vmem:[%s16255_s3 + $0x96c] ss:$52 sps:$4 sm:$0xff]   ;;  %v10887_v55 = vld [vmem:[%s16255_s3 + $0x968] ss:$52 sps:$4 sm:$0xff]  }
 0x192   :  { %6135 = vmatprep.subr.bf16.mxu1 %v10847_v58  ;;  %v10895_v58 = vld [vmem:[%s16255_s3 + $0x904] ss:$52 sps:$4 sm:$0xff]  }
 0x194   :  { %6095 = vmatpush2.bf16.msra.mxu0 %v10842_v52  ;;  %v10892_v52 = vld [vmem:[%s16255_s3 + $0x284] ss:$52 sps:$4 sm:$0xff]  }
 0x195   :  { %6136 = vmatpush2.bf16.msra.mxu1 %v10845_v60  ;;  %6096 = vmatprep.subr.bf16.mxu0 %v10850_v61  ;;  %v13081_v60 = vpop.permute.xlu1 %7004 }
 0x196   :  { %6137 = vmatprep.subr.bf16.mxu1 %v10853_v63  ;;  %16305 = vst [vmem:[#allocation2_spill] sm:$0xff] %v13081_v60  ;;  %v10893_v63 = vld [vmem:[%s16255_s3 + $0x900] ss:$52 sps:$4 sm:$0xff]  }
 0x198   :  { %6097 = vmatpush2.bf16.msra.mxu0 %v10848_v62  ;;  %v10890_v62 = vld [vmem:[%s16255_s3 + $0x280] ss:$52 sps:$4 sm:$0xff]  }
 0x199   :  { %6138 = vmatpush2.bf16.msra.mxu1 %v10851_v16  ;;  %6098 = vmatprep.subr.bf16.mxu0 %v10856_v12  ;;  %v10898_v12 = vld [vmem:[%s16255_s3 + $0x21c] ss:$52 sps:$4 sm:$0xff]  }
 0x19a   :  { %6139 = vmatprep.subr.bf16.mxu1 %v10859_v18 }
 0x19c   :  { %6099 = vmatpush2.bf16.msra.mxu0 %v10854_v4  ;;  %v10901_v4 = vld [vmem:[%s16255_s3 + $0x89c] ss:$52 sps:$4 sm:$0xff]  }
 0x19d   :  { %6140 = vmatpush2.bf16.msra.mxu1 %v10857_v20  ;;  %6100 = vmatprep.subr.bf16.mxu0 %v10862_v22 }
 0x19e   :  { %6141 = vmatprep.subr.bf16.mxu1 %v10865_v27  ;;  %v13110_v27 = vpop.permute.xlu1 %7020 }
 0x19f   :  { %16306 = vst [vmem:[#allocation3_spill] sm:$0xff] %v13110_v27  ;;  %v11159_v27 = vld [vmem:[%s16255_s3 + $0xaac] ss:$52 sps:$4 sm:$0xff]  }
 0x1a0   :  { %6101 = vmatpush2.bf16.msra.mxu0 %v10860_v25  ;;  %v10896_v25 = vld [vmem:[%s16255_s3 + $0x218] ss:$52 sps:$4 sm:$0xff]  }
 0x1a1   :  { %6142 = vmatpush2.bf16.msra.mxu1 %v10863_v28  ;;  %6102 = vmatprep.subr.bf16.mxu0 %v10868_v29  ;;  %v10899_v29 = vld [vmem:[%s16255_s3 + $0x898] ss:$52 sps:$4 sm:$0xff]  }
 0x1a2   :  { %6143 = vmatprep.subr.bf16.mxu1 %v10871_v31 }
 0x1a4   :  { %6103 = vmatpush2.bf16.msra.mxu0 %v10866_v30  ;;  %v10904_v30 = vld [vmem:[%s16255_s3 + $0x1b4] ss:$52 sps:$4 sm:$0xff]  }
 0x1a5   :  { %6144 = vmatpush2.bf16.msra.mxu1 %v10869_v32  ;;  %6104 = vmatprep.subr.bf16.mxu0 %v10874_v33  ;;  %v10907_v33 = vld [vmem:[%s16255_s3 + $0x834] ss:$52 sps:$4 sm:$0xff]  }
 0x1a6   :  { %6145 = vmatprep.subr.bf16.mxu1 %v10877_v23  ;;  %v10905_v23 = vld [vmem:[%s16255_s3 + $0x830] ss:$52 sps:$4 sm:$0xff]  }
 0x1a8   :  { %6105 = vmatpush2.bf16.msra.mxu0 %v10872_v24  ;;  %v10902_v24 = vld [vmem:[%s16255_s3 + $0x1b0] ss:$52 sps:$4 sm:$0xff]  }
 0x1a9   :  { %6146 = vmatpush2.bf16.msra.mxu1 %v10875_v19  ;;  %6106 = vmatprep.subr.bf16.mxu0 %v10880_v35  ;;  %v10910_v19 = vld [vmem:[%s16255_s3 + $0x14c] ss:$52 sps:$4 sm:$0xff]   ;;  %v13130_v35 = vpop.permute.xlu1 %7063 }
 0x1aa   :  { %6147 = vmatprep.subr.bf16.mxu1 %v10883_v37  ;;  %v10913_v37 = vld [vmem:[%s16255_s3 + $0x7cc] ss:$52 sps:$4 sm:$0xff]  }
 0x1ac   :  { %6107 = vmatpush2.bf16.msra.mxu0 %v10878_v17  ;;  %v10908_v17 = vld [vmem:[%s16255_s3 + $0x148] ss:$52 sps:$4 sm:$0xff]  }
 0x1ad   :  { %6148 = vmatpush2.bf16.msra.mxu1 %v10881_v38  ;;  %6158 = vmatprep.subr.bf16.mxu0 %v10886_v43  ;;  %v10911_v38 = vld [vmem:[%s16255_s3 + $0x7c8] ss:$52 sps:$4 sm:$0xff]   ;;  %v10916_v43 = vld [vmem:[%s16255_s3 + $0xe4] ss:$52 sps:$4 sm:$0xff]  }
 0x1ae   :  { %6199 = vmatprep.subr.bf16.mxu1 %v10889_v54  ;;  %v10919_v54 = vld [vmem:[%s16255_s3 + $0x764] ss:$52 sps:$4 sm:$0xff]  }
 0x1af   :  { %6109 = vmatmul.mubr.bf16.vlgmr.msra.gmra.mxu0 %v12640_v53  ;;  %v13084_v61 = vpop.f32.mrf.mxu0  ;;  %v13093_v16 = vpop.f32.mrf.mxu1 }
 0x1b0   :  { %6150 = vmatmul.mubr.bf16.vlgmr.msra.gmra.mxu1 %v12634_v49  ;;  %6159 = vmatpush1.bf16.msra.mxu0 %v10884_v46  ;;  %v10914_v46 = vld [vmem:[%s16255_s3 + $0xe0] ss:$52 sps:$4 sm:$0xff]  }
 0x1b1   :  { %6190 = vmatprep.mubr.bf16.mxu0 %v12371_v41  ;;  %6200 = vmatpush1.bf16.msra.mxu1 %v10887_v55  ;;  %v13102_v18 = vpop.f32.mrf.mxu0  ;;  %v13105_v20 = vpop.f32.mrf.mxu1 }
 0x1b2   :  { %6231 = vmatprep.mubr.bf16.mxu1 %v12379_v45  ;;  %6160 = vmatprep.subr.bf16.mxu0 %v10892_v52  ;;  %v13150_v55 = vpop.permute.xlu1 %7139  ;;  %v10917_v52 = vld [vmem:[%s16255_s3 + $0x760] ss:$52 sps:$4 sm:$0xff]  }
 0x1b3   :  { %6201 = vmatprep.subr.bf16.mxu1 %v10895_v58  ;;  %v5868_v22 = vpop.f32.mrf.mxu0  ;;  %v5909_v28 = vpop.f32.mrf.mxu1  ;;  %v10922_v58 = vld [vmem:[%s16255_s3 + $0x7c] ss:$52 sps:$4 sm:$0xff]  }
 0x1b4   :  { %6161 = vmatpush1.bf16.msra.mxu0 %v10890_v62  ;;  %v10920_v62 = vld [vmem:[%s16255_s3 + $0x78] ss:$52 sps:$4 sm:$0xff]   ;;  %v10931_v28 = vld [vmem:[%s16255_s3 + $0x694] ss:$52 sps:$4 sm:$0xff]  }
 0x1b5   :  { %6202 = vmatpush1.bf16.msra.mxu1 %v10893_v63  ;;  %v5869_v31 = vpop.f32.mrf.mxu0  ;;  %6162 = vmatprep.subr.bf16.mxu0 %v10898_v12  ;;  %v5910_v32 = vpop.f32.mrf.mxu1  ;;  %v10925_v63 = vld [vmem:[%s16255_s3 + $0x6fc] ss:$52 sps:$4 sm:$0xff]   ;;  %v10923_v12 = vld [vmem:[%s16255_s3 + $0x6f8] ss:$52 sps:$4 sm:$0xff]  }
 0x1b6   :  { %6203 = vmatprep.subr.bf16.mxu1 %v10901_v4  ;;  %v10928_v4 = vld [vmem:[%s16255_s3 + $0x14] ss:$52 sps:$4 sm:$0xff]   ;;  %v13170_v22 = vpop.permute.xlu1 %7151  ;;  %v10937_v32 = vld [vmem:[%s16255_s3 + $0xcac] ss:$52 sps:$4 sm:$0xff]  }
 0x1b7   :  { %v10932_v31 = vld [vmem:[%s16255_s3 + $0x628] ss:$52 sps:$4 sm:$0xff]  }
 0x1b8   :  { %6163 = vmatpush1.bf16.msra.mxu0 %v10896_v25  ;;  %v10926_v25 = vld [vmem:[%s16255_s3 + $0x10] ss:$52 sps:$4 sm:$0xff]  }
 0x1b9   :  { %6204 = vmatpush1.bf16.msra.mxu1 %v10899_v29  ;;  %6164 = vmatprep.subr.bf16.mxu0 %v10904_v30  ;;  %v10929_v29 = vld [vmem:[%s16255_s3 + $0x690] ss:$52 sps:$4 sm:$0xff]   ;;  %v10934_v30 = vld [vmem:[%s16255_s3 + $0x62c] ss:$52 sps:$4 sm:$0xff]  }
 0x1ba   :  { %6205 = vmatprep.subr.bf16.mxu1 %v10907_v33  ;;  %v13190_v33 = vpop.permute.xlu1 %7155 }
 0x1bc   :  { %6165 = vmatpush1.bf16.msra.mxu0 %v10902_v24  ;;  %v10935_v24 = vld [vmem:[%s16255_s3 + $0xca8] ss:$52 sps:$4 sm:$0xff]  }
 0x1bd   :  { %6206 = vmatpush1.bf16.msra.mxu1 %v10905_v23  ;;  %6166 = vmatprep.subr.bf16.mxu0 %v10910_v19  ;;  %v10940_v23 = vld [vmem:[%s16255_s3 + $0x5c4] ss:$52 sps:$4 sm:$0xff]   ;;  %v10938_v19 = vld [vmem:[%s16255_s3 + $0x5c0] ss:$52 sps:$4 sm:$0xff]  }
 0x1be   :  { %6207 = vmatprep.subr.bf16.mxu1 %v10913_v37  ;;  %v10941_v37 = vld [vmem:[%s16255_s3 + $0xc40] ss:$52 sps:$4 sm:$0xff]  }
 0x1c0   :  { %6167 = vmatpush1.bf16.msra.mxu0 %v10908_v17  ;;  %v10943_v17 = vld [vmem:[%s16255_s3 + $0xc44] ss:$52 sps:$4 sm:$0xff]  }
 0x1c1   :  { %6208 = vmatpush1.bf16.msra.mxu1 %v10911_v38  ;;  %6168 = vmatprep.subr.bf16.mxu0 %v10916_v43  ;;  %v10946_v38 = vld [vmem:[%s16255_s3 + $0x55c] ss:$52 sps:$4 sm:$0xff]   ;;  %v13210_v43 = vpop.permute.xlu1 %7219 }
 0x1c2   :  { %6209 = vmatprep.subr.bf16.mxu1 %v10919_v54  ;;  %v10944_v54 = vld [vmem:[%s16255_s3 + $0x558] ss:$52 sps:$4 sm:$0xff]  }
 0x1c4   :  { %6169 = vmatpush1.bf16.msra.mxu0 %v10914_v46  ;;  %v10949_v46 = vld [vmem:[%s16255_s3 + $0xbdc] ss:$52 sps:$4 sm:$0xff]  }
 0x1c5   :  { %6210 = vmatpush1.bf16.msra.mxu1 %v10917_v52  ;;  %6170 = vmatprep.subr.bf16.mxu0 %v10922_v58  ;;  %v10947_v52 = vld [vmem:[%s16255_s3 + $0xbd8] ss:$52 sps:$4 sm:$0xff]   ;;  %v10952_v58 = vld [vmem:[%s16255_s3 + $0x4f4] ss:$52 sps:$4 sm:$0xff]  }
 0x1c6   :  { %6211 = vmatprep.subr.bf16.mxu1 %v10925_v63  ;;  %v13227_v63 = vpop.permute.xlu1 %7229 }
 0x1c8   :  { %6171 = vmatpush1.bf16.msra.mxu0 %v10920_v62  ;;  %v10955_v62 = vld [vmem:[%s16255_s3 + $0xb74] ss:$52 sps:$4 sm:$0xff]  }
 0x1c9   :  { %6212 = vmatpush1.bf16.msra.mxu1 %v10923_v12  ;;  %6172 = vmatprep.subr.bf16.mxu0 %v10928_v4  ;;  %v10950_v12 = vld [vmem:[%s16255_s3 + $0x4f0] ss:$52 sps:$4 sm:$0xff]  }
 0x1ca   :  { %6213 = vmatprep.subr.bf16.mxu1 %v10931_v28  ;;  %v10953_v4 = vld [vmem:[%s16255_s3 + $0xb70] ss:$52 sps:$4 sm:$0xff]   ;;  %v10961_v28 = vld [vmem:[%s16255_s3 + $0xb0c] ss:$52 sps:$4 sm:$0xff]  }
 0x1cc   :  { %6173 = vmatpush1.bf16.msra.mxu0 %v10926_v25  ;;  %v10958_v25 = vld [vmem:[%s16255_s3 + $0x48c] ss:$52 sps:$4 sm:$0xff]  }
 0x1cd   :  { %6214 = vmatpush1.bf16.msra.mxu1 %v10929_v29  ;;  %6174 = vmatprep.subr.bf16.mxu0 %v10934_v30  ;;  %v10956_v29 = vld [vmem:[%s16255_s3 + $0x488] ss:$52 sps:$4 sm:$0xff]  }
 0x1ce   :  { %6215 = vmatprep.subr.bf16.mxu1 %v10937_v32  ;;  %v10959_v30 = vld [vmem:[%s16255_s3 + $0xb08] ss:$52 sps:$4 sm:$0xff]   ;;  %v13250_v32 = vpop.permute.xlu1 %7233 }
 0x1d0   :  { %6175 = vmatpush2.bf16.msra.mxu0 %v10932_v31  ;;  %v10964_v31 = vld [vmem:[%s16255_s3 + $0x424] ss:$52 sps:$4 sm:$0xff]  }
 0x1d1   :  { %6216 = vmatpush2.bf16.msra.mxu1 %v10935_v24  ;;  %6176 = vmatprep.subr.bf16.mxu0 %v10940_v23  ;;  %v10967_v24 = vld [vmem:[%s16255_s3 + $0xaa4] ss:$52 sps:$4 sm:$0xff]   ;;  %v10962_v23 = vld [vmem:[%s16255_s3 + $0x420] ss:$52 sps:$4 sm:$0xff]  }
 0x1d2   :  { %6217 = vmatprep.subr.bf16.mxu1 %v10943_v17  ;;  %v10970_v17 = vld [vmem:[%s16255_s3 + $0x3bc] ss:$52 sps:$4 sm:$0xff]  }
 0x1d4   :  { %6177 = vmatpush2.bf16.msra.mxu0 %v10938_v19  ;;  %v10965_v19 = vld [vmem:[%s16255_s3 + $0xaa0] ss:$52 sps:$4 sm:$0xff]  }
 0x1d5   :  { %6218 = vmatpush2.bf16.msra.mxu1 %v10941_v37  ;;  %6178 = vmatprep.subr.bf16.mxu0 %v10946_v38  ;;  %v10973_v37 = vld [vmem:[%s16255_s3 + $0xa3c] ss:$52 sps:$4 sm:$0xff]   ;;  %v13270_v38 = vld [vmem:[%s16260_s4] sm:$0xff] }
 0x1d6   :  { %6219 = vmatprep.subr.bf16.mxu1 %v10949_v46  ;;  %v13272_v46 = vpop.permute.xlu1 %7293  ;;  %v5776_v21 = vrot.slane %v13270_v38, %v12331_v13 }
 0x1d8   :  { %6179 = vmatpush2.bf16.msra.mxu0 %v10944_v54  ;;  %v10968_v54 = vld [vmem:[%s16255_s3 + $0x3b8] ss:$52 sps:$4 sm:$0xff]  }
 0x1d9   :  { %6220 = vmatpush2.bf16.msra.mxu1 %v10947_v52  ;;  %6180 = vmatprep.subr.bf16.mxu0 %v10952_v58  ;;  %v10971_v52 = vld [vmem:[%s16255_s3 + $0xa38] ss:$52 sps:$4 sm:$0xff]   ;;  %v10976_v58 = vld [vmem:[%s16255_s3 + $0x354] ss:$52 sps:$4 sm:$0xff]  }
 0x1da   :  { %6221 = vmatprep.subr.bf16.mxu1 %v10955_v62  ;;  %v5768_v62 = vrot.slane %v13270_v38, %v12328_v11 }
 0x1dc   :  { %6181 = vmatpush2.bf16.msra.mxu0 %v10950_v12  ;;  %v10979_v12 = vld [vmem:[%s16255_s3 + $0x9d4] ss:$52 sps:$4 sm:$0xff]  }
 0x1dd   :  { %6222 = vmatpush2.bf16.msra.mxu1 %v10953_v4  ;;  %6182 = vmatprep.subr.bf16.mxu0 %v10958_v25  ;;  %v10974_v4 = vld [vmem:[%s16255_s3 + $0x350] ss:$52 sps:$4 sm:$0xff]   ;;  %v5772_v25 = vrot.slane %v13270_v38, %v12334_v14 }
 0x1de   :  { %6223 = vmatprep.subr.bf16.mxu1 %v10961_v28  ;;  %v10977_v28 = vld [vmem:[%s16255_s3 + $0x9d0] ss:$52 sps:$4 sm:$0xff]  }
 0x1e0   :  { %6183 = vmatpush2.bf16.msra.mxu0 %v10956_v29  ;;  %v10982_v29 = vld [vmem:[%s16255_s3 + $0xfec] ss:$52 sps:$4 sm:$0xff]  }
 0x1e1   :  { %6224 = vmatpush2.bf16.msra.mxu1 %v10959_v30  ;;  %6184 = vmatprep.subr.bf16.mxu0 %v10964_v31  ;;  %v13299_v30 = vpop.permute.xlu1 %7297  ;;  %v5865_v31 = vadd.f32 %v13084_v61, %v5768_v62 }
 0x1e2   :  { %6225 = vmatprep.subr.bf16.mxu1 %v10967_v24  ;;  %v10985_v24 = vld [vmem:[%s16255_s3 + $0x166c] ss:$52 sps:$4 sm:$0xff]  }
 0x1e3   :  { %v5906_v61 = vadd.f32 %v13093_v16, %v5865_v31  ;;  %v10986_v16 = vld [vmem:[%s16255_s3 + $0xf80] ss:$52 sps:$4 sm:$0xff]   ;;  %v10994_v31 = vld [vmem:[%s16255_s3 + $0xf1c] ss:$52 sps:$4 sm:$0xff]  }
 0x1e4   :  { %6185 = vmatpush2.bf16.msra.mxu0 %v10962_v23  ;;  %v10980_v23 = vld [vmem:[%s16255_s3 + $0xfe8] ss:$52 sps:$4 sm:$0xff]  }
 0x1e5   :  { %6226 = vmatpush2.bf16.msra.mxu1 %v10965_v19  ;;  %6186 = vmatprep.subr.bf16.mxu0 %v10970_v17  ;;  %v5867_v19 = vadd.f32 %v13102_v18, %v5772_v25  ;;  %v10983_v17 = vld [vmem:[%s16255_s3 + $0x1668] ss:$52 sps:$4 sm:$0xff]   ;;  %v10991_v18 = vld [vmem:[%s16255_s3 + $0x1604] ss:$52 sps:$4 sm:$0xff]   ;;  %v10989_v25 = vld [vmem:[%s16255_s3 + $0x1600] ss:$52 sps:$4 sm:$0xff]  }
 0x1e6   :  { %6227 = vmatprep.subr.bf16.mxu1 %v10973_v37  ;;  %v10988_v37 = vld [vmem:[%s16255_s3 + $0xf84] ss:$52 sps:$4 sm:$0xff]  }
 0x1e8   :  { %6187 = vmatpush2.bf16.msra.mxu0 %v10968_v54 }
 0x1e9   :  { %6228 = vmatpush2.bf16.msra.mxu1 %v10971_v52  ;;  %6188 = vmatprep.subr.bf16.mxu0 %v10976_v58  ;;  %v13320_v52 = vpop.permute.xlu1 %7371 }
 0x1ea   :  { %6229 = vmatprep.subr.bf16.mxu1 %v10979_v12  ;;  %v5908_v12 = vadd.f32 %v13105_v20, %v5867_v19  ;;  %v10997_v20 = vld [vmem:[%s16255_s3 + $0x159c] ss:$52 sps:$4 sm:$0xff]  }
 0x1ec   :  { %6189 = vmatpush2.bf16.msra.mxu0 %v10974_v4 }
 0x1ed   :  { %6230 = vmatpush2.bf16.msra.mxu1 %v10977_v28  ;;  %6240 = vmatprep.subr.bf16.mxu0 %v10982_v29 }
 0x1ee   :  { %6281 = vmatprep.subr.bf16.mxu1 %v10985_v24 }
 0x1ef   :  { %v5946_v54 = vpop.f32.mrf.mxu0  ;;  %6191 = vmatmul.mubr.bf16.vlgmr.msra.gmra.mxu0 %v12377_v44  ;;  %v5987_v62 = vpop.f32.mrf.mxu1 }
 0x1f0   :  { %v5947_v58 = vadd.f32 %v5946_v54, %v5906_v61  ;;  %6232 = vmatmul.mubr.bf16.vlgmr.msra.gmra.mxu1 %v12369_v40  ;;  %6241 = vmatpush1.bf16.msra.mxu0 %v10980_v23  ;;  %v13350_v54 = vpop.permute.xlu1 %7375 }
 0x1f1   :  { %6272 = vmatprep.mubr.bf16.mxu0 %v12500_v42  ;;  %6282 = vmatpush1.bf16.msra.mxu1 %v10983_v17  ;;  %v5948_v4 = vpop.f32.mrf.mxu0  ;;  %v5989_v29 = vpop.f32.mrf.mxu1  ;;  %v10992_v17 = vld [vmem:[%s16255_s3 + $0xf18] ss:$52 sps:$4 sm:$0xff]  }
 0x1f2   :  { %v13331_v28 = vadd.f32 %v5987_v62, %v5947_v58  ;;  %6313 = vmatprep.mubr.bf16.mxu1 %v12509_v48  ;;  %6242 = vmatprep.subr.bf16.mxu0 %v10988_v37  ;;  %v5949_v24 = vadd.f32 %v5948_v4, %v5908_v12  ;;  %v10995_v37 = vld [vmem:[%s16255_s3 + $0x1598] ss:$52 sps:$4 sm:$0xff]   ;;  %v11000_v58 = vld [vmem:[%s16255_s3 + $0xeb4] ss:$52 sps:$4 sm:$0xff]   ;;  %v10998_v12 = vld [vmem:[%s16255_s3 + $0xeb0] ss:$52 sps:$4 sm:$0xff]  }
 0x1f3   :  { %v5950_v23 = vpop.f32.mrf.mxu0  ;;  %6283 = vmatprep.subr.bf16.mxu1 %v10991_v18  ;;  %v5991_v19 = vpop.f32.mrf.mxu1  ;;  %v11003_v62 = vld [vmem:[%s16255_s3 + $0x1534] ss:$52 sps:$4 sm:$0xff]   ;;  %v11001_v4 = vld [vmem:[%s16255_s3 + $0x1530] ss:$52 sps:$4 sm:$0xff]  }
 0x1f4   :  { %6243 = vmatpush1.bf16.msra.mxu0 %v10986_v16  ;;  %7097 = vrot.lane.b32.xlu0 %v13331_v28, %s16291_s18  ;;  %v13358_v16 = vadd.f32 %v5989_v29, %v5949_v24  ;;  %v11009_v29 = vld [vmem:[%s16255_s3 + $0x14cc] ss:$52 sps:$4 sm:$0xff]   ;;  %v11007_v23 = vld [vmem:[%s16255_s3 + $0x14c8] ss:$52 sps:$4 sm:$0xff]   ;;  %v11012_v19 = vld [vmem:[%s16255_s3 + $0xde4] ss:$52 sps:$4 sm:$0xff]  }
 0x1f5   :  { %6284 = vmatpush1.bf16.msra.mxu1 %v10989_v25  ;;  %7032 = vrot.lane.b32.xlu1 %v13331_v28, %s11819_s21  ;;  %v5951_v61 = vpop.f32.mrf.mxu0  ;;  %v5992_v18 = vpop.f32.mrf.mxu1  ;;  %v11006_v25 = vld [vmem:[%s16255_s3 + $0xe4c] ss:$52 sps:$4 sm:$0xff]  }
 0x1f6   :  { %6244 = vmatprep.subr.bf16.mxu0 %v10994_v31  ;;  %6285 = vmatprep.subr.bf16.mxu1 %v10997_v20  ;;  %v13374_v31 = vpop.permute.xlu1 %7449  ;;  %v11004_v20 = vld [vmem:[%s16255_s3 + $0xe48] ss:$52 sps:$4 sm:$0xff]   ;;  %v11010_v61 = vld [vmem:[%s16255_s3 + $0xde0] ss:$52 sps:$4 sm:$0xff]  }
 0x1f7   :  { %v13382_v24 = vld [vmem:[%s16259_s7 + $0x8] sm:$0xff] }
 0x1f8   :  { %6245 = vmatpush1.bf16.msra.mxu0 %v10992_v17  ;;  %v11015_v17 = vld [vmem:[%s16255_s3 + $0x1464] ss:$52 sps:$4 sm:$0xff]  }
 0x1f9   :  { %6286 = vmatpush1.bf16.msra.mxu1 %v10995_v37  ;;  %7099 = vrot.lane.b32.xlu1 %v13358_v16, %s16291_s18  ;;  %v11013_v37 = vld [vmem:[%s16255_s3 + $0x1460] ss:$52 sps:$4 sm:$0xff]  }
 0x1fa   :  { %6246 = vmatprep.subr.bf16.mxu0 %v11000_v58  ;;  %6287 = vmatprep.subr.bf16.mxu1 %v11003_v62  ;;  %v13402_v18 = vpop.permute.xlu1 %7453  ;;  %v11018_v58 = vld [vmem:[%s16255_s3 + $0xd7c] ss:$52 sps:$4 sm:$0xff]  }
 0x1fb   :  { %v11021_v62 = vld [vmem:[%s16255_s3 + $0x13fc] ss:$52 sps:$4 sm:$0xff]  }
 0x1fc   :  { %6247 = vmatpush1.bf16.msra.mxu0 %v10998_v12  ;;  %v11016_v12 = vld [vmem:[%s16255_s3 + $0xd78] ss:$52 sps:$4 sm:$0xff]  }
 0x1fd   :  { %6288 = vmatpush1.bf16.msra.mxu1 %v11001_v4  ;;  %8127 = vperm.xlu1 %10447, %v13382_v24   ;;  %v11019_v4 = vld [vmem:[%s16255_s3 + $0x13f8] ss:$52 sps:$4 sm:$0xff]  }
 0x1fe   :  { %6248 = vmatprep.subr.bf16.mxu0 %v11006_v25  ;;  %6289 = vmatprep.subr.bf16.mxu1 %v11009_v29  ;;  %v11024_v25 = vld [vmem:[%s16255_s3 + $0xd14] ss:$52 sps:$4 sm:$0xff]  }
 0x1ff   :  { %v11027_v29 = vld [vmem:[%s16255_s3 + $0x1394] ss:$52 sps:$4 sm:$0xff]  }
 0x200   :  { %6249 = vmatpush1.bf16.msra.mxu0 %v11004_v20  ;;  %v13425_v20 = vpop.permute.xlu1 %7527 }
 0x201   :  { %6290 = vmatpush1.bf16.msra.mxu1 %v11007_v23  ;;  %7252 = vrot.lane.b32.xlu1 %v13358_v16, %s11820_s0  ;;  %16307 = vst [vmem:[#allocation4_spill] sm:$0xff] %v13425_v20  ;;  %v11022_v23 = vld [vmem:[%s16255_s3 + $0xd10] ss:$52 sps:$4 sm:$0xff]  }
 0x202   :  { %6250 = vmatprep.subr.bf16.mxu0 %v11012_v19  ;;  %6291 = vmatprep.subr.bf16.mxu1 %v11015_v17  ;;  %v11025_v19 = vld [vmem:[%s16255_s3 + $0x1390] ss:$52 sps:$4 sm:$0xff]   ;;  %v11030_v17 = vld [vmem:[%s16255_s3 + $0x132c] ss:$52 sps:$4 sm:$0xff]  }
 0x203   :  { %10450 = vset.pattern.permute.xlu1 %v16264_v3  ;;  %v11069_v3 = vld [vmem:[%s16255_s3 + $0x173c] ss:$52 sps:$4 sm:$0xff]  }
 0x204   :  { %6251 = vmatpush1.bf16.msra.mxu0 %v11010_v61  ;;  %v11033_v61 = vld [vmem:[%s16255_s3 + $0x19ac] ss:$52 sps:$4 sm:$0xff]  }
 0x205   :  { %6292 = vmatpush1.bf16.msra.mxu1 %v11013_v37  ;;  %7317 = vrot.lane.b32.xlu1 %v13358_v16, %s11821_s12  ;;  %v11028_v37 = vld [vmem:[%s16255_s3 + $0x1328] ss:$52 sps:$4 sm:$0xff]  }
 0x206   :  { %6252 = vmatprep.subr.bf16.mxu0 %v11018_v58  ;;  %6293 = vmatprep.subr.bf16.mxu1 %v11021_v62  ;;  %v11031_v58 = vld [vmem:[%s16255_s3 + $0x19a8] ss:$52 sps:$4 sm:$0xff]   ;;  %v11036_v62 = vld [vmem:[%s16255_s3 + $0x12c4] ss:$52 sps:$4 sm:$0xff]  }
 0x208   :  { %6253 = vmatpush1.bf16.msra.mxu0 %v11016_v12  ;;  %v13448_v12 = vpop.permute.xlu1 %7531 }
 0x209   :  { %6294 = vmatpush1.bf16.msra.mxu1 %v11019_v4  ;;  %6254 = vmatprep.subr.bf16.mxu0 %v11024_v25  ;;  %16308 = vst [vmem:[#allocation5_spill] sm:$0xff] %v13448_v12  ;;  %v11039_v4 = vld [vmem:[%s16255_s3 + $0x1944] ss:$52 sps:$4 sm:$0xff]   ;;  %v11034_v25 = vld [vmem:[%s16255_s3 + $0x12c0] ss:$52 sps:$4 sm:$0xff]  }
 0x20a   :  { %6295 = vmatprep.subr.bf16.mxu1 %v11027_v29  ;;  %v11037_v29 = vld [vmem:[%s16255_s3 + $0x1940] ss:$52 sps:$4 sm:$0xff]  }
 0x20c   :  { %6255 = vmatpush1.bf16.msra.mxu0 %v11022_v23  ;;  %v11042_v23 = vld [vmem:[%s16255_s3 + $0x125c] ss:$52 sps:$4 sm:$0xff]  }
 0x20d   :  { %6296 = vmatpush1.bf16.msra.mxu1 %v11025_v19  ;;  %6256 = vmatprep.subr.bf16.mxu0 %v11030_v17  ;;  %v6979_v19 = vsel %vm6978_vm0, %v13331_v28, 0.0  ;;  %v11045_v17 = vld [vmem:[%s16255_s3 + $0x18dc] ss:$52 sps:$4 sm:$0xff]  }
 0x20e   :  { %6297 = vmatprep.subr.bf16.mxu1 %v11033_v61  ;;  %v13467_v61 = vpop.permute.xlu1 %7605 }
 0x210   :  { %6257 = vmatpush2.bf16.msra.mxu0 %v11028_v37  ;;  %v11040_v37 = vld [vmem:[%s16255_s3 + $0x1258] ss:$52 sps:$4 sm:$0xff]  }
 0x211   :  { %6298 = vmatpush2.bf16.msra.mxu1 %v11031_v58  ;;  %6258 = vmatprep.subr.bf16.mxu0 %v11036_v62  ;;  %v11043_v58 = vld [vmem:[%s16255_s3 + $0x18d8] ss:$52 sps:$4 sm:$0xff]   ;;  %v11048_v62 = vld [vmem:[%s16255_s3 + $0x11f4] ss:$52 sps:$4 sm:$0xff]  }
 0x212   :  { %6299 = vmatprep.subr.bf16.mxu1 %v11039_v4  ;;  %v11051_v4 = vld [vmem:[%s16255_s3 + $0x1874] ss:$52 sps:$4 sm:$0xff]  }
 0x213   :  { %6980 = vadd.xlane.f32.xlu0 %v6979_v19  ;;  %v13490_v19 = vpop.permute.xlu1 %7609 }
 0x214   :  { %6259 = vmatpush2.bf16.msra.mxu0 %v11034_v25  ;;  %v11046_v25 = vld [vmem:[%s16255_s3 + $0x11f0] ss:$52 sps:$4 sm:$0xff]   ;;  %16309 = vst [vmem:[#allocation6_spill] sm:$0xff] %v13490_v19 }
 0x215   :  { %6300 = vmatpush2.bf16.msra.mxu1 %v11037_v29  ;;  %6260 = vmatprep.subr.bf16.mxu0 %v11042_v23  ;;  %v11049_v29 = vld [vmem:[%s16255_s3 + $0x1870] ss:$52 sps:$4 sm:$0xff]   ;;  %v11054_v23 = vld [vmem:[%s16255_s3 + $0x118c] ss:$52 sps:$4 sm:$0xff]  }
 0x216   :  { %6301 = vmatprep.subr.bf16.mxu1 %v11045_v17  ;;  %v11057_v17 = vld [vmem:[%s16255_s3 + $0x180c] ss:$52 sps:$4 sm:$0xff]  }
 0x218   :  { %6261 = vmatpush2.bf16.msra.mxu0 %v11040_v37  ;;  %v11052_v37 = vld [vmem:[%s16255_s3 + $0x1188] ss:$52 sps:$4 sm:$0xff]  }
 0x219   :  { %6302 = vmatpush2.bf16.msra.mxu1 %v11043_v58  ;;  %6262 = vmatprep.subr.bf16.mxu0 %v11048_v62  ;;  %v11055_v58 = vld [vmem:[%s16255_s3 + $0x1808] ss:$52 sps:$4 sm:$0xff]   ;;  %v11060_v62 = vld [vmem:[%s16255_s3 + $0x1124] ss:$52 sps:$4 sm:$0xff]  }
 0x21a   :  { %6303 = vmatprep.subr.bf16.mxu1 %v11051_v4  ;;  %v11063_v4 = vld [vmem:[%s16255_s3 + $0x17a4] ss:$52 sps:$4 sm:$0xff]  }
 0x21c   :  { %6263 = vmatpush2.bf16.msra.mxu0 %v11046_v25  ;;  %v13507_v25 = vpop.permute.xlu1 %7659 }
 0x21d   :  { %6304 = vmatpush2.bf16.msra.mxu1 %v11049_v29  ;;  %6264 = vmatprep.subr.bf16.mxu0 %v11054_v23  ;;  %v11058_v29 = vld [vmem:[%s16255_s3 + $0x1120] ss:$52 sps:$4 sm:$0xff]  }
 0x21e   :  { %6305 = vmatprep.subr.bf16.mxu1 %v11057_v17  ;;  %v11061_v23 = vld [vmem:[%s16255_s3 + $0x17a0] ss:$52 sps:$4 sm:$0xff]   ;;  %v11066_v17 = vld [vmem:[%s16255_s3 + $0x10bc] ss:$52 sps:$4 sm:$0xff]  }
 0x220   :  { %6265 = vmatpush2.bf16.msra.mxu0 %v11052_v37  ;;  %v11064_v37 = vld [vmem:[%s16255_s3 + $0x10b8] ss:$52 sps:$4 sm:$0xff]  }
 0x221   :  { %6306 = vmatpush2.bf16.msra.mxu1 %v11055_v58  ;;  %6266 = vmatprep.subr.bf16.mxu0 %v11060_v62  ;;  %v11067_v58 = vld [vmem:[%s16255_s3 + $0x1738] ss:$52 sps:$4 sm:$0xff]   ;;  %v13527_v62 = vpop.permute.xlu1 %7673 }
 0x222   :  { %6307 = vmatprep.subr.bf16.mxu1 %v11063_v4  ;;  %16310 = vst [vmem:[#allocation7_spill] sm:$0xff] %v13527_v62  ;;  %v11072_v4 = vld [vmem:[%s16255_s3 + $0x1054] ss:$52 sps:$4 sm:$0xff]  }
 0x224   :  { %6267 = vmatpush2.bf16.msra.mxu0 %v11058_v29  ;;  %v11075_v29 = vld [vmem:[%s16255_s3 + $0x16d4] ss:$52 sps:$4 sm:$0xff]  }
 0x225   :  { %6308 = vmatpush2.bf16.msra.mxu1 %v11061_v23  ;;  %6268 = vmatprep.subr.bf16.mxu0 %v11066_v17  ;;  %v11070_v23 = vld [vmem:[%s16255_s3 + $0x1050] ss:$52 sps:$4 sm:$0xff]   ;;  %v11078_v17 = vld [vmem:[%s16255_s3 + $0x2f4] ss:$52 sps:$4 sm:$0xff]  }
 0x226   :  { %6309 = vmatprep.subr.bf16.mxu1 %v11069_v3  ;;  %v11073_v3 = vld [vmem:[%s16255_s3 + $0x16d0] ss:$52 sps:$4 sm:$0xff]  }
 0x228   :  { %6269 = vmatpush2.bf16.msra.mxu0 %v11064_v37  ;;  %v11081_v37 = vld [vmem:[%s16255_s3 + $0x974] ss:$52 sps:$4 sm:$0xff]  }
 0x229   :  { %6310 = vmatpush2.bf16.msra.mxu1 %v11067_v58  ;;  %7188 = vrot.lane.b32.xlu0 %v13358_v16, %s11822_s26  ;;  %v13551_v58 = vpop.permute.xlu1 %7735 }
 0x22a   :  { %6270 = vmatprep.subr.bf16.mxu0 %v11072_v4  ;;  %6311 = vmatprep.subr.bf16.mxu1 %v11075_v29  ;;  %16312 = vst [vmem:[#allocation9_spill] sm:$0xff] %v13551_v58  ;;  %v11079_v4 = vld [vmem:[%s16255_s3 + $0x970] ss:$52 sps:$4 sm:$0xff]   ;;  %v5780_v29 = vrot.slane %v13270_v38, %v12337_v15 }
 0x22c   :  { %6271 = vmatpush2.bf16.msra.mxu0 %v11070_v23  ;;  %v11084_v23 = vld [vmem:[%s16255_s3 + $0x28c] ss:$52 sps:$4 sm:$0xff]  }
 0x22d   :  { %6312 = vmatpush2.bf16.msra.mxu1 %v11073_v3  ;;  %6322 = vmatprep.subr.bf16.mxu0 %v11078_v17  ;;  %v11087_v3 = vld [vmem:[%s16255_s3 + $0x90c] ss:$52 sps:$4 sm:$0xff]   ;;  %v13573_v17 = vpop.permute.xlu0 %7283 }
 0x22e   :  { %6363 = vmatprep.subr.bf16.mxu1 %v11081_v37  ;;  %8123 = vperm.xlu0 %10448, %v11788_v34  }
 0x22f   :  { %v6028_v59 = vpop.f32.mrf.mxu0  ;;  %6273 = vmatmul.mubr.bf16.vlgmr.msra.gmra.mxu0 %v12640_v53 }
 0x230   :  { %v6029_v37 = vadd.f32 %v6028_v59, %v5776_v21  ;;  %v6069_v38 = vpop.f32.mrf.mxu1  ;;  %6314 = vmatmul.mubr.bf16.vlgmr.msra.gmra.mxu1 %v12634_v49  ;;  %6323 = vmatpush1.bf16.msra.mxu0 %v11076_v36  ;;  %v11090_v59 = vld [vmem:[%s16255_s3 + $0x224] ss:$52 sps:$4 sm:$0xff]   ;;  %v13586_v21 = vpop.permute.xlu1 %7747 }
 0x231   :  { %6354 = vmatprep.mubr.bf16.mxu0 %v12371_v41  ;;  %6364 = vmatpush1.bf16.msra.mxu1 %v11079_v4  ;;  %v6030_v10 = vpop.f32.mrf.mxu0  ;;  %16313 = vst [vmem:[#allocation10_spill] sm:$0xff] %v13586_v21  ;;  %v11093_v4 = vld [vmem:[%s16255_s3 + $0x8a4] ss:$52 sps:$4 sm:$0xff]  }
 0x232   :  { %v13588_v47 = vadd.f32 %v6069_v38, %v6029_v37  ;;  %6395 = vmatprep.mubr.bf16.mxu1 %v12379_v45  ;;  %v6031_v36 = vadd.f32 %v6030_v10, %v5780_v29  ;;  %v6071_v57 = vpop.f32.mrf.mxu1  ;;  %6324 = vmatprep.subr.bf16.mxu0 %v11084_v23  ;;  %v11088_v37 = vld [vmem:[%s16255_s3 + $0x220] ss:$52 sps:$4 sm:$0xff]  }
 0x233   :  { %v6032_v5 = vpop.f32.mrf.mxu0  ;;  %6365 = vmatprep.subr.bf16.mxu1 %v11087_v3  ;;  %10449 = vset.pattern.permute.xlu0 %v11803_v39  ;;  %v11091_v29 = vld [vmem:[%s16255_s3 + $0x8a0] ss:$52 sps:$4 sm:$0xff]   ;;  %v11096_v39 = vld [vmem:[%s16255_s3 + $0x1bc] ss:$52 sps:$4 sm:$0xff]  }
 0x234   :  { %v13595_v50 = vadd.f32 %v6071_v57, %v6031_v36  ;;  %v6073_v1 = vpop.f32.mrf.mxu1  ;;  %6325 = vmatpush1.bf16.msra.mxu0 %v11082_v51  ;;  %7073 = vperm.xlu0 %10449, %v11788_v34   ;;  %v13606_v57 = vpop.permute.xlu0 %7359  ;;  %v11099_v5 = vld [vmem:[%s16255_s3 + $0x83c] ss:$52 sps:$4 sm:$0xff]   ;;  %v11097_v51 = vld [vmem:[%s16255_s3 + $0x838] ss:$52 sps:$4 sm:$0xff]   ;;  %v11102_v23 = vld [vmem:[%s16255_s3 + $0x154] ss:$52 sps:$4 sm:$0xff]  }
 0x235   :  { %6366 = vmatpush1.bf16.msra.mxu1 %v11085_v0  ;;  %v6033_v10 = vpop.f32.mrf.mxu0  ;;  %6326 = vmatprep.subr.bf16.mxu0 %v11090_v59  ;;  %v13611_v34 = vpop.permute.xlu1 %7751  ;;  %v11094_v0 = vld [vmem:[%s16255_s3 + $0x1b8] ss:$52 sps:$4 sm:$0xff]   ;;  %v11105_v3 = vld [vmem:[%s16255_s3 + $0x7d4] ss:$52 sps:$4 sm:$0xff]   ;;  %v11103_v59 = vld [vmem:[%s16255_s3 + $0x7d0] ss:$52 sps:$4 sm:$0xff]  }
 0x236   :  { %v6074_v1 = vpop.f32.mrf.mxu1  ;;  %6367 = vmatprep.subr.bf16.mxu1 %v11093_v4  ;;  %16314 = vst [vmem:[#allocation11_spill] sm:$0xff] %v13611_v34  ;;  %v11108_v36 = vld [vmem:[%s16255_s3 + $0xec] ss:$52 sps:$4 sm:$0xff]   ;;  %v11106_v10 = vld [vmem:[%s16255_s3 + $0xe8] ss:$52 sps:$4 sm:$0xff]  }
 0x238   :  { %6327 = vmatpush1.bf16.msra.mxu0 %v11088_v37  ;;  %7077 = vperm.xlu0 %10449, %v13382_v24   ;;  %v13626_v38 = vpop.permute.xlu0 %7439  ;;  %v11100_v24 = vld [vmem:[%s16255_s3 + $0x150] ss:$52 sps:$4 sm:$0xff]   ;;  %v11111_v37 = vld [vmem:[%s16255_s3 + $0x76c] ss:$52 sps:$4 sm:$0xff]  }
 0x239   :  { %6368 = vmatpush1.bf16.msra.mxu1 %v11091_v29  ;;  %6328 = vmatprep.subr.bf16.mxu0 %v11096_v39  ;;  %v13637_v4 = vpop.permute.xlu1 %7889  ;;  %v11109_v29 = vld [vmem:[%s16255_s3 + $0x768] ss:$52 sps:$4 sm:$0xff]   ;;  %v11114_v39 = vld [vmem:[%s16255_s3 + $0x84] ss:$52 sps:$4 sm:$0xff]  }
 0x23a   :  { %6369 = vmatprep.subr.bf16.mxu1 %v11099_v5  ;;  %16315 = vst [vmem:[#allocation12_spill] sm:$0xff] %v13637_v4  ;;  %v11117_v5 = vld [vmem:[%s16255_s3 + $0x704] ss:$52 sps:$4 sm:$0xff]  }
 0x23c   :  { %6329 = vmatpush1.bf16.msra.mxu0 %v11094_v0  ;;  %v13651_v1 = vpop.permute.xlu0 %7515 }
 0x23d   :  { %6370 = vmatpush1.bf16.msra.mxu1 %v11097_v51  ;;  %6330 = vmatprep.subr.bf16.mxu0 %v11102_v23  ;;  %v13656_v0 = vpop.permute.xlu1 %7893  ;;  %v11112_v51 = vld [vmem:[%s16255_s3 + $0x80] ss:$52 sps:$4 sm:$0xff]  }
 0x23e   :  { %6371 = vmatprep.subr.bf16.mxu1 %v11105_v3  ;;  %16316 = vst [vmem:[#allocation13_spill] sm:$0xff] %v13656_v0  ;;  %v11115_v23 = vld [vmem:[%s16255_s3 + $0x700] ss:$52 sps:$4 sm:$0xff]   ;;  %v11120_v3 = vld [vmem:[%s16255_s3 + $0x1c] ss:$52 sps:$4 sm:$0xff]  }
 0x240   :  { %6331 = vmatpush1.bf16.msra.mxu0 %v11100_v24  ;;  %v11123_v24 = vld [vmem:[%s16255_s3 + $0x69c] ss:$52 sps:$4 sm:$0xff]  }
 0x241   :  { %6372 = vmatpush1.bf16.msra.mxu1 %v11103_v59  ;;  %6332 = vmatprep.subr.bf16.mxu0 %v11108_v36  ;;  %v13670_v59 = vpop.permute.xlu0 %7595  ;;  %v11118_v36 = vld [vmem:[%s16255_s3 + $0x18] ss:$52 sps:$4 sm:$0xff]  }
 0x242   :  { %6373 = vmatprep.subr.bf16.mxu1 %v11111_v37  ;;  %v11121_v37 = vld [vmem:[%s16255_s3 + $0x698] ss:$52 sps:$4 sm:$0xff]  }
 0x244   :  { %6333 = vmatpush1.bf16.msra.mxu0 %v11106_v10  ;;  %v11126_v10 = vld [vmem:[%s16255_s3 + $0x634] ss:$52 sps:$4 sm:$0xff]  }
 0x245   :  { %6374 = vmatpush1.bf16.msra.mxu1 %v11109_v29  ;;  %6334 = vmatprep.subr.bf16.mxu0 %v11114_v39  ;;  %v13681_v29 = vpop.permute.xlu1 %7967  ;;  %v11129_v39 = vld [vmem:[%s16255_s3 + $0xcb4] ss:$52 sps:$4 sm:$0xff]  }
 0x246   :  { %6375 = vmatprep.subr.bf16.mxu1 %v11117_v5  ;;  %16317 = vst [vmem:[#allocation14_spill] sm:$0xff] %v13681_v29  ;;  %v11124_v5 = vld [vmem:[%s16255_s3 + $0x630] ss:$52 sps:$4 sm:$0xff]  }
 0x248   :  { %6335 = vmatpush1.bf16.msra.mxu0 %v11112_v51  ;;  %v11127_v51 = vld [vmem:[%s16255_s3 + $0xcb0] ss:$52 sps:$4 sm:$0xff]  }
 0x249   :  { %6376 = vmatpush1.bf16.msra.mxu1 %v11115_v23  ;;  %6336 = vmatprep.subr.bf16.mxu0 %v11120_v3  ;;  %v13692_v23 = vpop.permute.xlu0 %7669  ;;  %v11132_v3 = vld [vmem:[%s16255_s3 + $0x5cc] ss:$52 sps:$4 sm:$0xff]  }
 0x24a   :  { %6377 = vmatprep.subr.bf16.mxu1 %v11123_v24  ;;  %16318 = vst [vmem:[#allocation15_spill] sm:$0xff] %v13692_v23  ;;  %v11135_v24 = vld [vmem:[%s16255_s3 + $0xc4c] ss:$52 sps:$4 sm:$0xff]  }
 0x24c   :  { %6337 = vmatpush1.bf16.msra.mxu0 %v11118_v36  ;;  %v13700_v36 = vpop.permute.xlu1 %7971 }
 0x24d   :  { %6378 = vmatpush1.bf16.msra.mxu1 %v11121_v37  ;;  %6338 = vmatprep.subr.bf16.mxu0 %v11126_v10  ;;  %16319 = vst [vmem:[#allocation16_spill] sm:$0xff] %v13700_v36  ;;  %v11130_v37 = vld [vmem:[%s16255_s3 + $0x5c8] ss:$52 sps:$4 sm:$0xff]  }
 0x24e   :  { %6379 = vmatprep.subr.bf16.mxu1 %v11129_v39  ;;  %v11133_v10 = vld [vmem:[%s16255_s3 + $0xc48] ss:$52 sps:$4 sm:$0xff]   ;;  %v11138_v39 = vld [vmem:[%s16255_s3 + $0x564] ss:$52 sps:$4 sm:$0xff]  }
 0x250   :  { %6339 = vmatpush2.bf16.msra.mxu0 %v11124_v5  ;;  %v13714_v5 = vpop.permute.xlu0 %7815  ;;  %v13722_v6 = vpop.permute.xlu1 %8045 }
 0x251   :  { %6380 = vmatpush2.bf16.msra.mxu1 %v11127_v51  ;;  %6340 = vmatprep.subr.bf16.mxu0 %v11132_v3  ;;  %16320 = vst [vmem:[#allocation17_spill] sm:$0xff] %v13714_v5  ;;  %v11136_v51 = vld [vmem:[%s16255_s3 + $0x560] ss:$52 sps:$4 sm:$0xff]   ;;  %16321 = vst [vmem:[#allocation18_spill] sm:$0xff] %v13722_v6 }
 0x252   :  { %6381 = vmatprep.subr.bf16.mxu1 %v11135_v24  ;;  %v11139_v3 = vld [vmem:[%s16255_s3 + $0xbe0] ss:$52 sps:$4 sm:$0xff]   ;;  %v11144_v24 = vld [vmem:[%s16255_s3 + $0x4fc] ss:$52 sps:$4 sm:$0xff]  }
 0x254   :  { %6341 = vmatpush2.bf16.msra.mxu0 %v11130_v37  ;;  %v11147_v37 = vld [vmem:[%s16255_s3 + $0xb7c] ss:$52 sps:$4 sm:$0xff]   ;;  %v13744_v2 = vpop.permute.xlu1 %8049 }
 0x255   :  { %6382 = vmatpush2.bf16.msra.mxu1 %v11133_v10  ;;  %6342 = vmatprep.subr.bf16.mxu0 %v11138_v39  ;;  %v11142_v10 = vld [vmem:[%s16255_s3 + $0x4f8] ss:$52 sps:$4 sm:$0xff]   ;;  %v13733_v39 = vpop.permute.xlu0 %7879  ;;  %16323 = vst [vmem:[#allocation20_spill] sm:$0xff] %v13744_v2 }
 0x256   :  { %6383 = vmatprep.subr.bf16.mxu1 %v11141_v26  ;;  %16322 = vst [vmem:[#allocation19_spill] sm:$0xff] %v13733_v39  ;;  %v11150_v26 = vld [vmem:[%s16255_s3 + $0x494] ss:$52 sps:$4 sm:$0xff]  }
 0x258   :  { %6343 = vmatpush2.bf16.msra.mxu0 %v11136_v51  ;;  %v11153_v51 = vld [vmem:[%s16255_s3 + $0xb14] ss:$52 sps:$4 sm:$0xff]  }
 0x259   :  { %6384 = vmatpush2.bf16.msra.mxu1 %v11139_v3  ;;  %6344 = vmatprep.subr.bf16.mxu0 %v11144_v24  ;;  %v11148_v3 = vld [vmem:[%s16255_s3 + $0x490] ss:$52 sps:$4 sm:$0xff]  }
 0x25a   :  { %6385 = vmatprep.subr.bf16.mxu1 %v11147_v37  ;;  %v11151_v24 = vld [vmem:[%s16255_s3 + $0xb10] ss:$52 sps:$4 sm:$0xff]   ;;  %v11156_v37 = vld [vmem:[%s16255_s3 + $0x42c] ss:$52 sps:$4 sm:$0xff]  }
 0x25c   :  { %6345 = vmatpush2.bf16.msra.mxu0 %v11142_v10  ;;  %v13758_v10 = vpop.permute.xlu0 %7955 }
 0x25d   :  { %6386 = vmatpush2.bf16.msra.mxu1 %v11145_v7  ;;  %6346 = vmatprep.subr.bf16.mxu0 %v11150_v26  ;;  %16324 = vst [vmem:[#allocation21_spill] sm:$0xff] %v13758_v10  ;;  %v11154_v7 = vld [vmem:[%s16255_s3 + $0x428] ss:$52 sps:$4 sm:$0xff]   ;;  %v13763_v26 = vpop.permute.xlu1 %8111 }
 0x25e   :  { %6387 = vmatprep.subr.bf16.mxu1 %v11153_v51  ;;  %16325 = vst [vmem:[#allocation22_spill] sm:$0xff] %v13763_v26  ;;  %v11162_v51 = vld [vmem:[%s16255_s3 + $0x3c4] ss:$52 sps:$4 sm:$0xff]  }
 0x260   :  { %6347 = vmatpush2.bf16.msra.mxu0 %v11148_v3  ;;  %v11165_v3 = vld [vmem:[%s16255_s3 + $0xa44] ss:$52 sps:$4 sm:$0xff]   ;;  %v13777_v60 = vpop.permute.xlu0 %8035 }
 0x261   :  { %6388 = vmatpush2.bf16.msra.mxu1 %v11151_v24  ;;  %6348 = vmatprep.subr.bf16.mxu0 %v11156_v37  ;;  %v11160_v24 = vld [vmem:[%s16255_s3 + $0x3c0] ss:$52 sps:$4 sm:$0xff]   ;;  %16326 = vst [vmem:[#allocation23_spill] sm:$0xff] %v13777_v60 }
 0x262   :  { %6389 = vmatprep.subr.bf16.mxu1 %v11159_v27  ;;  %v11163_v37 = vld [vmem:[%s16255_s3 + $0xa40] ss:$52 sps:$4 sm:$0xff]   ;;  %v11168_v27 = vld [vmem:[%s16255_s3 + $0x35c] ss:$52 sps:$4 sm:$0xff]  }
 0x264   :  { %6349 = vmatpush2.bf16.msra.mxu0 %v11154_v7  ;;  %v11171_v7 = vld [vmem:[%s16255_s3 + $0x9dc] ss:$52 sps:$4 sm:$0xff]  }
 0x265   :  { %6390 = vmatpush2.bf16.msra.mxu1 %v11157_v56  ;;  %6350 = vmatprep.subr.bf16.mxu0 %v11162_v51  ;;  %v11166_v56 = vld [vmem:[%s16255_s3 + $0x358] ss:$52 sps:$4 sm:$0xff]  }
 0x266   :  { %6391 = vmatprep.subr.bf16.mxu1 %v11165_v3  ;;  %v11169_v51 = vld [vmem:[%s16255_s3 + $0x9d8] ss:$52 sps:$4 sm:$0xff]   ;;  %v11174_v3 = vld [vmem:[%s16255_s3 + $0xff4] ss:$52 sps:$4 sm:$0xff]  }
 0x267   :  { %v7033_v26 = vpop.permute.xlu1 %7032 }
 0x268   :  { %6351 = vmatpush2.bf16.msra.mxu0 %v11160_v24  ;;  %v7035_v36 = vsel %vm6978_vm0, %v7033_v26, 0.0  ;;  %v11177_v26 = vld [vmem:[%s16255_s3 + $0x1674] ss:$52 sps:$4 sm:$0xff]   ;;  %v7098_v24 = vpop.permute.xlu0 %7097 }
 0x269   :  { %6392 = vmatpush2.bf16.msra.mxu1 %v11163_v37  ;;  %7036 = vadd.xlane.f32.xlu1 %v7035_v36  ;;  %v11172_v37 = vld [vmem:[%s16255_s3 + $0xff0] ss:$52 sps:$4 sm:$0xff]  }
 0x26a   :  { %6352 = vmatprep.subr.bf16.mxu0 %v11168_v27  ;;  %6393 = vmatprep.subr.bf16.mxu1 %v11171_v7  ;;  %v11175_v27 = vld [vmem:[%s16255_s3 + $0x1670] ss:$52 sps:$4 sm:$0xff]   ;;  %v11180_v7 = vld [vmem:[%s16255_s3 + $0xf8c] ss:$52 sps:$4 sm:$0xff]  }
 0x26b   :  { %v7100_v29 = vpop.permute.xlu1 %7099 }
 0x26c   :  { %6353 = vmatpush2.bf16.msra.mxu0 %v11166_v56  ;;  %v7102_v36 = vsel %vm7101_vm1, %v7098_v24, %v7100_v29  ;;  %v11183_v29 = vld [vmem:[%s16255_s3 + $0x160c] ss:$52 sps:$4 sm:$0xff]   ;;  %v11181_v24 = vld [vmem:[%s16255_s3 + $0x1608] ss:$52 sps:$4 sm:$0xff]  }
 0x26d   :  { %6394 = vmatpush2.bf16.msra.mxu1 %v11169_v51  ;;  %v7104_v2 = vsel %vm6978_vm0, %v7102_v36, 0.0  ;;  %6404 = vmatprep.subr.bf16.mxu0 %v11174_v3 }
 0x26e   :  { %7105 = vadd.xlane.f32.xlu0 %v7104_v2  ;;  %6445 = vmatprep.subr.bf16.mxu1 %v11177_v26  ;;  %v11178_v2 = vld [vmem:[%s16255_s3 + $0xf88] ss:$52 sps:$4 sm:$0xff]  }
 0x26f   :  { %v6110_v56 = vpop.f32.mrf.mxu0  ;;  %6355 = vmatmul.mubr.bf16.vlgmr.msra.gmra.mxu0 %v12377_v44 }
 0x270   :  { %v6111_v51 = vadd.f32 %v6110_v56, %v13588_v47  ;;  %v6151_v3 = vpop.f32.mrf.mxu1  ;;  %6396 = vmatmul.mubr.bf16.vlgmr.msra.gmra.mxu1 %v12369_v40  ;;  %6405 = vmatpush1.bf16.msra.mxu0 %v11172_v37  ;;  %v11186_v47 = vld [vmem:[%s16255_s3 + $0xf24] ss:$52 sps:$4 sm:$0xff]  }
 0x271   :  { %6436 = vmatprep.mubr.bf16.mxu0 %v12500_v42  ;;  %6446 = vmatpush1.bf16.msra.mxu1 %v11175_v27  ;;  %v6112_v26 = vpop.f32.mrf.mxu0  ;;  %v11189_v27 = vld [vmem:[%s16255_s3 + $0x15a4] ss:$52 sps:$4 sm:$0xff]  }
 0x272   :  { %v13828_v36 = vadd.f32 %v6151_v3, %v6111_v51  ;;  %6477 = vmatprep.mubr.bf16.mxu1 %v12509_v48  ;;  %v6113_v37 = vadd.f32 %v6112_v26, %v13595_v50  ;;  %v6153_v56 = vpop.f32.mrf.mxu1  ;;  %6406 = vmatprep.subr.bf16.mxu0 %v11180_v7  ;;  %v11184_v51 = vld [vmem:[%s16255_s3 + $0xf20] ss:$52 sps:$4 sm:$0xff]  }
 0x273   :  { %v6114_v6 = vpop.f32.mrf.mxu0  ;;  %6447 = vmatprep.subr.bf16.mxu1 %v11183_v29  ;;  %v11187_v50 = vld [vmem:[%s16255_s3 + $0x15a0] ss:$52 sps:$4 sm:$0xff]   ;;  %v11190_v29 = vld [vmem:[%s16255_s3 + $0xeb8] ss:$52 sps:$4 sm:$0xff]  }
 0x274   :  { %v13835_v10 = vadd.f32 %v6153_v56, %v6113_v37  ;;  %v6155_v34 = vpop.f32.mrf.mxu1  ;;  %6407 = vmatpush1.bf16.msra.mxu0 %v11178_v2  ;;  %v11192_v6 = vld [vmem:[%s16255_s3 + $0xebc] ss:$52 sps:$4 sm:$0xff]   ;;  %v11193_v2 = vld [vmem:[%s16255_s3 + $0x1538] ss:$52 sps:$4 sm:$0xff]   ;;  %v11198_v26 = vld [vmem:[%s16255_s3 + $0xe54] ss:$52 sps:$4 sm:$0xff]  }
 0x275   :  { %6448 = vmatpush1.bf16.msra.mxu1 %v11181_v24  ;;  %v6115_v3 = vpop.f32.mrf.mxu0  ;;  %6408 = vmatprep.subr.bf16.mxu0 %v11186_v47  ;;  %v11195_v34 = vld [vmem:[%s16255_s3 + $0x153c] ss:$52 sps:$4 sm:$0xff]   ;;  %v11201_v24 = vld [vmem:[%s16255_s3 + $0x14d4] ss:$52 sps:$4 sm:$0xff]   ;;  %v11204_v56 = vld [vmem:[%s16255_s3 + $0xdec] ss:$52 sps:$4 sm:$0xff]  }
 0x276   :  { %v6156_v7 = vpop.f32.mrf.mxu1  ;;  %6449 = vmatprep.subr.bf16.mxu1 %v11189_v27  ;;  %v11196_v47 = vld [vmem:[%s16255_s3 + $0xe50] ss:$52 sps:$4 sm:$0xff]   ;;  %v11207_v27 = vld [vmem:[%s16255_s3 + $0x146c] ss:$52 sps:$4 sm:$0xff]   ;;  %v11205_v3 = vld [vmem:[%s16255_s3 + $0x1468] ss:$52 sps:$4 sm:$0xff]  }
 0x277   :  { %v11199_v37 = vld [vmem:[%s16255_s3 + $0x14d0] ss:$52 sps:$4 sm:$0xff]   ;;  %v11208_v7 = vld [vmem:[%s16255_s3 + $0xd80] ss:$52 sps:$4 sm:$0xff]  }
 0x278   :  { %6409 = vmatpush1.bf16.msra.mxu0 %v11184_v51  ;;  %v11202_v51 = vld [vmem:[%s16255_s3 + $0xde8] ss:$52 sps:$4 sm:$0xff]  }
 0x279   :  { %6450 = vmatpush1.bf16.msra.mxu1 %v11187_v50  ;;  %6410 = vmatprep.subr.bf16.mxu0 %v11192_v6  ;;  %v11210_v50 = vld [vmem:[%s16255_s3 + $0xd84] ss:$52 sps:$4 sm:$0xff]  }
 0x27a   :  { %6451 = vmatprep.subr.bf16.mxu1 %v11195_v34  ;;  %v11213_v6 = vld [vmem:[%s16255_s3 + $0x1404] ss:$52 sps:$4 sm:$0xff]   ;;  %v11211_v34 = vld [vmem:[%s16255_s3 + $0x1400] ss:$52 sps:$4 sm:$0xff]  }
 0x27c   :  { %6411 = vmatpush1.bf16.msra.mxu0 %v11190_v29  ;;  %v11216_v29 = vld [vmem:[%s16255_s3 + $0xd1c] ss:$52 sps:$4 sm:$0xff]  }
 0x27d   :  { %6452 = vmatpush1.bf16.msra.mxu1 %v11193_v2  ;;  %6412 = vmatprep.subr.bf16.mxu0 %v11198_v26  ;;  %v11219_v2 = vld [vmem:[%s16255_s3 + $0x139c] ss:$52 sps:$4 sm:$0xff]   ;;  %v11214_v26 = vld [vmem:[%s16255_s3 + $0xd18] ss:$52 sps:$4 sm:$0xff]  }
 0x27e   :  { %6453 = vmatprep.subr.bf16.mxu1 %v11201_v24  ;;  %v11217_v24 = vld [vmem:[%s16255_s3 + $0x1398] ss:$52 sps:$4 sm:$0xff]  }
 0x280   :  { %6413 = vmatpush1.bf16.msra.mxu0 %v11196_v47  ;;  %v11222_v47 = vld [vmem:[%s16255_s3 + $0x1334] ss:$52 sps:$4 sm:$0xff]  }
 0x281   :  { %6454 = vmatpush1.bf16.msra.mxu1 %v11199_v37  ;;  %6414 = vmatprep.subr.bf16.mxu0 %v11204_v56  ;;  %v11225_v37 = vld [vmem:[%s16255_s3 + $0x19b4] ss:$52 sps:$4 sm:$0xff]   ;;  %v11220_v56 = vld [vmem:[%s16255_s3 + $0x1330] ss:$52 sps:$4 sm:$0xff]  }
 0x282   :  { %6455 = vmatprep.subr.bf16.mxu1 %v11207_v27  ;;  %v11223_v27 = vld [vmem:[%s16255_s3 + $0x19b0] ss:$52 sps:$4 sm:$0xff]  }
 0x284   :  { %6415 = vmatpush1.bf16.msra.mxu0 %v11202_v51  ;;  %v11228_v51 = vld [vmem:[%s16255_s3 + $0x12cc] ss:$52 sps:$4 sm:$0xff]  }
 0x285   :  { %6456 = vmatpush1.bf16.msra.mxu1 %v11205_v3  ;;  %6416 = vmatprep.subr.bf16.mxu0 %v11210_v50  ;;  %v11231_v3 = vld [vmem:[%s16255_s3 + $0x194c] ss:$52 sps:$4 sm:$0xff]   ;;  %v11226_v50 = vld [vmem:[%s16255_s3 + $0x12c8] ss:$52 sps:$4 sm:$0xff]  }
 0x286   :  { %6457 = vmatprep.subr.bf16.mxu1 %v11213_v6  ;;  %v11229_v6 = vld [vmem:[%s16255_s3 + $0x1948] ss:$52 sps:$4 sm:$0xff]  }
 0x288   :  { %6417 = vmatpush1.bf16.msra.mxu0 %v11208_v7  ;;  %v11234_v7 = vld [vmem:[%s16255_s3 + $0x1264] ss:$52 sps:$4 sm:$0xff]  }
 0x289   :  { %6458 = vmatpush1.bf16.msra.mxu1 %v11211_v34  ;;  %6418 = vmatprep.subr.bf16.mxu0 %v11216_v29  ;;  %v11237_v34 = vld [vmem:[%s16255_s3 + $0x18e4] ss:$52 sps:$4 sm:$0xff]   ;;  %v11232_v29 = vld [vmem:[%s16255_s3 + $0x1260] ss:$52 sps:$4 sm:$0xff]  }
 0x28a   :  { %6459 = vmatprep.subr.bf16.mxu1 %v11219_v2  ;;  %v11235_v2 = vld [vmem:[%s16255_s3 + $0x18e0] ss:$52 sps:$4 sm:$0xff]  }
 0x28c   :  { %6419 = vmatpush1.bf16.msra.mxu0 %v11214_v26  ;;  %v11240_v26 = vld [vmem:[%s16255_s3 + $0x11fc] ss:$52 sps:$4 sm:$0xff]  }
 0x28d   :  { %6460 = vmatpush1.bf16.msra.mxu1 %v11217_v24  ;;  %6420 = vmatprep.subr.bf16.mxu0 %v11222_v47  ;;  %v11243_v24 = vld [vmem:[%s16255_s3 + $0x187c] ss:$52 sps:$4 sm:$0xff]   ;;  %v11238_v47 = vld [vmem:[%s16255_s3 + $0x11f8] ss:$52 sps:$4 sm:$0xff]  }
 0x28e   :  { %6461 = vmatprep.subr.bf16.mxu1 %v11225_v37  ;;  %v11241_v37 = vld [vmem:[%s16255_s3 + $0x1878] ss:$52 sps:$4 sm:$0xff]  }
 0x290   :  { %6421 = vmatpush2.bf16.msra.mxu0 %v11220_v56  ;;  %v11246_v56 = vld [vmem:[%s16255_s3 + $0x1194] ss:$52 sps:$4 sm:$0xff]  }
 0x291   :  { %6462 = vmatpush2.bf16.msra.mxu1 %v11223_v27  ;;  %6422 = vmatprep.subr.bf16.mxu0 %v11228_v51  ;;  %v11249_v27 = vld [vmem:[%s16255_s3 + $0x1814] ss:$52 sps:$4 sm:$0xff]   ;;  %v13957_v51 = vpop.permute.xlu1 %8127 }
 0x292   :  { %6463 = vmatprep.subr.bf16.mxu1 %v11231_v3  ;;  %16327 = vst [vmem:[#allocation24_spill] sm:$0xff] %v13957_v51 }
 0x294   :  { %6423 = vmatpush2.bf16.msra.mxu0 %v11226_v50  ;;  %v11244_v50 = vld [vmem:[%s16255_s3 + $0x1190] ss:$52 sps:$4 sm:$0xff]  }
 0x295   :  { %6464 = vmatpush2.bf16.msra.mxu1 %v11229_v6  ;;  %6424 = vmatprep.subr.bf16.mxu0 %v11234_v7  ;;  %v11247_v7 = vld [vmem:[%s16255_s3 + $0x1810] ss:$52 sps:$4 sm:$0xff]  }
 0x296   :  { %6465 = vmatprep.subr.bf16.mxu1 %v11237_v34  ;;  %v11252_v34 = vld [vmem:[%s16255_s3 + $0x112c] ss:$52 sps:$4 sm:$0xff]  }
 0x298   :  { %6425 = vmatpush2.bf16.msra.mxu0 %v11232_v29  ;;  %v11255_v29 = vld [vmem:[%s16255_s3 + $0x17ac] ss:$52 sps:$4 sm:$0xff]  }
 0x299   :  { %6466 = vmatpush2.bf16.msra.mxu1 %v11235_v2  ;;  %6426 = vmatprep.subr.bf16.mxu0 %v11240_v26 }
 0x29a   :  { %6467 = vmatprep.subr.bf16.mxu1 %v11243_v24  ;;  %v11250_v24 = vld [vmem:[%s16255_s3 + $0x1128] ss:$52 sps:$4 sm:$0xff]  }
 0x29c   :  { %6427 = vmatpush2.bf16.msra.mxu0 %v11238_v47  ;;  %v6981_v3 = vpop.xlane.xlu0 %6980 }
 0x29d   :  { %6468 = vmatpush2.bf16.msra.mxu1 %v11241_v37  ;;  %v6982_v6 = vmul.f32 0.020408163, %v6981_v3  ;;  %6428 = vmatprep.subr.bf16.mxu0 %v11246_v56  ;;  %v11253_v37 = vld [vmem:[%s16255_s3 + $0x17a8] ss:$52 sps:$4 sm:$0xff]   ;;  %v7253_v3 = vpop.permute.xlu1 %7252 }
 0x29e   :  { %6469 = vmatprep.subr.bf16.mxu1 %v11249_v27  ;;  %v11258_v27 = vld [vmem:[%s16255_s3 + $0x10c4] ss:$52 sps:$4 sm:$0xff]  }
 0x29f   :  { %v13972_v2 = vsub.f32 %v13331_v28, %v6982_v6 }
 0x2a0   :  { %6429 = vmatpush2.bf16.msra.mxu0 %v11244_v50  ;;  %v7189_v26 = vpop.permute.xlu0 %7188  ;;  %v11261_v50 = vld [vmem:[%s16255_s3 + $0x1744] ss:$52 sps:$4 sm:$0xff]  }
 0x2a1   :  { %16328 = vst [vmem:[#allocation25_spill] sm:$0xff] %v13972_v2  ;;  %6470 = vmatpush2.bf16.msra.mxu1 %v11247_v7  ;;  %v7191_v47 = vsel %vm6978_vm0, %v7189_v26, 0.0  ;;  %6430 = vmatprep.subr.bf16.mxu0 %v11252_v34  ;;  %v6984_v56 = vmul.f32 %v13972_v2, %v13972_v2  ;;  %v11256_v7 = vld [vmem:[%s16255_s3 + $0x10c0] ss:$52 sps:$4 sm:$0xff]   ;;  %v7255_v34 = vsel %vm6978_vm0, %v7253_v3, 0.0 }
 0x2a2   :  { %7192 = vadd.xlane.f32.xlu1 %v7191_v47  ;;  %6471 = vmatprep.subr.bf16.mxu1 %v11255_v29  ;;  %v11259_v29 = vld [vmem:[%s16255_s3 + $0x1740] ss:$52 sps:$4 sm:$0xff]   ;;  %v11264_v26 = vld [vmem:[%s16255_s3 + $0x105c] ss:$52 sps:$4 sm:$0xff]   ;;  %v11262_v47 = vld [vmem:[%s16255_s3 + $0x1058] ss:$52 sps:$4 sm:$0xff]  }
 0x2a3   :  { %v6985_v6 = vsel %vm6978_vm0, %v6984_v56, 0.0  ;;  %v11270_v56 = vld [vmem:[%s16255_s3 + $0x2fc] ss:$52 sps:$4 sm:$0xff]   ;;  %v14018_v3 = vld [vmem:[%s16260_s4] sm:$0xff] }
 0x2a4   :  { %6431 = vmatpush2.bf16.msra.mxu0 %v11250_v24  ;;  %6986 = vadd.xlane.f32.xlu0 %v6985_v6  ;;  %v11267_v24 = vld [vmem:[%s16255_s3 + $0x16dc] ss:$52 sps:$4 sm:$0xff]   ;;  %v11268_v6 = vld [vmem:[%s16255_s3 + $0x2f8] ss:$52 sps:$4 sm:$0xff]  }
 0x2a5   :  { %6472 = vmatpush2.bf16.msra.mxu1 %v11253_v37  ;;  %6432 = vmatprep.subr.bf16.mxu0 %v11258_v27  ;;  %v11265_v37 = vld [vmem:[%s16255_s3 + $0x16d8] ss:$52 sps:$4 sm:$0xff]   ;;  %v11273_v27 = vld [vmem:[%s16255_s3 + $0x97c] ss:$52 sps:$4 sm:$0xff]  }
 0x2a6   :  { %7256 = vadd.xlane.f32.xlu1 %v7255_v34  ;;  %6473 = vmatprep.subr.bf16.mxu1 %v11261_v50  ;;  %v5784_v50 = vrot.slane %v14018_v3, %v12566_v8  ;;  %v16329_v34 = vsub.s32 5, %v12320_v9  ;;  %v11277_v2 = vld [vmem:[%s16255_s3 + $0x910] ss:$52 sps:$4 sm:$0xff]  }
 0x2a8   :  { %6433 = vmatpush2.bf16.msra.mxu0 %v11256_v7  ;;  %v11271_v7 = vld [vmem:[%s16255_s3 + $0x978] ss:$52 sps:$4 sm:$0xff]  }
 0x2a9   :  { %6474 = vmatpush2.bf16.msra.mxu1 %v11259_v29  ;;  %6434 = vmatprep.subr.bf16.mxu0 %v11264_v26  ;;  %v5788_v29 = vrot.slane %v14018_v3, %v16329_v34  ;;  %v11276_v26 = vld [vmem:[%s16255_s3 + $0x294] ss:$52 sps:$4 sm:$0xff]  }
 0x2aa   :  { %6475 = vmatprep.subr.bf16.mxu1 %v11267_v24 }
 0x2ac   :  { %6435 = vmatpush2.bf16.msra.mxu0 %v11262_v47  ;;  %v11279_v47 = vld [vmem:[%s16255_s3 + $0x914] ss:$52 sps:$4 sm:$0xff]  }
 0x2ad   :  { %6476 = vmatpush2.bf16.msra.mxu1 %v11265_v37  ;;  %6486 = vmatprep.subr.bf16.mxu0 %v11270_v56 }
 0x2ae   :  { %6527 = vmatprep.subr.bf16.mxu1 %v11273_v27  ;;  %v11274_v27 = vld [vmem:[%s16255_s3 + $0x290] ss:$52 sps:$4 sm:$0xff]  }
 0x2af   :  { %v6192_v24 = vpop.f32.mrf.mxu0  ;;  %6437 = vmatmul.mubr.bf16.vlgmr.msra.gmra.mxu0 %v12640_v53 }
 0x2b0   :  { %v6193_v37 = vadd.f32 %v6192_v24, %v5784_v50  ;;  %v6233_v56 = vpop.f32.mrf.mxu1  ;;  %6478 = vmatmul.mubr.bf16.vlgmr.msra.gmra.mxu1 %v12634_v49  ;;  %6487 = vmatpush1.bf16.msra.mxu0 %v11268_v6  ;;  %v11282_v50 = vld [vmem:[%s16255_s3 + $0x22c] ss:$52 sps:$4 sm:$0xff]  }
 0x2b1   :  { %6518 = vmatprep.mubr.bf16.mxu0 %v12371_v41  ;;  %6528 = vmatpush1.bf16.msra.mxu1 %v11271_v7  ;;  %v6194_v34 = vpop.f32.mrf.mxu0  ;;  %v11285_v7 = vld [vmem:[%s16255_s3 + $0x8ac] ss:$52 sps:$4 sm:$0xff]  }
 0x2b2   :  { %v14049_v24 = vadd.f32 %v6233_v56, %v6193_v37  ;;  %6559 = vmatprep.mubr.bf16.mxu1 %v12379_v45  ;;  %v6195_v6 = vadd.f32 %v6194_v34, %v5788_v29  ;;  %v6235_v51 = vpop.f32.mrf.mxu1  ;;  %6488 = vmatprep.subr.bf16.mxu0 %v11276_v26  ;;  %v11280_v37 = vld [vmem:[%s16255_s3 + $0x228] ss:$52 sps:$4 sm:$0xff]   ;;  %v11292_v34 = vld [vmem:[%s16255_s3 + $0x158] ss:$52 sps:$4 sm:$0xff]  }
 0x2b3   :  { %v6196_v60 = vpop.f32.mrf.mxu0  ;;  %6529 = vmatprep.subr.bf16.mxu1 %v11279_v47  ;;  %v11283_v29 = vld [vmem:[%s16255_s3 + $0x8a8] ss:$52 sps:$4 sm:$0xff]  }
 0x2b4   :  { %v14055_v0 = vadd.f32 %v6235_v51, %v6195_v6  ;;  %v6237_v4 = vpop.f32.mrf.mxu1  ;;  %6489 = vmatpush1.bf16.msra.mxu0 %v11274_v27  ;;  %v11288_v60 = vld [vmem:[%s16255_s3 + $0x1c4] ss:$52 sps:$4 sm:$0xff]   ;;  %v11286_v51 = vld [vmem:[%s16255_s3 + $0x1c0] ss:$52 sps:$4 sm:$0xff]   ;;  %v11294_v47 = vld [vmem:[%s16255_s3 + $0x15c] ss:$52 sps:$4 sm:$0xff]  }
 0x2b5   :  { %6530 = vmatpush1.bf16.msra.mxu1 %v11277_v2  ;;  %v6197_v56 = vpop.f32.mrf.mxu0  ;;  %6490 = vmatprep.subr.bf16.mxu0 %v11282_v50  ;;  %v11291_v4 = vld [vmem:[%s16255_s3 + $0x844] ss:$52 sps:$4 sm:$0xff]   ;;  %v11289_v2 = vld [vmem:[%s16255_s3 + $0x840] ss:$52 sps:$4 sm:$0xff]   ;;  %v11297_v27 = vld [vmem:[%s16255_s3 + $0x7dc] ss:$52 sps:$4 sm:$0xff]  }
 0x2b6   :  { %v6238_v26 = vpop.f32.mrf.mxu1  ;;  %6531 = vmatprep.subr.bf16.mxu1 %v11285_v7  ;;  %v11295_v50 = vld [vmem:[%s16255_s3 + $0x7d8] ss:$52 sps:$4 sm:$0xff]   ;;  %v11300_v6 = vld [vmem:[%s16255_s3 + $0xf4] ss:$52 sps:$4 sm:$0xff]   ;;  %v11301_v56 = vld [vmem:[%s16255_s3 + $0x770] ss:$52 sps:$4 sm:$0xff]  }
 0x2b7   :  { %7319 = vrot.lane.b32.xlu1 %v13828_v36, %s11821_s12  ;;  %v11303_v7 = vld [vmem:[%s16255_s3 + $0x774] ss:$52 sps:$4 sm:$0xff]  }
 0x2b8   :  { %6491 = vmatpush1.bf16.msra.mxu0 %v11280_v37  ;;  %v11298_v37 = vld [vmem:[%s16255_s3 + $0xf0] ss:$52 sps:$4 sm:$0xff]   ;;  %v11304_v26 = vld [vmem:[%s16255_s3 + $0x88] ss:$52 sps:$4 sm:$0xff]  }
 0x2b9   :  { %6532 = vmatpush1.bf16.msra.mxu1 %v11283_v29  ;;  %6492 = vmatprep.subr.bf16.mxu0 %v11288_v60  ;;  %v11306_v29 = vld [vmem:[%s16255_s3 + $0x8c] ss:$52 sps:$4 sm:$0xff]  }
 0x2ba   :  { %6533 = vmatprep.subr.bf16.mxu1 %v11291_v4  ;;  %v11309_v60 = vld [vmem:[%s16255_s3 + $0x70c] ss:$52 sps:$4 sm:$0xff]   ;;  %v11307_v4 = vld [vmem:[%s16255_s3 + $0x708] ss:$52 sps:$4 sm:$0xff]  }
 0x2bb   :  { %7408 = vrot.lane.b32.xlu1 %v13828_v36, %s11823_s19 }
 0x2bc   :  { %6493 = vmatpush1.bf16.msra.mxu0 %v11286_v51  ;;  %v11312_v51 = vld [vmem:[%s16255_s3 + $0x24] ss:$52 sps:$4 sm:$0xff]  }
 0x2bd   :  { %6534 = vmatpush1.bf16.msra.mxu1 %v11289_v2  ;;  %6494 = vmatprep.subr.bf16.mxu0 %v11294_v47  ;;  %v11315_v2 = vld [vmem:[%s16255_s3 + $0x6a4] ss:$52 sps:$4 sm:$0xff]   ;;  %v11310_v47 = vld [vmem:[%s16255_s3 + $0x20] ss:$52 sps:$4 sm:$0xff]  }
 0x2be   :  { %6535 = vmatprep.subr.bf16.mxu1 %v11297_v27  ;;  %v11313_v27 = vld [vmem:[%s16255_s3 + $0x6a0] ss:$52 sps:$4 sm:$0xff]  }
 0x2bf   :  { %7473 = vrot.lane.b32.xlu1 %v13828_v36, %s11824_s29 }
 0x2c0   :  { %6495 = vmatpush1.bf16.msra.mxu0 %v11292_v34  ;;  %v11318_v34 = vld [vmem:[%s16255_s3 + $0x63c] ss:$52 sps:$4 sm:$0xff]  }
 0x2c1   :  { %6536 = vmatpush1.bf16.msra.mxu1 %v11295_v50  ;;  %6496 = vmatprep.subr.bf16.mxu0 %v11300_v6  ;;  %v11321_v50 = vld [vmem:[%s16255_s3 + $0xcbc] ss:$52 sps:$4 sm:$0xff]   ;;  %v11316_v6 = vld [vmem:[%s16255_s3 + $0x638] ss:$52 sps:$4 sm:$0xff]  }
 0x2c2   :  { %6537 = vmatprep.subr.bf16.mxu1 %v11303_v7  ;;  %v11319_v7 = vld [vmem:[%s16255_s3 + $0xcb8] ss:$52 sps:$4 sm:$0xff]  }
 0x2c3   :  { %7475 = vrot.lane.b32.xlu1 %v13835_v10, %s11824_s29 }
 0x2c4   :  { %6497 = vmatpush1.bf16.msra.mxu0 %v11298_v37  ;;  %v11324_v37 = vld [vmem:[%s16255_s3 + $0x5d4] ss:$52 sps:$4 sm:$0xff]  }
 0x2c5   :  { %6538 = vmatpush1.bf16.msra.mxu1 %v11301_v56  ;;  %6498 = vmatprep.subr.bf16.mxu0 %v11306_v29  ;;  %v11327_v56 = vld [vmem:[%s16255_s3 + $0xc54] ss:$52 sps:$4 sm:$0xff]   ;;  %v11322_v29 = vld [vmem:[%s16255_s3 + $0x5d0] ss:$52 sps:$4 sm:$0xff]  }
 0x2c6   :  { %6539 = vmatprep.subr.bf16.mxu1 %v11309_v60  ;;  %v11325_v60 = vld [vmem:[%s16255_s3 + $0xc50] ss:$52 sps:$4 sm:$0xff]  }
 0x2c7   :  { %7564 = vrot.lane.b32.xlu1 %v13835_v10, %s11825_s2 }
 0x2c8   :  { %6499 = vmatpush1.bf16.msra.mxu0 %v11304_v26  ;;  %v11330_v26 = vld [vmem:[%s16255_s3 + $0x56c] ss:$52 sps:$4 sm:$0xff]  }
 0x2c9   :  { %6540 = vmatpush1.bf16.msra.mxu1 %v11307_v4  ;;  %6500 = vmatprep.subr.bf16.mxu0 %v11312_v51  ;;  %v11333_v4 = vld [vmem:[%s16255_s3 + $0xbec] ss:$52 sps:$4 sm:$0xff]   ;;  %v11328_v51 = vld [vmem:[%s16255_s3 + $0x568] ss:$52 sps:$4 sm:$0xff]  }
 0x2ca   :  { %6541 = vmatprep.subr.bf16.mxu1 %v11315_v2  ;;  %v11331_v2 = vld [vmem:[%s16255_s3 + $0xbe8] ss:$52 sps:$4 sm:$0xff]  }
 0x2cb   :  { %7628 = vrot.lane.b32.xlu1 %v13835_v10, %s11826_s17 }
 0x2cc   :  { %6501 = vmatpush1.bf16.msra.mxu0 %v11310_v47  ;;  %v11336_v47 = vld [vmem:[%s16255_s3 + $0x504] ss:$52 sps:$4 sm:$0xff]  }
 0x2cd   :  { %6542 = vmatpush1.bf16.msra.mxu1 %v11313_v27  ;;  %6502 = vmatprep.subr.bf16.mxu0 %v11318_v34  ;;  %v11339_v27 = vld [vmem:[%s16255_s3 + $0xb84] ss:$52 sps:$4 sm:$0xff]   ;;  %v11334_v34 = vld [vmem:[%s16255_s3 + $0x500] ss:$52 sps:$4 sm:$0xff]  }
 0x2ce   :  { %6543 = vmatprep.subr.bf16.mxu1 %v11321_v50  ;;  %v11337_v50 = vld [vmem:[%s16255_s3 + $0xb80] ss:$52 sps:$4 sm:$0xff]  }
 0x2cf   :  { %7693 = vrot.lane.b32.xlu1 %v13835_v10, %s11827_s10 }
 0x2d0   :  { %6503 = vmatpush2.bf16.msra.mxu0 %v11316_v6  ;;  %v11342_v6 = vld [vmem:[%s16255_s3 + $0x49c] ss:$52 sps:$4 sm:$0xff]  }
 0x2d1   :  { %6544 = vmatpush2.bf16.msra.mxu1 %v11319_v7  ;;  %6504 = vmatprep.subr.bf16.mxu0 %v11324_v37  ;;  %v11345_v7 = vld [vmem:[%s16255_s3 + $0xb1c] ss:$52 sps:$4 sm:$0xff]   ;;  %v11340_v37 = vld [vmem:[%s16255_s3 + $0x498] ss:$52 sps:$4 sm:$0xff]  }
 0x2d2   :  { %6545 = vmatprep.subr.bf16.mxu1 %v11327_v56  ;;  %v11343_v56 = vld [vmem:[%s16255_s3 + $0xb18] ss:$52 sps:$4 sm:$0xff]  }
 0x2d4   :  { %6505 = vmatpush2.bf16.msra.mxu0 %v11322_v29  ;;  %v11348_v29 = vld [vmem:[%s16255_s3 + $0x434] ss:$52 sps:$4 sm:$0xff]  }
 0x2d5   :  { %6546 = vmatpush2.bf16.msra.mxu1 %v11325_v60  ;;  %6506 = vmatprep.subr.bf16.mxu0 %v11330_v26  ;;  %v11351_v60 = vld [vmem:[%s16255_s3 + $0xab4] ss:$52 sps:$4 sm:$0xff]   ;;  %v11346_v26 = vld [vmem:[%s16255_s3 + $0x430] ss:$52 sps:$4 sm:$0xff]  }
 0x2d6   :  { %6547 = vmatprep.subr.bf16.mxu1 %v11333_v4  ;;  %v11349_v4 = vld [vmem:[%s16255_s3 + $0xab0] ss:$52 sps:$4 sm:$0xff]  }
 0x2d8   :  { %6507 = vmatpush2.bf16.msra.mxu0 %v11328_v51  ;;  %v11354_v51 = vld [vmem:[%s16255_s3 + $0x3cc] ss:$52 sps:$4 sm:$0xff]  }
 0x2d9   :  { %6548 = vmatpush2.bf16.msra.mxu1 %v11331_v2  ;;  %6508 = vmatprep.subr.bf16.mxu0 %v11336_v47  ;;  %v11357_v2 = vld [vmem:[%s16255_s3 + $0xa4c] ss:$52 sps:$4 sm:$0xff]   ;;  %v11352_v47 = vld [vmem:[%s16255_s3 + $0x3c8] ss:$52 sps:$4 sm:$0xff]  }
 0x2da   :  { %6549 = vmatprep.subr.bf16.mxu1 %v11339_v27  ;;  %v11355_v27 = vld [vmem:[%s16255_s3 + $0xa48] ss:$52 sps:$4 sm:$0xff]  }
 0x2dc   :  { %6509 = vmatpush2.bf16.msra.mxu0 %v11334_v34  ;;  %v11360_v34 = vld [vmem:[%s16255_s3 + $0x364] ss:$52 sps:$4 sm:$0xff]  }
 0x2dd   :  { %6550 = vmatpush2.bf16.msra.mxu1 %v11337_v50  ;;  %6510 = vmatprep.subr.bf16.mxu0 %v11342_v6  ;;  %v11363_v50 = vld [vmem:[%s16255_s3 + $0x9e4] ss:$52 sps:$4 sm:$0xff]   ;;  %v11358_v6 = vld [vmem:[%s16255_s3 + $0x360] ss:$52 sps:$4 sm:$0xff]  }
 0x2de   :  { %6551 = vmatprep.subr.bf16.mxu1 %v11345_v7  ;;  %v11361_v7 = vld [vmem:[%s16255_s3 + $0x9e0] ss:$52 sps:$4 sm:$0xff]  }
 0x2e0   :  { %6511 = vmatpush2.bf16.msra.mxu0 %v11340_v37  ;;  %v11366_v37 = vld [vmem:[%s16255_s3 + $0xffc] ss:$52 sps:$4 sm:$0xff]  }
 0x2e1   :  { %6552 = vmatpush2.bf16.msra.mxu1 %v11343_v56  ;;  %6512 = vmatprep.subr.bf16.mxu0 %v11348_v29  ;;  %v11369_v56 = vld [vmem:[%s16255_s3 + $0x167c] ss:$52 sps:$4 sm:$0xff]   ;;  %v11364_v29 = vld [vmem:[%s16255_s3 + $0xff8] ss:$52 sps:$4 sm:$0xff]  }
 0x2e2   :  { %6553 = vmatprep.subr.bf16.mxu1 %v11351_v60  ;;  %v11367_v60 = vld [vmem:[%s16255_s3 + $0x1678] ss:$52 sps:$4 sm:$0xff]  }
 0x2e4   :  { %6513 = vmatpush2.bf16.msra.mxu0 %v11346_v26  ;;  %v14245_v26 = vpop.permute.xlu1 %7317 }
 0x2e5   :  { %6554 = vmatpush2.bf16.msra.mxu1 %v11349_v4  ;;  %6514 = vmatprep.subr.bf16.mxu0 %v11354_v51  ;;  %v11372_v4 = vld [vmem:[%s16255_s3 + $0xf94] ss:$52 sps:$4 sm:$0xff]  }
 0x2e6   :  { %6555 = vmatprep.subr.bf16.mxu1 %v11357_v2  ;;  %v11375_v2 = vld [vmem:[%s16255_s3 + $0x1614] ss:$52 sps:$4 sm:$0xff]  }
 0x2e8   :  { %6515 = vmatpush2.bf16.msra.mxu0 %v11352_v47 }
 0x2e9   :  { %6556 = vmatpush2.bf16.msra.mxu1 %v11355_v27  ;;  %6516 = vmatprep.subr.bf16.mxu0 %v11360_v34  ;;  %v11370_v34 = vld [vmem:[%s16255_s3 + $0xf90] ss:$52 sps:$4 sm:$0xff]  }
 0x2ea   :  { %6557 = vmatprep.subr.bf16.mxu1 %v11363_v50 }
 0x2ec   :  { %6517 = vmatpush2.bf16.msra.mxu0 %v11358_v6  ;;  %v11373_v6 = vld [vmem:[%s16255_s3 + $0x1610] ss:$52 sps:$4 sm:$0xff]  }
 0x2ed   :  { %6558 = vmatpush2.bf16.msra.mxu1 %v11361_v7  ;;  %6568 = vmatprep.subr.bf16.mxu0 %v11366_v37 }
 0x2ee   :  { %6609 = vmatprep.subr.bf16.mxu1 %v11369_v56 }
 0x2ef   :  { %v6274_v51 = vpop.f32.mrf.mxu0  ;;  %6519 = vmatmul.mubr.bf16.vlgmr.msra.gmra.mxu0 %v12377_v44 }
 0x2f0   :  { %v6275_v47 = vadd.f32 %v6274_v51, %v14049_v24  ;;  %v6315_v27 = vpop.f32.mrf.mxu1  ;;  %6560 = vmatmul.mubr.bf16.vlgmr.msra.gmra.mxu1 %v12369_v40  ;;  %6569 = vmatpush1.bf16.msra.mxu0 %v11364_v29  ;;  %v11378_v24 = vld [vmem:[%s16255_s3 + $0xf2c] ss:$52 sps:$4 sm:$0xff]  }
 0x2f1   :  { %6600 = vmatprep.mubr.bf16.mxu0 %v12500_v42  ;;  %6610 = vmatpush1.bf16.msra.mxu1 %v11367_v60  ;;  %v6276_v50 = vpop.f32.mrf.mxu0  ;;  %v11381_v60 = vld [vmem:[%s16255_s3 + $0x15ac] ss:$52 sps:$4 sm:$0xff]  }
 0x2f2   :  { %v14266_v7 = vadd.f32 %v6315_v27, %v6275_v47  ;;  %6641 = vmatprep.mubr.bf16.mxu1 %v12509_v48  ;;  %v6277_v37 = vadd.f32 %v6276_v50, %v14055_v0  ;;  %v6317_v56 = vpop.f32.mrf.mxu1  ;;  %v7037_v29 = vpop.xlane.xlu1 %7036  ;;  %6570 = vmatprep.subr.bf16.mxu0 %v11372_v4  ;;  %v11376_v47 = vld [vmem:[%s16255_s3 + $0xf28] ss:$52 sps:$4 sm:$0xff]   ;;  %v11382_v50 = vld [vmem:[%s16255_s3 + $0xec0] ss:$52 sps:$4 sm:$0xff]  }
 0x2f3   :  { %v7038_v51 = vmul.f32 0.020408163, %v7037_v29  ;;  %v6278_v39 = vpop.f32.mrf.mxu0  ;;  %6611 = vmatprep.subr.bf16.mxu1 %v11375_v2  ;;  %v11379_v27 = vld [vmem:[%s16255_s3 + $0x15a8] ss:$52 sps:$4 sm:$0xff]   ;;  %v11387_v2 = vld [vmem:[%s16255_s3 + $0x1544] ss:$52 sps:$4 sm:$0xff]  }
 0x2f4   :  { %v14273_v5 = vadd.f32 %v6317_v56, %v6277_v37  ;;  %v6319_v21 = vpop.f32.mrf.mxu1  ;;  %6571 = vmatpush1.bf16.msra.mxu0 %v11370_v34  ;;  %v11393_v37 = vld [vmem:[%s16255_s3 + $0x14dc] ss:$52 sps:$4 sm:$0xff]   ;;  %v11388_v56 = vld [vmem:[%s16255_s3 + $0xe58] ss:$52 sps:$4 sm:$0xff]  }
 0x2f5   :  { %v14279_v0 = vsub.f32 %v13331_v28, %v7038_v51  ;;  %6612 = vmatpush1.bf16.msra.mxu1 %v11373_v6  ;;  %v6279_v4 = vpop.f32.mrf.mxu0  ;;  %6572 = vmatprep.subr.bf16.mxu0 %v11378_v24  ;;  %v11384_v21 = vld [vmem:[%s16255_s3 + $0xec4] ss:$52 sps:$4 sm:$0xff]   ;;  %v11385_v6 = vld [vmem:[%s16255_s3 + $0x1540] ss:$52 sps:$4 sm:$0xff]   ;;  %v11390_v24 = vld [vmem:[%s16255_s3 + $0xe5c] ss:$52 sps:$4 sm:$0xff]  }
 0x2f6   :  { %v6320_v39 = vpop.f32.mrf.mxu1  ;;  %6613 = vmatprep.subr.bf16.mxu1 %v11381_v60  ;;  %v11391_v29 = vld [vmem:[%s16255_s3 + $0x14d8] ss:$52 sps:$4 sm:$0xff]   ;;  %v11396_v60 = vld [vmem:[%s16255_s3 + $0xdf4] ss:$52 sps:$4 sm:$0xff]   ;;  %v11397_v4 = vld [vmem:[%s16255_s3 + $0x1470] ss:$52 sps:$4 sm:$0xff]  }
 0x2f7   :  { %v7040_v34 = vmul.f32 %v14279_v0, %v14279_v0  ;;  %v11399_v51 = vld [vmem:[%s16255_s3 + $0x1474] ss:$52 sps:$4 sm:$0xff]   ;;  %v11405_v39 = vld [vmem:[%s16255_s3 + $0x140c] ss:$52 sps:$4 sm:$0xff]  }
 0x2f8   :  { %6573 = vmatpush1.bf16.msra.mxu0 %v11376_v47  ;;  %v11394_v47 = vld [vmem:[%s16255_s3 + $0xdf0] ss:$52 sps:$4 sm:$0xff]  }
 0x2f9   :  { %6614 = vmatpush1.bf16.msra.mxu1 %v11379_v27  ;;  %7042 = vrot.lane.b32.xlu0 %v7040_v34, %s11819_s21  ;;  %v11402_v27 = vld [vmem:[%s16255_s3 + $0xd8c] ss:$52 sps:$4 sm:$0xff]   ;;  %v11408_v34 = vld [vmem:[%s16255_s3 + $0xd24] ss:$52 sps:$4 sm:$0xff]  }
 0x2fa   :  { %6574 = vmatprep.subr.bf16.mxu0 %v11384_v21  ;;  %6615 = vmatprep.subr.bf16.mxu1 %v11387_v2  ;;  %v11400_v21 = vld [vmem:[%s16255_s3 + $0xd88] ss:$52 sps:$4 sm:$0xff]  }
 0x2fb   :  { %v11403_v2 = vld [vmem:[%s16255_s3 + $0x1408] ss:$52 sps:$4 sm:$0xff]  }
 0x2fc   :  { %6575 = vmatpush1.bf16.msra.mxu0 %v11382_v50  ;;  %v11411_v50 = vld [vmem:[%s16255_s3 + $0x13a4] ss:$52 sps:$4 sm:$0xff]  }
 0x2fd   :  { %6616 = vmatpush1.bf16.msra.mxu1 %v11385_v6  ;;  %6576 = vmatprep.subr.bf16.mxu0 %v11390_v24  ;;  %v11406_v6 = vld [vmem:[%s16255_s3 + $0xd20] ss:$52 sps:$4 sm:$0xff]  }
 0x2fe   :  { %6617 = vmatprep.subr.bf16.mxu1 %v11393_v37  ;;  %v11409_v24 = vld [vmem:[%s16255_s3 + $0x13a0] ss:$52 sps:$4 sm:$0xff]   ;;  %v11414_v37 = vld [vmem:[%s16255_s3 + $0x133c] ss:$52 sps:$4 sm:$0xff]  }
 0x300   :  { %6577 = vmatpush1.bf16.msra.mxu0 %v11388_v56  ;;  %v11417_v56 = vld [vmem:[%s16255_s3 + $0x19bc] ss:$52 sps:$4 sm:$0xff]  }
 0x301   :  { %6618 = vmatpush1.bf16.msra.mxu1 %v11391_v29  ;;  %6578 = vmatprep.subr.bf16.mxu0 %v11396_v60  ;;  %v11412_v29 = vld [vmem:[%s16255_s3 + $0x1338] ss:$52 sps:$4 sm:$0xff]  }
 0x302   :  { %6619 = vmatprep.subr.bf16.mxu1 %v11399_v51  ;;  %v11415_v60 = vld [vmem:[%s16255_s3 + $0x19b8] ss:$52 sps:$4 sm:$0xff]   ;;  %v11420_v51 = vld [vmem:[%s16255_s3 + $0x12d4] ss:$52 sps:$4 sm:$0xff]  }
 0x304   :  { %6579 = vmatpush1.bf16.msra.mxu0 %v11394_v47  ;;  %v11423_v47 = vld [vmem:[%s16255_s3 + $0x1954] ss:$52 sps:$4 sm:$0xff]  }
 0x305   :  { %6620 = vmatpush1.bf16.msra.mxu1 %v11397_v4  ;;  %6580 = vmatprep.subr.bf16.mxu0 %v11402_v27  ;;  %v11418_v4 = vld [vmem:[%s16255_s3 + $0x12d0] ss:$52 sps:$4 sm:$0xff]  }
 0x306   :  { %6621 = vmatprep.subr.bf16.mxu1 %v11405_v39  ;;  %v11421_v27 = vld [vmem:[%s16255_s3 + $0x1950] ss:$52 sps:$4 sm:$0xff]   ;;  %v11426_v39 = vld [vmem:[%s16255_s3 + $0x126c] ss:$52 sps:$4 sm:$0xff]  }
 0x308   :  { %6581 = vmatpush1.bf16.msra.mxu0 %v11400_v21  ;;  %v11429_v21 = vld [vmem:[%s16255_s3 + $0x18ec] ss:$52 sps:$4 sm:$0xff]  }
 0x309   :  { %6622 = vmatpush1.bf16.msra.mxu1 %v11403_v2  ;;  %6582 = vmatprep.subr.bf16.mxu0 %v11408_v34  ;;  %v11424_v2 = vld [vmem:[%s16255_s3 + $0x1268] ss:$52 sps:$4 sm:$0xff]  }
 0x30a   :  { %6623 = vmatprep.subr.bf16.mxu1 %v11411_v50  ;;  %v11427_v34 = vld [vmem:[%s16255_s3 + $0x18e8] ss:$52 sps:$4 sm:$0xff]   ;;  %v11432_v50 = vld [vmem:[%s16255_s3 + $0x1204] ss:$52 sps:$4 sm:$0xff]  }
 0x30c   :  { %6583 = vmatpush1.bf16.msra.mxu0 %v11406_v6  ;;  %v11435_v6 = vld [vmem:[%s16255_s3 + $0x1884] ss:$52 sps:$4 sm:$0xff]  }
 0x30d   :  { %6624 = vmatpush1.bf16.msra.mxu1 %v11409_v24  ;;  %6584 = vmatprep.subr.bf16.mxu0 %v11414_v37  ;;  %v11430_v24 = vld [vmem:[%s16255_s3 + $0x1200] ss:$52 sps:$4 sm:$0xff]  }
 0x30e   :  { %6625 = vmatprep.subr.bf16.mxu1 %v11417_v56  ;;  %v11433_v37 = vld [vmem:[%s16255_s3 + $0x1880] ss:$52 sps:$4 sm:$0xff]   ;;  %v11438_v56 = vld [vmem:[%s16255_s3 + $0x119c] ss:$52 sps:$4 sm:$0xff]  }
 0x310   :  { %6585 = vmatpush2.bf16.msra.mxu0 %v11412_v29  ;;  %v11441_v29 = vld [vmem:[%s16255_s3 + $0x181c] ss:$52 sps:$4 sm:$0xff]  }
 0x311   :  { %6626 = vmatpush2.bf16.msra.mxu1 %v11415_v60  ;;  %6586 = vmatprep.subr.bf16.mxu0 %v11420_v51  ;;  %v11436_v60 = vld [vmem:[%s16255_s3 + $0x1198] ss:$52 sps:$4 sm:$0xff]  }
 0x312   :  { %6627 = vmatprep.subr.bf16.mxu1 %v11423_v47  ;;  %v11439_v51 = vld [vmem:[%s16255_s3 + $0x1818] ss:$52 sps:$4 sm:$0xff]   ;;  %v11444_v47 = vld [vmem:[%s16255_s3 + $0x1134] ss:$52 sps:$4 sm:$0xff]  }
 0x314   :  { %6587 = vmatpush2.bf16.msra.mxu0 %v11418_v4  ;;  %v11447_v4 = vld [vmem:[%s16255_s3 + $0x17b4] ss:$52 sps:$4 sm:$0xff]  }
 0x315   :  { %6628 = vmatpush2.bf16.msra.mxu1 %v11421_v27  ;;  %6588 = vmatprep.subr.bf16.mxu0 %v11426_v39  ;;  %v11442_v27 = vld [vmem:[%s16255_s3 + $0x1130] ss:$52 sps:$4 sm:$0xff]  }
 0x316   :  { %6629 = vmatprep.subr.bf16.mxu1 %v11429_v21  ;;  %v11445_v39 = vld [vmem:[%s16255_s3 + $0x17b0] ss:$52 sps:$4 sm:$0xff]   ;;  %v11450_v21 = vld [vmem:[%s16255_s3 + $0x10cc] ss:$52 sps:$4 sm:$0xff]  }
 0x318   :  { %6589 = vmatpush2.bf16.msra.mxu0 %v11424_v2  ;;  %v11453_v2 = vld [vmem:[%s16255_s3 + $0x174c] ss:$52 sps:$4 sm:$0xff]  }
 0x319   :  { %6630 = vmatpush2.bf16.msra.mxu1 %v11427_v34  ;;  %6590 = vmatprep.subr.bf16.mxu0 %v11432_v50  ;;  %v11448_v34 = vld [vmem:[%s16255_s3 + $0x10c8] ss:$52 sps:$4 sm:$0xff]  }
 0x31a   :  { %6631 = vmatprep.subr.bf16.mxu1 %v11435_v6  ;;  %v11451_v50 = vld [vmem:[%s16255_s3 + $0x1748] ss:$52 sps:$4 sm:$0xff]   ;;  %v11456_v6 = vld [vmem:[%s16255_s3 + $0x1064] ss:$52 sps:$4 sm:$0xff]  }
 0x31c   :  { %6591 = vmatpush2.bf16.msra.mxu0 %v11430_v24  ;;  %v11459_v24 = vld [vmem:[%s16255_s3 + $0x16e4] ss:$52 sps:$4 sm:$0xff]  }
 0x31d   :  { %6632 = vmatpush2.bf16.msra.mxu1 %v11433_v37  ;;  %6592 = vmatprep.subr.bf16.mxu0 %v11438_v56  ;;  %v11454_v37 = vld [vmem:[%s16255_s3 + $0x1060] ss:$52 sps:$4 sm:$0xff]  }
 0x31e   :  { %6633 = vmatprep.subr.bf16.mxu1 %v11441_v29  ;;  %v11457_v56 = vld [vmem:[%s16255_s3 + $0x16e0] ss:$52 sps:$4 sm:$0xff]   ;;  %v11462_v29 = vld [vmem:[%s16255_s3 + $0x304] ss:$52 sps:$4 sm:$0xff]  }
 0x320   :  { %6593 = vmatpush2.bf16.msra.mxu0 %v11436_v60  ;;  %v11465_v60 = vld [vmem:[%s16255_s3 + $0x984] ss:$52 sps:$4 sm:$0xff]  }
 0x321   :  { %6634 = vmatpush2.bf16.msra.mxu1 %v11439_v51  ;;  %6594 = vmatprep.subr.bf16.mxu0 %v11444_v47 }
 0x322   :  { %6635 = vmatprep.subr.bf16.mxu1 %v11447_v4  ;;  %v16330_v4 = vsub.s32 6, %v12320_v9 }
 0x324   :  { %6595 = vmatpush2.bf16.msra.mxu0 %v11442_v27  ;;  %v5792_v27 = vrot.slane %v14018_v3, %v16330_v4  ;;  %v11469_v4 = vld [vmem:[%s16255_s3 + $0x918] ss:$52 sps:$4 sm:$0xff]  }
 0x325   :  { %6636 = vmatpush2.bf16.msra.mxu1 %v11445_v39  ;;  %6596 = vmatprep.subr.bf16.mxu0 %v11450_v21  ;;  %v11460_v39 = vld [vmem:[%s16255_s3 + $0x300] ss:$52 sps:$4 sm:$0xff]  }
 0x326   :  { %6637 = vmatprep.subr.bf16.mxu1 %v11453_v2  ;;  %v11463_v21 = vld [vmem:[%s16255_s3 + $0x980] ss:$52 sps:$4 sm:$0xff]  }
 0x328   :  { %6597 = vmatpush2.bf16.msra.mxu0 %v11448_v34  ;;  %v16331_v34 = vsub.s32 7, %v12320_v9 }
 0x329   :  { %6638 = vmatpush2.bf16.msra.mxu1 %v11451_v50  ;;  %6598 = vmatprep.subr.bf16.mxu0 %v11456_v6 }
 0x32a   :  { %6639 = vmatprep.subr.bf16.mxu1 %v11459_v24  ;;  %v5796_v50 = vrot.slane %v14018_v3, %v16331_v34  ;;  %v11466_v3 = vld [vmem:[%s16255_s3 + $0x298] ss:$52 sps:$4 sm:$0xff]  }
 0x32b   :  { %v7193_v51 = vpop.xlane.xlu1 %7192 }
 0x32c   :  { %v7194_v47 = vmul.f32 0.020408163, %v7193_v51  ;;  %6599 = vmatpush2.bf16.msra.mxu0 %v11454_v37  ;;  %v11468_v37 = vld [vmem:[%s16255_s3 + $0x29c] ss:$52 sps:$4 sm:$0xff]  }
 0x32d   :  { %6640 = vmatpush2.bf16.msra.mxu1 %v11457_v56  ;;  %6650 = vmatprep.subr.bf16.mxu0 %v11462_v29  ;;  %v11471_v56 = vld [vmem:[%s16255_s3 + $0x91c] ss:$52 sps:$4 sm:$0xff]  }
 0x32e   :  { %v14459_v2 = vsub.f32 %v13358_v16, %v7194_v47  ;;  %6691 = vmatprep.subr.bf16.mxu1 %v11465_v60 }
 0x32f   :  { %v6356_v6 = vpop.f32.mrf.mxu0  ;;  %6601 = vmatmul.mubr.bf16.vlgmr.msra.gmra.mxu0 %v12640_v53  ;;  %v7257_v24 = vpop.xlane.xlu1 %7256 }
 0x330   :  { %v6357_v29 = vadd.f32 %v6356_v6, %v5792_v27  ;;  %v6397_v51 = vpop.f32.mrf.mxu1  ;;  %6642 = vmatmul.mubr.bf16.vlgmr.msra.gmra.mxu1 %v12634_v49  ;;  %v7258_v60 = vmul.f32 0.020408163, %v7257_v24  ;;  %6651 = vmatpush1.bf16.msra.mxu0 %v11460_v39  ;;  %v7196_v9 = vmul.f32 %v14459_v2, %v14459_v2  ;;  %v11474_v27 = vld [vmem:[%s16255_s3 + $0x234] ss:$52 sps:$4 sm:$0xff]  }
 0x331   :  { %6682 = vmatprep.mubr.bf16.mxu0 %v12371_v41  ;;  %6692 = vmatpush1.bf16.msra.mxu1 %v11463_v21  ;;  %v6358_v47 = vpop.f32.mrf.mxu0  ;;  %v11477_v21 = vld [vmem:[%s16255_s3 + $0x8b4] ss:$52 sps:$4 sm:$0xff]  }
 0x332   :  { %v14484_v39 = vadd.f32 %v6397_v51, %v6357_v29  ;;  %v14487_v34 = vsub.f32 %v13358_v16, %v7258_v60  ;;  %6723 = vmatprep.mubr.bf16.mxu1 %v12379_v45  ;;  %v6359_v6 = vadd.f32 %v6358_v47, %v5796_v50  ;;  %v6399_v24 = vpop.f32.mrf.mxu1  ;;  %7198 = vrot.lane.b32.xlu0 %v7196_v9, %s11822_s26  ;;  %v11472_v50 = vld [vmem:[%s16255_s3 + $0x230] ss:$52 sps:$4 sm:$0xff]   ;;  %v11483_v9 = vld [vmem:[%s16255_s3 + $0x84c] ss:$52 sps:$4 sm:$0xff]  }
 0x333   :  { %v6360_v58 = vpop.f32.mrf.mxu0  ;;  %6652 = vmatprep.subr.bf16.mxu0 %v11468_v37  ;;  %6693 = vmatprep.subr.bf16.mxu1 %v11471_v56  ;;  %v7320_v12 = vpop.permute.xlu1 %7319  ;;  %v11480_v56 = vld [vmem:[%s16255_s3 + $0x1cc] ss:$52 sps:$4 sm:$0xff]  }
 0x334   :  { %v14494_v20 = vadd.f32 %v6399_v24, %v6359_v6  ;;  %v6401_v29 = vpop.f32.mrf.mxu1  ;;  %6653 = vmatpush1.bf16.msra.mxu0 %v11466_v3  ;;  %v7260_v51 = vmul.f32 %v14487_v34, %v14487_v34  ;;  %v11475_v58 = vld [vmem:[%s16255_s3 + $0x8b0] ss:$52 sps:$4 sm:$0xff]   ;;  %v7322_v6 = vsel %vm7321_vm2, %v14245_v26, %v7320_v12  ;;  %v11487_v12 = vld [vmem:[%s16255_s3 + $0x7e0] ss:$52 sps:$4 sm:$0xff]  }
 0x335   :  { %6694 = vmatpush1.bf16.msra.mxu1 %v11469_v4  ;;  %v6361_v60 = vpop.f32.mrf.mxu0  ;;  %6654 = vmatprep.subr.bf16.mxu0 %v11474_v27  ;;  %v11478_v4 = vld [vmem:[%s16255_s3 + $0x1c8] ss:$52 sps:$4 sm:$0xff]   ;;  %v11486_v24 = vld [vmem:[%s16255_s3 + $0x164] ss:$52 sps:$4 sm:$0xff]  }
 0x336   :  { %v6402_v37 = vpop.f32.mrf.mxu1  ;;  %7262 = vrot.lane.b32.xlu0 %v7260_v51, %s11820_s0  ;;  %6695 = vmatprep.subr.bf16.mxu1 %v11477_v21  ;;  %v11481_v27 = vld [vmem:[%s16255_s3 + $0x848] ss:$52 sps:$4 sm:$0xff]   ;;  %v11489_v21 = vld [vmem:[%s16255_s3 + $0x7e4] ss:$52 sps:$4 sm:$0xff]   ;;  %v7324_v51 = vsel %vm6978_vm0, %v7322_v6, 0.0 }
 0x337   :  { %v7409_v3 = vpop.permute.xlu1 %7408  ;;  %v11492_v26 = vld [vmem:[%s16255_s3 + $0xfc] ss:$52 sps:$4 sm:$0xff]   ;;  %v11490_v37 = vld [vmem:[%s16255_s3 + $0xf8] ss:$52 sps:$4 sm:$0xff]  }
 0x338   :  { %6655 = vmatpush1.bf16.msra.mxu0 %v11472_v50  ;;  %v7411_v47 = vsel %vm6978_vm0, %v7409_v3, 0.0  ;;  %v11484_v50 = vld [vmem:[%s16255_s3 + $0x160] ss:$52 sps:$4 sm:$0xff]   ;;  %v11495_v60 = vld [vmem:[%s16255_s3 + $0x77c] ss:$52 sps:$4 sm:$0xff]  }
 0x339   :  { %6696 = vmatpush1.bf16.msra.mxu1 %v11475_v58  ;;  %7412 = vadd.xlane.f32.xlu1 %v7411_v47  ;;  %v11501_v3 = vld [vmem:[%s16255_s3 + $0x714] ss:$52 sps:$4 sm:$0xff]   ;;  %v11499_v6 = vld [vmem:[%s16255_s3 + $0x710] ss:$52 sps:$4 sm:$0xff]  }
 0x33a   :  { %6656 = vmatprep.subr.bf16.mxu0 %v11480_v56  ;;  %6697 = vmatprep.subr.bf16.mxu1 %v11483_v9  ;;  %v11493_v56 = vld [vmem:[%s16255_s3 + $0x778] ss:$52 sps:$4 sm:$0xff]   ;;  %v11498_v9 = vld [vmem:[%s16255_s3 + $0x94] ss:$52 sps:$4 sm:$0xff]  }
 0x33b   :  { %v7474_v29 = vpop.permute.xlu1 %7473 }
 0x33c   :  { %6657 = vmatpush1.bf16.msra.mxu0 %v11478_v4 }
 0x33d   :  { %6698 = vmatpush1.bf16.msra.mxu1 %v11481_v27  ;;  %7325 = vadd.xlane.f32.xlu1 %v7324_v51  ;;  %v11496_v27 = vld [vmem:[%s16255_s3 + $0x90] ss:$52 sps:$4 sm:$0xff]  }
 0x33e   :  { %6658 = vmatprep.subr.bf16.mxu0 %v11486_v24  ;;  %6699 = vmatprep.subr.bf16.mxu1 %v11489_v21  ;;  %v11504_v24 = vld [vmem:[%s16255_s3 + $0x2c] ss:$52 sps:$4 sm:$0xff]  }
 0x33f   :  { %v7476_v58 = vpop.permute.xlu1 %7475  ;;  %v11507_v21 = vld [vmem:[%s16255_s3 + $0x6ac] ss:$52 sps:$4 sm:$0xff]  }
 0x340   :  { %6659 = vmatpush1.bf16.msra.mxu0 %v11484_v50 }
 0x341   :  { %6700 = vmatpush1.bf16.msra.mxu1 %v11487_v12  ;;  %6660 = vmatprep.subr.bf16.mxu0 %v11492_v26  ;;  %v11502_v12 = vld [vmem:[%s16255_s3 + $0x28] ss:$52 sps:$4 sm:$0xff]   ;;  %v7478_v26 = vsel %vm7477_vm3, %v7474_v29, %v7476_v58  ;;  %v11508_v29 = vld [vmem:[%s16255_s3 + $0x640] ss:$52 sps:$4 sm:$0xff]  }
 0x342   :  { %6701 = vmatprep.subr.bf16.mxu1 %v11495_v60  ;;  %v11505_v60 = vld [vmem:[%s16255_s3 + $0x6a8] ss:$52 sps:$4 sm:$0xff]   ;;  %v11511_v58 = vld [vmem:[%s16255_s3 + $0xcc0] ss:$52 sps:$4 sm:$0xff]  }
 0x343   :  { %v7565_v47 = vpop.permute.xlu1 %7564 }
 0x344   :  { %6661 = vmatpush1.bf16.msra.mxu0 %v11490_v37  ;;  %v7567_v4 = vsel %vm6978_vm0, %v7565_v47, 0.0  ;;  %v11510_v37 = vld [vmem:[%s16255_s3 + $0x644] ss:$52 sps:$4 sm:$0xff]   ;;  %v11519_v47 = vld [vmem:[%s16255_s3 + $0xc5c] ss:$52 sps:$4 sm:$0xff]  }
 0x345   :  { %6702 = vmatpush1.bf16.msra.mxu1 %v11493_v56  ;;  %7568 = vadd.xlane.f32.xlu1 %v7567_v4  ;;  %v11513_v56 = vld [vmem:[%s16255_s3 + $0xcc4] ss:$52 sps:$4 sm:$0xff]   ;;  %v14591_v4 = vpop.permute.xlu0 %8123 }
 0x346   :  { %6662 = vmatprep.subr.bf16.mxu0 %v11498_v9  ;;  %6703 = vmatprep.subr.bf16.mxu1 %v11501_v3  ;;  %v7480_v9 = vsel %vm6978_vm0, %v7478_v26, 0.0  ;;  %v11516_v3 = vld [vmem:[%s16255_s3 + $0x5dc] ss:$52 sps:$4 sm:$0xff]   ;;  %16332 = vst [vmem:[#allocation26_spill] sm:$0xff] %v14591_v4  ;;  %v11528_v26 = vld [vmem:[%s16255_s3 + $0x50c] ss:$52 sps:$4 sm:$0xff]  }
 0x347   :  { %v7629_v51 = vpop.permute.xlu1 %7628  ;;  %v11659_v4 = vld [vmem:[%s16255_s3 + $0x920] ss:$52 sps:$4 sm:$0xff]  }
 0x348   :  { %6663 = vmatpush1.bf16.msra.mxu0 %v11496_v27  ;;  %v7631_v50 = vsel %vm6978_vm0, %v7629_v51, 0.0  ;;  %v11514_v27 = vld [vmem:[%s16255_s3 + $0x5d8] ss:$52 sps:$4 sm:$0xff]   ;;  %v11520_v51 = vld [vmem:[%s16255_s3 + $0x570] ss:$52 sps:$4 sm:$0xff]  }
 0x349   :  { %6704 = vmatpush1.bf16.msra.mxu1 %v11499_v6  ;;  %7632 = vadd.xlane.f32.xlu1 %v7631_v50  ;;  %v11517_v6 = vld [vmem:[%s16255_s3 + $0xc58] ss:$52 sps:$4 sm:$0xff]   ;;  %v14608_v50 = vpop.permute.xlu0 %7073 }
 0x34a   :  { %6664 = vmatprep.subr.bf16.mxu0 %v11504_v24  ;;  %6705 = vmatprep.subr.bf16.mxu1 %v11507_v21  ;;  %v11522_v24 = vld [vmem:[%s16255_s3 + $0x574] ss:$52 sps:$4 sm:$0xff]  }
 0x34b   :  { %v11525_v21 = vld [vmem:[%s16255_s3 + $0xbf4] ss:$52 sps:$4 sm:$0xff]  }
 0x34c   :  { %6665 = vmatpush1.bf16.msra.mxu0 %v11502_v12  ;;  %v11523_v12 = vld [vmem:[%s16255_s3 + $0xbf0] ss:$52 sps:$4 sm:$0xff]  }
 0x34d   :  { %6706 = vmatpush1.bf16.msra.mxu1 %v11505_v60  ;;  %7481 = vadd.xlane.f32.xlu1 %v7480_v9  ;;  %v11531_v60 = vld [vmem:[%s16255_s3 + $0xb8c] ss:$52 sps:$4 sm:$0xff]   ;;  %v11534_v9 = vld [vmem:[%s16255_s3 + $0x4a4] ss:$52 sps:$4 sm:$0xff]  }
 0x34e   :  { %6666 = vmatprep.subr.bf16.mxu0 %v11510_v37  ;;  %6707 = vmatprep.subr.bf16.mxu1 %v11513_v56  ;;  %v11526_v37 = vld [vmem:[%s16255_s3 + $0x508] ss:$52 sps:$4 sm:$0xff]  }
 0x34f   :  { %v11529_v56 = vld [vmem:[%s16255_s3 + $0xb88] ss:$52 sps:$4 sm:$0xff]  }
 0x350   :  { %6667 = vmatpush2.bf16.msra.mxu0 %v11508_v29  ;;  %v11537_v29 = vld [vmem:[%s16255_s3 + $0xb24] ss:$52 sps:$4 sm:$0xff]  }
 0x351   :  { %6708 = vmatpush2.bf16.msra.mxu1 %v11511_v58  ;;  %6668 = vmatprep.subr.bf16.mxu0 %v11516_v3  ;;  %v14631_v58 = vpop.permute.xlu0 %7077  ;;  %v11532_v3 = vld [vmem:[%s16255_s3 + $0x4a0] ss:$52 sps:$4 sm:$0xff]  }
 0x352   :  { %6709 = vmatprep.subr.bf16.mxu1 %v11519_v47  ;;  %v11535_v47 = vld [vmem:[%s16255_s3 + $0xb20] ss:$52 sps:$4 sm:$0xff]  }
 0x354   :  { %6669 = vmatpush2.bf16.msra.mxu0 %v11514_v27  ;;  %v11540_v27 = vld [vmem:[%s16255_s3 + $0x43c] ss:$52 sps:$4 sm:$0xff]  }
 0x355   :  { %6710 = vmatpush2.bf16.msra.mxu1 %v11517_v6  ;;  %6670 = vmatprep.subr.bf16.mxu0 %v11522_v24  ;;  %v11543_v6 = vld [vmem:[%s16255_s3 + $0xabc] ss:$52 sps:$4 sm:$0xff]   ;;  %v11538_v24 = vld [vmem:[%s16255_s3 + $0x438] ss:$52 sps:$4 sm:$0xff]  }
 0x356   :  { %6711 = vmatprep.subr.bf16.mxu1 %v11525_v21  ;;  %v7106_v21 = vpop.xlane.xlu0 %7105 }
 0x358   :  { %6671 = vmatpush2.bf16.msra.mxu0 %v11520_v51  ;;  %v11541_v51 = vld [vmem:[%s16255_s3 + $0xab8] ss:$52 sps:$4 sm:$0xff]  }
 0x359   :  { %6712 = vmatpush2.bf16.msra.mxu1 %v11523_v12  ;;  %6672 = vmatprep.subr.bf16.mxu0 %v11528_v26  ;;  %v11546_v12 = vld [vmem:[%s16255_s3 + $0x3d4] ss:$52 sps:$4 sm:$0xff]  }
 0x35a   :  { %6713 = vmatprep.subr.bf16.mxu1 %v11531_v60  ;;  %v11549_v26 = vld [vmem:[%s16255_s3 + $0xa54] ss:$52 sps:$4 sm:$0xff]   ;;  %v11544_v60 = vld [vmem:[%s16255_s3 + $0x3d0] ss:$52 sps:$4 sm:$0xff]  }
 0x35c   :  { %6673 = vmatpush2.bf16.msra.mxu0 %v11526_v37  ;;  %v6987_v37 = vpop.xlane.xlu0 %6986 }
 0x35d   :  { %6714 = vmatpush2.bf16.msra.mxu1 %v11529_v56  ;;  %6674 = vmatprep.subr.bf16.mxu0 %v11534_v9  ;;  %v11547_v56 = vld [vmem:[%s16255_s3 + $0xa50] ss:$52 sps:$4 sm:$0xff]   ;;  %v11552_v9 = vld [vmem:[%s16255_s3 + $0x36c] ss:$52 sps:$4 sm:$0xff]  }
 0x35e   :  { %7695 = vrot.lane.b32.xlu1 %v14266_v7, %s11827_s10  ;;  %6715 = vmatprep.subr.bf16.mxu1 %v11537_v29  ;;  %v11555_v29 = vld [vmem:[%s16255_s3 + $0x9ec] ss:$52 sps:$4 sm:$0xff]  }
 0x360   :  { %6675 = vmatpush2.bf16.msra.mxu0 %v11532_v3  ;;  %v6988_v3 = vmul.f32 0.020408163, %v6987_v37  ;;  %v11564_v37 = vld [vmem:[%s16255_s3 + $0xf9c] ss:$52 sps:$4 sm:$0xff]  }
 0x361   :  { %6716 = vmatpush2.bf16.msra.mxu1 %v11535_v47  ;;  %6676 = vmatprep.subr.bf16.mxu0 %v11540_v27  ;;  %v11550_v47 = vld [vmem:[%s16255_s3 + $0x368] ss:$52 sps:$4 sm:$0xff]  }
 0x362   :  { %7784 = vrot.lane.b32.xlu1 %v14266_v7, %s11828_s11  ;;  %6717 = vmatprep.subr.bf16.mxu1 %v11543_v6  ;;  %v11553_v27 = vld [vmem:[%s16255_s3 + $0x9e8] ss:$52 sps:$4 sm:$0xff]   ;;  %v11558_v6 = vld [vmem:[%s16255_s3 + $0x1004] ss:$52 sps:$4 sm:$0xff]  }
 0x364   :  { %6677 = vmatpush2.bf16.msra.mxu0 %v11538_v24  ;;  %v11561_v24 = vld [vmem:[%s16255_s3 + $0x1684] ss:$52 sps:$4 sm:$0xff]  }
 0x365   :  { %6718 = vmatpush2.bf16.msra.mxu1 %v11541_v51  ;;  %6678 = vmatprep.subr.bf16.mxu0 %v11546_v12  ;;  %v6989_v51 = vadd.f32 1e-05, %v6988_v3  ;;  %v11556_v12 = vld [vmem:[%s16255_s3 + $0x1000] ss:$52 sps:$4 sm:$0xff]  }
 0x366   :  { %7848 = vrot.lane.b32.xlu1 %v14266_v7, %s11829_s24  ;;  %6719 = vmatprep.subr.bf16.mxu1 %v11549_v26  ;;  %v11559_v26 = vld [vmem:[%s16255_s3 + $0x1680] ss:$52 sps:$4 sm:$0xff]  }
 0x367   :  { %11716 = vrsqrt.f32 %v6989_v51 }
 0x368   :  { %6679 = vmatpush2.bf16.msra.mxu0 %v11544_v60 }
 0x369   :  { %6720 = vmatpush2.bf16.msra.mxu1 %v11547_v56  ;;  %6680 = vmatprep.subr.bf16.mxu0 %v11552_v9  ;;  %v11567_v56 = vld [vmem:[%s16255_s3 + $0x161c] ss:$52 sps:$4 sm:$0xff]   ;;  %v7107_v9 = vmul.f32 0.020408163, %v7106_v21 }
 0x36a   :  { %7913 = vrot.lane.b32.xlu1 %v14266_v7, %s11830_s16  ;;  %6721 = vmatprep.subr.bf16.mxu1 %v11555_v29 }
 0x36c   :  { %6681 = vmatpush2.bf16.msra.mxu0 %v11550_v47  ;;  %v11562_v47 = vld [vmem:[%s16255_s3 + $0xf98] ss:$52 sps:$4 sm:$0xff]  }
 0x36d   :  { %6722 = vmatpush2.bf16.msra.mxu1 %v11553_v27  ;;  %6732 = vmatprep.subr.bf16.mxu0 %v11558_v6  ;;  %v11565_v6 = vld [vmem:[%s16255_s3 + $0x1618] ss:$52 sps:$4 sm:$0xff]  }
 0x36e   :  { %7915 = vrot.lane.b32.xlu1 %v14273_v5, %s11830_s16  ;;  %6773 = vmatprep.subr.bf16.mxu1 %v11561_v24 }
 0x36f   :  { %v6438_v60 = vpop.f32.mrf.mxu0  ;;  %6683 = vmatmul.mubr.bf16.vlgmr.msra.gmra.mxu0 %v12377_v44 }
 0x370   :  { %v6439_v29 = vadd.f32 %v6438_v60, %v14484_v39  ;;  %v6479_v3 = vpop.f32.mrf.mxu1  ;;  %6724 = vmatmul.mubr.bf16.vlgmr.msra.gmra.mxu1 %v12369_v40  ;;  %6733 = vmatpush1.bf16.msra.mxu0 %v11556_v12  ;;  %v11570_v39 = vld [vmem:[%s16255_s3 + $0xf34] ss:$52 sps:$4 sm:$0xff]   ;;  %v14726_v60 = vsub.f32 %v13331_v28, %v7107_v9  ;;  %v11576_v28 = vld [vmem:[%s16255_s3 + $0xecc] ss:$52 sps:$4 sm:$0xff]  }
 0x371   :  { %6764 = vmatprep.mubr.bf16.mxu0 %v12500_v42  ;;  %6774 = vmatpush1.bf16.msra.mxu1 %v11559_v26  ;;  %v6440_v27 = vpop.f32.mrf.mxu0  ;;  %v11573_v12 = vld [vmem:[%s16255_s3 + $0x15b4] ss:$52 sps:$4 sm:$0xff]  }
 0x372   :  { %v14716_v21 = vadd.f32 %v6479_v3, %v6439_v29  ;;  %6805 = vmatprep.mubr.bf16.mxu1 %v12509_v48  ;;  %v6441_v24 = vadd.f32 %v6440_v27, %v14494_v20  ;;  %v6481_v51 = vpop.f32.mrf.mxu1  ;;  %8004 = vrot.lane.b32.xlu1 %v14273_v5, %s11831_s28  ;;  %v11568_v20 = vld [vmem:[%s16255_s3 + $0xf30] ss:$52 sps:$4 sm:$0xff]  }
 0x373   :  { %v6442_v26 = vpop.f32.mrf.mxu0  ;;  %6734 = vmatprep.subr.bf16.mxu0 %v11564_v37  ;;  %6775 = vmatprep.subr.bf16.mxu1 %v11567_v56  ;;  %v11579_v56 = vld [vmem:[%s16255_s3 + $0x154c] ss:$52 sps:$4 sm:$0xff]  }
 0x374   :  { %v14728_v29 = vadd.f32 %v6481_v51, %v6441_v24  ;;  %v6483_v3 = vpop.f32.mrf.mxu1  ;;  %6735 = vmatpush1.bf16.msra.mxu0 %v11562_v47  ;;  %v11571_v26 = vld [vmem:[%s16255_s3 + $0x15b0] ss:$52 sps:$4 sm:$0xff]   ;;  %v14745_v47 = vsub.f32 %v13358_v16, %v7107_v9  ;;  %v11577_v24 = vld [vmem:[%s16255_s3 + $0x1548] ss:$52 sps:$4 sm:$0xff]  }
 0x375   :  { %6776 = vmatpush1.bf16.msra.mxu1 %v11565_v6  ;;  %v6443_v27 = vpop.f32.mrf.mxu0  ;;  %6736 = vmatprep.subr.bf16.mxu0 %v11570_v39  ;;  %v7110_v6 = vmul.f32 %v14726_v60, %v14726_v60  ;;  %v11574_v39 = vld [vmem:[%s16255_s3 + $0xec8] ss:$52 sps:$4 sm:$0xff]   ;;  %v11582_v51 = vld [vmem:[%s16255_s3 + $0xe64] ss:$52 sps:$4 sm:$0xff]   ;;  %v11580_v3 = vld [vmem:[%s16255_s3 + $0xe60] ss:$52 sps:$4 sm:$0xff]  }
 0x376   :  { %v6484_v37 = vpop.f32.mrf.mxu1  ;;  %8069 = vrot.lane.b32.xlu1 %v14273_v5, %s11832_s25  ;;  %6777 = vmatprep.subr.bf16.mxu1 %v11573_v12  ;;  %v11585_v9 = vld [vmem:[%s16255_s3 + $0x14e4] ss:$52 sps:$4 sm:$0xff]   ;;  %v7111_v12 = vmul.f32 %v14745_v47, %v14745_v47  ;;  %v11583_v27 = vld [vmem:[%s16255_s3 + $0x14e0] ss:$52 sps:$4 sm:$0xff]  }
 0x377   :  { %v11591_v37 = vld [vmem:[%s16255_s3 + $0x147c] ss:$52 sps:$4 sm:$0xff]  }
 0x378   :  { %6737 = vmatpush1.bf16.msra.mxu0 %v11568_v20  ;;  %v11717_v20 = vpop.eup %11716 }
 0x379   :  { %6778 = vmatpush1.bf16.msra.mxu1 %v11571_v26  ;;  %6738 = vmatprep.subr.bf16.mxu0 %v11576_v28  ;;  %v14773_v26 = vld [vmem:[%s16261_s5] sm:$0x1]  ;;  %v11588_v28 = vld [vmem:[%s16255_s3 + $0xdfc] ss:$52 sps:$4 sm:$0xff]  }
 0x37a   :  { %7114 = vrot.lane.b32.xlu1 %v7110_v6, %s16291_s18  ;;  %6779 = vmatprep.subr.bf16.mxu1 %v11579_v56  ;;  %v6991_v56 = vmul.f32 %v11717_v20, %v14773_v26  ;;  %v11586_v6 = vld [vmem:[%s16255_s3 + $0xdf8] ss:$52 sps:$4 sm:$0xff]  }
 0x37b   :  { %v11603_v20 = vld [vmem:[%s16255_s3 + $0x13ac] ss:$52 sps:$4 sm:$0xff]  }
 0x37c   :  { %6739 = vmatpush1.bf16.msra.mxu0 %v11574_v39  ;;  %v11589_v39 = vld [vmem:[%s16255_s3 + $0x1478] ss:$52 sps:$4 sm:$0xff]  }
 0x37d   :  { %6780 = vmatpush1.bf16.msra.mxu1 %v11577_v24  ;;  %6740 = vmatprep.subr.bf16.mxu0 %v11582_v51  ;;  %v11594_v24 = vld [vmem:[%s16255_s3 + $0xd94] ss:$52 sps:$4 sm:$0xff]  }
 0x37e   :  { %7116 = vrot.lane.b32.xlu1 %v7111_v12, %s16291_s18  ;;  %6781 = vmatprep.subr.bf16.mxu1 %v11585_v9  ;;  %v11597_v51 = vld [vmem:[%s16255_s3 + $0x1414] ss:$52 sps:$4 sm:$0xff]   ;;  %v11592_v9 = vld [vmem:[%s16255_s3 + $0xd90] ss:$52 sps:$4 sm:$0xff]   ;;  %s11853_s18 = smov 6  }
 0x37f   :  { %v11595_v12 = vld [vmem:[%s16255_s3 + $0x1410] ss:$52 sps:$4 sm:$0xff]  }
 0x380   :  { %6741 = vmatpush1.bf16.msra.mxu0 %v11580_v3  ;;  %v11600_v3 = vld [vmem:[%s16255_s3 + $0xd2c] ss:$52 sps:$4 sm:$0xff]  }
 0x381   :  { %6782 = vmatpush1.bf16.msra.mxu1 %v11583_v27  ;;  %6742 = vmatprep.subr.bf16.mxu0 %v11588_v28  ;;  %v16333_v27 = vmov 4   ;;  %v11598_v28 = vld [vmem:[%s16255_s3 + $0xd28] ss:$52 sps:$4 sm:$0xff]  }
 0x382   :  { %6994 = vperm.xlu1 %10450, %v6991_v56   ;;  %6783 = vmatprep.subr.bf16.mxu1 %v11591_v37  ;;  %v11601_v37 = vld [vmem:[%s16255_s3 + $0x13a8] ss:$52 sps:$4 sm:$0xff]   ;;  %v11606_v56 = vld [vmem:[%s16255_s3 + $0x1344] ss:$52 sps:$4 sm:$0xff]  }
 0x384   :  { %6743 = vmatpush1.bf16.msra.mxu0 %v11586_v6  ;;  %v11609_v6 = vld [vmem:[%s16255_s3 + $0x19c4] ss:$52 sps:$4 sm:$0xff]  }
 0x385   :  { %6784 = vmatpush1.bf16.msra.mxu1 %v11589_v39  ;;  %6744 = vmatprep.subr.bf16.mxu0 %v11594_v24  ;;  %v11604_v39 = vld [vmem:[%s16255_s3 + $0x1340] ss:$52 sps:$4 sm:$0xff]  }
 0x386   :  { %6785 = vmatprep.subr.bf16.mxu1 %v11597_v51  ;;  %10452 = vset.pattern.permute.xlu1 %v16333_v27  ;;  %v11607_v24 = vld [vmem:[%s16255_s3 + $0x19c0] ss:$52 sps:$4 sm:$0xff]   ;;  %v11612_v51 = vld [vmem:[%s16255_s3 + $0x12dc] ss:$52 sps:$4 sm:$0xff]  }
 0x387   :  { %v11621_v27 = vld [vmem:[%s16255_s3 + $0x18f4] ss:$52 sps:$4 sm:$0xff]  }
 0x388   :  { %6745 = vmatpush1.bf16.msra.mxu0 %v11592_v9  ;;  %v11615_v9 = vld [vmem:[%s16255_s3 + $0x195c] ss:$52 sps:$4 sm:$0xff]  }
 0x389   :  { %6786 = vmatpush1.bf16.msra.mxu1 %v11595_v12  ;;  %6746 = vmatprep.subr.bf16.mxu0 %v11600_v3  ;;  %v11610_v12 = vld [vmem:[%s16255_s3 + $0x12d8] ss:$52 sps:$4 sm:$0xff]  }
 0x38a   :  { %6787 = vmatprep.subr.bf16.mxu1 %v11603_v20  ;;  %v11613_v3 = vld [vmem:[%s16255_s3 + $0x1958] ss:$52 sps:$4 sm:$0xff]   ;;  %v11618_v20 = vld [vmem:[%s16255_s3 + $0x1274] ss:$52 sps:$4 sm:$0xff]  }
 0x38c   :  { %6747 = vmatpush1.bf16.msra.mxu0 %v11598_v28  ;;  %v11616_v28 = vld [vmem:[%s16255_s3 + $0x1270] ss:$52 sps:$4 sm:$0xff]  }
 0x38d   :  { %6788 = vmatpush1.bf16.msra.mxu1 %v11601_v37  ;;  %6748 = vmatprep.subr.bf16.mxu0 %v11606_v56  ;;  %v11619_v37 = vld [vmem:[%s16255_s3 + $0x18f0] ss:$52 sps:$4 sm:$0xff]   ;;  %v11624_v56 = vld [vmem:[%s16255_s3 + $0x120c] ss:$52 sps:$4 sm:$0xff]  }
 0x38e   :  { %6789 = vmatprep.subr.bf16.mxu1 %v11609_v6  ;;  %v11627_v6 = vld [vmem:[%s16255_s3 + $0x188c] ss:$52 sps:$4 sm:$0xff]  }
 0x390   :  { %6749 = vmatpush2.bf16.msra.mxu0 %v11604_v39  ;;  %v11622_v39 = vld [vmem:[%s16255_s3 + $0x1208] ss:$52 sps:$4 sm:$0xff]  }
 0x391   :  { %6790 = vmatpush2.bf16.msra.mxu1 %v11607_v24  ;;  %6750 = vmatprep.subr.bf16.mxu0 %v11612_v51  ;;  %v11625_v24 = vld [vmem:[%s16255_s3 + $0x1888] ss:$52 sps:$4 sm:$0xff]   ;;  %v11630_v51 = vld [vmem:[%s16255_s3 + $0x11a4] ss:$52 sps:$4 sm:$0xff]  }
 0x392   :  { %6791 = vmatprep.subr.bf16.mxu1 %v11615_v9  ;;  %v11633_v9 = vld [vmem:[%s16255_s3 + $0x1824] ss:$52 sps:$4 sm:$0xff]  }
 0x394   :  { %6751 = vmatpush2.bf16.msra.mxu0 %v11610_v12  ;;  %v11628_v12 = vld [vmem:[%s16255_s3 + $0x11a0] ss:$52 sps:$4 sm:$0xff]  }
 0x395   :  { %6792 = vmatpush2.bf16.msra.mxu1 %v11613_v3  ;;  %6752 = vmatprep.subr.bf16.mxu0 %v11618_v20  ;;  %v11631_v3 = vld [vmem:[%s16255_s3 + $0x1820] ss:$52 sps:$4 sm:$0xff]   ;;  %v11636_v20 = vld [vmem:[%s16255_s3 + $0x113c] ss:$52 sps:$4 sm:$0xff]  }
 0x396   :  { %6793 = vmatprep.subr.bf16.mxu1 %v11621_v27  ;;  %v11639_v27 = vld [vmem:[%s16255_s3 + $0x17bc] ss:$52 sps:$4 sm:$0xff]  }
 0x398   :  { %6753 = vmatpush2.bf16.msra.mxu0 %v11616_v28  ;;  %v14880_v28 = vpop.permute.xlu0 %7042 }
 0x399   :  { %6794 = vmatpush2.bf16.msra.mxu1 %v11619_v37  ;;  %6754 = vmatprep.subr.bf16.mxu0 %v11624_v56  ;;  %v11634_v37 = vld [vmem:[%s16255_s3 + $0x1138] ss:$52 sps:$4 sm:$0xff]  }
 0x39a   :  { %6795 = vmatprep.subr.bf16.mxu1 %v11627_v6  ;;  %v11637_v56 = vld [vmem:[%s16255_s3 + $0x17b8] ss:$52 sps:$4 sm:$0xff]   ;;  %v11642_v6 = vld [vmem:[%s16255_s3 + $0x10d4] ss:$52 sps:$4 sm:$0xff]  }
 0x39c   :  { %6755 = vmatpush2.bf16.msra.mxu0 %v11622_v39  ;;  %v11645_v39 = vld [vmem:[%s16255_s3 + $0x1754] ss:$52 sps:$4 sm:$0xff]  }
 0x39d   :  { %6796 = vmatpush2.bf16.msra.mxu1 %v11625_v24  ;;  %6756 = vmatprep.subr.bf16.mxu0 %v11630_v51  ;;  %v11640_v51 = vld [vmem:[%s16255_s3 + $0x10d0] ss:$52 sps:$4 sm:$0xff]  }
 0x39e   :  { %6797 = vmatprep.subr.bf16.mxu1 %v11633_v9 }
 0x3a0   :  { %6757 = vmatpush2.bf16.msra.mxu0 %v11628_v12  ;;  %v11643_v12 = vld [vmem:[%s16255_s3 + $0x1750] ss:$52 sps:$4 sm:$0xff]  }
 0x3a1   :  { %6798 = vmatpush2.bf16.msra.mxu1 %v11631_v3  ;;  %6758 = vmatprep.subr.bf16.mxu0 %v11636_v20  ;;  %v11648_v3 = vld [vmem:[%s16255_s3 + $0x106c] ss:$52 sps:$4 sm:$0xff]  }
 0x3a2   :  { %6799 = vmatprep.subr.bf16.mxu1 %v11639_v27  ;;  %v11651_v20 = vld [vmem:[%s16255_s3 + $0x16ec] ss:$52 sps:$4 sm:$0xff]  }
 0x3a4   :  { %6759 = vmatpush2.bf16.msra.mxu0 %v11634_v37  ;;  %v7199_v24 = vpop.permute.xlu0 %7198  ;;  %v11646_v37 = vld [vmem:[%s16255_s3 + $0x1068] ss:$52 sps:$4 sm:$0xff]  }
 0x3a5   :  { %6800 = vmatpush2.bf16.msra.mxu1 %v11637_v56  ;;  %v7201_v9 = vsel %vm6978_vm0, %v7199_v24, 0.0  ;;  %6760 = vmatprep.subr.bf16.mxu0 %v11642_v6  ;;  %v11649_v56 = vld [vmem:[%s16255_s3 + $0x16e8] ss:$52 sps:$4 sm:$0xff]  }
 0x3a6   :  { %7202 = vadd.xlane.f32.xlu0 %v7201_v9  ;;  %6801 = vmatprep.subr.bf16.mxu1 %v11645_v39  ;;  %v14917_v39 = vld [vmem:[%s16260_s4 + $0x8] sm:$0x1f]  ;;  %s11849_s4 = smov 104  }
 0x3a7   :  { %v11652_v24 = vld [vmem:[%s16255_s3 + $0x648] ss:$52 sps:$4 sm:$0xff]   ;;  %v5800_v9 = vrot.slane %v14917_v39, %v12328_v11 }
 0x3a8   :  { %6761 = vmatpush2.bf16.msra.mxu0 %v11640_v51  ;;  %v7263_v27 = vpop.permute.xlu0 %7262  ;;  %v11653_v51 = vld [vmem:[%s16255_s3 + $0xcc8] ss:$52 sps:$4 sm:$0xff]  }
 0x3a9   :  { %6802 = vmatpush2.bf16.msra.mxu1 %v11643_v12  ;;  %v7265_v6 = vsel %vm6978_vm0, %v7263_v27, 0.0  ;;  %6762 = vmatprep.subr.bf16.mxu0 %v11648_v3  ;;  %v11654_v12 = vld [vmem:[%s16255_s3 + $0x308] ss:$52 sps:$4 sm:$0xff]   ;;  %v11656_v27 = vld [vmem:[%s16255_s3 + $0x5e0] ss:$52 sps:$4 sm:$0xff]  }
 0x3aa   :  { %7266 = vadd.xlane.f32.xlu0 %v7265_v6  ;;  %6803 = vmatprep.subr.bf16.mxu1 %v11651_v20  ;;  %v11655_v3 = vld [vmem:[%s16255_s3 + $0x988] ss:$52 sps:$4 sm:$0xff]   ;;  %v5804_v20 = vrot.slane %v14917_v39, %v12334_v14  ;;  %v11658_v14 = vld [vmem:[%s16255_s3 + $0x2a0] ss:$52 sps:$4 sm:$0xff]  }
 0x3ac   :  { %6763 = vmatpush2.bf16.msra.mxu0 %v11646_v37 }
 0x3ad   :  { %6804 = vmatpush2.bf16.msra.mxu1 %v11649_v56  ;;  %10271 = vmatprep.subr.bf16.mxu0 %v11652_v24  ;;  %v11657_v56 = vld [vmem:[%s16255_s3 + $0xc60] ss:$52 sps:$4 sm:$0xff]  }
 0x3ae   :  { %10293 = vmatprep.subr.bf16.mxu1 %v11653_v51 }
 0x3af   :  { %v6520_v37 = vpop.f32.mrf.mxu0  ;;  %6765 = vmatmul.mubr.bf16.vlgmr.msra.gmra.mxu0 %v12640_v53 }
 0x3b0   :  { %v6521_v6 = vadd.f32 %v6520_v37, %v5800_v9  ;;  %v6561_v24 = vpop.f32.mrf.mxu1  ;;  %6806 = vmatmul.mubr.bf16.vlgmr.msra.gmra.mxu1 %v12634_v49  ;;  %10272 = vmatpush3.bf16.msra.mxu0 %v11654_v12  ;;  %v11660_v9 = vld [vmem:[%s16255_s3 + $0x578] ss:$52 sps:$4 sm:$0xff]  }
 0x3b1   :  { %6846 = vmatprep.mubr.bf16.mxu0 %v12371_v41  ;;  %10294 = vmatpush3.bf16.msra.mxu1 %v11655_v3  ;;  %v6522_v51 = vpop.f32.mrf.mxu0  ;;  %v11661_v41 = vld [vmem:[%s16255_s3 + $0xbf8] ss:$52 sps:$4 sm:$0xff]  }
 0x3b2   :  { %v14953_v37 = vadd.f32 %v6561_v24, %v6521_v6  ;;  %6886 = vmatprep.mubr.bf16.mxu1 %v12379_v45  ;;  %v6523_v12 = vadd.f32 %v6522_v51, %v5804_v20  ;;  %v6563_v62 = vpop.f32.mrf.mxu1  ;;  %10273 = vmatprep.subr.bf16.mxu0 %v11656_v27  ;;  %v11662_v6 = vld [vmem:[%s16255_s3 + $0x238] ss:$52 sps:$4 sm:$0xff]   ;;  %v11664_v20 = vld [vmem:[%s16255_s3 + $0x510] ss:$52 sps:$4 sm:$0xff]   ;;  %v11670_v51 = vld [vmem:[%s16255_s3 + $0x168] ss:$52 sps:$4 sm:$0xff]  }
 0x3b3   :  { %v6524_v3 = vpop.f32.mrf.mxu0  ;;  %10295 = vmatprep.subr.bf16.mxu1 %v11657_v56  ;;  %v11663_v45 = vld [vmem:[%s16255_s3 + $0x8b8] ss:$52 sps:$4 sm:$0xff]   ;;  %v11668_v56 = vld [vmem:[%s16255_s3 + $0x4a8] ss:$52 sps:$4 sm:$0xff]  }
 0x3b4   :  { %v14959_v23 = vadd.f32 %v6563_v62, %v6523_v12  ;;  %v6565_v19 = vpop.f32.mrf.mxu1  ;;  %10274 = vmatpush3.bf16.msra.mxu0 %v11658_v14  ;;  %v11666_v62 = vld [vmem:[%s16255_s3 + $0x1d0] ss:$52 sps:$4 sm:$0xff]   ;;  %v11669_v14 = vld [vmem:[%s16255_s3 + $0xb28] ss:$52 sps:$4 sm:$0xff]   ;;  %v11672_v12 = vld [vmem:[%s16255_s3 + $0x440] ss:$52 sps:$4 sm:$0xff]  }
 0x3b5   :  { %10296 = vmatpush3.bf16.msra.mxu1 %v11659_v4  ;;  %v6525_v24 = vpop.f32.mrf.mxu0  ;;  %10275 = vmatprep.subr.bf16.mxu0 %v11660_v9  ;;  %v11665_v19 = vld [vmem:[%s16255_s3 + $0xb90] ss:$52 sps:$4 sm:$0xff]   ;;  %v11671_v9 = vld [vmem:[%s16255_s3 + $0x7e8] ss:$52 sps:$4 sm:$0xff]   ;;  %v11673_v3 = vld [vmem:[%s16255_s3 + $0xac0] ss:$52 sps:$4 sm:$0xff]  }
 0x3b6   :  { %v6566_v27 = vpop.f32.mrf.mxu1  ;;  %10297 = vmatprep.subr.bf16.mxu1 %v11661_v41  ;;  %v11667_v4 = vld [vmem:[%s16255_s3 + $0x850] ss:$52 sps:$4 sm:$0xff]   ;;  %v14994_v41 = vpop.permute.xlu1 %7693  ;;  %v11675_v24 = vld [vmem:[%s16255_s3 + $0x780] ss:$52 sps:$4 sm:$0xff]  }
 0x3b7   :  { %v11677_v27 = vld [vmem:[%s16255_s3 + $0xa58] ss:$52 sps:$4 sm:$0xff]  }
 0x3b8   :  { %10276 = vmatpush3.bf16.msra.mxu0 %v11662_v6  ;;  %v11674_v6 = vld [vmem:[%s16255_s3 + $0x100] ss:$52 sps:$4 sm:$0xff]  }
 0x3b9   :  { %10298 = vmatpush3.bf16.msra.mxu1 %v11663_v45  ;;  %10277 = vmatprep.subr.bf16.mxu0 %v11664_v20  ;;  %v11676_v45 = vld [vmem:[%s16255_s3 + $0x3d8] ss:$52 sps:$4 sm:$0xff]  }
 0x3ba   :  { %10299 = vmatprep.subr.bf16.mxu1 %v11665_v19 }
 0x3bc   :  { %10278 = vmatpush3.bf16.msra.mxu0 %v11666_v62  ;;  %v11678_v62 = vld [vmem:[%s16255_s3 + $0x98] ss:$52 sps:$4 sm:$0xff]  }
 0x3bd   :  { %10300 = vmatpush3.bf16.msra.mxu1 %v11667_v4  ;;  %10279 = vmatprep.subr.bf16.mxu0 %v11668_v56  ;;  %v11679_v56 = vld [vmem:[%s16255_s3 + $0x718] ss:$52 sps:$4 sm:$0xff]  }
 0x3be   :  { %10301 = vmatprep.subr.bf16.mxu1 %v11669_v14 }
 0x3c0   :  { %10280 = vmatpush3.bf16.msra.mxu0 %v11670_v51  ;;  %v11680_v51 = vld [vmem:[%s16255_s3 + $0x370] ss:$52 sps:$4 sm:$0xff]  }
 0x3c1   :  { %10302 = vmatpush3.bf16.msra.mxu1 %v11671_v9  ;;  %10281 = vmatprep.subr.bf16.mxu0 %v11672_v12  ;;  %v11681_v9 = vld [vmem:[%s16255_s3 + $0x9f0] ss:$52 sps:$4 sm:$0xff]  }
 0x3c2   :  { %v7413_v20 = vpop.xlane.xlu1 %7412  ;;  %10303 = vmatprep.subr.bf16.mxu1 %v11673_v3 }
 0x3c3   :  { %v7414_v19 = vmul.f32 0.020408163, %v7413_v20  ;;  %v11684_v20 = vld [vmem:[%s16255_s3 + $0x1348] ss:$52 sps:$4 sm:$0xff]  }
 0x3c4   :  { %10282 = vmatpush3.bf16.msra.mxu0 %v11674_v6  ;;  %v11682_v6 = vld [vmem:[%s16255_s3 + $0x30] ss:$52 sps:$4 sm:$0xff]  }
 0x3c5   :  { %v15015_v4 = vsub.f32 %v13828_v36, %v7414_v19  ;;  %10304 = vmatpush3.bf16.msra.mxu1 %v11675_v24  ;;  %10283 = vmatprep.subr.bf16.mxu0 %v11676_v45  ;;  %v11683_v45 = vld [vmem:[%s16255_s3 + $0x6b0] ss:$52 sps:$4 sm:$0xff]  }
 0x3c6   :  { %v7326_v14 = vpop.xlane.xlu1 %7325  ;;  %10305 = vmatprep.subr.bf16.mxu1 %v11677_v27  ;;  %v11685_v27 = vld [vmem:[%s16255_s3 + $0x19c8] ss:$52 sps:$4 sm:$0xff]  }
 0x3c7   :  { %v7327_v12 = vmul.f32 0.020408163, %v7326_v14  ;;  %v7416_v3 = vmul.f32 %v15015_v4, %v15015_v4 }
 0x3c8   :  { %10284 = vmatpush3.bf16.msra.mxu0 %v11678_v62  ;;  %v11686_v62 = vld [vmem:[%s16255_s3 + $0x1008] ss:$52 sps:$4 sm:$0xff]  }
 0x3c9   :  { %v15032_v24 = vsub.f32 %v13358_v16, %v7327_v12  ;;  %10306 = vmatpush3.bf16.msra.mxu1 %v11679_v56  ;;  %7418 = vrot.lane.b32.xlu0 %v7416_v3, %s11823_s19  ;;  %v15047_v19 = vsub.f32 %v13828_v36, %v7327_v12  ;;  %v11687_v56 = vld [vmem:[%s16255_s3 + $0x1688] ss:$52 sps:$4 sm:$0xff]   ;;  %v11689_v12 = vld [vmem:[%s16255_s3 + $0x1960] ss:$52 sps:$4 sm:$0xff]  }
 0x3ca   :  { %10285 = vmatprep.subr.bf16.mxu0 %v11680_v51  ;;  %10307 = vmatprep.subr.bf16.mxu1 %v11681_v9  ;;  %v11688_v9 = vld [vmem:[%s16255_s3 + $0x12e0] ss:$52 sps:$4 sm:$0xff]  }
 0x3cb   :  { %v7330_v16 = vmul.f32 %v15032_v24, %v15032_v24  ;;  %v7331_v3 = vmul.f32 %v15047_v19, %v15047_v19 }
 0x3cc   :  { %10286 = vmatpush3.bf16.msra.mxu0 %v11682_v6  ;;  %v11690_v6 = vld [vmem:[%s16255_s3 + $0xfa0] ss:$52 sps:$4 sm:$0xff]  }
 0x3cd   :  { %10308 = vmatpush3.bf16.msra.mxu1 %v11683_v45  ;;  %7334 = vrot.lane.b32.xlu0 %v7330_v16, %s11821_s12  ;;  %v11691_v45 = vld [vmem:[%s16255_s3 + $0x1620] ss:$52 sps:$4 sm:$0xff]  }
 0x3ce   :  { %v7569_v14 = vpop.xlane.xlu1 %7568  ;;  %10315 = vmatprep.subr.bf16.mxu0 %v11684_v20  ;;  %10337 = vmatprep.subr.bf16.mxu1 %v11685_v27  ;;  %v11693_v27 = vld [vmem:[%s16255_s3 + $0x18f8] ss:$52 sps:$4 sm:$0xff]  }
 0x3cf   :  { %v7570_v51 = vmul.f32 0.020408163, %v7569_v14  ;;  %6847 = vmatmul.mubr.bf16.vlgmr.msra.gmra.mxu0 %v12377_v44  ;;  %v11696_v14 = vld [vmem:[%s16255_s3 + $0x1210] ss:$52 sps:$4 sm:$0xff]  }
 0x3d0   :  { %6887 = vmatmul.mubr.bf16.vlgmr.msra.gmra.mxu1 %v12369_v40  ;;  %10316 = vmatpush3.bf16.msra.mxu0 %v11686_v62  ;;  %v11692_v40 = vld [vmem:[%s16255_s3 + $0x1278] ss:$52 sps:$4 sm:$0xff]  }
 0x3d1   :  { %v15070_v44 = vsub.f32 %v13835_v10, %v7570_v51  ;;  %6926 = vmatprep.mubr.bf16.mxu0 %v12500_v42  ;;  %10338 = vmatpush3.bf16.msra.mxu1 %v11687_v56  ;;  %v11694_v62 = vld [vmem:[%s16255_s3 + $0xf38] ss:$52 sps:$4 sm:$0xff]  }
 0x3d2   :  { %6966 = vmatprep.mubr.bf16.mxu1 %v12509_v48  ;;  %7336 = vrot.lane.b32.xlu0 %v7331_v3, %s11821_s12  ;;  %v7633_v20 = vpop.xlane.xlu1 %7632  ;;  %v11695_v56 = vld [vmem:[%s16255_s3 + $0x15b8] ss:$52 sps:$4 sm:$0xff]  }
 0x3d3   :  { %v7634_v16 = vmul.f32 0.020408163, %v7633_v20  ;;  %10317 = vmatprep.subr.bf16.mxu0 %v11688_v9  ;;  %10339 = vmatprep.subr.bf16.mxu1 %v11689_v12  ;;  %v7572_v42 = vmul.f32 %v15070_v44, %v15070_v44  ;;  %v11697_v9 = vld [vmem:[%s16255_s3 + $0x1890] ss:$52 sps:$4 sm:$0xff]   ;;  %v11700_v20 = vld [vmem:[%s16255_s3 + $0x11a8] ss:$52 sps:$4 sm:$0xff]  }
 0x3d4   :  { %10318 = vmatpush3.bf16.msra.mxu0 %v11690_v6  ;;  %v11698_v6 = vld [vmem:[%s16255_s3 + $0xed0] ss:$52 sps:$4 sm:$0xff]  }
 0x3d5   :  { %v15090_v48 = vsub.f32 %v13835_v10, %v7634_v16  ;;  %10340 = vmatpush3.bf16.msra.mxu1 %v11691_v45  ;;  %10319 = vmatprep.subr.bf16.mxu0 %v11692_v40  ;;  %v11699_v40 = vld [vmem:[%s16255_s3 + $0x1550] ss:$52 sps:$4 sm:$0xff]   ;;  %v11701_v16 = vld [vmem:[%s16255_s3 + $0x1828] ss:$52 sps:$4 sm:$0xff]  }
 0x3d6   :  { %7574 = vrot.lane.b32.xlu0 %v7572_v42, %s11825_s2  ;;  %v7482_v51 = vpop.xlane.xlu1 %7481  ;;  %10341 = vmatprep.subr.bf16.mxu1 %v11693_v27 }
 0x3d7   :  { %v7483_v12 = vmul.f32 0.020408163, %v7482_v51  ;;  %v7636_v3 = vmul.f32 %v15090_v48, %v15090_v48 }
 0x3d8   :  { %10320 = vmatpush3.bf16.msra.mxu0 %v11694_v62  ;;  %v11702_v62 = vld [vmem:[%s16255_s3 + $0xe68] ss:$52 sps:$4 sm:$0xff]  }
 0x3d9   :  { %v15108_v45 = vsub.f32 %v13828_v36, %v7483_v12  ;;  %10342 = vmatpush3.bf16.msra.mxu1 %v11695_v56  ;;  %10321 = vmatprep.subr.bf16.mxu0 %v11696_v14  ;;  %v15123_v42 = vsub.f32 %v13835_v10, %v7483_v12  ;;  %v11703_v56 = vld [vmem:[%s16255_s3 + $0x14e8] ss:$52 sps:$4 sm:$0xff]   ;;  %v11704_v14 = vld [vmem:[%s16255_s3 + $0x1140] ss:$52 sps:$4 sm:$0xff]  }
 0x3da   :  { %7638 = vrot.lane.b32.xlu0 %v7636_v3, %s11826_s17  ;;  %v7696_v27 = vpop.permute.xlu1 %7695  ;;  %10343 = vmatprep.subr.bf16.mxu1 %v11697_v9  ;;  %v11705_v9 = vld [vmem:[%s16255_s3 + $0x17c0] ss:$52 sps:$4 sm:$0xff]  }
 0x3db   :  { %v7486_v36 = vmul.f32 %v15108_v45, %v15108_v45  ;;  %v7487_v3 = vmul.f32 %v15123_v42, %v15123_v42 }
 0x3dc   :  { %10322 = vmatpush3.bf16.msra.mxu0 %v11698_v6  ;;  %v11706_v6 = vld [vmem:[%s16255_s3 + $0xe00] ss:$52 sps:$4 sm:$0xff]  }
 0x3dd   :  { %10344 = vmatpush3.bf16.msra.mxu1 %v11699_v40  ;;  %10323 = vmatprep.subr.bf16.mxu0 %v11700_v20  ;;  %v11707_v40 = vld [vmem:[%s16255_s3 + $0x1480] ss:$52 sps:$4 sm:$0xff]   ;;  %v11708_v20 = vld [vmem:[%s16255_s3 + $0x10d8] ss:$52 sps:$4 sm:$0xff]  }
 0x3de   :  { %7490 = vrot.lane.b32.xlu0 %v7486_v36, %s11824_s29  ;;  %v7785_v51 = vpop.permute.xlu1 %7784  ;;  %10345 = vmatprep.subr.bf16.mxu1 %v11701_v16  ;;  %v11709_v36 = vld [vmem:[%s16255_s3 + $0x1758] ss:$52 sps:$4 sm:$0xff]  }
 0x3df   :  { %v7787_v12 = vsel %vm6978_vm0, %v7785_v51, 0.0  ;;  %v11711_v51 = vld [vmem:[%s16255_s3 + $0x1418] ss:$52 sps:$4 sm:$0xff]  }
 0x3e0   :  { %10324 = vmatpush3.bf16.msra.mxu0 %v11702_v62  ;;  %7788 = vadd.xlane.f32.xlu1 %v7787_v12 }
 0x3e1   :  { %10346 = vmatpush3.bf16.msra.mxu1 %v11703_v56  ;;  %10325 = vmatprep.subr.bf16.mxu0 %v11704_v14  ;;  %v7698_v56 = vsel %vm7697_vm4, %v14994_v41, %v7696_v27  ;;  %v11710_v14 = vld [vmem:[%s16255_s3 + $0xd98] ss:$52 sps:$4 sm:$0xff]   ;;  %v11713_v41 = vld [vmem:[%s16255_s3 + $0x16f0] ss:$52 sps:$4 sm:$0xff]  }
 0x3e2   :  { %7492 = vrot.lane.b32.xlu0 %v7487_v3, %s11824_s29  ;;  %v7849_v16 = vpop.permute.xlu1 %7848  ;;  %10347 = vmatprep.subr.bf16.mxu1 %v11705_v9  ;;  %v11712_v9 = vld [vmem:[%s16255_s3 + $0x1070] ss:$52 sps:$4 sm:$0xff]   ;;  %v7700_v27 = vsel %vm6978_vm0, %v7698_v56, 0.0 }
 0x3e3   :  { %v7851_v62 = vsel %vm6978_vm0, %v7849_v16, 0.0  ;;  %v11714_v3 = vld [vmem:[%s16255_s3 + $0xd30] ss:$52 sps:$4 sm:$0xff]  }
 0x3e4   :  { %10326 = vmatpush3.bf16.msra.mxu0 %v11706_v6  ;;  %7852 = vadd.xlane.f32.xlu1 %v7851_v62  ;;  %v11715_v6 = vld [vmem:[%s16255_s3 + $0x13b0] ss:$52 sps:$4 sm:$0xff]   ;;  %s11833_s3 = smov 112  }
 0x3e5   :  { %10348 = vmatpush3.bf16.msra.mxu1 %v11707_v40  ;;  %10327 = vmatprep.subr.bf16.mxu0 %v11708_v20 }
 0x3e6   :  { %v7914_v12 = vpop.permute.xlu1 %7913  ;;  %10349 = vmatprep.subr.bf16.mxu1 %v11709_v36 }
 0x3e8   :  { %10328 = vmatpush3.bf16.msra.mxu0 %v11710_v14  ;;  %7701 = vadd.xlane.f32.xlu1 %v7700_v27 }
 0x3e9   :  { %10350 = vmatpush3.bf16.msra.mxu1 %v11711_v51  ;;  %10329 = vmatprep.subr.bf16.mxu0 %v11712_v9 }
 0x3ea   :  { %v7916_v40 = vpop.permute.xlu1 %7915  ;;  %10351 = vmatprep.subr.bf16.mxu1 %v11713_v41 }
 0x3eb   :  { %v7918_v62 = vsel %vm7917_vm5, %v7914_v12, %v7916_v40 }
 0x3ec   :  { %10330 = vmatpush3.bf16.msra.mxu0 %v11714_v3 }
 0x3ed   :  { %10352 = vmatpush3.bf16.msra.mxu1 %v11715_v6 }
 0x3ee   :  { %v8005_v20 = vpop.permute.xlu1 %8004 }
 0x3ef   :  { %v6602_v16 = vpop.f32.mrf.mxu0  ;;  %6927 = vmatmul.mubr.bf16.vlgmr.msra.gmra.mxu0 %v12640_v53  ;;  %v8007_v36 = vsel %vm6978_vm0, %v8005_v20, 0.0  ;;  %v7920_v53 = vsel %vm6978_vm0, %v7918_v62, 0.0  ;;  %v5808_v62 = vrot.slane %v14917_v39, %v12331_v13 }
 0x3f0   :  { %v6603_v56 = vadd.f32 %v6602_v16, %v14953_v37  ;;  %v6643_v14 = vpop.f32.mrf.mxu1  ;;  %6967 = vmatmul.mubr.bf16.vlgmr.msra.gmra.mxu1 %v12634_v49  ;;  %8008 = vadd.xlane.f32.xlu1 %v8007_v36  ;;  %v7045_v49 = vsel %vm6978_vm0, %v14880_v28, 0.0  ;;  %v5812_v28 = vrot.slane %v14917_v39, %v12337_v15 }
 0x3f1   :  { %v6604_v51 = vpop.f32.mrf.mxu0 }
 0x3f2   :  { %v15181_v9 = vadd.f32 %v6643_v14, %v6603_v56  ;;  %v6605_v41 = vadd.f32 %v6604_v51, %v14959_v23  ;;  %v6645_v27 = vpop.f32.mrf.mxu1  ;;  %v15184_v3 = vpop.permute.xlu1 %8069 }
 0x3f3   :  { %v6606_v6 = vpop.f32.mrf.mxu0 }
 0x3f4   :  { %16334 = vst [vmem:[#allocation27_spill] sm:$0xff] %v15181_v9  ;;  %v15187_v20 = vadd.f32 %v6645_v27, %v6605_v41  ;;  %v6647_v12 = vpop.f32.mrf.mxu1  ;;  %7921 = vadd.xlane.f32.xlu1 %v7920_v53 }
 0x3f5   :  { %v6607_v37 = vpop.f32.mrf.mxu0 }
 0x3f6   :  { %16335 = vst [vmem:[#allocation28_spill] sm:$0xff] %v15187_v20  ;;  %v6648_v40 = vpop.f32.mrf.mxu1  ;;  %v7115_v16 = vpop.permute.xlu1 %7114 }
 0x3f8   :  { %7046 = vadd.xlane.f32.xlu1 %v7045_v49 }
 0x3fa   :  { %v7117_v36 = vpop.permute.xlu1 %7116 }
 0x3fb   :  { %v7118_v23 = vsel %vm7101_vm1, %v7115_v16, %v7117_v36 }
 0x3fc   :  { %v7120_v56 = vsel %vm6978_vm0, %v7118_v23, 0.0 }
 0x3fd   :  { %7121 = vadd.xlane.f32.xlu1 %v7120_v56 }
 0x40e   :  { %8071 = vrot.lane.b32.xlu1 %v14716_v21, %s11832_s25 }
 0x412   :  { %8160 = vrot.lane.b32.xlu1 %v14716_v21, %s11833_s3 }
 0x42f   :  { %v6684_v14 = vpop.f32.mrf.mxu0  ;;  %v15201_v27 = vpop.xlane.xlu0 %7202 }
 0x430   :  { %v6685_v51 = vadd.f32 %v6684_v14, %v5808_v62  ;;  %v6725_v41 = vpop.f32.mrf.mxu1 }
 0x431   :  { %v6686_v6 = vpop.f32.mrf.mxu0 }
 0x432   :  { %v6726_v53 = vadd.f32 %v6725_v41, %v6685_v51  ;;  %v6687_v12 = vadd.f32 %v6686_v6, %v5812_v28  ;;  %v6727_v37 = vpop.f32.mrf.mxu1 }
 0x433   :  { %v6688_v40 = vpop.f32.mrf.mxu0  ;;  %v15203_v56 = vpop.xlane.xlu0 %7266 }
 0x434   :  { %v6728_v16 = vadd.f32 %v6727_v37, %v6687_v12  ;;  %v6729_v49 = vpop.f32.mrf.mxu1 }
 0x435   :  { %v6689_v36 = vpop.f32.mrf.mxu0  ;;  %v15212_v49 = vpop.permute.xlu1 %6994 }
 0x436   :  { %v6730_v23 = vpop.f32.mrf.mxu1  ;;  %16336 = vst [vmem:[#allocation29_spill] sm:$0xff] %v15212_v49 }
 0x43b   :  { %v7419_v13 = vpop.permute.xlu0 %7418 }
 0x43c   :  { %v7421_v20 = vsel %vm6978_vm0, %v7419_v13, 0.0 }
 0x43d   :  { %7422 = vadd.xlane.f32.xlu0 %v7421_v20 }
 0x43f   :  { %v7335_v15 = vpop.permute.xlu0 %7334 }
 0x444   :  { %v7337_v62 = vpop.permute.xlu0 %7336 }
 0x445   :  { %v7338_v14 = vsel %vm7321_vm2, %v7335_v15, %v7337_v62 }
 0x446   :  { %v7340_v9 = vsel %vm6978_vm0, %v7338_v14, 0.0 }
 0x447   :  { %7341 = vadd.xlane.f32.xlu0 %v7340_v9 }
 0x448   :  { %v7575_v28 = vpop.permute.xlu0 %7574 }
 0x449   :  { %v7577_v51 = vsel %vm6978_vm0, %v7575_v28, 0.0 }
 0x44b   :  { %7578 = vadd.xlane.f32.xlu0 %v7577_v51 }
 0x44c   :  { %v7639_v41 = vpop.permute.xlu0 %7638 }
 0x44d   :  { %v7641_v6 = vsel %vm6978_vm0, %v7639_v41, 0.0 }
 0x44f   :  { %7642 = vadd.xlane.f32.xlu0 %v7641_v6 }
 0x450   :  { %v7491_v12 = vpop.permute.xlu0 %7490 }
 0x454   :  { %v7493_v37 = vpop.permute.xlu0 %7492 }
 0x455   :  { %v7494_v40 = vsel %vm7477_vm3, %v7491_v12, %v7493_v37 }
 0x456   :  { %v7496_v20 = vsel %vm6978_vm0, %v7494_v40, 0.0 }
 0x457   :  { %7497 = vadd.xlane.f32.xlu0 %v7496_v20 }
 0x469   :  { %v7789_v36 = vpop.xlane.xlu1 %7788 }
 0x46a   :  { %v7790_v23 = vmul.f32 0.020408163, %v7789_v36 }
 0x46c   :  { %v15215_v9 = vsub.f32 %v14266_v7, %v7790_v23 }
 0x46d   :  { %v7853_v13 = vpop.xlane.xlu1 %7852 }
 0x46e   :  { %v7854_v15 = vmul.f32 0.020408163, %v7853_v13  ;;  %v7792_v62 = vmul.f32 %v15215_v9, %v15215_v9 }
 0x46f   :  { %v6766_v14 = vpop.f32.mrf.mxu0 }
 0x470   :  { %v15220_v28 = vsub.f32 %v14266_v7, %v7854_v15  ;;  %v6767_v51 = vadd.f32 %v6766_v14, %v6726_v53  ;;  %v6807_v41 = vpop.f32.mrf.mxu1  ;;  %7794 = vrot.lane.b32.xlu0 %v7792_v62, %s11828_s11 }
 0x471   :  { %v6768_v6 = vpop.f32.mrf.mxu0  ;;  %v7702_v12 = vpop.xlane.xlu1 %7701 }
 0x472   :  { %v15223_v37 = vadd.f32 %v6807_v41, %v6767_v51  ;;  %v6769_v40 = vadd.f32 %v6768_v6, %v6728_v16  ;;  %v6809_v20 = vpop.f32.mrf.mxu1  ;;  %v7703_v36 = vmul.f32 0.020408163, %v7702_v12  ;;  %v7856_v23 = vmul.f32 %v15220_v28, %v15220_v28 }
 0x473   :  { %v6770_v13 = vpop.f32.mrf.mxu0 }
 0x474   :  { %16337 = vst [vmem:[#allocation30_spill] sm:$0xff] %v15223_v37  ;;  %v15227_v49 = vadd.f32 %v6809_v20, %v6769_v40  ;;  %v15230_v15 = vsub.f32 %v13835_v10, %v7703_v36  ;;  %v6811_v53 = vpop.f32.mrf.mxu1  ;;  %7858 = vrot.lane.b32.xlu0 %v7856_v23, %s11829_s24  ;;  %v15234_v14 = vsub.f32 %v14266_v7, %v7703_v36  ;;  %v7204_v13 = vmul.f32 0.020408163, %v15201_v27 }
 0x475   :  { %v6771_v62 = vpop.f32.mrf.mxu0 }
 0x476   :  { %16338 = vst [vmem:[#allocation31_spill] sm:$0xff] %v15227_v49  ;;  %v6812_v51 = vpop.f32.mrf.mxu1  ;;  %v7706_v16 = vmul.f32 %v15230_v15, %v15230_v15  ;;  %v7707_v12 = vmul.f32 %v15234_v14, %v15234_v14 }
 0x478   :  { %7710 = vrot.lane.b32.xlu0 %v7706_v16, %s11827_s10 }
 0x479   :  { %v8009_v41 = vpop.xlane.xlu1 %8008 }
 0x47a   :  { %v8010_v6 = vmul.f32 0.020408163, %v8009_v41 }
 0x47c   :  { %v15242_v10 = vsub.f32 %v14273_v5, %v8010_v6  ;;  %7712 = vrot.lane.b32.xlu0 %v7707_v12, %s11827_s10  ;;  %v7205_v6 = vadd.f32 1e-05, %v7204_v13 }
 0x47d   :  { %v7922_v40 = vpop.xlane.xlu1 %7921 }
 0x47e   :  { %16339 = vst [vmem:[#allocation32_spill] sm:$0xff] %v15242_v10  ;;  %v7923_v20 = vmul.f32 0.020408163, %v7922_v40  ;;  %v8012_v36 = vmul.f32 %v15242_v10, %v15242_v10 }
 0x480   :  { %v15248_v23 = vsub.f32 %v14266_v7, %v7923_v20  ;;  %8014 = vrot.lane.b32.xlu0 %v8012_v36, %s11831_s28  ;;  %v15253_v62 = vsub.f32 %v14273_v5, %v7923_v20  ;;  %v7268_v36 = vmul.f32 0.020408163, %v15203_v56 }
 0x481   :  { %v7047_v53 = vpop.xlane.xlu1 %7046 }
 0x482   :  { %16340 = vst [vmem:[#allocation33_spill] sm:$0xff] %v15248_v23  ;;  %16341 = vst [vmem:[#allocation34_spill] sm:$0xff] %v15253_v62  ;;  %v7048_v51 = vmul.f32 0.020408163, %v7047_v53  ;;  %v7926_v16 = vmul.f32 %v15248_v23, %v15248_v23  ;;  %v7927_v7 = vmul.f32 %v15253_v62, %v15253_v62 }
 0x484   :  { %v7049_v41 = vadd.f32 1e-05, %v7048_v51  ;;  %7930 = vrot.lane.b32.xlu0 %v7926_v16, %s11830_s16  ;;  %v7269_v51 = vadd.f32 1e-05, %v7268_v36 }
 0x486   :  { %11718 = vrsqrt.f32 %v7049_v41  ;;  %v7122_v12 = vpop.xlane.xlu1 %7121 }
 0x487   :  { %v7123_v40 = vmul.f32 0.020408163, %v7122_v12  ;;  %11720 = vrsqrt.f32 %v7205_v6  ;;  %v5816_v12 = vrot.slane %v14917_v39, %v12566_v8  ;;  %v16342_v39 = vmov 3  }
 0x488   :  { %7932 = vrot.lane.b32.xlu0 %v7927_v7, %s11830_s16 }
 0x489   :  { %v7124_v27 = vadd.f32 1e-05, %v7123_v40 }
 0x48a   :  { %v8072_v20 = vpop.permute.xlu1 %8071 }
 0x48b   :  { %11722 = vrsqrt.f32 %v7124_v27  ;;  %v8074_v16 = vsel %vm8073_vm6, %v15184_v3, %v8072_v20 }
 0x48c   :  { %11724 = vrsqrt.f32 %v7269_v51  ;;  %v8076_v36 = vsel %vm6978_vm0, %v8074_v16, 0.0 }
 0x48e   :  { %v8161_v53 = vpop.permute.xlu1 %8160 }
 0x48f   :  { %v10287_v49 = vpop.f32.mrf.mxu0  ;;  %v8163_v13 = vsel %vm6978_vm0, %v8161_v53, 0.0 }
 0x490   :  { %v10309_v41 = vpop.f32.mrf.mxu1  ;;  %8164 = vadd.xlane.f32.xlu1 %v8163_v13 }
 0x491   :  { %v10288_v6 = vpop.f32.mrf.mxu0 }
 0x492   :  { %v10289_v7 = vadd.f32 %v10288_v6, %v10287_v49  ;;  %v10310_v40 = vpop.f32.mrf.mxu1 }
 0x493   :  { %v11719_v37 = vpop.eup %11718  ;;  %v10311_v56 = vadd.f32 %v10310_v40, %v10309_v41  ;;  %v10290_v27 = vpop.f32.mrf.mxu0  ;;  %v16343_v41 = vmov 2  }
 0x494   :  { %v6849_v62 = vadd.f32 %v10289_v7, %v5816_v12  ;;  %v10312_v23 = vpop.f32.mrf.mxu1  ;;  %8077 = vadd.xlane.f32.xlu1 %v8076_v36  ;;  %v7051_v53 = vmul.f32 %v11719_v37, %v14773_v26  ;;  %v11721_v20 = vpop.eup %11720  ;;  %v16344_v37 = vmov 6  }
 0x495   :  { %v10291_v3 = vpop.f32.mrf.mxu0  ;;  %v7207_v8 = vmul.f32 %v11721_v20, %v14773_v26 }
 0x496   :  { %v6889_v13 = vadd.f32 %v10311_v56, %v6849_v62  ;;  %v10313_v10 = vpop.f32.mrf.mxu1  ;;  %7054 = vperm.xlu0 %10449, %v7051_v53  }
 0x498   :  { %v11723_v49 = vpop.eup %11722 }
 0x499   :  { %v7126_v51 = vmul.f32 %v11723_v49, %v14773_v26  ;;  %v11725_v16 = vpop.eup %11724 }
 0x49a   :  { %10451 = vset.pattern.permute.xlu0 %v16342_v39  ;;  %v7271_v23 = vmul.f32 %v11725_v16, %v14773_v26 }
 0x49b   :  { %7210 = vperm.xlu0 %10451, %v7207_v8   ;;  %v16303_v8 = vmov 16  }
 0x49f   :  { %10453 = vset.pattern.permute.xlu0 %v16343_v41 }
 0x4a0   :  { %7129 = vperm.xlu0 %10453, %v7126_v51  }
 0x4a4   :  { %10459 = vset.pattern.permute.xlu0 %v16303_v8 }
 0x4a5   :  { %7274 = vperm.xlu1 %10452, %v7271_v23  }
 0x4a9   :  { %10454 = vset.pattern.permute.xlu1 %v16344_v37 }
 0x4af   :  { %v10331_v62 = vpop.f32.mrf.mxu0 }
 0x4b0   :  { %v10353_v10 = vpop.f32.mrf.mxu1 }
 0x4b1   :  { %v10332_v12 = vpop.f32.mrf.mxu0 }
 0x4b2   :  { %v10333_v6 = vadd.f32 %v10332_v12, %v10331_v62  ;;  %v10354_v7 = vpop.f32.mrf.mxu1 }
 0x4b3   :  { %v10355_v40 = vadd.f32 %v10354_v7, %v10353_v10  ;;  %v10334_v56 = vpop.f32.mrf.mxu0 }
 0x4b4   :  { %v6929_v27 = vadd.f32 %v10333_v6, %v6889_v13  ;;  %v10356_v36 = vpop.f32.mrf.mxu1  ;;  %v16346_v56 = vmov 5  }
 0x4b5   :  { %v10335_v53 = vpop.f32.mrf.mxu0 }
 0x4b6   :  { %v15275_v3 = vadd.f32 %v10355_v40, %v6929_v27  ;;  %v10357_v20 = vpop.f32.mrf.mxu1 }
 0x4b8   :  { %16345 = vst [vmem:[#allocation35_spill] sm:$0xff] %v15275_v3 }
 0x4c6   :  { %v7423_v39 = vpop.xlane.xlu0 %7422 }
 0x4c7   :  { %v7424_v49 = vmul.f32 0.020408163, %v7423_v39 }
 0x4c9   :  { %v7425_v51 = vadd.f32 1e-05, %v7424_v49 }
 0x4cb   :  { %11726 = vrsqrt.f32 %v7425_v51 }
 0x4d0   :  { %v7342_v41 = vpop.xlane.xlu0 %7341 }
 0x4d1   :  { %v7343_v16 = vmul.f32 0.020408163, %v7342_v41 }
 0x4d3   :  { %v7344_v23 = vadd.f32 1e-05, %v7343_v16 }
 0x4d4   :  { %v7579_v37 = vpop.xlane.xlu0 %7578 }
 0x4d5   :  { %11728 = vrsqrt.f32 %v7344_v23  ;;  %v7580_v62 = vmul.f32 0.020408163, %v7579_v37  ;;  %v16347_v37 = vmov 8  }
 0x4d7   :  { %v7581_v10 = vadd.f32 1e-05, %v7580_v62 }
 0x4d8   :  { %v11727_v13 = vpop.eup %11726  ;;  %v7643_v12 = vpop.xlane.xlu0 %7642 }
 0x4d9   :  { %11730 = vrsqrt.f32 %v7581_v10  ;;  %v7644_v6 = vmul.f32 0.020408163, %v7643_v12  ;;  %v7427_v7 = vmul.f32 %v11727_v13, %v14773_v26  ;;  %v15288_v12 = vld [vmem:[%s16261_s5] sm:$0x1] }
 0x4db   :  { %v7645_v40 = vadd.f32 1e-05, %v7644_v6  ;;  %7430 = vperm.xlu1 %10454, %v7427_v7   ;;  %v16348_v7 = vmov 9  }
 0x4dd   :  { %11732 = vrsqrt.f32 %v7645_v40 }
 0x4df   :  { %10455 = vset.pattern.permute.xlu1 %v16346_v56 }
 0x4e0   :  { %v7498_v27 = vpop.xlane.xlu0 %7497 }
 0x4e1   :  { %v7499_v36 = vmul.f32 0.020408163, %v7498_v27 }
 0x4e2   :  { %v11729_v53 = vpop.eup %11728 }
 0x4e3   :  { %v7500_v20 = vadd.f32 1e-05, %v7499_v36  ;;  %v7346_v39 = vmul.f32 %v11729_v53, %v14773_v26  ;;  %v16349_v36 = vmov 7  }
 0x4e4   :  { %v7795_v49 = vpop.permute.xlu0 %7794 }
 0x4e5   :  { %11734 = vrsqrt.f32 %v7500_v20  ;;  %7349 = vperm.xlu1 %10455, %v7346_v39   ;;  %v7797_v51 = vsel %vm6978_vm0, %v7795_v49, 0.0 }
 0x4e6   :  { %v11731_v41 = vpop.eup %11730  ;;  %7798 = vadd.xlane.f32.xlu0 %v7797_v51 }
 0x4e7   :  { %v7583_v16 = vmul.f32 %v11731_v41, %v14773_v26 }
 0x4e8   :  { %v7859_v23 = vpop.permute.xlu0 %7858 }
 0x4e9   :  { %10456 = vset.pattern.permute.xlu1 %v16347_v37  ;;  %v7861_v62 = vsel %vm6978_vm0, %v7859_v23, 0.0 }
 0x4ea   :  { %v11733_v10 = vpop.eup %11732  ;;  %7586 = vperm.xlu1 %10456, %v7583_v16   ;;  %7862 = vadd.xlane.f32.xlu0 %v7861_v62  ;;  %v7069_v62 = vrot.slane %v13130_v35, %v12328_v11 }
 0x4eb   :  { %v7647_v6 = vmul.f32 %v15288_v12, %v11733_v10 }
 0x4ec   :  { %v7711_v13 = vpop.permute.xlu0 %7710 }
 0x4ee   :  { %10457 = vset.pattern.permute.xlu1 %v16348_v7 }
 0x4ef   :  { %7650 = vperm.xlu1 %10457, %v7647_v6  }
 0x4f0   :  { %v7713_v26 = vpop.permute.xlu0 %7712 }
 0x4f1   :  { %v7714_v40 = vsel %vm7697_vm4, %v7711_v13, %v7713_v26 }
 0x4f2   :  { %v11735_v56 = vpop.eup %11734  ;;  %v7716_v27 = vsel %vm6978_vm0, %v7714_v40, 0.0  ;;  %v7225_v40 = vrot.slane %v13210_v43, %v12328_v11 }
 0x4f3   :  { %7717 = vadd.xlane.f32.xlu0 %v7716_v27  ;;  %10458 = vset.pattern.permute.xlu1 %v16349_v36  ;;  %v7502_v53 = vmul.f32 %v15288_v12, %v11735_v56 }
 0x4f4   :  { %v8015_v20 = vpop.permute.xlu0 %8014 }
 0x4f5   :  { %7505 = vperm.xlu1 %10458, %v7502_v53   ;;  %v8017_v39 = vsel %vm6978_vm0, %v8015_v20, 0.0 }
 0x4f7   :  { %8018 = vadd.xlane.f32.xlu0 %v8017_v39 }
 0x4f8   :  { %v7931_v49 = vpop.permute.xlu0 %7930 }
 0x4f9   :  { %10460 = vset.pattern.permute.xlu1 %v16303_v8 }
 0x4fc   :  { %v7933_v51 = vpop.permute.xlu0 %7932 }
 0x4fd   :  { %v7934_v41 = vsel %vm7917_vm5, %v7931_v49, %v7933_v51 }
 0x4fe   :  { %v7936_v16 = vsel %vm6978_vm0, %v7934_v41, 0.0 }
 0x4ff   :  { %7937 = vadd.xlane.f32.xlu0 %v7936_v16 }
 0x511   :  { %v7055_v23 = vpop.permute.xlu0 %7054 }
 0x512   :  { %v7060_v37 = vrot.slane %v7055_v23, %v12328_v11 }
 0x514   :  { %v7061_v10 = vmul.f32 %v7060_v37, %v14279_v0  ;;  %v7145_v37 = vrot.slane %v13150_v55, %v12328_v11  ;;  %v7289_v55 = vrot.slane %v13573_v17, %v12328_v11 }
 0x516   :  { %v7070_v13 = vadd.f32 %v7069_v62, %v7061_v10  ;;  %v7211_v6 = vpop.permute.xlu0 %7210 }
 0x517   :  { %v7216_v7 = vrot.slane %v7211_v6, %v12328_v11 }
 0x518   :  { %v7071_v26 = vmax.f32 %v7070_v13, 0.0 }
 0x519   :  { %v7217_v56 = vmul.f32 %v7216_v7, %v14459_v2  ;;  %v8165_v27 = vpop.xlane.xlu1 %8164 }
 0x51a   :  { %v7083_v36 = vrot.slane %v7071_v26, %v12328_v11  ;;  %v8166_v53 = vmul.f32 0.020408163, %v8165_v27 }
 0x51b   :  { %v7226_v20 = vadd.f32 %v7225_v40, %v7217_v56  ;;  %v7130_v39 = vpop.permute.xlu0 %7129 }
 0x51c   :  { %v15310_v35 = vsub.f32 %v14716_v21, %v8166_v53  ;;  %v7135_v0 = vrot.slane %v7130_v39, %v12328_v11  ;;  %v7085_v49 = vmul.f32 %v7083_v36, %v14631_v58  ;;  %v7084_v17 = vmul.f32 %v7083_v36, %v14608_v50  ;;  %v15356_v50 = vld [vmem:[%s16258_s6] sm:$0x1] }
 0x51d   :  { %v7227_v51 = vmax.f32 %v7226_v20, 0.0  ;;  %v8078_v41 = vpop.xlane.xlu1 %8077 }
 0x51e   :  { %v8168_v43 = vmul.f32 %v15310_v35, %v15310_v35  ;;  %v7136_v2 = vmul.f32 %v7135_v0, %v14726_v60  ;;  %v8079_v16 = vmul.f32 0.020408163, %v8078_v41  ;;  %7090 = vrot.lane.b32.xlu1 %v7085_v49, %s11819_s21  ;;  %v7137_v27 = vmul.f32 %v7135_v0, %v14745_v47  ;;  %v15373_v41 = vld [vmem:[%s16259_s7 + $0x8] sm:$0xff] }
 0x51f   :  { %v7239_v23 = vrot.slane %v7227_v51, %v12328_v11 }
 0x520   :  { %v15322_v62 = vsub.f32 %v14273_v5, %v8079_v16  ;;  %8170 = vrot.lane.b32.xlu0 %v8168_v43, %s11833_s3  ;;  %v7146_v13 = vadd.f32 %v7145_v37, %v7136_v2  ;;  %v15327_v6 = vsub.f32 %v14716_v21, %v8079_v16 }
 0x521   :  { %v7275_v58 = vpop.permute.xlu1 %7274  ;;  %v7240_v10 = vmul.f32 %v7239_v23, %v13227_v63  ;;  %v7241_v63 = vmul.f32 %v7239_v23, %v13250_v32  ;;  %v7147_v32 = vadd.f32 %v7145_v37, %v7137_v27 }
 0x522   :  { %v8082_v60 = vmul.f32 %v15322_v62, %v15322_v62  ;;  %v7280_v7 = vrot.slane %v7275_v58, %v12328_v11  ;;  %v7148_v26 = vmax.f32 %v7146_v13, 0.0  ;;  %v8083_v40 = vmul.f32 %v15327_v6, %v15327_v6 }
 0x523   :  { %7244 = vrot.lane.b32.xlu1 %v7240_v10, %s11822_s26  ;;  %v7149_v51 = vmax.f32 %v7147_v32, 0.0 }
 0x524   :  { %8086 = vrot.lane.b32.xlu0 %v8082_v60, %s11832_s25  ;;  %v7281_v5 = vmul.f32 %v7280_v7, %v14487_v34  ;;  %v7161_v20 = vrot.slane %v7148_v26, %v12328_v11 }
 0x526   :  { %v7290_v56 = vadd.f32 %v7289_v55, %v7281_v5  ;;  %v7168_v49 = vmul.f32 %v7161_v20, %v13190_v33  ;;  %v7166_v36 = vmul.f32 %v7161_v20, %v13170_v22 }
 0x527   :  { %7246 = vrot.lane.b32.xlu1 %v7241_v63, %s11822_s26  ;;  %s16350_s26 = smov 30  }
 0x528   :  { %8088 = vrot.lane.b32.xlu0 %v8083_v40, %s11832_s25  ;;  %v7291_v53 = vmax.f32 %v7290_v56, 0.0 }
 0x52a   :  { %v7303_v34 = vrot.slane %v7291_v53, %v12328_v11  ;;  %v16301_v53 = vmov 18  }
 0x52c   :  { %7088 = vrot.lane.b32.xlu0 %v7084_v17, %s11819_s21  ;;  %v7304_v39 = vmul.f32 %v7303_v34, %v13272_v46  ;;  %v7305_v47 = vmul.f32 %v7303_v34, %v13299_v30  ;;  %v7165_v46 = vrot.slane %v7149_v51, %v12328_v11  ;;  %v15367_v30 = vld [vmem:[%s16259_s7] sm:$0xff]  ;;  %s11859_s21 = smov 66  }
 0x52e   :  { %7308 = vrot.lane.b32.xlu1 %v7304_v39, %s11820_s0  ;;  %v7167_v0 = vmul.f32 %v7165_v46, %v13170_v22  ;;  %v16302_v22 = vmov 17   ;;  %v7169_v27 = vmul.f32 %v7165_v46, %v13190_v33 }
 0x530   :  { %7178 = vrot.lane.b32.xlu0 %v7168_v49, %s16350_s26 }
 0x532   :  { %7310 = vrot.lane.b32.xlu1 %v7305_v47, %s11820_s0 }
 0x534   :  { %8191 = vperm.xlu0 %10459, %v15356_v50  }
 0x536   :  { %7174 = vrot.lane.b32.xlu1 %v7166_v36, %s16350_s26 }
 0x538   :  { %10462 = vset.pattern.permute.xlu0 %v16302_v22 }
 0x53a   :  { %7176 = vrot.lane.b32.xlu1 %v7167_v0, %s16350_s26 }
 0x53e   :  { %8201 = vperm.xlu1 %10460, %v15367_v30  }
 0x542   :  { %8205 = vperm.xlu1 %10460, %v15373_v41  }
 0x546   :  { %8224 = vrot.lane.b32.xlu1 %v14716_v21, %s11835_s30 }
 0x547   :  { %10461 = vset.pattern.permute.xlu1 %v16302_v22 }
 0x556   :  { %v15380_v43 = vpop.permute.xlu1 %7430 }
 0x560   :  { %v15382_v2 = vpop.permute.xlu1 %7349 }
 0x565   :  { %v15384_v16 = vpop.permute.xlu1 %7586 }
 0x56a   :  { %v15386_v23 = vpop.permute.xlu1 %7650 }
 0x56f   :  { %v7799_v20 = vpop.xlane.xlu0 %7798 }
 0x570   :  { %v15388_v37 = vpop.permute.xlu1 %7505 }
 0x573   :  { %v7863_v39 = vpop.xlane.xlu0 %7862 }
 0x57c   :  { %v7718_v47 = vpop.xlane.xlu0 %7717 }
 0x580   :  { %v8019_v36 = vpop.xlane.xlu0 %8018 }
 0x590   :  { %v15390_v58 = vpop.permute.xlu1 %7090 }
 0x591   :  { %16351 = vst [vmem:[#allocation36_spill] sm:$0xff] %v15390_v58 }
 0x595   :  { %v15392_v10 = vpop.permute.xlu1 %7244 }
 0x596   :  { %16352 = vst [vmem:[#allocation37_spill] sm:$0xff] %v15392_v10  ;;  %v7719_v10 = vmul.f32 0.020408163, %v7718_v47 }
 0x599   :  { %v15394_v13 = vpop.permute.xlu1 %7246 }
 0x59a   :  { %16353 = vst [vmem:[#allocation38_spill] sm:$0xff] %v15394_v13 }
 0x5a0   :  { %v15396_v60 = vpop.permute.xlu1 %7308 }
 0x5a1   :  { %16354 = vst [vmem:[#allocation39_spill] sm:$0xff] %v15396_v60 }
 0x5a4   :  { %v15398_v7 = vpop.permute.xlu1 %7310 }
 0x5a5   :  { %16355 = vst [vmem:[#allocation40_spill] sm:$0xff] %v15398_v7 }
 0x5a8   :  { %v15400_v55 = vpop.permute.xlu1 %7174 }
 0x5a9   :  { %16356 = vst [vmem:[#allocation41_spill] sm:$0xff] %v15400_v55 }
 0x5ac   :  { %v15402_v5 = vpop.permute.xlu1 %7176 }
 0x5ad   :  { %16357 = vst [vmem:[#allocation42_spill] sm:$0xff] %v15402_v5 }
 0x5b9   :  { %v15404_v63 = vpop.permute.xlu1 %8201 }
 0x5bd   :  { %v15406_v26 = vpop.permute.xlu1 %8205 }
 0x5c1   :  { %v8225_v40 = vpop.permute.xlu1 %8224 }
 0x5c2   :  { %v8227_v56 = vsel %vm6978_vm0, %v8225_v40, 0.0  ;;  %v7938_v40 = vpop.xlane.xlu0 %7937 }
 0x5c3   :  { %8228 = vadd.xlane.f32.xlu1 %v8227_v56 }
 0x5d4   :  { %7180 = vrot.lane.b32.xlu1 %v7169_v27, %s16350_s26  ;;  %s11856_s26 = smov 36  }
 0x5d8   :  { %8255 = vperm.xlu1 %10461, %v15356_v50  }
 0x5dc   :  { %8265 = vperm.xlu1 %10461, %v15367_v30  }
 0x5e0   :  { %8289 = vrot.lane.b32.xlu1 %v14716_v21, %s11837_s13 }
 0x5e1   :  { %10463 = vset.pattern.permute.xlu1 %v16301_v53 }
 0x5e4   :  { %8291 = vrot.lane.b32.xlu1 %v14728_v29, %s11837_s13 }
 0x64c   :  { %v8229_v17 = vpop.xlane.xlu1 %8228 }
 0x64d   :  { %v8230_v34 = vmul.f32 0.020408163, %v8229_v17 }
 0x64f   :  { %v15419_v33 = vsub.f32 %v14716_v21, %v8230_v34  ;;  %v8171_v34 = vpop.permute.xlu0 %8170 }
 0x650   :  { %v15421_v32 = vpop.permute.xlu1 %7180 }
 0x651   :  { %16358 = vst [vmem:[#allocation43_spill] sm:$0xff] %v15421_v32  ;;  %v8232_v49 = vmul.f32 %v15419_v33, %v15419_v33  ;;  %v7864_v32 = vmul.f32 0.020408163, %v7863_v39 }
 0x653   :  { %8234 = vrot.lane.b32.xlu0 %v8232_v49, %s11835_s30  ;;  %v8087_v53 = vpop.permute.xlu0 %8086  ;;  %v8173_v49 = vsel %vm6978_vm0, %v8171_v34, 0.0  ;;  %v7865_v60 = vadd.f32 1e-05, %v7864_v32  ;;  %v7436_v32 = vrot.slane %v15380_v43, %v12328_v11  ;;  %v7355_v43 = vrot.slane %v15382_v2, %v12328_v11 }
 0x654   :  { %v15426_v51 = vpop.permute.xlu1 %8255 }
 0x655   :  { %v7437_v47 = vmul.f32 %v7436_v32, %v15015_v4  ;;  %v16365_v32 = vmov 13  }
 0x657   :  { %v8089_v22 = vpop.permute.xlu0 %8088 }
 0x658   :  { %v15428_v46 = vpop.permute.xlu1 %8265  ;;  %v8090_v8 = vsel %vm8073_vm6, %v8087_v53, %v8089_v22 }
 0x659   :  { %v8092_v7 = vsel %vm6978_vm0, %v8090_v8, 0.0 }
 0x65c   :  { %v8290_v0 = vpop.permute.xlu1 %8289 }
 0x660   :  { %v8292_v56 = vpop.permute.xlu1 %8291 }
 0x661   :  { %v8294_v27 = vsel %vm8293_vm7, %v8290_v0, %v8292_v56  ;;  %v16359_v0 = vmov 11   ;;  %v15441_v56 = vpop.permute.xlu0 %7088 }
 0x662   :  { %v8296_v17 = vsel %vm6978_vm0, %v8294_v27, 0.0  ;;  %16360 = vst [vmem:[#allocation44_spill] sm:$0xff] %v15441_v56  ;;  %v8020_v56 = vmul.f32 0.020408163, %v8019_v36 }
 0x663   :  { %8297 = vadd.xlane.f32.xlu1 %v8296_v17 }
 0x664   :  { %v8021_v55 = vadd.f32 1e-05, %v8020_v56 }
 0x665   :  { %v15443_v27 = vpop.permute.xlu0 %7178 }
 0x666   :  { %16361 = vst [vmem:[#allocation45_spill] sm:$0xff] %v15443_v27 }
 0x669   :  { %v15445_v22 = vpop.permute.xlu0 %8191 }
 0x672   :  { %8174 = vadd.xlane.f32.xlu0 %v8173_v49 }
 0x674   :  { %8331 = vperm.xlu1 %10463, %v15356_v50  }
 0x676   :  { %8093 = vadd.xlane.f32.xlu0 %v8092_v7 }
 0x678   :  { %8343 = vperm.xlu1 %10463, %v15367_v30  }
 0x67c   :  { %8347 = vperm.xlu1 %10463, %v15373_v41  }
 0x680   :  { %8380 = vrot.lane.b32.xlu1 %v14728_v29, %s11839_s1 }
 0x681   :  { %10464 = vset.pattern.permute.xlu1 %v16359_v0 }
 0x6c5   :  { %v8235_v53 = vpop.permute.xlu0 %8234 }
 0x6c6   :  { %v8237_v8 = vsel %vm6978_vm0, %v8235_v53, 0.0 }
 0x6c7   :  { %8238 = vadd.xlane.f32.xlu0 %v8237_v8 }
 0x6dd   :  { %8269 = vperm.xlu0 %10462, %v15373_v41  }
 0x6ec   :  { %v8298_v7 = vpop.xlane.xlu1 %8297 }
 0x6ed   :  { %v8299_v17 = vmul.f32 0.020408163, %v8298_v7  ;;  %v7800_v7 = vmul.f32 0.020408163, %v7799_v20 }
 0x6ef   :  { %v15450_v34 = vsub.f32 %v14716_v21, %v8299_v17  ;;  %v15455_v0 = vsub.f32 %v14728_v29, %v8299_v17  ;;  %v7801_v17 = vadd.f32 1e-05, %v7800_v7 }
 0x6f0   :  { %v15452_v49 = vpop.permute.xlu1 %8331 }
 0x6f1   :  { %v8302_v13 = vmul.f32 %v15450_v34, %v15450_v34  ;;  %v8303_v53 = vmul.f32 %v15455_v0, %v15455_v0  ;;  %11736 = vrsqrt.f32 %v7801_v17 }
 0x6f2   :  { %11738 = vrsqrt.f32 %v7865_v60  ;;  %v16362_v60 = vmov 12  }
 0x6f3   :  { %8306 = vrot.lane.b32.xlu0 %v8302_v13, %s11837_s13  ;;  %v7720_v13 = vadd.f32 1e-05, %v7719_v10 }
 0x6f4   :  { %v15460_v58 = vpop.permute.xlu1 %8343 }
 0x6f5   :  { %11740 = vrsqrt.f32 %v7720_v13  ;;  %v7356_v13 = vmul.f32 %v7355_v43, %v15032_v24 }
 0x6f6   :  { %11742 = vrsqrt.f32 %v8021_v55  ;;  %v7445_v55 = vrot.slane %v13626_v38, %v12328_v11  ;;  %v7365_v38 = vrot.slane %v13606_v57, %v12328_v11 }
 0x6f7   :  { %8308 = vrot.lane.b32.xlu0 %v8303_v53, %s11837_s13  ;;  %v7939_v53 = vmul.f32 0.020408163, %v7938_v40 }
 0x6f8   :  { %v15465_v8 = vpop.permute.xlu1 %8347  ;;  %v7446_v56 = vadd.f32 %v7445_v55, %v7437_v47 }
 0x6f9   :  { %v7940_v20 = vadd.f32 1e-05, %v7939_v53  ;;  %v16364_v53 = vmov 14  }
 0x6fa   :  { %v7447_v17 = vmax.f32 %v7446_v56, 0.0 }
 0x6fb   :  { %11744 = vrsqrt.f32 %v7940_v20 }
 0x6fc   :  { %v8381_v21 = vpop.permute.xlu1 %8380  ;;  %v7459_v20 = vrot.slane %v7447_v17, %v12328_v11  ;;  %v7665_v17 = vrot.slane %v13507_v25, %v12328_v11  ;;  %v7521_v25 = vrot.slane %v13651_v1, %v12328_v11 }
 0x6fd   :  { %v8383_v27 = vsel %vm6978_vm0, %v8381_v21, 0.0 }
 0x6fe   :  { %8384 = vadd.xlane.f32.xlu1 %v8383_v27  ;;  %v11737_v5 = vpop.eup %11736  ;;  %v7460_v24 = vmul.f32 %v7459_v20, %v13374_v31  ;;  %v7461_v55 = vmul.f32 %v7459_v20, %v13402_v18 }
 0x6ff   :  { %v7803_v27 = vmul.f32 %v15288_v12, %v11737_v5  ;;  %v11739_v21 = vpop.eup %11738  ;;  %v16363_v5 = vmov 10  }
 0x700   :  { %v7867_v10 = vmul.f32 %v15288_v12, %v11739_v21  ;;  %v7366_v21 = vadd.f32 %v7365_v38, %v7356_v13 }
 0x702   :  { %v11741_v39 = vpop.eup %11740 }
 0x703   :  { %v7722_v36 = vmul.f32 %v15288_v12, %v11741_v39  ;;  %v11743_v40 = vpop.eup %11742  ;;  %v16366_v39 = vmov 16  }
 0x704   :  { %v8023_v7 = vmul.f32 %v15288_v12, %v11743_v40  ;;  %v7601_v40 = vrot.slane %v13670_v59, %v12328_v11 }
 0x708   :  { %v11745_v4 = vpop.eup %11744 }
 0x709   :  { %v7942_v2 = vmul.f32 %v15288_v12, %v11745_v4 }
 0x70f   :  { %7825 = vperm.xlu1 %10464, %v15367_v30  }
 0x713   :  { %7829 = vperm.xlu1 %10464, %v15373_v41  }
 0x717   :  { %7806 = vperm.xlu1 %10464, %v7803_v27   ;;  %v7357_v27 = vmul.f32 %v7355_v43, %v15047_v19  ;;  %v7592_v19 = vrot.slane %v15384_v16, %v12328_v11  ;;  %v7656_v43 = vrot.slane %v15386_v23, %v12328_v11  ;;  %v7511_v23 = vrot.slane %v15388_v37, %v12328_v11 }
 0x71b   :  { %10465 = vset.pattern.permute.xlu1 %v16362_v60  ;;  %v7368_v60 = vmax.f32 %v7366_v21, 0.0  ;;  %v16367_v21 = vld [vmem:[#allocation6_spill] sm:$0xff] }
 0x71c   :  { %7870 = vperm.xlu1 %10465, %v7867_v10   ;;  %v7367_v10 = vadd.f32 %v7365_v38, %v7357_v27  ;;  %v8175_v38 = vpop.xlane.xlu0 %8174  ;;  %v7513_v27 = vmul.f32 %v7511_v23, %v15123_v42 }
 0x71d   :  { %v7381_v57 = vrot.slane %v7368_v60, %v12328_v11 }
 0x71e   :  { %v7369_v47 = vmax.f32 %v7367_v10, 0.0  ;;  %v8176_v10 = vmul.f32 0.020408163, %v8175_v38 }
 0x71f   :  { %v7386_v31 = vmul.f32 %v7381_v57, %v13320_v52 }
 0x720   :  { %10466 = vset.pattern.permute.xlu1 %v16363_v5  ;;  %v7593_v5 = vmul.f32 %v7592_v19, %v15070_v44  ;;  %v7388_v44 = vmul.f32 %v7381_v57, %v13350_v54  ;;  %v16369_v57 = vld [vmem:[#allocation7_spill] sm:$0xff] }
 0x721   :  { %7725 = vperm.xlu1 %10466, %v7722_v36   ;;  %v7385_v36 = vrot.slane %v7369_v47, %v12328_v11  ;;  %v8177_v47 = vadd.f32 1e-05, %v8176_v10 }
 0x722   :  { %v7602_v56 = vadd.f32 %v7601_v40, %v7593_v5 }
 0x723   :  { %v7387_v16 = vmul.f32 %v7385_v36, %v13320_v52  ;;  %v7389_v52 = vmul.f32 %v7385_v36, %v13350_v54  ;;  %11746 = vrsqrt.f32 %v8177_v47  ;;  %v16370_v36 = vld [vmem:[#allocation4_spill] sm:$0xff] }
 0x724   :  { %v7603_v18 = vmax.f32 %v7602_v56, 0.0 }
 0x725   :  { %10467 = vset.pattern.permute.xlu1 %v16364_v53 }
 0x726   :  { %8026 = vperm.xlu1 %10467, %v8023_v7   ;;  %v7657_v7 = vmul.f32 %v7656_v43, %v15090_v48  ;;  %v7615_v59 = vrot.slane %v7603_v18, %v12328_v11  ;;  %v7512_v48 = vmul.f32 %v7511_v23, %v15108_v45 }
 0x728   :  { %v7666_v13 = vadd.f32 %v7665_v17, %v7657_v7  ;;  %v7616_v4 = vmul.f32 %v7615_v59, %v13467_v61  ;;  %v7522_v37 = vadd.f32 %v7521_v25, %v7512_v48  ;;  %v7617_v54 = vmul.f32 %v7615_v59, %v16367_v21  ;;  %v16368_v61 = vld [vmem:[#allocation15_spill] sm:$0xff] }
 0x72a   :  { %10468 = vset.pattern.permute.xlu1 %v16365_v32  ;;  %v7667_v53 = vmax.f32 %v7666_v13, 0.0  ;;  %v7523_v32 = vadd.f32 %v7521_v25, %v7513_v27  ;;  %v7524_v45 = vmax.f32 %v7522_v37, 0.0  ;;  %v16373_v27 = vmov 15  }
 0x72b   :  { %7945 = vperm.xlu1 %10468, %v7942_v2   ;;  %v8094_v2 = vpop.xlane.xlu0 %8093 }
 0x72c   :  { %v7679_v20 = vrot.slane %v7667_v53, %v12328_v11  ;;  %v8095_v40 = vmul.f32 0.020408163, %v8094_v2 }
 0x72e   :  { %v7680_v60 = vmul.f32 %v7679_v20, %v16368_v61  ;;  %v7681_v42 = vmul.f32 %v7679_v20, %v16369_v57  ;;  %v8096_v43 = vadd.f32 1e-05, %v8095_v40  ;;  %v11840_v40 = vmov 19  }
 0x72f   :  { %7464 = vrot.lane.b32.xlu1 %v7460_v24, %s11823_s19  ;;  %v7525_v24 = vmax.f32 %v7523_v32, 0.0  ;;  %10474 = vset.pattern.permute.xlu0 %v11840_v40 }
 0x730   :  { %10469 = vset.pattern.permute.xlu1 %v16366_v39  ;;  %v7537_v39 = vrot.slane %v7524_v45, %v12328_v11  ;;  %v11747_v17 = vpop.eup %11746 }
 0x731   :  { %v8179_v13 = vmul.f32 %v15288_v12, %v11747_v17 }
 0x732   :  { %v7542_v5 = vmul.f32 %v7537_v39, %v16370_v36 }
 0x733   :  { %7466 = vrot.lane.b32.xlu1 %v7461_v55, %s11823_s19  ;;  %v7541_v55 = vrot.slane %v7525_v24, %v12328_v11  ;;  %v16374_v24 = vld [vmem:[#allocation9_spill] sm:$0xff]  ;;  %s11843_s19 = smov 123  }
 0x735   :  { %v7543_v56 = vmul.f32 %v7541_v55, %v16370_v36 }
 0x737   :  { %7394 = vrot.lane.b32.xlu1 %v7386_v31, %s11821_s12 }
 0x73b   :  { %7396 = vrot.lane.b32.xlu1 %v7387_v16, %s11821_s12  ;;  %v16371_v16 = vld [vmem:[#allocation5_spill] sm:$0xff] }
 0x73c   :  { %v7544_v18 = vmul.f32 %v7537_v39, %v16371_v16  ;;  %v7741_v39 = vrot.slane %v16374_v24, %v12328_v11 }
 0x73f   :  { %7398 = vrot.lane.b32.xlu1 %v7388_v44, %s11821_s12  ;;  %v7545_v44 = vmul.f32 %v7541_v55, %v16371_v16 }
 0x743   :  { %7400 = vrot.lane.b32.xlu1 %v7389_v52, %s11821_s12  ;;  %s11841_s12 = smov 44  }
 0x747   :  { %7620 = vrot.lane.b32.xlu1 %v7616_v4, %s11825_s2  ;;  %v16372_v4 = vmov 17  }
 0x74b   :  { %7622 = vrot.lane.b32.xlu1 %v7617_v54, %s11825_s2 }
 0x74f   :  { %7684 = vrot.lane.b32.xlu1 %v7680_v60, %s11826_s17 }
 0x750   :  { %v8239_v1 = vpop.xlane.xlu0 %8238 }
 0x751   :  { %v8240_v19 = vmul.f32 0.020408163, %v8239_v1 }
 0x753   :  { %7686 = vrot.lane.b32.xlu1 %v7681_v42, %s11826_s17  ;;  %v8241_v31 = vadd.f32 1e-05, %v8240_v19  ;;  %s11845_s17 = smov 74  }
 0x755   :  { %11748 = vrsqrt.f32 %v8241_v31 }
 0x756   :  { %11750 = vrsqrt.f32 %v8096_v43  ;;  %v16375_v43 = vld [vmem:[#allocation10_spill] sm:$0xff] }
 0x757   :  { %7550 = vrot.lane.b32.xlu1 %v7542_v5, %s11824_s29 }
 0x758   :  { %v15540_v7 = vpop.permute.xlu0 %8269 }
 0x75b   :  { %7552 = vrot.lane.b32.xlu1 %v7543_v56, %s11824_s29 }
 0x75f   :  { %7554 = vrot.lane.b32.xlu1 %v7544_v18, %s11824_s29 }
 0x762   :  { %v11749_v23 = vpop.eup %11748 }
 0x763   :  { %7556 = vrot.lane.b32.xlu1 %v7545_v44, %s11824_s29  ;;  %v8243_v48 = vmul.f32 %v15288_v12, %v11749_v23  ;;  %v11751_v25 = vpop.eup %11750  ;;  %v16376_v23 = vld [vmem:[#allocation17_spill] sm:$0xff] }
 0x764   :  { %v8098_v20 = vmul.f32 %v15288_v12, %v11751_v25 }
 0x765   :  { %v8307_v59 = vpop.permute.xlu0 %8306 }
 0x767   :  { %8182 = vperm.xlu1 %10469, %v8179_v13  }
 0x769   :  { %v8309_v52 = vpop.permute.xlu0 %8308 }
 0x76a   :  { %v8310_v53 = vsel %vm8293_vm7, %v8307_v59, %v8309_v52  ;;  %v7821_v52 = vrot.slane %v16376_v23, %v12328_v11 }
 0x76b   :  { %10470 = vset.pattern.permute.xlu1 %v16372_v4  ;;  %v8312_v38 = vsel %vm6978_vm0, %v8310_v53, 0.0 }
 0x76c   :  { %8246 = vperm.xlu1 %10470, %v8243_v48   ;;  %8313 = vadd.xlane.f32.xlu0 %v8312_v38 }
 0x770   :  { %10471 = vset.pattern.permute.xlu1 %v16373_v27 }
 0x771   :  { %8101 = vperm.xlu1 %10471, %v8098_v20  }
 0x775   :  { %10472 = vset.pattern.permute.xlu1 %v11840_v40 }
 0x787   :  { %v8385_v37 = vpop.xlane.xlu1 %8384 }
 0x788   :  { %v8386_v21 = vmul.f32 0.020408163, %v8385_v37  ;;  %v16377_v37 = vld [vmem:[#allocation19_spill] sm:$0xff] }
 0x78a   :  { %v15552_v54 = vsub.f32 %v14728_v29, %v8386_v21  ;;  %v7885_v21 = vrot.slane %v16377_v37, %v12328_v11  ;;  %v16387_v37 = vld [vmem:[#allocation34_spill] sm:$0xff] }
 0x78b   :  { %v7826_v2 = vpop.permute.xlu1 %7825 }
 0x78c   :  { %v8388_v32 = vmul.f32 %v15552_v54, %v15552_v54 }
 0x78e   :  { %8390 = vrot.lane.b32.xlu0 %v8388_v32, %s11839_s1 }
 0x78f   :  { %v7830_v45 = vpop.permute.xlu1 %7829 }
 0x793   :  { %v7807_v10 = vpop.permute.xlu1 %7806 }
 0x797   :  { %v7871_v61 = vpop.permute.xlu1 %7870 }
 0x798   :  { %v7876_v48 = vrot.slane %v7871_v61, %v12328_v11 }
 0x79a   :  { %v7877_v20 = vmul.f32 %v7876_v48, %v15220_v28 }
 0x79c   :  { %v7726_v60 = vpop.permute.xlu1 %7725 }
 0x79d   :  { %v7731_v1 = vrot.slane %v7726_v60, %v12328_v11  ;;  %v16378_v60 = vmov 18  }
 0x79f   :  { %v7733_v47 = vmul.f32 %v7731_v1, %v15234_v14  ;;  %v7732_v36 = vmul.f32 %v7731_v1, %v15230_v15  ;;  %v7812_v15 = vrot.slane %v7807_v10, %v12328_v11 }
 0x7a1   :  { %v7743_v57 = vadd.f32 %v7741_v39, %v7733_v47  ;;  %v7742_v5 = vadd.f32 %v7741_v39, %v7732_v36  ;;  %v7813_v13 = vmul.f32 %v7812_v15, %v15215_v9  ;;  %v7886_v9 = vadd.f32 %v7885_v21, %v7877_v20  ;;  %v8027_v24 = vpop.permute.xlu1 %8026  ;;  %v16379_v47 = vld [vmem:[#allocation12_spill] sm:$0xff] }
 0x7a3   :  { %v7744_v31 = vmax.f32 %v7742_v5, 0.0  ;;  %v7822_v53 = vadd.f32 %v7821_v52, %v7813_v13  ;;  %v7887_v61 = vmax.f32 %v7886_v9, 0.0 }
 0x7a5   :  { %v7757_v56 = vrot.slane %v7744_v31, %v12328_v11  ;;  %v7823_v25 = vmax.f32 %v7822_v53, 0.0  ;;  %v7899_v28 = vrot.slane %v7887_v61, %v12328_v11  ;;  %v8032_v31 = vrot.slane %v8027_v24, %v12328_v11  ;;  %v16384_v53 = vld [vmem:[#allocation33_spill] sm:$0xff]  ;;  %v16388_v61 = vld [vmem:[#allocation18_spill] sm:$0xff] }
 0x7a7   :  { %v7762_v16 = vmul.f32 %v7757_v56, %v16375_v43  ;;  %v7835_v32 = vrot.slane %v7823_v25, %v12328_v11  ;;  %v16386_v25 = vld [vmem:[#allocation21_spill] sm:$0xff] }
 0x7a8   :  { %v7961_v20 = vrot.slane %v16386_v25, %v12328_v11 }
 0x7a9   :  { %v7836_v1 = vmul.f32 %v7835_v32, %v7826_v2  ;;  %v7837_v39 = vmul.f32 %v7835_v32, %v7830_v45  ;;  %v7745_v45 = vmax.f32 %v7743_v57, 0.0 }
 0x7f5   :  { %v8314_v42 = vpop.xlane.xlu0 %8313 }
 0x7f6   :  { %v8315_v14 = vmul.f32 0.020408163, %v8314_v42  ;;  %v7900_v42 = vmul.f32 %v7899_v28, %v16379_v47 }
 0x7f8   :  { %v8316_v59 = vadd.f32 1e-05, %v8315_v14 }
 0x800   :  { %v8391_v19 = vpop.permute.xlu0 %8390 }
 0x801   :  { %v8393_v55 = vsel %vm6978_vm0, %v8391_v19, 0.0  ;;  %v7946_v19 = vpop.permute.xlu1 %7945 }
 0x802   :  { %8394 = vadd.xlane.f32.xlu0 %v8393_v55  ;;  %v16380_v55 = vld [vmem:[#allocation13_spill] sm:$0xff]  ;;  %v7951_v57 = vrot.slane %v7946_v19, %v12328_v11 }
 0x803   :  { %v7901_v36 = vmul.f32 %v7899_v28, %v16380_v55  ;;  %v16390_v55 = vld [vmem:[#allocation14_spill] sm:$0xff] }
 0x804   :  { %v7952_v48 = vmul.f32 %v7951_v57, %v16384_v53  ;;  %v7953_v21 = vmul.f32 %v7951_v57, %v16387_v37 }
 0x805   :  { %v15586_v5 = vpop.permute.xlu1 %7464 }
 0x806   :  { %v7962_v32 = vadd.f32 %v7961_v20, %v7952_v48 }
 0x809   :  { %v15589_v2 = vpop.permute.xlu1 %7466 }
 0x818   :  { %7770 = vrot.lane.b32.xlu0 %v7762_v16, %s11827_s10  ;;  %v16381_v16 = vld [vmem:[#allocation32_spill] sm:$0xff] }
 0x819   :  { %v8033_v14 = vmul.f32 %v8032_v31, %v16381_v16 }
 0x81c   :  { %8411 = vperm.xlu0 %10474, %v15356_v50  }
 0x88b   :  { %v8395_v18 = vpop.xlane.xlu0 %8394 }
 0x88c   :  { %v8396_v44 = vmul.f32 0.020408163, %v8395_v18  ;;  %v15597_v18 = vpop.permute.xlu1 %7394 }
 0x88e   :  { %v8397_v17 = vadd.f32 1e-05, %v8396_v44  ;;  %v16382_v44 = vld [vmem:[#allocation23_spill] sm:$0xff] }
 0x890   :  { %11752 = vrsqrt.f32 %v8397_v17  ;;  %v8041_v17 = vrot.slane %v16382_v44, %v12328_v11  ;;  %v15605_v23 = vpop.permute.xlu1 %7396 }
 0x891   :  { %11754 = vrsqrt.f32 %v8316_v59  ;;  %v16383_v59 = vld [vmem:[#allocation27_spill] sm:$0xff] }
 0x892   :  { %v8042_v15 = vadd.f32 %v8041_v17, %v8033_v14 }
 0x894   :  { %v8043_v52 = vmax.f32 %v8042_v15, 0.0 }
 0x89d   :  { %v11753_v4 = vpop.eup %11752 }
 0x89e   :  { %v8399_v38 = vmul.f32 %v15288_v12, %v11753_v4  ;;  %v11755_v27 = vpop.eup %11754  ;;  %v16385_v4 = vld [vmem:[#allocation11_spill] sm:$0xff] }
 0x89f   :  { %v8318_v10 = vmul.f32 %v15288_v12, %v11755_v27  ;;  %v8055_v27 = vrot.slane %v8043_v52, %v12328_v11 }
 0x8a0   :  { %8402 = vperm.xlu1 %10472, %v8399_v38   ;;  %v7764_v38 = vmul.f32 %v7757_v56, %v16385_v4 }
 0x8a1   :  { %v8056_v56 = vmul.f32 %v8055_v27, %v16388_v61 }
 0x8a4   :  { %10473 = vset.pattern.permute.xlu1 %v16378_v60  ;;  %v7964_v60 = vmax.f32 %v7962_v32, 0.0 }
 0x8a5   :  { %8321 = vperm.xlu1 %10473, %v8318_v10   ;;  %v7963_v10 = vadd.f32 %v7961_v20, %v7953_v21 }
 0x8a6   :  { %v7977_v24 = vrot.slane %v7964_v60, %v12328_v11 }
 0x8a7   :  { %v7965_v28 = vmax.f32 %v7963_v10, 0.0 }
 0x8a9   :  { %7840 = vrot.lane.b32.xlu1 %v7836_v1, %s11828_s11 }
 0x8aa   :  { %10475 = vset.pattern.permute.xlu1 %v11840_v40  ;;  %v7761_v40 = vrot.slane %v7745_v45, %v12328_v11 }
 0x8ac   :  { %v7763_v13 = vmul.f32 %v7761_v40, %v16375_v43  ;;  %v15615_v43 = vpop.permute.xlu1 %7398  ;;  %v7765_v9 = vmul.f32 %v7761_v40, %v16385_v4  ;;  %v16391_v40 = vld [vmem:[#allocation16_spill] sm:$0xff] }
 0x8ad   :  { %7842 = vrot.lane.b32.xlu1 %v7837_v39, %s11828_s11  ;;  %v16389_v39 = vld [vmem:[#allocation20_spill] sm:$0xff]  ;;  %v7984_v16 = vmul.f32 %v7977_v24, %v16391_v40 }
 0x8ae   :  { %v8057_v47 = vmul.f32 %v8055_v27, %v16389_v39  ;;  %v8337_v27 = vrot.slane %v15452_v49, %v12328_v11 }
 0x8b0   :  { %v15620_v1 = vpop.permute.xlu1 %7400 }
 0x8b1   :  { %7904 = vrot.lane.b32.xlu1 %v7900_v42, %s11829_s24  ;;  %v7981_v42 = vrot.slane %v7965_v28, %v12328_v11 }
 0x8b3   :  { %v7983_v45 = vmul.f32 %v7981_v42, %v16390_v55  ;;  %v7985_v44 = vmul.f32 %v7981_v42, %v16391_v40 }
 0x8b4   :  { %v15627_v19 = vpop.permute.xlu1 %7620 }
 0x8b5   :  { %7906 = vrot.lane.b32.xlu1 %v7901_v36, %s11829_s24  ;;  %v7982_v36 = vmul.f32 %v7977_v24, %v16390_v55 }
 0x8b8   :  { %v15632_v31 = vpop.permute.xlu1 %7622 }
 0x8b9   :  { %8421 = vperm.xlu1 %10475, %v15367_v30  }
 0x8bc   :  { %v15637_v14 = vpop.permute.xlu1 %7684 }
 0x8bd   :  { %8425 = vperm.xlu1 %10475, %v15373_v41  }
 0x8c0   :  { %v15641_v17 = vpop.permute.xlu1 %7686 }
 0x8c1   :  { %8445 = vrot.lane.b32.xlu1 %v14728_v29, %s11841_s12  ;;  %16392 = vst [vmem:[#allocation6_spill] sm:$0xff] %v15641_v17 }
 0x8c4   :  { %v15643_v15 = vpop.permute.xlu1 %7550 }
 0x8c5   :  { %8447 = vrot.lane.b32.xlu1 %v16383_v59, %s11841_s12 }
 0x8c8   :  { %v15645_v57 = vpop.permute.xlu1 %7552 }
 0x8c9   :  { %7772 = vrot.lane.b32.xlu1 %v7763_v13, %s11827_s10 }
 0x8cc   :  { %v15647_v13 = vpop.permute.xlu1 %7554 }
 0x8cd   :  { %7774 = vrot.lane.b32.xlu1 %v7764_v38, %s11827_s10 }
 0x8d0   :  { %v15649_v52 = vpop.permute.xlu1 %7556 }
 0x8d1   :  { %7776 = vrot.lane.b32.xlu1 %v7765_v9, %s11827_s10 }
 0x8d4   :  { %v8183_v53 = vpop.permute.xlu1 %8182 }
 0x8d5   :  { %8060 = vrot.lane.b32.xlu1 %v8056_v56, %s11831_s28 }
 0x8d8   :  { %v15651_v48 = vpop.permute.xlu1 %8246 }
 0x8d9   :  { %8062 = vrot.lane.b32.xlu1 %v8057_v47, %s11831_s28 }
 0x8dc   :  { %v15653_v4 = vpop.permute.xlu1 %8101 }
 0x8dd   :  { %7990 = vrot.lane.b32.xlu1 %v7982_v36, %s11830_s16 }
 0x8e1   :  { %7992 = vrot.lane.b32.xlu1 %v7983_v45, %s11830_s16 }
 0x8e5   :  { %7994 = vrot.lane.b32.xlu1 %v7984_v16, %s11830_s16 }
 0x8e9   :  { %7996 = vrot.lane.b32.xlu1 %v7985_v44, %s11830_s16 }
 0x91b   :  { %v15655_v38 = vpop.permute.xlu1 %8402 }
 0x920   :  { %v8322_v25 = vpop.permute.xlu1 %8321 }
 0x921   :  { %v8327_v20 = vrot.slane %v8322_v25, %v12328_v11 }
 0x923   :  { %v8329_v37 = vmul.f32 %v8327_v20, %v15455_v0 }
 0x924   :  { %v15661_v21 = vpop.permute.xlu1 %7840 }
 0x925   :  { %v15663_v32 = vadd.f32 %v8337_v27, %v8329_v37 }
 0x928   :  { %v15665_v9 = vpop.permute.xlu1 %7842 }
 0x929   :  { %16393 = vst [vmem:[#allocation15_spill] sm:$0xff] %v15665_v9 }
 0x92c   :  { %v15667_v10 = vpop.permute.xlu1 %7904 }
 0x930   :  { %v15669_v60 = vpop.permute.xlu1 %7906 }
 0x931   :  { %16394 = vst [vmem:[#allocation7_spill] sm:$0xff] %v15669_v60 }
 0x934   :  { %v15671_v61 = vpop.permute.xlu1 %8421 }
 0x938   :  { %v15673_v56 = vpop.permute.xlu1 %8425 }
 0x93c   :  { %v8446_v28 = vpop.permute.xlu1 %8445 }
 0x940   :  { %v8448_v24 = vpop.permute.xlu1 %8447 }
 0x941   :  { %v8450_v49 = vsel %vm8449_vm8, %v8446_v28, %v8448_v24 }
 0x942   :  { %v8452_v0 = vsel %vm6978_vm0, %v8450_v49, 0.0 }
 0x943   :  { %8453 = vadd.xlane.f32.xlu1 %v8452_v0 }
 0x944   :  { %v15677_v39 = vpop.permute.xlu1 %7772 }
 0x948   :  { %v15679_v47 = vpop.permute.xlu1 %7774 }
 0x949   :  { %16395 = vst [vmem:[#allocation4_spill] sm:$0xff] %v15679_v47 }
 0x94c   :  { %v15681_v42 = vpop.permute.xlu1 %7776 }
 0x950   :  { %v15683_v55 = vpop.permute.xlu1 %8060 }
 0x954   :  { %v15685_v36 = vpop.permute.xlu1 %8062 }
 0x955   :  { %16396 = vst [vmem:[#allocation5_spill] sm:$0xff] %v15685_v36  ;;  %v15707_v36 = vpop.permute.xlu0 %7770 }
 0x958   :  { %v15687_v45 = vpop.permute.xlu1 %7990 }
 0x959   :  { %v8412_v60 = vpop.permute.xlu0 %8411 }
 0x95c   :  { %v15689_v40 = vpop.permute.xlu1 %7992 }
 0x960   :  { %v15691_v16 = vpop.permute.xlu1 %7994 }
 0x961   :  { %16397 = vst [vmem:[#allocation9_spill] sm:$0xff] %v15691_v16 }
 0x964   :  { %v15693_v44 = vpop.permute.xlu1 %7996 }
 0x965   :  { %16398 = vst [vmem:[#allocation10_spill] sm:$0xff] %v15693_v44  ;;  %v8328_v44 = vmul.f32 %v8327_v20, %v15450_v34 }
 0x967   :  { %v8338_v9 = vadd.f32 %v8337_v27, %v8328_v44  ;;  %v8197_v27 = vrot.slane %v15445_v22, %v12328_v11 }
 0x969   :  { %v8340_v17 = vmax.f32 %v8338_v9, 0.0  ;;  %v8252_v9 = vrot.slane %v15651_v48, %v12328_v11 }
 0x96b   :  { %v15713_v47 = vrot.slane %v8340_v17, %v12328_v11 }
 0x9cc   :  { %v8454_v25 = vpop.xlane.xlu1 %8453 }
 0x9cd   :  { %v8455_v37 = vmul.f32 0.020408163, %v8454_v25 }
 0x9cf   :  { %v15696_v28 = vsub.f32 %v14728_v29, %v8455_v37  ;;  %v15699_v24 = vsub.f32 %v16383_v59, %v8455_v37 }
 0x9d1   :  { %v8458_v49 = vmul.f32 %v15696_v28, %v15696_v28  ;;  %v8459_v0 = vmul.f32 %v15699_v24, %v15699_v24 }
 0x9d3   :  { %8462 = vrot.lane.b32.xlu0 %v8458_v49, %s11841_s12  ;;  %v11842_v49 = vmov 20  }
 0x9d4   :  { %10476 = vset.pattern.permute.xlu1 %v11842_v49  ;;  %10477 = vset.pattern.permute.xlu0 %v11842_v49  ;;  %v8261_v49 = vrot.slane %v15426_v51, %v12328_v11 }
 0x9d7   :  { %8464 = vrot.lane.b32.xlu0 %v8459_v0, %s11841_s12  ;;  %v8358_v0 = vmul.f32 %v15713_v47, %v15460_v58 }
 0xa45   :  { %v8463_v25 = vpop.permute.xlu0 %8462 }
 0xa49   :  { %v8465_v16 = vpop.permute.xlu0 %8464 }
 0xa4a   :  { %v8466_v29 = vsel %vm8449_vm8, %v8463_v25, %v8465_v16 }
 0xa4b   :  { %v8468_v37 = vsel %vm6978_vm0, %v8466_v29, 0.0  ;;  %v8188_v29 = vrot.slane %v8183_v53, %v12328_v11 }
 0xa4c   :  { %8469 = vadd.xlane.f32.xlu0 %v8468_v37  ;;  %v8253_v37 = vmul.f32 %v8252_v9, %v15419_v33  ;;  %v16399_v33 = vld [vmem:[#allocation22_spill] sm:$0xff] }
 0xa4d   :  { %v8189_v20 = vmul.f32 %v8188_v29, %v15310_v35  ;;  %v8107_v35 = vrot.slane %v15653_v4, %v12328_v11 }
 0xa4f   :  { %v8198_v17 = vadd.f32 %v8197_v27, %v8189_v20  ;;  %v8108_v29 = vmul.f32 %v8107_v35, %v15322_v62  ;;  %v8109_v20 = vmul.f32 %v8107_v35, %v15327_v6 }
 0xa51   :  { %v8199_v44 = vmax.f32 %v8198_v17, 0.0 }
 0xa53   :  { %v8211_v53 = vrot.slane %v8199_v44, %v12328_v11 }
 0xa55   :  { %v8212_v48 = vmul.f32 %v8211_v53, %v15404_v63  ;;  %v8213_v4 = vmul.f32 %v8211_v53, %v15406_v26  ;;  %v16400_v26 = vld [vmem:[#allocation26_spill] sm:$0xff] }
 0xa62   :  { %8366 = vrot.lane.b32.xlu0 %v8358_v0, %s11837_s13 }
 0xa66   :  { %8487 = vperm.xlu0 %10477, %v15356_v50  }
 0xad5   :  { %v8470_v16 = vpop.xlane.xlu0 %8469 }
 0xad6   :  { %v8471_v25 = vmul.f32 0.020408163, %v8470_v16  ;;  %v8262_v16 = vadd.f32 %v8261_v49, %v8253_v37  ;;  %v8408_v37 = vrot.slane %v15655_v38, %v12328_v11 }
 0xad8   :  { %v8472_v34 = vadd.f32 1e-05, %v8471_v25  ;;  %v8263_v22 = vmax.f32 %v8262_v16, 0.0 }
 0xada   :  { %11756 = vrsqrt.f32 %v8472_v34  ;;  %v8117_v34 = vrot.slane %v16399_v33, %v12328_v11  ;;  %v8275_v51 = vrot.slane %v8263_v22, %v12328_v11 }
 0xadc   :  { %v8118_v27 = vadd.f32 %v8117_v34, %v8108_v29  ;;  %v8276_v62 = vmul.f32 %v8275_v51, %v15428_v46  ;;  %v8277_v44 = vmul.f32 %v8275_v51, %v15540_v7  ;;  %v8417_v46 = vrot.slane %v8412_v60, %v12328_v11  ;;  %v16401_v7 = vld [vmem:[#allocation24_spill] sm:$0xff] }
 0xadd   :  { %v8341_v29 = vmax.f32 %v15663_v32, 0.0 }
 0xade   :  { %v8120_v17 = vmax.f32 %v8118_v27, 0.0 }
 0xae0   :  { %v8133_v9 = vrot.slane %v8120_v17, %v12328_v11 }
 0xae2   :  { %v8138_v49 = vmul.f32 %v8133_v9, %v16400_v26  ;;  %v8140_v35 = vmul.f32 %v8133_v9, %v16401_v7 }
 0xae7   :  { %v11757_v0 = vpop.eup %11756 }
 0xae8   :  { %v8474_v25 = vmul.f32 %v15288_v12, %v11757_v0  ;;  %v8119_v12 = vadd.f32 %v8117_v34, %v8109_v20  ;;  %v8409_v0 = vmul.f32 %v8408_v37, %v15552_v54 }
 0xaea   :  { %8477 = vperm.xlu1 %10476, %v8474_v25   ;;  %v8121_v63 = vmax.f32 %v8119_v12, 0.0  ;;  %v8418_v16 = vadd.f32 %v8417_v46, %v8409_v0 }
 0xaec   :  { %v8137_v6 = vrot.slane %v8121_v63, %v12328_v11  ;;  %v8419_v38 = vmax.f32 %v8418_v16, 0.0  ;;  %v15812_v16 = vpop.permute.xlu0 %8366 }
 0xaee   :  { %8216 = vrot.lane.b32.xlu1 %v8212_v48, %s11833_s3  ;;  %v8139_v53 = vmul.f32 %v8137_v6, %v16400_v26  ;;  %v8141_v25 = vmul.f32 %v8137_v6, %v16401_v7  ;;  %v8431_v22 = vrot.slane %v8419_v38, %v12328_v11  ;;  %v8357_v48 = vrot.slane %v8341_v29, %v12328_v11 }
 0xaf0   :  { %v8432_v54 = vmul.f32 %v8431_v22, %v15671_v61  ;;  %v8433_v60 = vmul.f32 %v8431_v22, %v15673_v56  ;;  %v8359_v61 = vmul.f32 %v8357_v48, %v15460_v58  ;;  %v8360_v56 = vmul.f32 %v15713_v47, %v15465_v8  ;;  %v8488_v7 = vpop.permute.xlu0 %8487 }
 0xaf1   :  { %v8361_v33 = vmul.f32 %v8357_v48, %v15465_v8  ;;  %v15819_v48 = vld [vmem:[%s16261_s5] sm:$0x1] }
 0xaf2   :  { %8218 = vrot.lane.b32.xlu1 %v8213_v4, %s11833_s3  ;;  %s11851_s3 = smov 55  }
 0xaf6   :  { %8280 = vrot.lane.b32.xlu1 %v8276_v62, %s11835_s30 }
 0xafa   :  { %8282 = vrot.lane.b32.xlu1 %v8277_v44, %s11835_s30 }
 0xafe   :  { %8146 = vrot.lane.b32.xlu1 %v8138_v49, %s11832_s25 }
 0xb02   :  { %8148 = vrot.lane.b32.xlu1 %v8139_v53, %s11832_s25 }
 0xb06   :  { %8150 = vrot.lane.b32.xlu1 %v8140_v35, %s11832_s25 }
 0xb0a   :  { %8152 = vrot.lane.b32.xlu1 %v8141_v25, %s11832_s25  ;;  %v11844_v25 = vmov 21  }
 0xb0b   :  { %10479 = vset.pattern.permute.xlu0 %v11844_v25 }
 0xb0e   :  { %8436 = vrot.lane.b32.xlu1 %v8432_v54, %s11839_s1 }
 0xb12   :  { %8438 = vrot.lane.b32.xlu1 %v8433_v60, %s11839_s1 }
 0xb16   :  { %8499 = vperm.xlu1 %10476, %v15367_v30  }
 0xb1a   :  { %8503 = vperm.xlu1 %10476, %v15373_v41  }
 0xb1e   :  { %8536 = vrot.lane.b32.xlu1 %v16383_v59, %s11843_s19 }
 0xb1f   :  { %10478 = vset.pattern.permute.xlu1 %v11844_v25  ;;  %v11846_v25 = vmov 22  }
 0xb22   :  { %8368 = vrot.lane.b32.xlu1 %v8359_v61, %s11837_s13 }
 0xb26   :  { %8370 = vrot.lane.b32.xlu1 %v8360_v56, %s11837_s13 }
 0xb2a   :  { %8372 = vrot.lane.b32.xlu1 %v8361_v33, %s11837_s13 }
 0xb65   :  { %v15777_v32 = vpop.permute.xlu1 %8477 }
 0xb69   :  { %v15779_v34 = vpop.permute.xlu1 %8216 }
 0xb6d   :  { %v15781_v51 = vpop.permute.xlu1 %8218 }
 0xb71   :  { %v15783_v20 = vpop.permute.xlu1 %8280 }
 0xb75   :  { %v15785_v58 = vpop.permute.xlu1 %8282 }
 0xb76   :  { %16402 = vst [vmem:[#allocation17_spill] sm:$0xff] %v15785_v58 }
 0xb79   :  { %v15787_v27 = vpop.permute.xlu1 %8146 }
 0xb7d   :  { %v15789_v4 = vpop.permute.xlu1 %8148 }
 0xb81   :  { %v15791_v47 = vpop.permute.xlu1 %8150 }
 0xb85   :  { %v15793_v12 = vpop.permute.xlu1 %8152 }
 0xb89   :  { %v15795_v8 = vpop.permute.xlu1 %8436 }
 0xb8d   :  { %v15797_v17 = vpop.permute.xlu1 %8438 }
 0xb8e   :  { %16403 = vst [vmem:[#allocation19_spill] sm:$0xff] %v15797_v17 }
 0xb91   :  { %v15799_v62 = vpop.permute.xlu1 %8499 }
 0xb95   :  { %v15801_v63 = vpop.permute.xlu1 %8503 }
 0xb99   :  { %v8537_v9 = vpop.permute.xlu1 %8536 }
 0xb9a   :  { %v8539_v44 = vsel %vm6978_vm0, %v8537_v9, 0.0 }
 0xb9b   :  { %8540 = vadd.xlane.f32.xlu1 %v8539_v44 }
 0xb9d   :  { %v15804_v37 = vpop.permute.xlu1 %8368 }
 0xba1   :  { %v15806_v6 = vpop.permute.xlu1 %8370 }
 0xba2   :  { %16404 = vst [vmem:[#allocation12_spill] sm:$0xff] %v15806_v6 }
 0xba5   :  { %v15808_v26 = vpop.permute.xlu1 %8372 }
 0xba6   :  { %16405 = vst [vmem:[#allocation13_spill] sm:$0xff] %v15808_v26  ;;  %v16424_v26 = vld [vmem:[#allocation37_spill] sm:$0xff] }
 0xc24   :  { %v8541_v49 = vpop.xlane.xlu1 %8540 }
 0xc25   :  { %v8542_v0 = vmul.f32 0.020408163, %v8541_v49 }
 0xc27   :  { %v8543_v46 = vsub.f32 %v16383_v59, %v8542_v0 }
 0xc29   :  { %v8544_v53 = vmul.f32 %v8543_v46, %v8543_v46 }
 0xc2b   :  { %8546 = vrot.lane.b32.xlu0 %v8544_v53, %s11843_s19 }
 0xc9d   :  { %v8547_v35 = vpop.permute.xlu0 %8546 }
 0xc9e   :  { %v8549_v38 = vsel %vm6978_vm0, %v8547_v35, 0.0 }
 0xc9f   :  { %8550 = vadd.xlane.f32.xlu0 %v8549_v38 }
 0xcb5   :  { %8567 = vperm.xlu0 %10479, %v15356_v50  }
 0xcb9   :  { %10481 = vset.pattern.permute.xlu0 %v11846_v25 }
 0xd28   :  { %v8551_v22 = vpop.xlane.xlu0 %8550 }
 0xd29   :  { %v8552_v54 = vmul.f32 0.020408163, %v8551_v22  ;;  %v15833_v22 = vld [vmem:[%s16258_s6] sm:$0x1] }
 0xd2b   :  { %v8553_v60 = vadd.f32 1e-05, %v8552_v54 }
 0xd2d   :  { %11758 = vrsqrt.f32 %v8553_v60 }
 0xd3a   :  { %v11759_v29 = vpop.eup %11758 }
 0xd3b   :  { %v8555_v61 = vmul.f32 %v15819_v48, %v11759_v29 }
 0xd3d   :  { %8558 = vperm.xlu1 %10478, %v8555_v61  }
 0xd41   :  { %8577 = vperm.xlu1 %10478, %v15367_v30   ;;  %v8568_v30 = vpop.permute.xlu0 %8567 }
 0xd45   :  { %8581 = vperm.xlu1 %10478, %v15373_v41  }
 0xd49   :  { %8600 = vrot.lane.b32.xlu1 %v16383_v59, %s11845_s17 }
 0xd4a   :  { %10480 = vset.pattern.permute.xlu1 %v11846_v25 }
 0xdb8   :  { %v8559_v50 = vpop.permute.xlu1 %8558 }
 0xdb9   :  { %v8564_v29 = vrot.slane %v8559_v50, %v12328_v11 }
 0xdbc   :  { %v8578_v56 = vpop.permute.xlu1 %8577 }
 0xdc0   :  { %v8582_v33 = vpop.permute.xlu1 %8581 }
 0xdc4   :  { %v8601_v9 = vpop.permute.xlu1 %8600 }
 0xdc5   :  { %v8603_v44 = vsel %vm6978_vm0, %v8601_v9, 0.0  ;;  %v8565_v9 = vmul.f32 %v8564_v29, %v8543_v46 }
 0xdc6   :  { %8604 = vadd.xlane.f32.xlu1 %v8603_v44  ;;  %v8573_v44 = vrot.slane %v8568_v30, %v12328_v11 }
 0xe4f   :  { %v8605_v49 = vpop.xlane.xlu1 %8604 }
 0xe50   :  { %v8606_v0 = vmul.f32 0.020408163, %v8605_v49  ;;  %v8574_v49 = vadd.f32 %v8573_v44, %v8565_v9 }
 0xe52   :  { %v8607_v53 = vsub.f32 %v16383_v59, %v8606_v0  ;;  %v8483_v0 = vrot.slane %v15777_v32, %v12328_v11 }
 0xe54   :  { %v8608_v35 = vmul.f32 %v8607_v53, %v8607_v53  ;;  %v8485_v50 = vmul.f32 %v8483_v0, %v15699_v24 }
 0xe56   :  { %8610 = vrot.lane.b32.xlu0 %v8608_v35, %s11845_s17  ;;  %v8575_v35 = vmax.f32 %v8574_v49, 0.0 }
 0xe58   :  { %v8587_v17 = vrot.slane %v8575_v35, %v12328_v11 }
 0xe5a   :  { %v8588_v46 = vmul.f32 %v8587_v17, %v8578_v56  ;;  %v8589_v32 = vmul.f32 %v8587_v17, %v8582_v33  ;;  %v15860_v33 = vld [vmem:[%s16259_s7] sm:$0xff] }
 0xec8   :  { %v8611_v41 = vpop.permute.xlu0 %8610 }
 0xec9   :  { %v8613_v38 = vsel %vm6978_vm0, %v8611_v41, 0.0  ;;  %v8484_v41 = vmul.f32 %v8483_v0, %v15696_v28 }
 0xeca   :  { %8614 = vadd.xlane.f32.xlu0 %v8613_v38  ;;  %v8493_v38 = vrot.slane %v8488_v7, %v12328_v11 }
 0xecc   :  { %v8495_v30 = vadd.f32 %v8493_v38, %v8485_v50 }
 0xee0   :  { %8631 = vperm.xlu0 %10481, %v15833_v22  }
 0xf53   :  { %v8615_v54 = vpop.xlane.xlu0 %8614 }
 0xf54   :  { %v8616_v60 = vmul.f32 0.020408163, %v8615_v54 }
 0xf56   :  { %v8617_v61 = vadd.f32 1e-05, %v8616_v60  ;;  %v8494_v60 = vadd.f32 %v8493_v38, %v8484_v41 }
 0xf58   :  { %11760 = vrsqrt.f32 %v8617_v61  ;;  %v8496_v29 = vmax.f32 %v8494_v60, 0.0  ;;  %v8497_v61 = vmax.f32 %v8495_v30, 0.0 }
 0xf5a   :  { %v8509_v28 = vrot.slane %v8496_v29, %v12328_v11  ;;  %v8513_v9 = vrot.slane %v8497_v61, %v12328_v11 }
 0xf5b   :  { %v8632_v35 = vpop.permute.xlu0 %8631 }
 0xf5c   :  { %v8514_v7 = vmul.f32 %v8509_v28, %v15799_v62  ;;  %v8515_v24 = vmul.f32 %v8513_v9, %v15799_v62  ;;  %v8516_v56 = vmul.f32 %v8509_v28, %v15801_v63  ;;  %v8517_v17 = vmul.f32 %v8513_v9, %v15801_v63  ;;  %v15866_v62 = vld [vmem:[%s16259_s7 + $0x8] sm:$0xff] }
 0xf65   :  { %v11761_v25 = vpop.eup %11760 }
 0xf66   :  { %v8619_v54 = vmul.f32 %v15819_v48, %v11761_v25  ;;  %v8637_v25 = vrot.slane %v8632_v35, %v12328_v11 }
 0xf68   :  { %8622 = vperm.xlu1 %10480, %v8619_v54  }
 0xf6c   :  { %8592 = vrot.lane.b32.xlu1 %v8588_v46, %s11843_s19 }
 0xf70   :  { %8594 = vrot.lane.b32.xlu1 %v8589_v32, %s11843_s19 }
 0xf74   :  { %8522 = vrot.lane.b32.xlu1 %v8514_v7, %s11841_s12 }
 0xf78   :  { %8524 = vrot.lane.b32.xlu1 %v8515_v24, %s11841_s12 }
 0xf7c   :  { %8526 = vrot.lane.b32.xlu1 %v8516_v56, %s11841_s12 }
 0xf80   :  { %8528 = vrot.lane.b32.xlu1 %v8517_v17, %s11841_s12 }
 0xf84   :  { %8641 = vperm.xlu1 %10480, %v15860_v33  }
 0xf88   :  { %8645 = vperm.xlu1 %10480, %v15866_v62  }
 0xfe3   :  { %v8623_v44 = vpop.permute.xlu1 %8622 }
 0xfe4   :  { %v8628_v0 = vrot.slane %v8623_v44, %v12328_v11 }
 0xfe6   :  { %v8629_v38 = vmul.f32 %v8628_v0, %v8607_v53  ;;  %v16409_v53 = vld [vmem:[#allocation28_spill] sm:$0xff] }
 0xfe7   :  { %v15869_v49 = vpop.permute.xlu1 %8592 }
 0xfe8   :  { %v8638_v50 = vadd.f32 %v8637_v25, %v8629_v38 }
 0xfea   :  { %v8639_v46 = vmax.f32 %v8638_v50, 0.0 }
 0xfeb   :  { %v15871_v63 = vpop.permute.xlu1 %8594 }
 0xfec   :  { %16406 = vst [vmem:[#allocation32_spill] sm:$0xff] %v15871_v63  ;;  %v8651_v29 = vrot.slane %v8639_v46, %v12328_v11 }
 0xfef   :  { %v15874_v41 = vpop.permute.xlu1 %8522 }
 0xff3   :  { %v15877_v54 = vpop.permute.xlu1 %8524 }
 0xff7   :  { %v15879_v60 = vpop.permute.xlu1 %8526 }
 0xff8   :  { %16407 = vst [vmem:[#allocation23_spill] sm:$0xff] %v15879_v60 }
 0xffb   :  { %v15881_v30 = vpop.permute.xlu1 %8528 }
 0xffc   :  { %16408 = vst [vmem:[#allocation27_spill] sm:$0xff] %v15881_v30 }
 0xfff   :  { %v8642_v32 = vpop.permute.xlu1 %8641 }
0x1000   :  { %v8652_v61 = vmul.f32 %v8651_v29, %v8642_v32 }
0x1002   :  { %8656 = vrot.lane.b32.xlu1 %v8652_v61, %s11845_s17 }
0x1003   :  { %v8646_v28 = vpop.permute.xlu1 %8645 }
0x1004   :  { %v8653_v7 = vmul.f32 %v8651_v29, %v8646_v28 }
0x1006   :  { %8658 = vrot.lane.b32.xlu1 %v8653_v7, %s11845_s17 }
0x100a   :  { %8665 = vrot.lane.b32.xlu1 %v16383_v59, %s11847_s14 }
0x100e   :  { %8667 = vrot.lane.b32.xlu1 %v16409_v53, %s11847_s14 }
0x1074   :  { %v15890_v9 = vpop.permute.xlu1 %8656 }
0x1078   :  { %v15892_v24 = vpop.permute.xlu1 %8658 }
0x1079   :  { %16410 = vst [vmem:[#allocation33_spill] sm:$0xff] %v15892_v24 }
0x107c   :  { %v8666_v56 = vpop.permute.xlu1 %8665 }
0x1080   :  { %v8668_v17 = vpop.permute.xlu1 %8667 }
0x1081   :  { %v8670_v44 = vsel %vm8669_vm9, %v8666_v56, %v8668_v17  ;;  %v11848_v56 = vmov 23  }
0x1082   :  { %v8672_v0 = vsel %vm6978_vm0, %v8670_v44, 0.0  ;;  %10482 = vset.pattern.permute.xlu1 %v11848_v56  ;;  %10483 = vset.pattern.permute.xlu0 %v11848_v56 }
0x1083   :  { %8673 = vadd.xlane.f32.xlu1 %v8672_v0 }
0x110c   :  { %v8674_v35 = vpop.xlane.xlu1 %8673 }
0x110d   :  { %v8675_v38 = vmul.f32 0.020408163, %v8674_v35 }
0x110f   :  { %v8676_v25 = vsub.f32 %v16383_v59, %v8675_v38  ;;  %v8677_v50 = vsub.f32 %v16409_v53, %v8675_v38 }
0x1111   :  { %v8678_v46 = vmul.f32 %v8676_v25, %v8676_v25  ;;  %v8679_v29 = vmul.f32 %v8677_v50, %v8677_v50 }
0x1113   :  { %8682 = vrot.lane.b32.xlu0 %v8678_v46, %s11847_s14 }
0x1117   :  { %8684 = vrot.lane.b32.xlu0 %v8679_v29, %s11847_s14 }
0x1185   :  { %v8683_v32 = vpop.permute.xlu0 %8682 }
0x1189   :  { %v8685_v61 = vpop.permute.xlu0 %8684 }
0x118a   :  { %v8686_v28 = vsel %vm8669_vm9, %v8683_v32, %v8685_v61 }
0x118b   :  { %v8688_v7 = vsel %vm6978_vm0, %v8686_v28, 0.0 }
0x118c   :  { %8689 = vadd.xlane.f32.xlu0 %v8688_v7 }
0x11a2   :  { %8719 = vperm.xlu0 %10483, %v15860_v33  }
0x1215   :  { %v8690_v59 = vpop.xlane.xlu0 %8689 }
0x1216   :  { %v8691_v17 = vmul.f32 0.020408163, %v8690_v59 }
0x1218   :  { %v8692_v44 = vadd.f32 1e-05, %v8691_v17 }
0x121a   :  { %11762 = vrsqrt.f32 %v8692_v44 }
0x121d   :  { %v8720_v44 = vpop.permute.xlu0 %8719 }
0x1227   :  { %v11763_v0 = vpop.eup %11762 }
0x1228   :  { %v8694_v35 = vmul.f32 %v15819_v48, %v11763_v0 }
0x122a   :  { %8697 = vperm.xlu1 %10482, %v8694_v35  }
0x122e   :  { %8707 = vperm.xlu1 %10482, %v15833_v22  }
0x1232   :  { %8723 = vperm.xlu1 %10482, %v15866_v62  }
0x12a5   :  { %v8698_v38 = vpop.permute.xlu1 %8697 }
0x12a6   :  { %v8703_v46 = vrot.slane %v8698_v38, %v12328_v11 }
0x12a8   :  { %v8704_v32 = vmul.f32 %v8703_v46, %v8676_v25  ;;  %v8705_v61 = vmul.f32 %v8703_v46, %v8677_v50 }
0x12a9   :  { %v8708_v29 = vpop.permute.xlu1 %8707 }
0x12aa   :  { %v8713_v28 = vrot.slane %v8708_v29, %v12328_v11 }
0x12ac   :  { %v8714_v7 = vadd.f32 %v8713_v28, %v8704_v32  ;;  %v8715_v56 = vadd.f32 %v8713_v28, %v8705_v61 }
0x12ad   :  { %v8724_v38 = vpop.permute.xlu1 %8723 }
0x12ae   :  { %v8716_v59 = vmax.f32 %v8714_v7, 0.0  ;;  %v8717_v17 = vmax.f32 %v8715_v56, 0.0 }
0x12b0   :  { %v8729_v0 = vrot.slane %v8716_v59, %v12328_v11  ;;  %v8733_v35 = vrot.slane %v8717_v17, %v12328_v11 }
0x12b2   :  { %v8734_v24 = vmul.f32 %v8729_v0, %v8720_v44  ;;  %v8735_v63 = vmul.f32 %v8733_v35, %v8720_v44  ;;  %v8736_v25 = vmul.f32 %v8729_v0, %v8724_v38  ;;  %v8737_v50 = vmul.f32 %v8733_v35, %v8724_v38 }
0x12b3   :  { %v11850_v0 = vmov 24  }
0x12b4   :  { %8742 = vrot.lane.b32.xlu1 %v8734_v24, %s11847_s14  ;;  %10485 = vset.pattern.permute.xlu0 %v11850_v0 }
0x12b5   :  { %10484 = vset.pattern.permute.xlu1 %v11850_v0 }
0x12b8   :  { %8744 = vrot.lane.b32.xlu1 %v8735_v63, %s11847_s14 }
0x12bc   :  { %8746 = vrot.lane.b32.xlu1 %v8736_v25, %s11847_s14 }
0x12c0   :  { %8748 = vrot.lane.b32.xlu1 %v8737_v50, %s11847_s14 }
0x12c4   :  { %8756 = vrot.lane.b32.xlu1 %v16409_v53, %s11849_s4 }
0x1326   :  { %v15916_v46 = vpop.permute.xlu1 %8742 }
0x132a   :  { %v15918_v29 = vpop.permute.xlu1 %8744 }
0x132e   :  { %v15920_v32 = vpop.permute.xlu1 %8746 }
0x132f   :  { %16411 = vst [vmem:[#allocation11_spill] sm:$0xff] %v15920_v32 }
0x1332   :  { %v15922_v24 = vpop.permute.xlu1 %8748 }
0x1333   :  { %16412 = vst [vmem:[#allocation21_spill] sm:$0xff] %v15922_v24 }
0x1336   :  { %v8757_v63 = vpop.permute.xlu1 %8756 }
0x1337   :  { %v8759_v61 = vsel %vm6978_vm0, %v8757_v63, 0.0 }
0x1338   :  { %8760 = vadd.xlane.f32.xlu1 %v8759_v61 }
0x13c1   :  { %v8761_v28 = vpop.xlane.xlu1 %8760 }
0x13c2   :  { %v8762_v7 = vmul.f32 0.020408163, %v8761_v28 }
0x13c4   :  { %v8763_v56 = vsub.f32 %v16409_v53, %v8762_v7 }
0x13c6   :  { %v8764_v59 = vmul.f32 %v8763_v56, %v8763_v56 }
0x13c8   :  { %8766 = vrot.lane.b32.xlu0 %v8764_v59, %s11849_s4 }
0x143a   :  { %v8767_v17 = vpop.permute.xlu0 %8766 }
0x143b   :  { %v8769_v44 = vsel %vm6978_vm0, %v8767_v17, 0.0 }
0x143c   :  { %8770 = vadd.xlane.f32.xlu0 %v8769_v44 }
0x1452   :  { %8797 = vperm.xlu0 %10485, %v15860_v33  }
0x14c5   :  { %v8771_v35 = vpop.xlane.xlu0 %8770 }
0x14c6   :  { %v8772_v38 = vmul.f32 0.020408163, %v8771_v35 }
0x14c8   :  { %v8773_v25 = vadd.f32 1e-05, %v8772_v38 }
0x14ca   :  { %11764 = vrsqrt.f32 %v8773_v25 }
0x14cd   :  { %v8798_v35 = vpop.permute.xlu0 %8797 }
0x14d7   :  { %v11765_v50 = vpop.eup %11764 }
0x14d8   :  { %v8775_v63 = vmul.f32 %v15819_v48, %v11765_v50 }
0x14da   :  { %8778 = vperm.xlu1 %10484, %v8775_v63  }
0x14de   :  { %8787 = vperm.xlu1 %10484, %v15833_v22  }
0x14e2   :  { %8801 = vperm.xlu1 %10484, %v15866_v62  }
0x1555   :  { %v8779_v61 = vpop.permute.xlu1 %8778 }
0x1556   :  { %v8784_v28 = vrot.slane %v8779_v61, %v12328_v11 }
0x1558   :  { %v8785_v59 = vmul.f32 %v8784_v28, %v8763_v56 }
0x1559   :  { %v8788_v7 = vpop.permute.xlu1 %8787 }
0x155a   :  { %v8793_v17 = vrot.slane %v8788_v7, %v12328_v11 }
0x155c   :  { %v8794_v44 = vadd.f32 %v8793_v17, %v8785_v59 }
0x155d   :  { %v8802_v50 = vpop.permute.xlu1 %8801 }
0x155e   :  { %v8795_v0 = vmax.f32 %v8794_v44, 0.0 }
0x1560   :  { %v8807_v38 = vrot.slane %v8795_v0, %v12328_v11 }
0x1562   :  { %v8808_v25 = vmul.f32 %v8807_v38, %v8798_v35  ;;  %v8809_v63 = vmul.f32 %v8807_v38, %v8802_v50 }
0x1564   :  { %8812 = vrot.lane.b32.xlu1 %v8808_v25, %s11849_s4  ;;  %v11852_v25 = vmov 25  }
0x1565   :  { %10486 = vset.pattern.permute.xlu1 %v11852_v25  ;;  %10487 = vset.pattern.permute.xlu0 %v11852_v25 }
0x1568   :  { %8814 = vrot.lane.b32.xlu1 %v8809_v63, %s11849_s4 }
0x156c   :  { %8820 = vrot.lane.b32.xlu1 %v16409_v53, %s11851_s3 }
0x15d6   :  { %v15939_v61 = vpop.permute.xlu1 %8812 }
0x15da   :  { %v15941_v56 = vpop.permute.xlu1 %8814 }
0x15db   :  { %16413 = vst [vmem:[#allocation34_spill] sm:$0xff] %v15941_v56 }
0x15de   :  { %v8821_v28 = vpop.permute.xlu1 %8820 }
0x15df   :  { %v8823_v7 = vsel %vm6978_vm0, %v8821_v28, 0.0 }
0x15e0   :  { %8824 = vadd.xlane.f32.xlu1 %v8823_v7 }
0x1669   :  { %v8825_v59 = vpop.xlane.xlu1 %8824 }
0x166a   :  { %v8826_v17 = vmul.f32 0.020408163, %v8825_v59 }
0x166c   :  { %v8827_v44 = vsub.f32 %v16409_v53, %v8826_v17 }
0x166e   :  { %v8828_v0 = vmul.f32 %v8827_v44, %v8827_v44 }
0x1670   :  { %8830 = vrot.lane.b32.xlu0 %v8828_v0, %s11851_s3 }
0x16e2   :  { %v8831_v35 = vpop.permute.xlu0 %8830 }
0x16e3   :  { %v8833_v38 = vsel %vm6978_vm0, %v8831_v35, 0.0 }
0x16e4   :  { %8834 = vadd.xlane.f32.xlu0 %v8833_v38 }
0x16fa   :  { %8865 = vperm.xlu0 %10487, %v15866_v62  }
0x176d   :  { %v8835_v50 = vpop.xlane.xlu0 %8834 }
0x176e   :  { %v8836_v63 = vmul.f32 0.020408163, %v8835_v50 }
0x1770   :  { %v8837_v28 = vadd.f32 1e-05, %v8836_v63 }
0x1772   :  { %11766 = vrsqrt.f32 %v8837_v28 }
0x1775   :  { %v8866_v24 = vpop.permute.xlu0 %8865 }
0x177f   :  { %v11767_v7 = vpop.eup %11766 }
0x1780   :  { %v8839_v59 = vmul.f32 %v15819_v48, %v11767_v7 }
0x1782   :  { %8842 = vperm.xlu1 %10486, %v8839_v59  }
0x1786   :  { %8851 = vperm.xlu1 %10486, %v15833_v22  }
0x178a   :  { %8861 = vperm.xlu1 %10486, %v15860_v33  }
0x17fd   :  { %v8843_v17 = vpop.permute.xlu1 %8842 }
0x17fe   :  { %v8848_v0 = vrot.slane %v8843_v17, %v12328_v11 }
0x1800   :  { %v8849_v38 = vmul.f32 %v8848_v0, %v8827_v44  ;;  %v16414_v44 = vld [vmem:[#allocation30_spill] sm:$0xff] }
0x1801   :  { %v8852_v35 = vpop.permute.xlu1 %8851 }
0x1802   :  { %v8857_v25 = vrot.slane %v8852_v35, %v12328_v11 }
0x1804   :  { %v8858_v56 = vadd.f32 %v8857_v25, %v8849_v38 }
0x1805   :  { %v8862_v63 = vpop.permute.xlu1 %8861 }
0x1806   :  { %v8859_v32 = vmax.f32 %v8858_v56, 0.0 }
0x1808   :  { %v8871_v50 = vrot.slane %v8859_v32, %v12328_v11 }
0x180a   :  { %v8872_v28 = vmul.f32 %v8871_v50, %v8862_v63  ;;  %v8873_v7 = vmul.f32 %v8871_v50, %v8866_v24 }
0x180c   :  { %8876 = vrot.lane.b32.xlu1 %v8872_v28, %s11851_s3 }
0x1810   :  { %8878 = vrot.lane.b32.xlu1 %v8873_v7, %s11851_s3 }
0x1814   :  { %8885 = vrot.lane.b32.xlu1 %v16409_v53, %s11853_s18 }
0x1818   :  { %8887 = vrot.lane.b32.xlu1 %v16414_v44, %s11853_s18 }
0x187e   :  { %v15960_v59 = vpop.permute.xlu1 %8876 }
0x1882   :  { %v15962_v56 = vpop.permute.xlu1 %8878 }
0x1883   :  { %16415 = vst [vmem:[#allocation18_spill] sm:$0xff] %v15962_v56 }
0x1886   :  { %v8886_v32 = vpop.permute.xlu1 %8885 }
0x188a   :  { %v8888_v17 = vpop.permute.xlu1 %8887 }
0x188b   :  { %v8890_v0 = vsel %vm8889_vm10, %v8886_v32, %v8888_v17  ;;  %v11854_v17 = vmov 26  }
0x188c   :  { %v8892_v24 = vsel %vm6978_vm0, %v8890_v0, 0.0  ;;  %10488 = vset.pattern.permute.xlu1 %v11854_v17 }
0x188d   :  { %8893 = vadd.xlane.f32.xlu1 %v8892_v24 }
0x1916   :  { %v8894_v35 = vpop.xlane.xlu1 %8893 }
0x1917   :  { %v8895_v38 = vmul.f32 0.020408163, %v8894_v35 }
0x1919   :  { %v8896_v25 = vsub.f32 %v16409_v53, %v8895_v38  ;;  %v8897_v50 = vsub.f32 %v16414_v44, %v8895_v38 }
0x191b   :  { %v8898_v63 = vmul.f32 %v8896_v25, %v8896_v25  ;;  %v8899_v28 = vmul.f32 %v8897_v50, %v8897_v50 }
0x191d   :  { %8902 = vrot.lane.b32.xlu0 %v8898_v63, %s11853_s18 }
0x1921   :  { %8904 = vrot.lane.b32.xlu0 %v8899_v28, %s11853_s18 }
0x198f   :  { %v8903_v7 = vpop.permute.xlu0 %8902 }
0x1993   :  { %v8905_v56 = vpop.permute.xlu0 %8904 }
0x1994   :  { %v8906_v60 = vsel %vm8889_vm10, %v8903_v7, %v8905_v56 }
0x1995   :  { %v8908_v32 = vsel %vm6978_vm0, %v8906_v60, 0.0 }
0x1996   :  { %8909 = vadd.xlane.f32.xlu0 %v8908_v32 }
0x1a1f   :  { %v8910_v0 = vpop.xlane.xlu0 %8909 }
0x1a20   :  { %v8911_v24 = vmul.f32 0.020408163, %v8910_v0 }
0x1a22   :  { %v8912_v53 = vadd.f32 1e-05, %v8911_v24 }
0x1a24   :  { %11768 = vrsqrt.f32 %v8912_v53 }
0x1a31   :  { %v11769_v35 = vpop.eup %11768 }
0x1a32   :  { %v8914_v38 = vmul.f32 %v15819_v48, %v11769_v35 }
0x1a34   :  { %8917 = vperm.xlu1 %10488, %v8914_v38  }
0x1a38   :  { %8927 = vperm.xlu1 %10488, %v15833_v22  }
0x1a3c   :  { %8939 = vperm.xlu1 %10488, %v15860_v33  }
0x1a40   :  { %8943 = vperm.xlu1 %10488, %v15866_v62  }
0x1aaf   :  { %v8918_v56 = vpop.permute.xlu1 %8917 }
0x1ab0   :  { %v8923_v60 = vrot.slane %v8918_v56, %v12328_v11 }
0x1ab2   :  { %v8924_v28 = vmul.f32 %v8923_v60, %v8896_v25  ;;  %v8925_v7 = vmul.f32 %v8923_v60, %v8897_v50  ;;  %v16416_v50 = vld [vmem:[#allocation31_spill] sm:$0xff] }
0x1ab3   :  { %v8928_v63 = vpop.permute.xlu1 %8927 }
0x1ab4   :  { %v8933_v32 = vrot.slane %v8928_v63, %v12328_v11  ;;  %v16419_v63 = vld [vmem:[#allocation2_spill] sm:$0xff] }
0x1ab6   :  { %v8934_v17 = vadd.f32 %v8933_v32, %v8924_v28  ;;  %v8935_v0 = vadd.f32 %v8933_v32, %v8925_v7  ;;  %v7010_v28 = vrot.slane %v16419_v63, %v12328_v11 }
0x1ab7   :  { %v8940_v30 = vpop.permute.xlu1 %8939 }
0x1ab8   :  { %v8936_v24 = vmax.f32 %v8934_v17, 0.0  ;;  %v8937_v53 = vmax.f32 %v8935_v0, 0.0 }
0x1aba   :  { %v8949_v35 = vrot.slane %v8936_v24, %v12328_v11  ;;  %v8953_v38 = vrot.slane %v8937_v53, %v12328_v11  ;;  %v16420_v24 = vld [vmem:[#allocation8_spill] sm:$0xff] }
0x1abb   :  { %v8944_v56 = vpop.permute.xlu1 %8943 }
0x1abc   :  { %v8954_v58 = vmul.f32 %v8949_v35, %v8940_v30  ;;  %v8955_v6 = vmul.f32 %v8953_v38, %v8940_v30  ;;  %v8956_v25 = vmul.f32 %v8949_v35, %v8944_v56  ;;  %v16418_v30 = vld [vmem:[#allocation25_spill] sm:$0xff]  ;;  %v8957_v7 = vmul.f32 %v8953_v38, %v8944_v56  ;;  %v16421_v35 = vld [vmem:[#allocation42_spill] sm:$0xff]  ;;  %v16425_v56 = vld [vmem:[#allocation39_spill] sm:$0xff] }
0x1abd   :  { %v7402_v38 = vsel %vm7321_vm2, %v15597_v18, %v15605_v23  ;;  %v7998_v23 = vsel %vm7917_vm5, %v15687_v45, %v15689_v40 }
0x1abe   :  { %8964 = vrot.lane.b32.xlu0 %v8955_v6, %s11853_s18  ;;  %8962 = vrot.lane.b32.xlu1 %v8954_v58, %s11853_s18  ;;  %v16417_v58 = vld [vmem:[#allocation29_spill] sm:$0xff] }
0x1abf   :  { %v7000_v6 = vrot.slane %v16417_v58, %v12328_v11 }
0x1ac1   :  { %v7001_v60 = vmul.f32 %v7000_v6, %v16418_v30  ;;  %v16423_v6 = vld [vmem:[#allocation44_spill] sm:$0xff] }
0x1ac2   :  { %9263 = vrot.lane.b32.xlu0 %v15275_v3, %s11855_s15  ;;  %9041 = vrot.lane.b32.xlu1 %v16414_v44, %s11856_s26 }
0x1ac3   :  { %v7011_v32 = vadd.f32 %v7010_v28, %v7001_v60 }
0x1ac5   :  { %v7012_v17 = vmax.f32 %v7011_v32, 0.0 }
0x1ac6   :  { %9043 = vrot.lane.b32.xlu1 %v16416_v50, %s11856_s26  ;;  %8966 = vrot.lane.b32.xlu0 %v8956_v25, %s11853_s18  ;;  %v16422_v25 = vld [vmem:[#allocation41_spill] sm:$0xff] }
0x1ac7   :  { %v16004_v0 = vrot.slane %v7012_v17, %v12328_v11  ;;  %v7182_v58 = vsel %vm7101_vm1, %v16422_v25, %v16421_v35 }
0x1ac9   :  { %v7027_v53 = vmul.f32 %v16004_v0, %v16420_v24 }
0x1aca   :  { %8976 = vrot.lane.b32.xlu1 %v16414_v44, %s11857_s20 }
0x1acb   :  { %v7094_v30 = vadd.f32 %v16423_v6, %v7027_v53 }
0x1acd   :  { %v7186_v3 = vadd.f32 %v7182_v58, %v7094_v30 }
0x1ace   :  { %9132 = vrot.lane.b32.xlu1 %v16416_v50, %s11858_s22 }
0x1acf   :  { %v7250_v63 = vadd.f32 %v16424_v26, %v7186_v3  ;;  %v7778_v3 = vsel %vm7697_vm4, %v15707_v36, %v15677_v39 }
0x1ad1   :  { %v7314_v60 = vadd.f32 %v16425_v56, %v7250_v63 }
0x1ad2   :  { %9261 = vrot.lane.b32.xlu1 %v16416_v50, %s11855_s15 }
0x1ad3   :  { %v7406_v28 = vadd.f32 %v7402_v38, %v7314_v60 }
0x1ad5   :  { %v7470_v32 = vadd.f32 %v15586_v5, %v7406_v28  ;;  %v8154_v5 = vsel %vm8073_vm6, %v15787_v27, %v15789_v4 }
0x1ad6   :  { %9196 = vrot.lane.b32.xlu1 %v16416_v50, %s11859_s21 }
0x1ada   :  { %8968 = vrot.lane.b32.xlu1 %v8957_v7, %s11853_s18  ;;  %v7558_v7 = vsel %vm7477_vm3, %v15643_v15, %v15645_v57 }
0x1adb   :  { %v7562_v17 = vadd.f32 %v7558_v7, %v7470_v32 }
0x1add   :  { %v7626_v24 = vadd.f32 %v15627_v19, %v7562_v17 }
0x1adf   :  { %v7690_v26 = vadd.f32 %v15637_v14, %v7626_v24  ;;  %v8374_v14 = vsel %vm8293_vm7, %v15812_v16, %v15804_v37 }
0x1ae1   :  { %v7782_v53 = vadd.f32 %v7778_v3, %v7690_v26 }
0x1ae3   :  { %v7846_v18 = vadd.f32 %v15661_v21, %v7782_v53 }
0x1ae5   :  { %v7910_v15 = vadd.f32 %v15667_v10, %v7846_v18  ;;  %v8530_v10 = vsel %vm8449_vm8, %v15874_v41, %v15877_v54  ;;  %v11860_v18 = vmov 27  }
0x1ae6   :  { %10490 = vset.pattern.permute.xlu1 %v11860_v18  ;;  %10489 = vset.pattern.permute.xlu0 %v11860_v18  ;;  %v16432_v18 = vld [vmem:[#allocation4_spill] sm:$0xff] }
0x1ae7   :  { %v8002_v57 = vadd.f32 %v7998_v23, %v7910_v15 }
0x1ae9   :  { %v8066_v19 = vadd.f32 %v15683_v55, %v8002_v57  ;;  %v8750_v55 = vsel %vm8669_vm9, %v15916_v46, %v15918_v29 }
0x1aeb   :  { %v8158_v35 = vadd.f32 %v8154_v5, %v8066_v19 }
0x1aed   :  { %v8222_v39 = vadd.f32 %v15779_v34, %v8158_v35 }
0x1aef   :  { %v8286_v21 = vadd.f32 %v15783_v20, %v8222_v39 }
0x1af1   :  { %v8378_v36 = vadd.f32 %v8374_v14, %v8286_v21 }
0x1af3   :  { %v8442_v45 = vadd.f32 %v15795_v8, %v8378_v36 }
0x1af5   :  { %v8534_v40 = vadd.f32 %v8530_v10, %v8442_v45 }
0x1af7   :  { %v8598_v27 = vadd.f32 %v15869_v49, %v8534_v40 }
0x1af9   :  { %v8662_v34 = vadd.f32 %v15890_v9, %v8598_v27 }
0x1afb   :  { %v8754_v4 = vadd.f32 %v8750_v55, %v8662_v34 }
0x1afd   :  { %v8818_v37 = vadd.f32 %v15939_v61, %v8754_v4 }
0x1aff   :  { %v8882_v20 = vadd.f32 %v15960_v59, %v8818_v37 }
0x1b30   :  { %v8965_v16 = vpop.permute.xlu0 %8964  ;;  %v8963_v25 = vpop.permute.xlu1 %8962 }
0x1b31   :  { %v8970_v41 = vsel %vm8889_vm10, %v8963_v25, %v8965_v16 }
0x1b32   :  { %v16052_v54 = vadd.f32 %v8970_v41, %v8882_v20 }
0x1b34   :  { %v9042_v8 = vpop.permute.xlu1 %9041  ;;  %v9264_v61 = vpop.permute.xlu0 %9263 }
0x1b38   :  { %v9044_v58 = vpop.permute.xlu1 %9043  ;;  %v16060_v60 = vpop.permute.xlu0 %8966 }
0x1b39   :  { %v9046_v46 = vsel %vm9045_vm11, %v9042_v8, %v9044_v58 }
0x1b3a   :  { %v9048_v29 = vsel %vm6978_vm0, %v9046_v46, 0.0  ;;  %v16426_v46 = vld [vmem:[#allocation3_spill] sm:$0xff] }
0x1b3c   :  { %v8977_v49 = vpop.permute.xlu1 %8976 }
0x1b3d   :  { %v8979_v6 = vsel %vm6978_vm0, %v8977_v49, 0.0 }
0x1b3e   :  { %8980 = vadd.xlane.f32.xlu0 %v8979_v6 }
0x1b40   :  { %v9133_v9 = vpop.permute.xlu1 %9132 }
0x1b41   :  { %v9135_v30 = vsel %vm6978_vm0, %v9133_v9, 0.0  ;;  %v16427_v9 = vld [vmem:[#allocation43_spill] sm:$0xff] }
0x1b42   :  { %9049 = vadd.xlane.f32.xlu0 %v9048_v29  ;;  %v16428_v29 = vld [vmem:[#allocation45_spill] sm:$0xff] }
0x1b44   :  { %v9262_v59 = vpop.permute.xlu1 %9261 }
0x1b45   :  { %v9266_v63 = vsel %vm9265_vm12, %v9262_v59, %v9264_v61  ;;  %v7183_v61 = vsel %vm7101_vm1, %v16428_v29, %v16427_v9  ;;  %v16429_v59 = vld [vmem:[#allocation36_spill] sm:$0xff]  ;;  %v16447_v9 = vld [vmem:[#allocation11_spill] sm:$0xff]  ;;  %v16448_v29 = vld [vmem:[#allocation33_spill] sm:$0xff] }
0x1b46   :  { %9136 = vadd.xlane.f32.xlu0 %v9135_v30  ;;  %v9268_v53 = vsel %vm6978_vm0, %v9266_v63, 0.0 }
0x1b48   :  { %v9197_v38 = vpop.permute.xlu1 %9196 }
0x1b49   :  { %v9199_v56 = vsel %vm6978_vm0, %v9197_v38, 0.0  ;;  %v16430_v38 = vld [vmem:[#allocation38_spill] sm:$0xff] }
0x1b4a   :  { %9200 = vadd.xlane.f32.xlu0 %v9199_v56 }
0x1b4c   :  { %v16064_v24 = vpop.permute.xlu1 %8968 }
0x1bc7   :  { %v8981_v28 = vpop.xlane.xlu0 %8980 }
0x1bc8   :  { %v8982_v7 = vmul.f32 0.020408163, %v8981_v28  ;;  %v7403_v28 = vsel %vm7321_vm2, %v15615_v43, %v15620_v1  ;;  %v16434_v43 = vld [vmem:[#allocation15_spill] sm:$0xff] }
0x1bca   :  { %v8983_v32 = vsub.f32 %v16414_v44, %v8982_v7  ;;  %v16431_v7 = vld [vmem:[#allocation40_spill] sm:$0xff] }
0x1bcb   :  { %v9050_v35 = vpop.xlane.xlu0 %9049 }
0x1bcc   :  { %v8984_v17 = vmul.f32 %v8983_v32, %v8983_v32  ;;  %v9051_v20 = vmul.f32 0.020408163, %v9050_v35  ;;  %v16436_v35 = vld [vmem:[#allocation9_spill] sm:$0xff] }
0x1bce   :  { %8986 = vrot.lane.b32.xlu1 %v8984_v17, %s11857_s20  ;;  %v16083_v41 = vsub.f32 %v16414_v44, %v9051_v20  ;;  %v16087_v58 = vsub.f32 %v16416_v50, %v9051_v20  ;;  %v7028_v44 = vmul.f32 %v16004_v0, %v16426_v46  ;;  %v7559_v0 = vsel %vm7477_vm3, %v15647_v13, %v15649_v52 }
0x1bcf   :  { %v16072_v39 = vpop.xlane.xlu0 %9136 }
0x1bd0   :  { %v9054_v49 = vmul.f32 %v16083_v41, %v16083_v41  ;;  %v9055_v6 = vmul.f32 %v16087_v58, %v16087_v58  ;;  %v7095_v30 = vadd.f32 %v16429_v59, %v7028_v44  ;;  %v16446_v44 = vld [vmem:[#allocation21_spill] sm:$0xff] }
0x1bd2   :  { %v7187_v63 = vadd.f32 %v7183_v61, %v7095_v30  ;;  %v16449_v30 = vld [vmem:[#allocation34_spill] sm:$0xff] }
0x1bd3   :  { %v16074_v14 = vpop.xlane.xlu0 %9200 }
0x1bd4   :  { %v7251_v56 = vadd.f32 %v16430_v38, %v7187_v63  ;;  %v8971_v38 = vsel %vm8889_vm10, %v16060_v60, %v16064_v24 }
0x1c40   :  { %v8987_v3 = vpop.permute.xlu1 %8986 }
0x1c41   :  { %v8989_v26 = vsel %vm6978_vm0, %v8987_v3, 0.0 }
0x1c42   :  { %8990 = vadd.xlane.f32.xlu1 %v8989_v26 }
0x1c46   :  { %9269 = vadd.xlane.f32.xlu1 %v9268_v53 }
0x1c57   :  { %9007 = vperm.xlu1 %10490, %v15833_v22  }
0x1c5b   :  { %9017 = vperm.xlu1 %10490, %v15860_v33  }
0x1c5f   :  { %9021 = vperm.xlu1 %10490, %v15866_v62  }
0x1ccb   :  { %v8991_v23 = vpop.xlane.xlu1 %8990 }
0x1ccc   :  { %v8992_v15 = vmul.f32 0.020408163, %v8991_v23  ;;  %v7779_v23 = vsel %vm7697_vm4, %v16432_v18, %v15681_v42 }
0x1cce   :  { %v8993_v57 = vadd.f32 1e-05, %v8992_v15  ;;  %v16433_v15 = vld [vmem:[#allocation6_spill] sm:$0xff] }
0x1ccf   :  { %v16076_v21 = vpop.xlane.xlu1 %9269 }
0x1cd0   :  { %11770 = vrsqrt.f32 %v8993_v57 }
0x1cd3   :  { %v9008_v36 = vpop.permute.xlu1 %9007 }
0x1cd4   :  { %v9013_v45 = vrot.slane %v9008_v36, %v12328_v11 }
0x1cd7   :  { %v9018_v4 = vpop.permute.xlu1 %9017 }
0x1cdb   :  { %v9022_v25 = vpop.permute.xlu1 %9021 }
0x1cdd   :  { %v11771_v5 = vpop.eup %11770 }
0x1cde   :  { %v8995_v19 = vmul.f32 %v15819_v48, %v11771_v5 }
0x1ce0   :  { %8998 = vperm.xlu0 %10489, %v8995_v19   ;;  %v16435_v19 = vld [vmem:[#allocation10_spill] sm:$0xff] }
0x1ce1   :  { %v7999_v36 = vsel %vm7917_vm5, %v16436_v35, %v16435_v19 }
0x1d5b   :  { %v8999_v10 = vpop.permute.xlu0 %8998 }
0x1d5c   :  { %v9004_v40 = vrot.slane %v8999_v10, %v12328_v11  ;;  %v16437_v10 = vld [vmem:[#allocation7_spill] sm:$0xff] }
0x1d5e   :  { %v9005_v27 = vmul.f32 %v9004_v40, %v8983_v32  ;;  %v7315_v32 = vadd.f32 %v16431_v7, %v7251_v56 }
0x1d60   :  { %v9014_v55 = vadd.f32 %v9013_v45, %v9005_v27  ;;  %v7407_v17 = vadd.f32 %v7403_v28, %v7315_v32  ;;  %v16439_v27 = vld [vmem:[#allocation13_spill] sm:$0xff]  ;;  %v16450_v28 = vld [vmem:[#allocation18_spill] sm:$0xff] }
0x1d62   :  { %v9015_v34 = vmax.f32 %v9014_v55, 0.0  ;;  %v7471_v3 = vadd.f32 %v15589_v2, %v7407_v17  ;;  %v8155_v2 = vsel %vm8073_vm6, %v15791_v47, %v15793_v12  ;;  %v16440_v55 = vld [vmem:[#allocation12_spill] sm:$0xff] }
0x1d63   :  { %v16445_v47 = vld [vmem:[#allocation32_spill] sm:$0xff] }
0x1d64   :  { %v9027_v37 = vrot.slane %v9015_v34, %v12328_v11  ;;  %v7563_v26 = vadd.f32 %v7559_v0, %v7471_v3  ;;  %v8375_v34 = vsel %vm8293_vm7, %v16440_v55, %v16439_v27 }
0x1d66   :  { %v9028_v16 = vmul.f32 %v9027_v37, %v9018_v4  ;;  %v9029_v8 = vmul.f32 %v9027_v37, %v9022_v25  ;;  %v7627_v53 = vadd.f32 %v15632_v31, %v7563_v26  ;;  %v16438_v31 = vld [vmem:[#allocation5_spill] sm:$0xff]  ;;  %v16443_v25 = vld [vmem:[#allocation23_spill] sm:$0xff] }
0x1d67   :  { %v16441_v4 = vld [vmem:[#allocation17_spill] sm:$0xff] }
0x1d68   :  { %9032 = vrot.lane.b32.xlu1 %v9028_v16, %s11857_s20  ;;  %v7691_v57 = vadd.f32 %v16433_v15, %v7627_v53  ;;  %v16442_v16 = vld [vmem:[#allocation27_spill] sm:$0xff]  ;;  %v11861_v15 = vmov 28  }
0x1d69   :  { %10491 = vset.pattern.permute.xlu0 %v11861_v15 }
0x1d6a   :  { %v7783_v5 = vadd.f32 %v7779_v23, %v7691_v57 }
0x1d6c   :  { %9034 = vrot.lane.b32.xlu1 %v9029_v8, %s11857_s20  ;;  %v7847_v1 = vadd.f32 %v16434_v43, %v7783_v5  ;;  %v8531_v8 = vsel %vm8449_vm8, %v16443_v25, %v16442_v16 }
0x1d6e   :  { %v7911_v13 = vadd.f32 %v16437_v10, %v7847_v1  ;;  %v9202_v1 = vmul.f32 0.020408163, %v16074_v14  ;;  %v9271_v10 = vmul.f32 0.020408163, %v16076_v21 }
0x1d70   :  { %9058 = vrot.lane.b32.xlu1 %v9054_v49, %s11856_s26  ;;  %v8003_v52 = vadd.f32 %v7999_v36, %v7911_v13  ;;  %v16444_v49 = vld [vmem:[#allocation19_spill] sm:$0xff]  ;;  %v16159_v36 = vsub.f32 %v16416_v50, %v9202_v1  ;;  %v16166_v13 = vsub.f32 %v16416_v50, %v9271_v10 }
0x1d72   :  { %v8067_v45 = vadd.f32 %v16438_v31, %v8003_v52  ;;  %v9274_v52 = vmul.f32 %v16166_v13, %v16166_v13 }
0x1d74   :  { %9060 = vrot.lane.b32.xlu1 %v9055_v6, %s11856_s26  ;;  %v8159_v40 = vadd.f32 %v8155_v2, %v8067_v45 }
0x1d76   :  { %v8223_v42 = vadd.f32 %v15781_v51, %v8159_v40  ;;  %v8751_v51 = vsel %vm8669_vm9, %v16447_v9, %v16446_v44 }
0x1d78   :  { %v8287_v37 = vadd.f32 %v16441_v4, %v8223_v42 }
0x1d7a   :  { %v8379_v20 = vadd.f32 %v8375_v34, %v8287_v37 }
0x1d7c   :  { %v8443_v6 = vadd.f32 %v16444_v49, %v8379_v20 }
0x1d7e   :  { %v8535_v46 = vadd.f32 %v8531_v8, %v8443_v6 }
0x1d80   :  { %v8599_v12 = vadd.f32 %v16445_v47, %v8535_v46 }
0x1d82   :  { %v8663_v61 = vadd.f32 %v16448_v29, %v8599_v12 }
0x1d84   :  { %v8755_v59 = vadd.f32 %v8751_v51, %v8663_v61  ;;  %v11862_v61 = vmov 29  }
0x1d85   :  { %10492 = vset.pattern.permute.xlu1 %v11862_v61 }
0x1d86   :  { %v8819_v63 = vadd.f32 %v16449_v30, %v8755_v59 }
0x1d88   :  { %v8883_v7 = vadd.f32 %v16450_v28, %v8819_v63 }
0x1d8a   :  { %v8975_v17 = vadd.f32 %v8971_v38, %v8883_v7 }
0x1dda   :  { %v9033_v56 = vpop.permute.xlu1 %9032 }
0x1ddb   :  { %v16144_v32 = vadd.f32 %v9033_v56, %v16052_v54  ;;  %v9138_v54 = vmul.f32 0.020408163, %v16072_v39  ;;  %v9204_v39 = vmul.f32 %v16159_v36, %v16159_v36 }
0x1ddd   :  { %v16152_v43 = vsub.f32 %v16416_v50, %v9138_v54 }
0x1dde   :  { %v9035_v0 = vpop.permute.xlu1 %9034 }
0x1ddf   :  { %v16146_v3 = vadd.f32 %v9035_v0, %v8975_v17  ;;  %v9140_v35 = vmul.f32 %v16152_v43, %v16152_v43 }
0x1de2   :  { %v9059_v26 = vpop.permute.xlu1 %9058 }
0x1de6   :  { %v9061_v53 = vpop.permute.xlu1 %9060 }
0x1de7   :  { %v9062_v18 = vsel %vm9045_vm11, %v9059_v26, %v9061_v53 }
0x1de8   :  { %v9064_v23 = vsel %vm6978_vm0, %v9062_v18, 0.0 }
0x1de9   :  { %9065 = vadd.xlane.f32.xlu1 %v9064_v23 }
0x1e72   :  { %v9066_v60 = vpop.xlane.xlu1 %9065 }
0x1e73   :  { %v9067_v24 = vmul.f32 0.020408163, %v9066_v60 }
0x1e75   :  { %v9068_v57 = vadd.f32 1e-05, %v9067_v24 }
0x1e77   :  { %11772 = vrsqrt.f32 %v9068_v57 }
0x1e84   :  { %v11773_v5 = vpop.eup %11772 }
0x1e85   :  { %v9070_v19 = vmul.f32 %v15819_v48, %v11773_v5  ;;  %v16451_v48 = vld [vmem:[#allocation35_spill] sm:$0xff] }
0x1e86   :  { %v16170_v14 = vsub.f32 %v16451_v48, %v9271_v10 }
0x1e87   :  { %9073 = vperm.xlu0 %10491, %v9070_v19  }
0x1e88   :  { %v9275_v21 = vmul.f32 %v16170_v14, %v16170_v14 }
0x1e8b   :  { %9142 = vrot.lane.b32.xlu0 %v9140_v35, %s11858_s22 }
0x1e8f   :  { %9206 = vrot.lane.b32.xlu0 %v9204_v39, %s11859_s21 }
0x1e93   :  { %9278 = vrot.lane.b32.xlu0 %v9274_v52, %s11855_s15 }
0x1e97   :  { %9280 = vrot.lane.b32.xlu0 %v9275_v21, %s11855_s15 }
0x1e9b   :  { %9083 = vperm.xlu0 %10491, %v15833_v22  }
0x1e9f   :  { %9095 = vperm.xlu0 %10491, %v15860_v33  }
0x1ea3   :  { %9099 = vperm.xlu0 %10491, %v15866_v62  }
0x1ea7   :  { %10493 = vset.pattern.permute.xlu0 %v11862_v61 }
0x1f02   :  { %v9074_v50 = vpop.permute.xlu0 %9073 }
0x1f03   :  { %v9079_v42 = vrot.slane %v9074_v50, %v12328_v11 }
0x1f05   :  { %v9080_v55 = vmul.f32 %v9079_v42, %v16083_v41  ;;  %v9081_v34 = vmul.f32 %v9079_v42, %v16087_v58 }
0x1f06   :  { %v9143_v2 = vpop.permute.xlu0 %9142 }
0x1f07   :  { %v9145_v9 = vsel %vm6978_vm0, %v9143_v2, 0.0 }
0x1f0a   :  { %v9207_v31 = vpop.permute.xlu0 %9206 }
0x1f0b   :  { %v9209_v44 = vsel %vm6978_vm0, %v9207_v31, 0.0  ;;  %v11799_v31 = vld [vmem:[%s16258_s6] sm:$0x1] }
0x1f0e   :  { %v9279_v45 = vpop.permute.xlu0 %9278 }
0x1f12   :  { %v9281_v40 = vpop.permute.xlu0 %9280 }
0x1f13   :  { %v9282_v51 = vsel %vm9265_vm12, %v9279_v45, %v9281_v40 }
0x1f14   :  { %v9284_v29 = vsel %vm6978_vm0, %v9282_v51, 0.0 }
0x1f16   :  { %v9084_v27 = vpop.permute.xlu0 %9083 }
0x1f17   :  { %v9089_v4 = vrot.slane %v9084_v27, %v12328_v11 }
0x1f19   :  { %v9090_v37 = vadd.f32 %v9089_v4, %v9080_v55  ;;  %v9091_v20 = vadd.f32 %v9089_v4, %v9081_v34 }
0x1f1a   :  { %v9096_v16 = vpop.permute.xlu0 %9095 }
0x1f1b   :  { %v9092_v25 = vmax.f32 %v9090_v37, 0.0  ;;  %v9093_v8 = vmax.f32 %v9091_v20, 0.0 }
0x1f1d   :  { %v9105_v49 = vrot.slane %v9092_v25, %v12328_v11  ;;  %v9109_v6 = vrot.slane %v9093_v8, %v12328_v11 }
0x1f1e   :  { %v9100_v12 = vpop.permute.xlu0 %9099 }
0x1f1f   :  { %v9110_v46 = vmul.f32 %v9105_v49, %v9096_v16  ;;  %v9111_v47 = vmul.f32 %v9109_v6, %v9096_v16  ;;  %v9112_v41 = vmul.f32 %v9105_v49, %v9100_v12  ;;  %v9113_v58 = vmul.f32 %v9109_v6, %v9100_v12 }
0x1f21   :  { %9120 = vrot.lane.b32.xlu0 %v9111_v47, %s11856_s26  ;;  %9118 = vrot.lane.b32.xlu1 %v9110_v46, %s11856_s26 }
0x1f25   :  { %9122 = vrot.lane.b32.xlu0 %v9112_v41, %s11856_s26 }
0x1f29   :  { %9124 = vrot.lane.b32.xlu0 %v9113_v58, %s11856_s26 }
0x1f45   :  { %9210 = vadd.xlane.f32.xlu1 %v9209_v44  ;;  %v16452_v44 = vmov 0  }
0x1f48   :  { %9146 = vadd.xlane.f32.xlu0 %v9145_v9  ;;  %v11801_v9 = vld [vmem:[%s16259_s7 + $0x8] sm:$0xff] }
0x1f4c   :  { %9285 = vadd.xlane.f32.xlu0 %v9284_v29 }
0x1f62   :  { %9163 = vperm.xlu0 %10493, %v15833_v22   ;;  %v11798_v22 = vld [vmem:[%s16261_s5] sm:$0x1] }
0x1f93   :  { %v9119_v59 = vpop.permute.xlu1 %9118  ;;  %v9121_v30 = vpop.permute.xlu0 %9120 }
0x1f94   :  { %v9126_v63 = vsel %vm9045_vm11, %v9119_v59, %v9121_v30 }
0x1f95   :  { %v9130_v38 = vadd.f32 %v9126_v63, %v16144_v32  ;;  %v11863_v32 = vmov 30  }
0x1f96   :  { %10495 = vset.pattern.permute.xlu0 %v11863_v32 }
0x1f97   :  { %v9123_v56 = vpop.permute.xlu0 %9122  ;;  %9237 = vperm.xlu0 %10495, %v15860_v33  }
0x1f9b   :  { %v9125_v28 = vpop.permute.xlu0 %9124 }
0x1f9c   :  { %v9127_v7 = vsel %vm9045_vm11, %v9123_v56, %v9125_v28 }
0x1f9d   :  { %v9131_v17 = vadd.f32 %v9127_v7, %v16146_v3 }
0x1fce   :  { %v9211_v3 = vpop.xlane.xlu1 %9210 }
0x1fcf   :  { %v9212_v60 = vmul.f32 0.020408163, %v9211_v3 }
0x1fd1   :  { %v9147_v0 = vpop.xlane.xlu0 %9146  ;;  %v9213_v57 = vadd.f32 1e-05, %v9212_v60 }
0x1fd2   :  { %v9148_v26 = vmul.f32 0.020408163, %v9147_v0 }
0x1fd4   :  { %v9149_v53 = vadd.f32 1e-05, %v9148_v26 }
0x1fd5   :  { %v9286_v15 = vpop.xlane.xlu0 %9285 }
0x1fd6   :  { %11774 = vrsqrt.f32 %v9149_v53  ;;  %v9287_v55 = vmul.f32 0.020408163, %v9286_v15 }
0x1fd7   :  { %11776 = vrsqrt.f32 %v9213_v57 }
0x1fd8   :  { %v9288_v34 = vadd.f32 1e-05, %v9287_v55 }
0x1fda   :  { %11778 = vrsqrt.f32 %v9288_v34 }
0x1fdd   :  { %v9164_v24 = vpop.permute.xlu0 %9163 }
0x1fde   :  { %v9169_v1 = vrot.slane %v9164_v24, %v12328_v11 }
0x1fe3   :  { %v11775_v18 = vpop.eup %11774 }
0x1fe4   :  { %v9151_v23 = vmul.f32 %v11798_v22, %v11775_v18  ;;  %v11777_v50 = vpop.eup %11776 }
0x1fe5   :  { %v9215_v2 = vmul.f32 %v11798_v22, %v11777_v50 }
0x1fe6   :  { %9154 = vperm.xlu1 %10492, %v9151_v23  }
0x1fe7   :  { %v11779_v41 = vpop.eup %11778 }
0x1fe8   :  { %v9290_v58 = vmul.f32 %v11798_v22, %v11779_v41 }
0x1fea   :  { %9173 = vperm.xlu1 %10492, %v15860_v33  }
0x1fee   :  { %9177 = vperm.xlu1 %10492, %v15866_v62  }
0x1ff2   :  { %10494 = vset.pattern.permute.xlu1 %v11863_v32 }
0x2012   :  { %v9238_v49 = vpop.permute.xlu0 %9237 }
0x2061   :  { %v9155_v54 = vpop.permute.xlu1 %9154 }
0x2062   :  { %v9160_v5 = vrot.slane %v9155_v54, %v12328_v11 }
0x2064   :  { %v9161_v19 = vmul.f32 %v9160_v5, %v16152_v43  ;;  %v11864_v43 = vmov 31  }
0x2065   :  { %v9174_v39 = vpop.permute.xlu1 %9173  ;;  %10497 = vset.pattern.permute.xlu0 %v11864_v43 }
0x2066   :  { %v9170_v35 = vadd.f32 %v9169_v1, %v9161_v19 }
0x2068   :  { %v9171_v10 = vmax.f32 %v9170_v35, 0.0 }
0x2069   :  { %v9178_v33 = vpop.permute.xlu1 %9177 }
0x206a   :  { %v9183_v48 = vrot.slane %v9171_v10, %v12328_v11 }
0x206c   :  { %v9184_v52 = vmul.f32 %v9183_v48, %v9174_v39  ;;  %v9185_v21 = vmul.f32 %v9183_v48, %v9178_v33 }
0x206e   :  { %9188 = vrot.lane.b32.xlu1 %v9184_v52, %s11858_s22 }
0x2072   :  { %9190 = vrot.lane.b32.xlu1 %v9185_v21, %s11858_s22 }
0x2076   :  { %9218 = vperm.xlu1 %10494, %v9215_v2  }
0x207a   :  { %9227 = vperm.xlu1 %10494, %v11799_v31  }
0x207e   :  { %9241 = vperm.xlu1 %10494, %v15866_v62  }
0x2082   :  { %10496 = vset.pattern.permute.xlu1 %v11864_v43 }
0x20e0   :  { %v9189_v45 = vpop.permute.xlu1 %9188 }
0x20e1   :  { %v9194_v40 = vadd.f32 %v9189_v45, %v9130_v38 }
0x20e4   :  { %v9191_v42 = vpop.permute.xlu1 %9190 }
0x20e5   :  { %v9195_v27 = vadd.f32 %v9191_v42, %v9131_v17 }
0x20f1   :  { %v9219_v4 = vpop.permute.xlu1 %9218 }
0x20f2   :  { %v9224_v37 = vrot.slane %v9219_v4, %v12328_v11 }
0x20f4   :  { %v9225_v16 = vmul.f32 %v9224_v37, %v16159_v36  ;;  %v11800_v36 = vld [vmem:[%s16259_s7] sm:$0xff] }
0x20f5   :  { %v9228_v20 = vpop.permute.xlu1 %9227 }
0x20f6   :  { %v9233_v25 = vrot.slane %v9228_v20, %v12328_v11 }
0x20f8   :  { %v9234_v8 = vadd.f32 %v9233_v25, %v9225_v16 }
0x20f9   :  { %v9242_v46 = vpop.permute.xlu1 %9241 }
0x20fa   :  { %v9235_v62 = vmax.f32 %v9234_v8, 0.0 }
0x20fc   :  { %v9247_v6 = vrot.slane %v9235_v62, %v12328_v11 }
0x20fe   :  { %v9249_v47 = vmul.f32 %v9247_v6, %v9242_v46  ;;  %v9248_v12 = vmul.f32 %v9247_v6, %v9238_v49 }
0x2100   :  { %9254 = vrot.lane.b32.xlu0 %v9249_v47, %s11859_s21  ;;  %9252 = vrot.lane.b32.xlu1 %v9248_v12, %s11859_s21 }
0x2104   :  { %9293 = vperm.xlu1 %10496, %v9290_v58   ;;  %9303 = vperm.xlu0 %10497, %v11799_v31  }
0x2108   :  { %9315 = vperm.xlu1 %10496, %v11800_v36   ;;  %10498 = vset.pattern.permute.xlu0 %v16452_v44 }
0x210c   :  { %9319 = vperm.xlu1 %10496, %v11801_v9  }
0x2110   :  { %10499 = vset.pattern.permute.xlu1 %v16452_v44 }
0x2172   :  { %v9253_v51 = vpop.permute.xlu1 %9252  ;;  %v9255_v29 = vpop.permute.xlu0 %9254 }
0x2173   :  { %v9258_v61 = vadd.f32 %v9253_v51, %v9194_v40  ;;  %v9259_v59 = vadd.f32 %v9255_v29, %v9195_v27 }
0x217f   :  { %v9294_v30 = vpop.permute.xlu1 %9293  ;;  %v9304_v63 = vpop.permute.xlu0 %9303 }
0x2180   :  { %v9299_v38 = vrot.slane %v9294_v30, %v12328_v11  ;;  %v9309_v56 = vrot.slane %v9304_v63, %v12328_v11 }
0x2182   :  { %v9300_v28 = vmul.f32 %v9299_v38, %v16166_v13  ;;  %v9301_v7 = vmul.f32 %v9299_v38, %v16170_v14  ;;  %v9353_v14 = vld [vmem:[%s16262_s8 + $0x8] sm:$0xff] }
0x2183   :  { %v9316_v18 = vpop.permute.xlu1 %9315 }
0x2184   :  { %v9310_v17 = vadd.f32 %v9309_v56, %v9300_v28  ;;  %v9311_v0 = vadd.f32 %v9309_v56, %v9301_v7 }
0x2186   :  { %v9312_v26 = vmax.f32 %v9310_v17, 0.0  ;;  %v9313_v53 = vmax.f32 %v9311_v0, 0.0 }
0x2187   :  { %v9320_v15 = vpop.permute.xlu1 %9319 }
0x2188   :  { %v9325_v22 = vrot.slane %v9312_v26, %v12328_v11  ;;  %v9329_v23 = vrot.slane %v9313_v53, %v12328_v11  ;;  %v9352_v11 = vld [vmem:[%s16262_s8] sm:$0xff] }
0x218a   :  { %v9330_v32 = vmul.f32 %v9325_v22, %v9316_v18  ;;  %v9331_v3 = vmul.f32 %v9329_v23, %v9316_v18  ;;  %v9332_v60 = vmul.f32 %v9325_v22, %v9320_v15  ;;  %v9333_v13 = vmul.f32 %v9329_v23, %v9320_v15 }
0x218c   :  { %9340 = vrot.lane.b32.xlu1 %v9331_v3, %s11855_s15  ;;  %9338 = vrot.lane.b32.xlu0 %v9330_v32, %s11855_s15 }
0x2190   :  { %9344 = vrot.lane.b32.xlu1 %v9333_v13, %s11855_s15  ;;  %9342 = vrot.lane.b32.xlu0 %v9332_v60, %s11855_s15 }
0x2194   :  { %9361 = vperm.xlu1 %10499, %v9353_v14   ;;  %9356 = vperm.xlu0 %10498, %v9352_v11  }
0x21fe   :  { %v9341_v24 = vpop.permute.xlu1 %9340  ;;  %v9339_v57 = vpop.permute.xlu0 %9338 }
0x21ff   :  { %v9346_v1 = vsel %vm9265_vm12, %v9339_v57, %v9341_v24 }
0x2200   :  { %v9350_v10 = vadd.f32 %v9346_v1, %v9258_v61 }
0x2202   :  { %v9345_v54 = vpop.permute.xlu1 %9344  ;;  %v9343_v5 = vpop.permute.xlu0 %9342 }
0x2203   :  { %v9347_v19 = vsel %vm9265_vm12, %v9343_v5, %v9345_v54 }
0x2204   :  { %v9351_v35 = vadd.f32 %v9347_v19, %v9259_v59 }
0x220f   :  { %v9362_v39 = vpop.permute.xlu1 %9361  ;;  %v9357_v48 = vpop.permute.xlu0 %9356 }
0x2210   :  { %v9365_v52 = vadd.f32 %v9362_v39, %v9351_v35  ;;  %v9364_v33 = vadd.f32 %v9357_v48, %v9350_v10 }
0x2212   :  { %11780 = vtanh.f32 %v9365_v52 }
0x2213   :  { %11782 = vtanh.f32 %v9364_v33 }
0x221f   :  { %v11781_v21 = vpop.eup %11780 }
0x2220   :  { %v11783_v50 = vpop.eup %11782  ;;  %9370 = vst.msk [vmem:[%s16263_s9 + $0x8] sm:$0xff] %vm9368_vm13, %v11781_v21 }
0x2221   :  { %9369 = vst.msk [vmem:[%s16263_s9] sm:$0xff] %vm9368_vm13, %v11783_v50 }

</bundles_post_ra>
